<compile_context>
chip_gen: v7x
topology: tpu7x:2x2x1
jax: 0.10.0
libtpu: 0.0.40
codegen_flags: <defaults>
</compile_context>

<pallas_src>
import functools

import jax
import jax.numpy as jnp
from jax.experimental import pallas as pl
from jax.experimental.pallas import tpu as pltpu

# ---------------- small synthetic sizes ----------------
BATCH = 2
NUM_FRAMES = 2
IMG_C, IMG_H, IMG_W = 3, 16, 16
PATCH = 8
NUM_PATCHES = (IMG_H // PATCH) * (IMG_W // PATCH)        # 4
SEQ = NUM_PATCHES + 1                                    # 5 tokens (CLS + patches)
HIDDEN = 32                                              # stand-in for ViT hidden_size=768
CONV1_OUT = 128
CONV2_OUT = 64
LSTM_H = 128
OUT_SIZE = 8
NB = 8                                                   # per-time row block (padded to a full sublane tile)


# ---------------- the single fused kernel ----------------
def fused_forward_kernel(ptok_ref, pw_ref, tokadd_ref,
                         c1w_ref, c1b_ref, c2w_ref, c2b_ref,
                         l0_wih_ref, l0_whh_ref, l0_b_ref,
                         l1_wih_ref, l1_whh_ref, l1_b_ref,
                         fcw_ref, fcb_ref, o_ref, x1pad_ref,
                         *, nb, seq, hidden):
    """Layout: "time-major padded flat".  Row (t+1)*nb + s holds token t of
    sequence s (s >= real batch are zero dummy rows); nb zero rows at each
    end act as Conv1d(pad=1) padding."""
    f32 = jnp.float32
    bf16 = jnp.bfloat16
    R = (seq + 2) * nb                                   # 56 rows

    # ---- synthetic patch embedding (stand-in for the ViT feature extractor) ----
    # pad/CLS rows of ptok are zero; tokadd supplies cls+pos / patch_b+pos.
    feats = jnp.dot(ptok_ref[...], pw_ref[...],
                    preferred_element_type=f32) + tokadd_ref[...]      # (R, HIDDEN) f32

    # ---- Conv1d(k=3, pad=1) as ONE im2col matmul (lane-concat of 3 shifts) ----
    def im2col(xp):
        return jnp.concatenate(
            [xp[0:R - 2 * nb], xp[nb:R - nb], xp[2 * nb:R]], axis=1)

    g1 = jnp.dot(im2col(feats).astype(bf16), c1w_ref[...],
                 preferred_element_type=f32)
    x1 = jnp.maximum(g1 + c1b_ref[...], 0.0)             # (seq*nb, 128) f32

    # write into a zero-padded VMEM slab (no re-pad concatenates) for conv2
    x1pad_ref[0:nb, :] = jnp.zeros((nb, CONV1_OUT), f32)
    x1pad_ref[R - nb:R, :] = jnp.zeros((nb, CONV1_OUT), f32)
    x1pad_ref[nb:R - nb, :] = x1

    g2 = jnp.dot(im2col(x1pad_ref[...]).astype(bf16), c2w_ref[...],
                 preferred_element_type=f32)
    toks = jnp.maximum(g2 + c2b_ref[...], 0.0)           # (seq*nb, 64) f32 time-major

    # ---- bidirectional LSTM cell (PyTorch gate order i, f, g, o) ----
    def cell(g, c_prev):
        i_g = jax.nn.sigmoid(g[:, 0 * hidden:1 * hidden])
        f_g = jax.nn.sigmoid(g[:, 1 * hidden:2 * hidden])
        g_g = jnp.tanh(g[:, 2 * hidden:3 * hidden])
        o_g = jax.nn.sigmoid(g[:, 3 * hidden:4 * hidden])
        c_new = f_g * c_prev + i_g * g_g
        return o_g * jnp.tanh(c_new), c_new

    def bilstm(x_tm, wih_ref, whh_ref, b_ref):
        # Merged fwd|bwd input projection, hoisted out of the recurrent loop.
        gx = jnp.dot(x_tm.astype(bf16), wih_ref[...],
                     preferred_element_type=f32) + b_ref[...]          # (seq*nb, 8H)
        h_f = jnp.zeros((nb, hidden), f32)
        c_f = jnp.zeros((nb, hidden), f32)
        h_b = jnp.zeros((nb, hidden), f32)
        c_b = jnp.zeros((nb, hidden), f32)
        outs_f = [None] * seq
        outs_b = [None] * seq
        for t in range(seq):                             # static unroll; h/c stay in vregs
            tb = seq - 1 - t
            # one block-diagonal recurrent matmul per step (K=256 -> one MXU pass)
            h_cat = jnp.concatenate([h_f, h_b], axis=1).astype(bf16)   # (nb, 2H)
            g_rec = jnp.dot(h_cat, whh_ref[...], preferred_element_type=f32)  # (nb, 8H)
            gf = gx[t * nb:(t + 1) * nb, 0:4 * hidden] + g_rec[:, 0:4 * hidden]
            gb = (gx[tb * nb:(tb + 1) * nb, 4 * hidden:8 * hidden]
                  + g_rec[:, 4 * hidden:8 * hidden])
            h_f, c_f = cell(gf, c_f)
            h_b, c_b = cell(gb, c_b)
            outs_f[t] = h_f
            outs_b[tb] = h_b
        # per-time block = [h_fwd(t), h_bwd(t)] on the feature (lane) axis
        return [jnp.concatenate([outs_f[t], outs_b[t]], axis=1) for t in range(seq)]

    blocks1 = bilstm(toks, l0_wih_ref, l0_whh_ref, l0_b_ref)
    y1 = jnp.concatenate(blocks1, axis=0)                # (seq*nb, 2H) time-major, aligned
    blocks2 = bilstm(y1, l1_wih_ref, l1_whh_ref, l1_b_ref)

    # ---- mean over time, Dropout(0.3) == identity at inference, Linear ----
    acc = blocks2[0]
    for t in range(1, seq):
        acc = acc + blocks2[t]
    xm = acc * (1.0 / seq)                               # (nb, 2H) f32
    o_ref[...] = jnp.dot(xm.astype(bf16), fcw_ref[...],
                         preferred_element_type=f32) + fcb_ref[...]


# ---------------- wrapper ----------------
def conv_model_forward(x, params):
    b, f, c, h, w = x.shape
    n = b * f
    nb = NB
    assert n <= nb
    bf16 = jnp.bfloat16
    x = x.reshape(n, c, h, w)                            # view(B*F, C, H, W)

    # input prep for the synthetic feature extractor (im2col-style patching)
    p = x.reshape(n, c, h // PATCH, PATCH, w // PATCH, PATCH)
    p = p.transpose(0, 2, 4, 1, 3, 5).reshape(n, NUM_PATCHES, c * PATCH * PATCH)
    # time-major padded-flat layout: row (t+1)*nb + s = token t of sequence s,
    # batch rows zero-padded n->nb, nb zero rows at each end (conv padding);
    # token 0 = CLS (zero patches).
    p_tm = jnp.transpose(p, (1, 0, 2))                   # (NUM_PATCHES, n, patch_dim)
    p_tm = jnp.pad(p_tm, ((0, 0), (0, nb - n), (0, 0)))  # dummy batch rows = 0
    patch_dim = p_tm.shape[-1]
    p_flat = p_tm.reshape(NUM_PATCHES * nb, patch_dim)
    ptok = jnp.concatenate([jnp.zeros((2 * nb, patch_dim), jnp.float32),
                            p_flat,
                            jnp.zeros((nb, patch_dim), jnp.float32)],
                           axis=0).astype(bf16)          # ((SEQ+2)*nb, patch_dim)

    # additive token term folded from params: 0 on pad rows, cls+pos[0] on CLS
    # rows, patch_b+pos[1+j] on patch rows (parameter folding, tiny).
    hid = params["patch_w"].shape[1]
    cls_blk = jnp.broadcast_to(params["cls"] + params["pos"][0:1], (nb, hid))
    patch_blk = jnp.broadcast_to(
        (params["patch_b"] + params["pos"][1:])[:, None, :],
        (NUM_PATCHES, nb, hid)).reshape(NUM_PATCHES * nb, hid)
    zeros_blk = jnp.zeros((nb, hid), jnp.float32)
    tok_add = jnp.concatenate([zeros_blk, cls_blk, patch_blk, zeros_blk], axis=0)

    # weight prep: bf16 matmul operands, im2col-flattened conv weights,
    # merged fwd|bwd input projections, block-diagonal W_hh.
    patch_w = params["patch_w"].astype(bf16)
    c1w = params["conv1_w"].reshape(3 * hid, CONV1_OUT).astype(bf16)
    c2w = params["conv2_w"].reshape(3 * CONV1_OUT, CONV2_OUT).astype(bf16)
    fcw = params["fc_w"].astype(bf16)

    def merge_layer(dirs):
        (wih_f, whh_f, b_f), (wih_b, whh_b, b_b) = dirs
        wih_cat = jnp.concatenate([wih_f, wih_b], axis=1).astype(bf16)
        b_cat = jnp.concatenate([b_f, b_b], axis=1)      # f32
        g4 = 4 * LSTM_H
        whh_blk = jnp.zeros((2 * LSTM_H, 2 * g4), jnp.float32)
        whh_blk = whh_blk.at[0:LSTM_H, 0:g4].set(whh_f)
        whh_blk = whh_blk.at[LSTM_H:2 * LSTM_H, g4:2 * g4].set(whh_b)
        return wih_cat, whh_blk.astype(bf16), b_cat

    l0_wih, l0_whh, l0_b = merge_layer(params["lstm"][0])
    l1_wih, l1_whh, l1_b = merge_layer(params["lstm"][1])

    args = [ptok, patch_w, tok_add,
            c1w, params["conv1_b"], c2w, params["conv2_b"],
            l0_wih, l0_whh, l0_b, l1_wih, l1_whh, l1_b,
            fcw, params["fc_b"]]

    def full_spec(shape):
        nd = len(shape)
        return pl.BlockSpec(shape, lambda i, _nd=nd: (0,) * _nd)

    R = (SEQ + 2) * nb
    kernel = functools.partial(fused_forward_kernel, nb=nb, seq=SEQ, hidden=LSTM_H)
    out = pl.pallas_call(
        kernel,
        out_shape=jax.ShapeDtypeStruct((nb, OUT_SIZE), jnp.float32),
        grid=(1,),
        in_specs=[full_spec(a.shape) for a in args],
        out_specs=full_spec((nb, OUT_SIZE)),
        scratch_shapes=[pltpu.VMEM((R, CONV1_OUT), jnp.float32)],
        compiler_params=pltpu.CompilerParams(dimension_semantics=("arbitrary",)),
    )(*args)
    return out[:n]                                       # drop the dummy batch rows


# ---------------- parameters (deterministic, synthetic, f32 master copy) ----------------
def init_params(key):
    keys = jax.random.split(key, 24)

    def rnd(k, shape, scale=0.05):
        return (scale * jax.random.normal(k, shape)).astype(jnp.float32)

    patch_dim = IMG_C * PATCH * PATCH
    params = {
        "patch_w": rnd(keys[0], (patch_dim, HIDDEN), 0.02),
        "patch_b": jnp.zeros((1, HIDDEN), jnp.float32),
        "cls": rnd(keys[1], (1, HIDDEN), 0.02),
        "pos": rnd(keys[2], (SEQ, HIDDEN), 0.02),
        "conv1_w": rnd(keys[3], (3, HIDDEN, CONV1_OUT)),
        "conv1_b": rnd(keys[4], (1, CONV1_OUT)),
        "conv2_w": rnd(keys[5], (3, CONV1_OUT, CONV2_OUT)),
        "conv2_b": rnd(keys[6], (1, CONV2_OUT)),
        "fc_w": rnd(keys[7], (2 * LSTM_H, OUT_SIZE)),
        "fc_b": rnd(keys[8], (1, OUT_SIZE)),
    }
    lstm_layers = []
    in_sizes = [CONV2_OUT, 2 * LSTM_H]
    k = 9
    for layer in range(2):
        dirs = []
        for _direction in range(2):
            w_ih = rnd(keys[k], (in_sizes[layer], 4 * LSTM_H)); k += 1
            w_hh = rnd(keys[k], (LSTM_H, 4 * LSTM_H)); k += 1
            # b_ih + b_hh folded into a single bias (mathematically identical)
            bias = rnd(keys[k], (1, 4 * LSTM_H)); k += 1
            dirs.append((w_ih, w_hh, bias))
        lstm_layers.append(dirs)
    params["lstm"] = lstm_layers
    return params


if __name__ == "__main__":
    key = jax.random.PRNGKey(0)
    pkey, xkey = jax.random.split(key)
    params = init_params(pkey)
    x = jax.random.normal(
        xkey, (BATCH, NUM_FRAMES, IMG_C, IMG_H, IMG_W), dtype=jnp.float32)

    fwd = jax.jit(conv_model_forward)
    out = jax.block_until_ready(fwd(x, params))

    assert out.shape == (BATCH * NUM_FRAMES, OUT_SIZE), out.shape
    assert bool(jnp.all(jnp.isfinite(out)))
    print("KERNEL_OK")
</pallas_src>

<mosaic_0001>
module attributes {stable_mosaic.version = 11 : i64} {
  func.func @fused_forward_kernel(%arg0: i32, %arg1: memref<56x192xbf16, #tpu.memory_space<vmem>>, %arg2: memref<192x32xbf16, #tpu.memory_space<vmem>>, %arg3: memref<56x32xf32, #tpu.memory_space<vmem>>, %arg4: memref<96x128xbf16, #tpu.memory_space<vmem>>, %arg5: memref<1x128xf32, #tpu.memory_space<vmem>>, %arg6: memref<384x64xbf16, #tpu.memory_space<vmem>>, %arg7: memref<1x64xf32, #tpu.memory_space<vmem>>, %arg8: memref<64x1024xbf16, #tpu.memory_space<vmem>>, %arg9: memref<256x1024xbf16, #tpu.memory_space<vmem>>, %arg10: memref<1x1024xf32, #tpu.memory_space<vmem>>, %arg11: memref<256x1024xbf16, #tpu.memory_space<vmem>>, %arg12: memref<256x1024xbf16, #tpu.memory_space<vmem>>, %arg13: memref<1x1024xf32, #tpu.memory_space<vmem>>, %arg14: memref<256x8xbf16, #tpu.memory_space<vmem>>, %arg15: memref<1x8xf32, #tpu.memory_space<vmem>>, %arg16: memref<8x8xf32, #tpu.memory_space<vmem>>, %arg17: memref<56x128xf32, #tpu.memory_space<vmem>>) attributes {dimension_semantics = [#tpu.dimension_semantics<arbitrary>], iteration_bounds = array<i64: 1>, scalar_prefetch = 0 : i64, scratch_operands = 1 : i64, tpu.core_type = #tpu.core_type<tc>, window_params = [{pipeline_mode = #tpu.pipeline_mode<synchronous>, transform_indices = @transform_0, window_bounds = array<i64: 56, 192>}, {pipeline_mode = #tpu.pipeline_mode<synchronous>, transform_indices = @transform_1, window_bounds = array<i64: 192, 32>}, {pipeline_mode = #tpu.pipeline_mode<synchronous>, transform_indices = @transform_2, window_bounds = array<i64: 56, 32>}, {pipeline_mode = #tpu.pipeline_mode<synchronous>, transform_indices = @transform_3, window_bounds = array<i64: 96, 128>}, {pipeline_mode = #tpu.pipeline_mode<synchronous>, transform_indices = @transform_4, window_bounds = array<i64: 1, 128>}, {pipeline_mode = #tpu.pipeline_mode<synchronous>, transform_indices = @transform_5, window_bounds = array<i64: 384, 64>}, {pipeline_mode = #tpu.pipeline_mode<synchronous>, transform_indices = @transform_6, window_bounds = array<i64: 1, 64>}, {pipeline_mode = #tpu.pipeline_mode<synchronous>, transform_indices = @transform_7, window_bounds = array<i64: 64, 1024>}, {pipeline_mode = #tpu.pipeline_mode<synchronous>, transform_indices = @transform_8, window_bounds = array<i64: 256, 1024>}, {pipeline_mode = #tpu.pipeline_mode<synchronous>, transform_indices = @transform_9, window_bounds = array<i64: 1, 1024>}, {pipeline_mode = #tpu.pipeline_mode<synchronous>, transform_indices = @transform_10, window_bounds = array<i64: 256, 1024>}, {pipeline_mode = #tpu.pipeline_mode<synchronous>, transform_indices = @transform_11, window_bounds = array<i64: 256, 1024>}, {pipeline_mode = #tpu.pipeline_mode<synchronous>, transform_indices = @transform_12, window_bounds = array<i64: 1, 1024>}, {pipeline_mode = #tpu.pipeline_mode<synchronous>, transform_indices = @transform_13, window_bounds = array<i64: 256, 8>}, {pipeline_mode = #tpu.pipeline_mode<synchronous>, transform_indices = @transform_14, window_bounds = array<i64: 1, 8>}, {pipeline_mode = #tpu.pipeline_mode<synchronous>, transform_indices = @transform_15, window_bounds = array<i64: 8, 8>}]} {
    %c0 = arith.constant 0 : index
    %c0_0 = arith.constant 0 : index
    %0 = vector.load %arg1[%c0, %c0_0] : memref<56x192xbf16, #tpu.memory_space<vmem>>, vector<56x192xbf16>
    %c0_1 = arith.constant 0 : index
    %c0_2 = arith.constant 0 : index
    %1 = vector.load %arg2[%c0_1, %c0_2] : memref<192x32xbf16, #tpu.memory_space<vmem>>, vector<192x32xbf16>
    %cst = arith.constant dense<0.000000e+00> : vector<56x32xf32>
    %2 = tpu.matmul %0, %1, %cst {dimension_numbers = #tpu.dot_dimension_numbers<[1], [0], [0], [1], [0, 0, 1, 1], [], []>} : vector<56x192xbf16>, vector<192x32xbf16>, vector<56x32xf32> -> vector<56x32xf32>
    %c0_3 = arith.constant 0 : index
    %c0_4 = arith.constant 0 : index
    %3 = vector.load %arg3[%c0_3, %c0_4] : memref<56x32xf32, #tpu.memory_space<vmem>>, vector<56x32xf32>
    %4 = arith.addf %2, %3 : vector<56x32xf32>
    %5 = vector.extract_strided_slice %4 {offsets = [0, 0], sizes = [40, 32], strides = [1, 1]} : vector<56x32xf32> to vector<40x32xf32>
    %6 = vector.extract_strided_slice %4 {offsets = [8, 0], sizes = [40, 32], strides = [1, 1]} : vector<56x32xf32> to vector<40x32xf32>
    %7 = vector.extract_strided_slice %4 {offsets = [16, 0], sizes = [40, 32], strides = [1, 1]} : vector<56x32xf32> to vector<40x32xf32>
    %8 = tpu.concatenate %5, %6, %7 in 1 : vector<40x32xf32>, vector<40x32xf32>, vector<40x32xf32> -> vector<40x96xf32>
    %9 = arith.truncf %8 : vector<40x96xf32> to vector<40x96xbf16>
    %c0_5 = arith.constant 0 : index
    %c0_6 = arith.constant 0 : index
    %10 = vector.load %arg4[%c0_5, %c0_6] : memref<96x128xbf16, #tpu.memory_space<vmem>>, vector<96x128xbf16>
    %cst_7 = arith.constant dense<0.000000e+00> : vector<40x128xf32>
    %11 = tpu.matmul %9, %10, %cst_7 {dimension_numbers = #tpu.dot_dimension_numbers<[1], [0], [0], [1], [0, 0, 1, 1], [], []>} : vector<40x96xbf16>, vector<96x128xbf16>, vector<40x128xf32> -> vector<40x128xf32>
    %c0_8 = arith.constant 0 : index
    %c0_9 = arith.constant 0 : index
    %12 = vector.load %arg5[%c0_8, %c0_9] : memref<1x128xf32, #tpu.memory_space<vmem>>, vector<1x128xf32>
    %13 = vector.broadcast %12 : vector<1x128xf32> to vector<40x128xf32>
    %14 = arith.addf %11, %13 : vector<40x128xf32>
    %cst_10 = arith.constant 0.000000e+00 : f32
    %15 = vector.broadcast %cst_10 : f32 to vector<40x128xf32>
    %16 = arith.maximumf %14, %15 : vector<40x128xf32>
    %cst_11 = arith.constant 0.000000e+00 : f32
    %17 = vector.broadcast %cst_11 : f32 to vector<8x128xf32>
    %c0_12 = arith.constant 0 : index
    %c0_13 = arith.constant 0 : index
    %18 = vector.load %arg17[%c0_12, %c0_13] : memref<56x128xf32, #tpu.memory_space<vmem>>, vector<8x128xf32>
    tpu.vector_store %arg17[%c0_12, %c0_13], %17 {strides = array<i32>} : memref<56x128xf32, #tpu.memory_space<vmem>>, vector<8x128xf32>,
    %cst_14 = arith.constant 0.000000e+00 : f32
    %19 = vector.broadcast %cst_14 : f32 to vector<8x128xf32>
    %c48 = arith.constant 48 : index
    %c0_15 = arith.constant 0 : index
    %20 = vector.load %arg17[%c48, %c0_15] : memref<56x128xf32, #tpu.memory_space<vmem>>, vector<8x128xf32>
    tpu.vector_store %arg17[%c48, %c0_15], %19 {strides = array<i32>} : memref<56x128xf32, #tpu.memory_space<vmem>>, vector<8x128xf32>,
    %c8 = arith.constant 8 : index
    %c0_16 = arith.constant 0 : index
    %21 = vector.load %arg17[%c8, %c0_16] : memref<56x128xf32, #tpu.memory_space<vmem>>, vector<40x128xf32>
    tpu.vector_store %arg17[%c8, %c0_16], %16 {strides = array<i32>} : memref<56x128xf32, #tpu.memory_space<vmem>>, vector<40x128xf32>,
    %c0_17 = arith.constant 0 : index
    %c0_18 = arith.constant 0 : index
    %22 = vector.load %arg17[%c0_17, %c0_18] : memref<56x128xf32, #tpu.memory_space<vmem>>, vector<56x128xf32>
    %23 = vector.extract_strided_slice %22 {offsets = [0, 0], sizes = [40, 128], strides = [1, 1]} : vector<56x128xf32> to vector<40x128xf32>
    %24 = vector.extract_strided_slice %22 {offsets = [8, 0], sizes = [40, 128], strides = [1, 1]} : vector<56x128xf32> to vector<40x128xf32>
    %25 = vector.extract_strided_slice %22 {offsets = [16, 0], sizes = [40, 128], strides = [1, 1]} : vector<56x128xf32> to vector<40x128xf32>
    %26 = tpu.concatenate %23, %24, %25 in 1 : vector<40x128xf32>, vector<40x128xf32>, vector<40x128xf32> -> vector<40x384xf32>
    %27 = arith.truncf %26 : vector<40x384xf32> to vector<40x384xbf16>
    %c0_19 = arith.constant 0 : index
    %c0_20 = arith.constant 0 : index
    %28 = vector.load %arg6[%c0_19, %c0_20] : memref<384x64xbf16, #tpu.memory_space<vmem>>, vector<384x64xbf16>
    %cst_21 = arith.constant dense<0.000000e+00> : vector<40x64xf32>
    %29 = tpu.matmul %27, %28, %cst_21 {dimension_numbers = #tpu.dot_dimension_numbers<[1], [0], [0], [1], [0, 0, 1, 1], [], []>} : vector<40x384xbf16>, vector<384x64xbf16>, vector<40x64xf32> -> vector<40x64xf32>
    %c0_22 = arith.constant 0 : index
    %c0_23 = arith.constant 0 : index
    %30 = vector.load %arg7[%c0_22, %c0_23] : memref<1x64xf32, #tpu.memory_space<vmem>>, vector<1x64xf32>
    %31 = vector.broadcast %30 : vector<1x64xf32> to vector<40x64xf32>
    %32 = arith.addf %29, %31 : vector<40x64xf32>
    %cst_24 = arith.constant 0.000000e+00 : f32
    %33 = vector.broadcast %cst_24 : f32 to vector<40x64xf32>
    %34 = arith.maximumf %32, %33 : vector<40x64xf32>
    %35 = arith.truncf %34 : vector<40x64xf32> to vector<40x64xbf16>
    %c0_25 = arith.constant 0 : index
    %c0_26 = arith.constant 0 : index
    %36 = vector.load %arg8[%c0_25, %c0_26] : memref<64x1024xbf16, #tpu.memory_space<vmem>>, vector<64x1024xbf16>
    %cst_27 = arith.constant dense<0.000000e+00> : vector<40x1024xf32>
    %37 = tpu.matmul %35, %36, %cst_27 {dimension_numbers = #tpu.dot_dimension_numbers<[1], [0], [0], [1], [0, 0, 1, 1], [], []>} : vector<40x64xbf16>, vector<64x1024xbf16>, vector<40x1024xf32> -> vector<40x1024xf32>
    %c0_28 = arith.constant 0 : index
    %c0_29 = arith.constant 0 : index
    %38 = vector.load %arg10[%c0_28, %c0_29] : memref<1x1024xf32, #tpu.memory_space<vmem>>, vector<1x1024xf32>
    %39 = vector.broadcast %38 : vector<1x1024xf32> to vector<40x1024xf32>
    %40 = arith.addf %37, %39 : vector<40x1024xf32>
    %cst_30 = arith.constant 0.000000e+00 : f32
    %41 = vector.broadcast %cst_30 : f32 to vector<8x128xf32>
    %cst_31 = arith.constant 0.000000e+00 : f32
    %42 = vector.broadcast %cst_31 : f32 to vector<8x128xf32>
    %cst_32 = arith.constant 0.000000e+00 : f32
    %43 = vector.broadcast %cst_32 : f32 to vector<8x128xf32>
    %cst_33 = arith.constant 0.000000e+00 : f32
    %44 = vector.broadcast %cst_33 : f32 to vector<8x128xf32>
    %45 = tpu.concatenate %41, %43 in 1 : vector<8x128xf32>, vector<8x128xf32> -> vector<8x256xf32>
    %46 = arith.truncf %45 : vector<8x256xf32> to vector<8x256xbf16>
    %c0_34 = arith.constant 0 : index
    %c0_35 = arith.constant 0 : index
    %47 = vector.load %arg9[%c0_34, %c0_35] : memref<256x1024xbf16, #tpu.memory_space<vmem>>, vector<256x1024xbf16>
    %cst_36 = arith.constant dense<0.000000e+00> : vector<8x1024xf32>
    %48 = tpu.matmul %46, %47, %cst_36 {dimension_numbers = #tpu.dot_dimension_numbers<[1], [0], [0], [1], [0, 0, 1, 1], [], []>} : vector<8x256xbf16>, vector<256x1024xbf16>, vector<8x1024xf32> -> vector<8x1024xf32>
    %49 = vector.extract_strided_slice %40 {offsets = [0, 0], sizes = [8, 512], strides = [1, 1]} : vector<40x1024xf32> to vector<8x512xf32>
    %50 = vector.extract_strided_slice %48 {offsets = [0, 0], sizes = [8, 512], strides = [1, 1]} : vector<8x1024xf32> to vector<8x512xf32>
    %51 = arith.addf %49, %50 : vector<8x512xf32>
    %52 = vector.extract_strided_slice %40 {offsets = [32, 512], sizes = [8, 512], strides = [1, 1]} : vector<40x1024xf32> to vector<8x512xf32>
    %53 = vector.extract_strided_slice %48 {offsets = [0, 512], sizes = [8, 512], strides = [1, 1]} : vector<8x1024xf32> to vector<8x512xf32>
    %54 = arith.addf %52, %53 : vector<8x512xf32>
    %55 = vector.extract_strided_slice %51 {offsets = [0, 0], sizes = [8, 128], strides = [1, 1]} : vector<8x512xf32> to vector<8x128xf32>
    %56 = arith.negf %55 : vector<8x128xf32>
    %57 = math.exp %56 : vector<8x128xf32>
    %cst_37 = arith.constant 1.000000e+00 : f32
    %58 = vector.broadcast %cst_37 : f32 to vector<8x128xf32>
    %59 = arith.addf %58, %57 : vector<8x128xf32>
    %60 = arith.divf %58, %59 : vector<8x128xf32>
    %61 = vector.extract_strided_slice %51 {offsets = [0, 128], sizes = [8, 128], strides = [1, 1]} : vector<8x512xf32> to vector<8x128xf32>
    %62 = arith.negf %61 : vector<8x128xf32>
    %63 = math.exp %62 : vector<8x128xf32>
    %cst_38 = arith.constant 1.000000e+00 : f32
    %64 = vector.broadcast %cst_38 : f32 to vector<8x128xf32>
    %65 = arith.addf %64, %63 : vector<8x128xf32>
    %66 = arith.divf %64, %65 : vector<8x128xf32>
    %67 = vector.extract_strided_slice %51 {offsets = [0, 256], sizes = [8, 128], strides = [1, 1]} : vector<8x512xf32> to vector<8x128xf32>
    %68 = math.tanh %67 : vector<8x128xf32>
    %69 = vector.extract_strided_slice %51 {offsets = [0, 384], sizes = [8, 128], strides = [1, 1]} : vector<8x512xf32> to vector<8x128xf32>
    %70 = arith.negf %69 : vector<8x128xf32>
    %71 = math.exp %70 : vector<8x128xf32>
    %cst_39 = arith.constant 1.000000e+00 : f32
    %72 = vector.broadcast %cst_39 : f32 to vector<8x128xf32>
    %73 = arith.addf %72, %71 : vector<8x128xf32>
    %74 = arith.divf %72, %73 : vector<8x128xf32>
    %75 = arith.mulf %66, %42 : vector<8x128xf32>
    %76 = arith.mulf %60, %68 : vector<8x128xf32>
    %77 = arith.addf %75, %76 : vector<8x128xf32>
    %78 = math.tanh %77 : vector<8x128xf32>
    %79 = arith.mulf %74, %78 : vector<8x128xf32>
    %80 = vector.extract_strided_slice %54 {offsets = [0, 0], sizes = [8, 128], strides = [1, 1]} : vector<8x512xf32> to vector<8x128xf32>
    %81 = arith.negf %80 : vector<8x128xf32>
    %82 = math.exp %81 : vector<8x128xf32>
    %cst_40 = arith.constant 1.000000e+00 : f32
    %83 = vector.broadcast %cst_40 : f32 to vector<8x128xf32>
    %84 = arith.addf %83, %82 : vector<8x128xf32>
    %85 = arith.divf %83, %84 : vector<8x128xf32>
    %86 = vector.extract_strided_slice %54 {offsets = [0, 128], sizes = [8, 128], strides = [1, 1]} : vector<8x512xf32> to vector<8x128xf32>
    %87 = arith.negf %86 : vector<8x128xf32>
    %88 = math.exp %87 : vector<8x128xf32>
    %cst_41 = arith.constant 1.000000e+00 : f32
    %89 = vector.broadcast %cst_41 : f32 to vector<8x128xf32>
    %90 = arith.addf %89, %88 : vector<8x128xf32>
    %91 = arith.divf %89, %90 : vector<8x128xf32>
    %92 = vector.extract_strided_slice %54 {offsets = [0, 256], sizes = [8, 128], strides = [1, 1]} : vector<8x512xf32> to vector<8x128xf32>
    %93 = math.tanh %92 : vector<8x128xf32>
    %94 = vector.extract_strided_slice %54 {offsets = [0, 384], sizes = [8, 128], strides = [1, 1]} : vector<8x512xf32> to vector<8x128xf32>
    %95 = arith.negf %94 : vector<8x128xf32>
    %96 = math.exp %95 : vector<8x128xf32>
    %cst_42 = arith.constant 1.000000e+00 : f32
    %97 = vector.broadcast %cst_42 : f32 to vector<8x128xf32>
    %98 = arith.addf %97, %96 : vector<8x128xf32>
    %99 = arith.divf %97, %98 : vector<8x128xf32>
    %100 = arith.mulf %91, %44 : vector<8x128xf32>
    %101 = arith.mulf %85, %93 : vector<8x128xf32>
    %102 = arith.addf %100, %101 : vector<8x128xf32>
    %103 = math.tanh %102 : vector<8x128xf32>
    %104 = arith.mulf %99, %103 : vector<8x128xf32>
    %105 = tpu.concatenate %79, %104 in 1 : vector<8x128xf32>, vector<8x128xf32> -> vector<8x256xf32>
    %106 = arith.truncf %105 : vector<8x256xf32> to vector<8x256xbf16>
    %c0_43 = arith.constant 0 : index
    %c0_44 = arith.constant 0 : index
    %107 = vector.load %arg9[%c0_43, %c0_44] : memref<256x1024xbf16, #tpu.memory_space<vmem>>, vector<256x1024xbf16>
    %cst_45 = arith.constant dense<0.000000e+00> : vector<8x1024xf32>
    %108 = tpu.matmul %106, %107, %cst_45 {dimension_numbers = #tpu.dot_dimension_numbers<[1], [0], [0], [1], [0, 0, 1, 1], [], []>} : vector<8x256xbf16>, vector<256x1024xbf16>, vector<8x1024xf32> -> vector<8x1024xf32>
    %109 = vector.extract_strided_slice %40 {offsets = [8, 0], sizes = [8, 512], strides = [1, 1]} : vector<40x1024xf32> to vector<8x512xf32>
    %110 = vector.extract_strided_slice %108 {offsets = [0, 0], sizes = [8, 512], strides = [1, 1]} : vector<8x1024xf32> to vector<8x512xf32>
    %111 = arith.addf %109, %110 : vector<8x512xf32>
    %112 = vector.extract_strided_slice %40 {offsets = [24, 512], sizes = [8, 512], strides = [1, 1]} : vector<40x1024xf32> to vector<8x512xf32>
    %113 = vector.extract_strided_slice %108 {offsets = [0, 512], sizes = [8, 512], strides = [1, 1]} : vector<8x1024xf32> to vector<8x512xf32>
    %114 = arith.addf %112, %113 : vector<8x512xf32>
    %115 = vector.extract_strided_slice %111 {offsets = [0, 0], sizes = [8, 128], strides = [1, 1]} : vector<8x512xf32> to vector<8x128xf32>
    %116 = arith.negf %115 : vector<8x128xf32>
    %117 = math.exp %116 : vector<8x128xf32>
    %cst_46 = arith.constant 1.000000e+00 : f32
    %118 = vector.broadcast %cst_46 : f32 to vector<8x128xf32>
    %119 = arith.addf %118, %117 : vector<8x128xf32>
    %120 = arith.divf %118, %119 : vector<8x128xf32>
    %121 = vector.extract_strided_slice %111 {offsets = [0, 128], sizes = [8, 128], strides = [1, 1]} : vector<8x512xf32> to vector<8x128xf32>
    %122 = arith.negf %121 : vector<8x128xf32>
    %123 = math.exp %122 : vector<8x128xf32>
    %cst_47 = arith.constant 1.000000e+00 : f32
    %124 = vector.broadcast %cst_47 : f32 to vector<8x128xf32>
    %125 = arith.addf %124, %123 : vector<8x128xf32>
    %126 = arith.divf %124, %125 : vector<8x128xf32>
    %127 = vector.extract_strided_slice %111 {offsets = [0, 256], sizes = [8, 128], strides = [1, 1]} : vector<8x512xf32> to vector<8x128xf32>
    %128 = math.tanh %127 : vector<8x128xf32>
    %129 = vector.extract_strided_slice %111 {offsets = [0, 384], sizes = [8, 128], strides = [1, 1]} : vector<8x512xf32> to vector<8x128xf32>
    %130 = arith.negf %129 : vector<8x128xf32>
    %131 = math.exp %130 : vector<8x128xf32>
    %cst_48 = arith.constant 1.000000e+00 : f32
    %132 = vector.broadcast %cst_48 : f32 to vector<8x128xf32>
    %133 = arith.addf %132, %131 : vector<8x128xf32>
    %134 = arith.divf %132, %133 : vector<8x128xf32>
    %135 = arith.mulf %126, %77 : vector<8x128xf32>
    %136 = arith.mulf %120, %128 : vector<8x128xf32>
    %137 = arith.addf %135, %136 : vector<8x128xf32>
    %138 = math.tanh %137 : vector<8x128xf32>
    %139 = arith.mulf %134, %138 : vector<8x128xf32>
    %140 = vector.extract_strided_slice %114 {offsets = [0, 0], sizes = [8, 128], strides = [1, 1]} : vector<8x512xf32> to vector<8x128xf32>
    %141 = arith.negf %140 : vector<8x128xf32>
    %142 = math.exp %141 : vector<8x128xf32>
    %cst_49 = arith.constant 1.000000e+00 : f32
    %143 = vector.broadcast %cst_49 : f32 to vector<8x128xf32>
    %144 = arith.addf %143, %142 : vector<8x128xf32>
    %145 = arith.divf %143, %144 : vector<8x128xf32>
    %146 = vector.extract_strided_slice %114 {offsets = [0, 128], sizes = [8, 128], strides = [1, 1]} : vector<8x512xf32> to vector<8x128xf32>
    %147 = arith.negf %146 : vector<8x128xf32>
    %148 = math.exp %147 : vector<8x128xf32>
    %cst_50 = arith.constant 1.000000e+00 : f32
    %149 = vector.broadcast %cst_50 : f32 to vector<8x128xf32>
    %150 = arith.addf %149, %148 : vector<8x128xf32>
    %151 = arith.divf %149, %150 : vector<8x128xf32>
    %152 = vector.extract_strided_slice %114 {offsets = [0, 256], sizes = [8, 128], strides = [1, 1]} : vector<8x512xf32> to vector<8x128xf32>
    %153 = math.tanh %152 : vector<8x128xf32>
    %154 = vector.extract_strided_slice %114 {offsets = [0, 384], sizes = [8, 128], strides = [1, 1]} : vector<8x512xf32> to vector<8x128xf32>
    %155 = arith.negf %154 : vector<8x128xf32>
    %156 = math.exp %155 : vector<8x128xf32>
    %cst_51 = arith.constant 1.000000e+00 : f32
    %157 = vector.broadcast %cst_51 : f32 to vector<8x128xf32>
    %158 = arith.addf %157, %156 : vector<8x128xf32>
    %159 = arith.divf %157, %158 : vector<8x128xf32>
    %160 = arith.mulf %151, %102 : vector<8x128xf32>
    %161 = arith.mulf %145, %153 : vector<8x128xf32>
    %162 = arith.addf %160, %161 : vector<8x128xf32>
    %163 = math.tanh %162 : vector<8x128xf32>
    %164 = arith.mulf %159, %163 : vector<8x128xf32>
    %165 = tpu.concatenate %139, %164 in 1 : vector<8x128xf32>, vector<8x128xf32> -> vector<8x256xf32>
    %166 = arith.truncf %165 : vector<8x256xf32> to vector<8x256xbf16>
    %c0_52 = arith.constant 0 : index
    %c0_53 = arith.constant 0 : index
    %167 = vector.load %arg9[%c0_52, %c0_53] : memref<256x1024xbf16, #tpu.memory_space<vmem>>, vector<256x1024xbf16>
    %cst_54 = arith.constant dense<0.000000e+00> : vector<8x1024xf32>
    %168 = tpu.matmul %166, %167, %cst_54 {dimension_numbers = #tpu.dot_dimension_numbers<[1], [0], [0], [1], [0, 0, 1, 1], [], []>} : vector<8x256xbf16>, vector<256x1024xbf16>, vector<8x1024xf32> -> vector<8x1024xf32>
    %169 = vector.extract_strided_slice %40 {offsets = [16, 0], sizes = [8, 512], strides = [1, 1]} : vector<40x1024xf32> to vector<8x512xf32>
    %170 = vector.extract_strided_slice %168 {offsets = [0, 0], sizes = [8, 512], strides = [1, 1]} : vector<8x1024xf32> to vector<8x512xf32>
    %171 = arith.addf %169, %170 : vector<8x512xf32>
    %172 = vector.extract_strided_slice %40 {offsets = [16, 512], sizes = [8, 512], strides = [1, 1]} : vector<40x1024xf32> to vector<8x512xf32>
    %173 = vector.extract_strided_slice %168 {offsets = [0, 512], sizes = [8, 512], strides = [1, 1]} : vector<8x1024xf32> to vector<8x512xf32>
    %174 = arith.addf %172, %173 : vector<8x512xf32>
    %175 = vector.extract_strided_slice %171 {offsets = [0, 0], sizes = [8, 128], strides = [1, 1]} : vector<8x512xf32> to vector<8x128xf32>
    %176 = arith.negf %175 : vector<8x128xf32>
    %177 = math.exp %176 : vector<8x128xf32>
    %cst_55 = arith.constant 1.000000e+00 : f32
    %178 = vector.broadcast %cst_55 : f32 to vector<8x128xf32>
    %179 = arith.addf %178, %177 : vector<8x128xf32>
    %180 = arith.divf %178, %179 : vector<8x128xf32>
    %181 = vector.extract_strided_slice %171 {offsets = [0, 128], sizes = [8, 128], strides = [1, 1]} : vector<8x512xf32> to vector<8x128xf32>
    %182 = arith.negf %181 : vector<8x128xf32>
    %183 = math.exp %182 : vector<8x128xf32>
    %cst_56 = arith.constant 1.000000e+00 : f32
    %184 = vector.broadcast %cst_56 : f32 to vector<8x128xf32>
    %185 = arith.addf %184, %183 : vector<8x128xf32>
    %186 = arith.divf %184, %185 : vector<8x128xf32>
    %187 = vector.extract_strided_slice %171 {offsets = [0, 256], sizes = [8, 128], strides = [1, 1]} : vector<8x512xf32> to vector<8x128xf32>
    %188 = math.tanh %187 : vector<8x128xf32>
    %189 = vector.extract_strided_slice %171 {offsets = [0, 384], sizes = [8, 128], strides = [1, 1]} : vector<8x512xf32> to vector<8x128xf32>
    %190 = arith.negf %189 : vector<8x128xf32>
    %191 = math.exp %190 : vector<8x128xf32>
    %cst_57 = arith.constant 1.000000e+00 : f32
    %192 = vector.broadcast %cst_57 : f32 to vector<8x128xf32>
    %193 = arith.addf %192, %191 : vector<8x128xf32>
    %194 = arith.divf %192, %193 : vector<8x128xf32>
    %195 = arith.mulf %186, %137 : vector<8x128xf32>
    %196 = arith.mulf %180, %188 : vector<8x128xf32>
    %197 = arith.addf %195, %196 : vector<8x128xf32>
    %198 = math.tanh %197 : vector<8x128xf32>
    %199 = arith.mulf %194, %198 : vector<8x128xf32>
    %200 = vector.extract_strided_slice %174 {offsets = [0, 0], sizes = [8, 128], strides = [1, 1]} : vector<8x512xf32> to vector<8x128xf32>
    %201 = arith.negf %200 : vector<8x128xf32>
    %202 = math.exp %201 : vector<8x128xf32>
    %cst_58 = arith.constant 1.000000e+00 : f32
    %203 = vector.broadcast %cst_58 : f32 to vector<8x128xf32>
    %204 = arith.addf %203, %202 : vector<8x128xf32>
    %205 = arith.divf %203, %204 : vector<8x128xf32>
    %206 = vector.extract_strided_slice %174 {offsets = [0, 128], sizes = [8, 128], strides = [1, 1]} : vector<8x512xf32> to vector<8x128xf32>
    %207 = arith.negf %206 : vector<8x128xf32>
    %208 = math.exp %207 : vector<8x128xf32>
    %cst_59 = arith.constant 1.000000e+00 : f32
    %209 = vector.broadcast %cst_59 : f32 to vector<8x128xf32>
    %210 = arith.addf %209, %208 : vector<8x128xf32>
    %211 = arith.divf %209, %210 : vector<8x128xf32>
    %212 = vector.extract_strided_slice %174 {offsets = [0, 256], sizes = [8, 128], strides = [1, 1]} : vector<8x512xf32> to vector<8x128xf32>
    %213 = math.tanh %212 : vector<8x128xf32>
    %214 = vector.extract_strided_slice %174 {offsets = [0, 384], sizes = [8, 128], strides = [1, 1]} : vector<8x512xf32> to vector<8x128xf32>
    %215 = arith.negf %214 : vector<8x128xf32>
    %216 = math.exp %215 : vector<8x128xf32>
    %cst_60 = arith.constant 1.000000e+00 : f32
    %217 = vector.broadcast %cst_60 : f32 to vector<8x128xf32>
    %218 = arith.addf %217, %216 : vector<8x128xf32>
    %219 = arith.divf %217, %218 : vector<8x128xf32>
    %220 = arith.mulf %211, %162 : vector<8x128xf32>
    %221 = arith.mulf %205, %213 : vector<8x128xf32>
    %222 = arith.addf %220, %221 : vector<8x128xf32>
    %223 = math.tanh %222 : vector<8x128xf32>
    %224 = arith.mulf %219, %223 : vector<8x128xf32>
    %225 = tpu.concatenate %199, %224 in 1 : vector<8x128xf32>, vector<8x128xf32> -> vector<8x256xf32>
    %226 = arith.truncf %225 : vector<8x256xf32> to vector<8x256xbf16>
    %c0_61 = arith.constant 0 : index
    %c0_62 = arith.constant 0 : index
    %227 = vector.load %arg9[%c0_61, %c0_62] : memref<256x1024xbf16, #tpu.memory_space<vmem>>, vector<256x1024xbf16>
    %cst_63 = arith.constant dense<0.000000e+00> : vector<8x1024xf32>
    %228 = tpu.matmul %226, %227, %cst_63 {dimension_numbers = #tpu.dot_dimension_numbers<[1], [0], [0], [1], [0, 0, 1, 1], [], []>} : vector<8x256xbf16>, vector<256x1024xbf16>, vector<8x1024xf32> -> vector<8x1024xf32>
    %229 = vector.extract_strided_slice %40 {offsets = [24, 0], sizes = [8, 512], strides = [1, 1]} : vector<40x1024xf32> to vector<8x512xf32>
    %230 = vector.extract_strided_slice %228 {offsets = [0, 0], sizes = [8, 512], strides = [1, 1]} : vector<8x1024xf32> to vector<8x512xf32>
    %231 = arith.addf %229, %230 : vector<8x512xf32>
    %232 = vector.extract_strided_slice %40 {offsets = [8, 512], sizes = [8, 512], strides = [1, 1]} : vector<40x1024xf32> to vector<8x512xf32>
    %233 = vector.extract_strided_slice %228 {offsets = [0, 512], sizes = [8, 512], strides = [1, 1]} : vector<8x1024xf32> to vector<8x512xf32>
    %234 = arith.addf %232, %233 : vector<8x512xf32>
    %235 = vector.extract_strided_slice %231 {offsets = [0, 0], sizes = [8, 128], strides = [1, 1]} : vector<8x512xf32> to vector<8x128xf32>
    %236 = arith.negf %235 : vector<8x128xf32>
    %237 = math.exp %236 : vector<8x128xf32>
    %cst_64 = arith.constant 1.000000e+00 : f32
    %238 = vector.broadcast %cst_64 : f32 to vector<8x128xf32>
    %239 = arith.addf %238, %237 : vector<8x128xf32>
    %240 = arith.divf %238, %239 : vector<8x128xf32>
    %241 = vector.extract_strided_slice %231 {offsets = [0, 128], sizes = [8, 128], strides = [1, 1]} : vector<8x512xf32> to vector<8x128xf32>
    %242 = arith.negf %241 : vector<8x128xf32>
    %243 = math.exp %242 : vector<8x128xf32>
    %cst_65 = arith.constant 1.000000e+00 : f32
    %244 = vector.broadcast %cst_65 : f32 to vector<8x128xf32>
    %245 = arith.addf %244, %243 : vector<8x128xf32>
    %246 = arith.divf %244, %245 : vector<8x128xf32>
    %247 = vector.extract_strided_slice %231 {offsets = [0, 256], sizes = [8, 128], strides = [1, 1]} : vector<8x512xf32> to vector<8x128xf32>
    %248 = math.tanh %247 : vector<8x128xf32>
    %249 = vector.extract_strided_slice %231 {offsets = [0, 384], sizes = [8, 128], strides = [1, 1]} : vector<8x512xf32> to vector<8x128xf32>
    %250 = arith.negf %249 : vector<8x128xf32>
    %251 = math.exp %250 : vector<8x128xf32>
    %cst_66 = arith.constant 1.000000e+00 : f32
    %252 = vector.broadcast %cst_66 : f32 to vector<8x128xf32>
    %253 = arith.addf %252, %251 : vector<8x128xf32>
    %254 = arith.divf %252, %253 : vector<8x128xf32>
    %255 = arith.mulf %246, %197 : vector<8x128xf32>
    %256 = arith.mulf %240, %248 : vector<8x128xf32>
    %257 = arith.addf %255, %256 : vector<8x128xf32>
    %258 = math.tanh %257 : vector<8x128xf32>
    %259 = arith.mulf %254, %258 : vector<8x128xf32>
    %260 = vector.extract_strided_slice %234 {offsets = [0, 0], sizes = [8, 128], strides = [1, 1]} : vector<8x512xf32> to vector<8x128xf32>
    %261 = arith.negf %260 : vector<8x128xf32>
    %262 = math.exp %261 : vector<8x128xf32>
    %cst_67 = arith.constant 1.000000e+00 : f32
    %263 = vector.broadcast %cst_67 : f32 to vector<8x128xf32>
    %264 = arith.addf %263, %262 : vector<8x128xf32>
    %265 = arith.divf %263, %264 : vector<8x128xf32>
    %266 = vector.extract_strided_slice %234 {offsets = [0, 128], sizes = [8, 128], strides = [1, 1]} : vector<8x512xf32> to vector<8x128xf32>
    %267 = arith.negf %266 : vector<8x128xf32>
    %268 = math.exp %267 : vector<8x128xf32>
    %cst_68 = arith.constant 1.000000e+00 : f32
    %269 = vector.broadcast %cst_68 : f32 to vector<8x128xf32>
    %270 = arith.addf %269, %268 : vector<8x128xf32>
    %271 = arith.divf %269, %270 : vector<8x128xf32>
    %272 = vector.extract_strided_slice %234 {offsets = [0, 256], sizes = [8, 128], strides = [1, 1]} : vector<8x512xf32> to vector<8x128xf32>
    %273 = math.tanh %272 : vector<8x128xf32>
    %274 = vector.extract_strided_slice %234 {offsets = [0, 384], sizes = [8, 128], strides = [1, 1]} : vector<8x512xf32> to vector<8x128xf32>
    %275 = arith.negf %274 : vector<8x128xf32>
    %276 = math.exp %275 : vector<8x128xf32>
    %cst_69 = arith.constant 1.000000e+00 : f32
    %277 = vector.broadcast %cst_69 : f32 to vector<8x128xf32>
    %278 = arith.addf %277, %276 : vector<8x128xf32>
    %279 = arith.divf %277, %278 : vector<8x128xf32>
    %280 = arith.mulf %271, %222 : vector<8x128xf32>
    %281 = arith.mulf %265, %273 : vector<8x128xf32>
    %282 = arith.addf %280, %281 : vector<8x128xf32>
    %283 = math.tanh %282 : vector<8x128xf32>
    %284 = arith.mulf %279, %283 : vector<8x128xf32>
    %285 = tpu.concatenate %259, %284 in 1 : vector<8x128xf32>, vector<8x128xf32> -> vector<8x256xf32>
    %286 = arith.truncf %285 : vector<8x256xf32> to vector<8x256xbf16>
    %c0_70 = arith.constant 0 : index
    %c0_71 = arith.constant 0 : index
    %287 = vector.load %arg9[%c0_70, %c0_71] : memref<256x1024xbf16, #tpu.memory_space<vmem>>, vector<256x1024xbf16>
    %cst_72 = arith.constant dense<0.000000e+00> : vector<8x1024xf32>
    %288 = tpu.matmul %286, %287, %cst_72 {dimension_numbers = #tpu.dot_dimension_numbers<[1], [0], [0], [1], [0, 0, 1, 1], [], []>} : vector<8x256xbf16>, vector<256x1024xbf16>, vector<8x1024xf32> -> vector<8x1024xf32>
    %289 = vector.extract_strided_slice %40 {offsets = [32, 0], sizes = [8, 512], strides = [1, 1]} : vector<40x1024xf32> to vector<8x512xf32>
    %290 = vector.extract_strided_slice %288 {offsets = [0, 0], sizes = [8, 512], strides = [1, 1]} : vector<8x1024xf32> to vector<8x512xf32>
    %291 = arith.addf %289, %290 : vector<8x512xf32>
    %292 = vector.extract_strided_slice %40 {offsets = [0, 512], sizes = [8, 512], strides = [1, 1]} : vector<40x1024xf32> to vector<8x512xf32>
    %293 = vector.extract_strided_slice %288 {offsets = [0, 512], sizes = [8, 512], strides = [1, 1]} : vector<8x1024xf32> to vector<8x512xf32>
    %294 = arith.addf %292, %293 : vector<8x512xf32>
    %295 = vector.extract_strided_slice %291 {offsets = [0, 0], sizes = [8, 128], strides = [1, 1]} : vector<8x512xf32> to vector<8x128xf32>
    %296 = arith.negf %295 : vector<8x128xf32>
    %297 = math.exp %296 : vector<8x128xf32>
    %cst_73 = arith.constant 1.000000e+00 : f32
    %298 = vector.broadcast %cst_73 : f32 to vector<8x128xf32>
    %299 = arith.addf %298, %297 : vector<8x128xf32>
    %300 = arith.divf %298, %299 : vector<8x128xf32>
    %301 = vector.extract_strided_slice %291 {offsets = [0, 128], sizes = [8, 128], strides = [1, 1]} : vector<8x512xf32> to vector<8x128xf32>
    %302 = arith.negf %301 : vector<8x128xf32>
    %303 = math.exp %302 : vector<8x128xf32>
    %cst_74 = arith.constant 1.000000e+00 : f32
    %304 = vector.broadcast %cst_74 : f32 to vector<8x128xf32>
    %305 = arith.addf %304, %303 : vector<8x128xf32>
    %306 = arith.divf %304, %305 : vector<8x128xf32>
    %307 = vector.extract_strided_slice %291 {offsets = [0, 256], sizes = [8, 128], strides = [1, 1]} : vector<8x512xf32> to vector<8x128xf32>
    %308 = math.tanh %307 : vector<8x128xf32>
    %309 = vector.extract_strided_slice %291 {offsets = [0, 384], sizes = [8, 128], strides = [1, 1]} : vector<8x512xf32> to vector<8x128xf32>
    %310 = arith.negf %309 : vector<8x128xf32>
    %311 = math.exp %310 : vector<8x128xf32>
    %cst_75 = arith.constant 1.000000e+00 : f32
    %312 = vector.broadcast %cst_75 : f32 to vector<8x128xf32>
    %313 = arith.addf %312, %311 : vector<8x128xf32>
    %314 = arith.divf %312, %313 : vector<8x128xf32>
    %315 = arith.mulf %306, %257 : vector<8x128xf32>
    %316 = arith.mulf %300, %308 : vector<8x128xf32>
    %317 = arith.addf %315, %316 : vector<8x128xf32>
    %318 = math.tanh %317 : vector<8x128xf32>
    %319 = arith.mulf %314, %318 : vector<8x128xf32>
    %320 = vector.extract_strided_slice %294 {offsets = [0, 0], sizes = [8, 128], strides = [1, 1]} : vector<8x512xf32> to vector<8x128xf32>
    %321 = arith.negf %320 : vector<8x128xf32>
    %322 = math.exp %321 : vector<8x128xf32>
    %cst_76 = arith.constant 1.000000e+00 : f32
    %323 = vector.broadcast %cst_76 : f32 to vector<8x128xf32>
    %324 = arith.addf %323, %322 : vector<8x128xf32>
    %325 = arith.divf %323, %324 : vector<8x128xf32>
    %326 = vector.extract_strided_slice %294 {offsets = [0, 128], sizes = [8, 128], strides = [1, 1]} : vector<8x512xf32> to vector<8x128xf32>
    %327 = arith.negf %326 : vector<8x128xf32>
    %328 = math.exp %327 : vector<8x128xf32>
    %cst_77 = arith.constant 1.000000e+00 : f32
    %329 = vector.broadcast %cst_77 : f32 to vector<8x128xf32>
    %330 = arith.addf %329, %328 : vector<8x128xf32>
    %331 = arith.divf %329, %330 : vector<8x128xf32>
    %332 = vector.extract_strided_slice %294 {offsets = [0, 256], sizes = [8, 128], strides = [1, 1]} : vector<8x512xf32> to vector<8x128xf32>
    %333 = math.tanh %332 : vector<8x128xf32>
    %334 = vector.extract_strided_slice %294 {offsets = [0, 384], sizes = [8, 128], strides = [1, 1]} : vector<8x512xf32> to vector<8x128xf32>
    %335 = arith.negf %334 : vector<8x128xf32>
    %336 = math.exp %335 : vector<8x128xf32>
    %cst_78 = arith.constant 1.000000e+00 : f32
    %337 = vector.broadcast %cst_78 : f32 to vector<8x128xf32>
    %338 = arith.addf %337, %336 : vector<8x128xf32>
    %339 = arith.divf %337, %338 : vector<8x128xf32>
    %340 = arith.mulf %331, %282 : vector<8x128xf32>
    %341 = arith.mulf %325, %333 : vector<8x128xf32>
    %342 = arith.addf %340, %341 : vector<8x128xf32>
    %343 = math.tanh %342 : vector<8x128xf32>
    %344 = arith.mulf %339, %343 : vector<8x128xf32>
    %345 = tpu.concatenate %79, %344 in 1 : vector<8x128xf32>, vector<8x128xf32> -> vector<8x256xf32>
    %346 = tpu.concatenate %139, %284 in 1 : vector<8x128xf32>, vector<8x128xf32> -> vector<8x256xf32>
    %347 = tpu.concatenate %199, %224 in 1 : vector<8x128xf32>, vector<8x128xf32> -> vector<8x256xf32>
    %348 = tpu.concatenate %259, %164 in 1 : vector<8x128xf32>, vector<8x128xf32> -> vector<8x256xf32>
    %349 = tpu.concatenate %319, %104 in 1 : vector<8x128xf32>, vector<8x128xf32> -> vector<8x256xf32>
    %350 = tpu.concatenate %345, %346, %347, %348, %349 in 0 : vector<8x256xf32>, vector<8x256xf32>, vector<8x256xf32>, vector<8x256xf32>, vector<8x256xf32> -> vector<40x256xf32>
    %351 = arith.truncf %350 : vector<40x256xf32> to vector<40x256xbf16>
    %c0_79 = arith.constant 0 : index
    %c0_80 = arith.constant 0 : index
    %352 = vector.load %arg11[%c0_79, %c0_80] : memref<256x1024xbf16, #tpu.memory_space<vmem>>, vector<256x1024xbf16>
    %cst_81 = arith.constant dense<0.000000e+00> : vector<40x1024xf32>
    %353 = tpu.matmul %351, %352, %cst_81 {dimension_numbers = #tpu.dot_dimension_numbers<[1], [0], [0], [1], [0, 0, 1, 1], [], []>} : vector<40x256xbf16>, vector<256x1024xbf16>, vector<40x1024xf32> -> vector<40x1024xf32>
    %c0_82 = arith.constant 0 : index
    %c0_83 = arith.constant 0 : index
    %354 = vector.load %arg13[%c0_82, %c0_83] : memref<1x1024xf32, #tpu.memory_space<vmem>>, vector<1x1024xf32>
    %355 = vector.broadcast %354 : vector<1x1024xf32> to vector<40x1024xf32>
    %356 = arith.addf %353, %355 : vector<40x1024xf32>
    %cst_84 = arith.constant 0.000000e+00 : f32
    %357 = vector.broadcast %cst_84 : f32 to vector<8x128xf32>
    %cst_85 = arith.constant 0.000000e+00 : f32
    %358 = vector.broadcast %cst_85 : f32 to vector<8x128xf32>
    %cst_86 = arith.constant 0.000000e+00 : f32
    %359 = vector.broadcast %cst_86 : f32 to vector<8x128xf32>
    %cst_87 = arith.constant 0.000000e+00 : f32
    %360 = vector.broadcast %cst_87 : f32 to vector<8x128xf32>
    %361 = tpu.concatenate %357, %359 in 1 : vector<8x128xf32>, vector<8x128xf32> -> vector<8x256xf32>
    %362 = arith.truncf %361 : vector<8x256xf32> to vector<8x256xbf16>
    %c0_88 = arith.constant 0 : index
    %c0_89 = arith.constant 0 : index
    %363 = vector.load %arg12[%c0_88, %c0_89] : memref<256x1024xbf16, #tpu.memory_space<vmem>>, vector<256x1024xbf16>
    %cst_90 = arith.constant dense<0.000000e+00> : vector<8x1024xf32>
    %364 = tpu.matmul %362, %363, %cst_90 {dimension_numbers = #tpu.dot_dimension_numbers<[1], [0], [0], [1], [0, 0, 1, 1], [], []>} : vector<8x256xbf16>, vector<256x1024xbf16>, vector<8x1024xf32> -> vector<8x1024xf32>
    %365 = vector.extract_strided_slice %356 {offsets = [0, 0], sizes = [8, 512], strides = [1, 1]} : vector<40x1024xf32> to vector<8x512xf32>
    %366 = vector.extract_strided_slice %364 {offsets = [0, 0], sizes = [8, 512], strides = [1, 1]} : vector<8x1024xf32> to vector<8x512xf32>
    %367 = arith.addf %365, %366 : vector<8x512xf32>
    %368 = vector.extract_strided_slice %356 {offsets = [32, 512], sizes = [8, 512], strides = [1, 1]} : vector<40x1024xf32> to vector<8x512xf32>
    %369 = vector.extract_strided_slice %364 {offsets = [0, 512], sizes = [8, 512], strides = [1, 1]} : vector<8x1024xf32> to vector<8x512xf32>
    %370 = arith.addf %368, %369 : vector<8x512xf32>
    %371 = vector.extract_strided_slice %367 {offsets = [0, 0], sizes = [8, 128], strides = [1, 1]} : vector<8x512xf32> to vector<8x128xf32>
    %372 = arith.negf %371 : vector<8x128xf32>
    %373 = math.exp %372 : vector<8x128xf32>
    %cst_91 = arith.constant 1.000000e+00 : f32
    %374 = vector.broadcast %cst_91 : f32 to vector<8x128xf32>
    %375 = arith.addf %374, %373 : vector<8x128xf32>
    %376 = arith.divf %374, %375 : vector<8x128xf32>
    %377 = vector.extract_strided_slice %367 {offsets = [0, 128], sizes = [8, 128], strides = [1, 1]} : vector<8x512xf32> to vector<8x128xf32>
    %378 = arith.negf %377 : vector<8x128xf32>
    %379 = math.exp %378 : vector<8x128xf32>
    %cst_92 = arith.constant 1.000000e+00 : f32
    %380 = vector.broadcast %cst_92 : f32 to vector<8x128xf32>
    %381 = arith.addf %380, %379 : vector<8x128xf32>
    %382 = arith.divf %380, %381 : vector<8x128xf32>
    %383 = vector.extract_strided_slice %367 {offsets = [0, 256], sizes = [8, 128], strides = [1, 1]} : vector<8x512xf32> to vector<8x128xf32>
    %384 = math.tanh %383 : vector<8x128xf32>
    %385 = vector.extract_strided_slice %367 {offsets = [0, 384], sizes = [8, 128], strides = [1, 1]} : vector<8x512xf32> to vector<8x128xf32>
    %386 = arith.negf %385 : vector<8x128xf32>
    %387 = math.exp %386 : vector<8x128xf32>
    %cst_93 = arith.constant 1.000000e+00 : f32
    %388 = vector.broadcast %cst_93 : f32 to vector<8x128xf32>
    %389 = arith.addf %388, %387 : vector<8x128xf32>
    %390 = arith.divf %388, %389 : vector<8x128xf32>
    %391 = arith.mulf %382, %358 : vector<8x128xf32>
    %392 = arith.mulf %376, %384 : vector<8x128xf32>
    %393 = arith.addf %391, %392 : vector<8x128xf32>
    %394 = math.tanh %393 : vector<8x128xf32>
    %395 = arith.mulf %390, %394 : vector<8x128xf32>
    %396 = vector.extract_strided_slice %370 {offsets = [0, 0], sizes = [8, 128], strides = [1, 1]} : vector<8x512xf32> to vector<8x128xf32>
    %397 = arith.negf %396 : vector<8x128xf32>
    %398 = math.exp %397 : vector<8x128xf32>
    %cst_94 = arith.constant 1.000000e+00 : f32
    %399 = vector.broadcast %cst_94 : f32 to vector<8x128xf32>
    %400 = arith.addf %399, %398 : vector<8x128xf32>
    %401 = arith.divf %399, %400 : vector<8x128xf32>
    %402 = vector.extract_strided_slice %370 {offsets = [0, 128], sizes = [8, 128], strides = [1, 1]} : vector<8x512xf32> to vector<8x128xf32>
    %403 = arith.negf %402 : vector<8x128xf32>
    %404 = math.exp %403 : vector<8x128xf32>
    %cst_95 = arith.constant 1.000000e+00 : f32
    %405 = vector.broadcast %cst_95 : f32 to vector<8x128xf32>
    %406 = arith.addf %405, %404 : vector<8x128xf32>
    %407 = arith.divf %405, %406 : vector<8x128xf32>
    %408 = vector.extract_strided_slice %370 {offsets = [0, 256], sizes = [8, 128], strides = [1, 1]} : vector<8x512xf32> to vector<8x128xf32>
    %409 = math.tanh %408 : vector<8x128xf32>
    %410 = vector.extract_strided_slice %370 {offsets = [0, 384], sizes = [8, 128], strides = [1, 1]} : vector<8x512xf32> to vector<8x128xf32>
    %411 = arith.negf %410 : vector<8x128xf32>
    %412 = math.exp %411 : vector<8x128xf32>
    %cst_96 = arith.constant 1.000000e+00 : f32
    %413 = vector.broadcast %cst_96 : f32 to vector<8x128xf32>
    %414 = arith.addf %413, %412 : vector<8x128xf32>
    %415 = arith.divf %413, %414 : vector<8x128xf32>
    %416 = arith.mulf %407, %360 : vector<8x128xf32>
    %417 = arith.mulf %401, %409 : vector<8x128xf32>
    %418 = arith.addf %416, %417 : vector<8x128xf32>
    %419 = math.tanh %418 : vector<8x128xf32>
    %420 = arith.mulf %415, %419 : vector<8x128xf32>
    %421 = tpu.concatenate %395, %420 in 1 : vector<8x128xf32>, vector<8x128xf32> -> vector<8x256xf32>
    %422 = arith.truncf %421 : vector<8x256xf32> to vector<8x256xbf16>
    %c0_97 = arith.constant 0 : index
    %c0_98 = arith.constant 0 : index
    %423 = vector.load %arg12[%c0_97, %c0_98] : memref<256x1024xbf16, #tpu.memory_space<vmem>>, vector<256x1024xbf16>
    %cst_99 = arith.constant dense<0.000000e+00> : vector<8x1024xf32>
    %424 = tpu.matmul %422, %423, %cst_99 {dimension_numbers = #tpu.dot_dimension_numbers<[1], [0], [0], [1], [0, 0, 1, 1], [], []>} : vector<8x256xbf16>, vector<256x1024xbf16>, vector<8x1024xf32> -> vector<8x1024xf32>
    %425 = vector.extract_strided_slice %356 {offsets = [8, 0], sizes = [8, 512], strides = [1, 1]} : vector<40x1024xf32> to vector<8x512xf32>
    %426 = vector.extract_strided_slice %424 {offsets = [0, 0], sizes = [8, 512], strides = [1, 1]} : vector<8x1024xf32> to vector<8x512xf32>
    %427 = arith.addf %425, %426 : vector<8x512xf32>
    %428 = vector.extract_strided_slice %356 {offsets = [24, 512], sizes = [8, 512], strides = [1, 1]} : vector<40x1024xf32> to vector<8x512xf32>
    %429 = vector.extract_strided_slice %424 {offsets = [0, 512], sizes = [8, 512], strides = [1, 1]} : vector<8x1024xf32> to vector<8x512xf32>
    %430 = arith.addf %428, %429 : vector<8x512xf32>
    %431 = vector.extract_strided_slice %427 {offsets = [0, 0], sizes = [8, 128], strides = [1, 1]} : vector<8x512xf32> to vector<8x128xf32>
    %432 = arith.negf %431 : vector<8x128xf32>
    %433 = math.exp %432 : vector<8x128xf32>
    %cst_100 = arith.constant 1.000000e+00 : f32
    %434 = vector.broadcast %cst_100 : f32 to vector<8x128xf32>
    %435 = arith.addf %434, %433 : vector<8x128xf32>
    %436 = arith.divf %434, %435 : vector<8x128xf32>
    %437 = vector.extract_strided_slice %427 {offsets = [0, 128], sizes = [8, 128], strides = [1, 1]} : vector<8x512xf32> to vector<8x128xf32>
    %438 = arith.negf %437 : vector<8x128xf32>
    %439 = math.exp %438 : vector<8x128xf32>
    %cst_101 = arith.constant 1.000000e+00 : f32
    %440 = vector.broadcast %cst_101 : f32 to vector<8x128xf32>
    %441 = arith.addf %440, %439 : vector<8x128xf32>
    %442 = arith.divf %440, %441 : vector<8x128xf32>
    %443 = vector.extract_strided_slice %427 {offsets = [0, 256], sizes = [8, 128], strides = [1, 1]} : vector<8x512xf32> to vector<8x128xf32>
    %444 = math.tanh %443 : vector<8x128xf32>
    %445 = vector.extract_strided_slice %427 {offsets = [0, 384], sizes = [8, 128], strides = [1, 1]} : vector<8x512xf32> to vector<8x128xf32>
    %446 = arith.negf %445 : vector<8x128xf32>
    %447 = math.exp %446 : vector<8x128xf32>
    %cst_102 = arith.constant 1.000000e+00 : f32
    %448 = vector.broadcast %cst_102 : f32 to vector<8x128xf32>
    %449 = arith.addf %448, %447 : vector<8x128xf32>
    %450 = arith.divf %448, %449 : vector<8x128xf32>
    %451 = arith.mulf %442, %393 : vector<8x128xf32>
    %452 = arith.mulf %436, %444 : vector<8x128xf32>
    %453 = arith.addf %451, %452 : vector<8x128xf32>
    %454 = math.tanh %453 : vector<8x128xf32>
    %455 = arith.mulf %450, %454 : vector<8x128xf32>
    %456 = vector.extract_strided_slice %430 {offsets = [0, 0], sizes = [8, 128], strides = [1, 1]} : vector<8x512xf32> to vector<8x128xf32>
    %457 = arith.negf %456 : vector<8x128xf32>
    %458 = math.exp %457 : vector<8x128xf32>
    %cst_103 = arith.constant 1.000000e+00 : f32
    %459 = vector.broadcast %cst_103 : f32 to vector<8x128xf32>
    %460 = arith.addf %459, %458 : vector<8x128xf32>
    %461 = arith.divf %459, %460 : vector<8x128xf32>
    %462 = vector.extract_strided_slice %430 {offsets = [0, 128], sizes = [8, 128], strides = [1, 1]} : vector<8x512xf32> to vector<8x128xf32>
    %463 = arith.negf %462 : vector<8x128xf32>
    %464 = math.exp %463 : vector<8x128xf32>
    %cst_104 = arith.constant 1.000000e+00 : f32
    %465 = vector.broadcast %cst_104 : f32 to vector<8x128xf32>
    %466 = arith.addf %465, %464 : vector<8x128xf32>
    %467 = arith.divf %465, %466 : vector<8x128xf32>
    %468 = vector.extract_strided_slice %430 {offsets = [0, 256], sizes = [8, 128], strides = [1, 1]} : vector<8x512xf32> to vector<8x128xf32>
    %469 = math.tanh %468 : vector<8x128xf32>
    %470 = vector.extract_strided_slice %430 {offsets = [0, 384], sizes = [8, 128], strides = [1, 1]} : vector<8x512xf32> to vector<8x128xf32>
    %471 = arith.negf %470 : vector<8x128xf32>
    %472 = math.exp %471 : vector<8x128xf32>
    %cst_105 = arith.constant 1.000000e+00 : f32
    %473 = vector.broadcast %cst_105 : f32 to vector<8x128xf32>
    %474 = arith.addf %473, %472 : vector<8x128xf32>
    %475 = arith.divf %473, %474 : vector<8x128xf32>
    %476 = arith.mulf %467, %418 : vector<8x128xf32>
    %477 = arith.mulf %461, %469 : vector<8x128xf32>
    %478 = arith.addf %476, %477 : vector<8x128xf32>
    %479 = math.tanh %478 : vector<8x128xf32>
    %480 = arith.mulf %475, %479 : vector<8x128xf32>
    %481 = tpu.concatenate %455, %480 in 1 : vector<8x128xf32>, vector<8x128xf32> -> vector<8x256xf32>
    %482 = arith.truncf %481 : vector<8x256xf32> to vector<8x256xbf16>
    %c0_106 = arith.constant 0 : index
    %c0_107 = arith.constant 0 : index
    %483 = vector.load %arg12[%c0_106, %c0_107] : memref<256x1024xbf16, #tpu.memory_space<vmem>>, vector<256x1024xbf16>
    %cst_108 = arith.constant dense<0.000000e+00> : vector<8x1024xf32>
    %484 = tpu.matmul %482, %483, %cst_108 {dimension_numbers = #tpu.dot_dimension_numbers<[1], [0], [0], [1], [0, 0, 1, 1], [], []>} : vector<8x256xbf16>, vector<256x1024xbf16>, vector<8x1024xf32> -> vector<8x1024xf32>
    %485 = vector.extract_strided_slice %356 {offsets = [16, 0], sizes = [8, 512], strides = [1, 1]} : vector<40x1024xf32> to vector<8x512xf32>
    %486 = vector.extract_strided_slice %484 {offsets = [0, 0], sizes = [8, 512], strides = [1, 1]} : vector<8x1024xf32> to vector<8x512xf32>
    %487 = arith.addf %485, %486 : vector<8x512xf32>
    %488 = vector.extract_strided_slice %356 {offsets = [16, 512], sizes = [8, 512], strides = [1, 1]} : vector<40x1024xf32> to vector<8x512xf32>
    %489 = vector.extract_strided_slice %484 {offsets = [0, 512], sizes = [8, 512], strides = [1, 1]} : vector<8x1024xf32> to vector<8x512xf32>
    %490 = arith.addf %488, %489 : vector<8x512xf32>
    %491 = vector.extract_strided_slice %487 {offsets = [0, 0], sizes = [8, 128], strides = [1, 1]} : vector<8x512xf32> to vector<8x128xf32>
    %492 = arith.negf %491 : vector<8x128xf32>
    %493 = math.exp %492 : vector<8x128xf32>
    %cst_109 = arith.constant 1.000000e+00 : f32
    %494 = vector.broadcast %cst_109 : f32 to vector<8x128xf32>
    %495 = arith.addf %494, %493 : vector<8x128xf32>
    %496 = arith.divf %494, %495 : vector<8x128xf32>
    %497 = vector.extract_strided_slice %487 {offsets = [0, 128], sizes = [8, 128], strides = [1, 1]} : vector<8x512xf32> to vector<8x128xf32>
    %498 = arith.negf %497 : vector<8x128xf32>
    %499 = math.exp %498 : vector<8x128xf32>
    %cst_110 = arith.constant 1.000000e+00 : f32
    %500 = vector.broadcast %cst_110 : f32 to vector<8x128xf32>
    %501 = arith.addf %500, %499 : vector<8x128xf32>
    %502 = arith.divf %500, %501 : vector<8x128xf32>
    %503 = vector.extract_strided_slice %487 {offsets = [0, 256], sizes = [8, 128], strides = [1, 1]} : vector<8x512xf32> to vector<8x128xf32>
    %504 = math.tanh %503 : vector<8x128xf32>
    %505 = vector.extract_strided_slice %487 {offsets = [0, 384], sizes = [8, 128], strides = [1, 1]} : vector<8x512xf32> to vector<8x128xf32>
    %506 = arith.negf %505 : vector<8x128xf32>
    %507 = math.exp %506 : vector<8x128xf32>
    %cst_111 = arith.constant 1.000000e+00 : f32
    %508 = vector.broadcast %cst_111 : f32 to vector<8x128xf32>
    %509 = arith.addf %508, %507 : vector<8x128xf32>
    %510 = arith.divf %508, %509 : vector<8x128xf32>
    %511 = arith.mulf %502, %453 : vector<8x128xf32>
    %512 = arith.mulf %496, %504 : vector<8x128xf32>
    %513 = arith.addf %511, %512 : vector<8x128xf32>
    %514 = math.tanh %513 : vector<8x128xf32>
    %515 = arith.mulf %510, %514 : vector<8x128xf32>
    %516 = vector.extract_strided_slice %490 {offsets = [0, 0], sizes = [8, 128], strides = [1, 1]} : vector<8x512xf32> to vector<8x128xf32>
    %517 = arith.negf %516 : vector<8x128xf32>
    %518 = math.exp %517 : vector<8x128xf32>
    %cst_112 = arith.constant 1.000000e+00 : f32
    %519 = vector.broadcast %cst_112 : f32 to vector<8x128xf32>
    %520 = arith.addf %519, %518 : vector<8x128xf32>
    %521 = arith.divf %519, %520 : vector<8x128xf32>
    %522 = vector.extract_strided_slice %490 {offsets = [0, 128], sizes = [8, 128], strides = [1, 1]} : vector<8x512xf32> to vector<8x128xf32>
    %523 = arith.negf %522 : vector<8x128xf32>
    %524 = math.exp %523 : vector<8x128xf32>
    %cst_113 = arith.constant 1.000000e+00 : f32
    %525 = vector.broadcast %cst_113 : f32 to vector<8x128xf32>
    %526 = arith.addf %525, %524 : vector<8x128xf32>
    %527 = arith.divf %525, %526 : vector<8x128xf32>
    %528 = vector.extract_strided_slice %490 {offsets = [0, 256], sizes = [8, 128], strides = [1, 1]} : vector<8x512xf32> to vector<8x128xf32>
    %529 = math.tanh %528 : vector<8x128xf32>
    %530 = vector.extract_strided_slice %490 {offsets = [0, 384], sizes = [8, 128], strides = [1, 1]} : vector<8x512xf32> to vector<8x128xf32>
    %531 = arith.negf %530 : vector<8x128xf32>
    %532 = math.exp %531 : vector<8x128xf32>
    %cst_114 = arith.constant 1.000000e+00 : f32
    %533 = vector.broadcast %cst_114 : f32 to vector<8x128xf32>
    %534 = arith.addf %533, %532 : vector<8x128xf32>
    %535 = arith.divf %533, %534 : vector<8x128xf32>
    %536 = arith.mulf %527, %478 : vector<8x128xf32>
    %537 = arith.mulf %521, %529 : vector<8x128xf32>
    %538 = arith.addf %536, %537 : vector<8x128xf32>
    %539 = math.tanh %538 : vector<8x128xf32>
    %540 = arith.mulf %535, %539 : vector<8x128xf32>
    %541 = tpu.concatenate %515, %540 in 1 : vector<8x128xf32>, vector<8x128xf32> -> vector<8x256xf32>
    %542 = arith.truncf %541 : vector<8x256xf32> to vector<8x256xbf16>
    %c0_115 = arith.constant 0 : index
    %c0_116 = arith.constant 0 : index
    %543 = vector.load %arg12[%c0_115, %c0_116] : memref<256x1024xbf16, #tpu.memory_space<vmem>>, vector<256x1024xbf16>
    %cst_117 = arith.constant dense<0.000000e+00> : vector<8x1024xf32>
    %544 = tpu.matmul %542, %543, %cst_117 {dimension_numbers = #tpu.dot_dimension_numbers<[1], [0], [0], [1], [0, 0, 1, 1], [], []>} : vector<8x256xbf16>, vector<256x1024xbf16>, vector<8x1024xf32> -> vector<8x1024xf32>
    %545 = vector.extract_strided_slice %356 {offsets = [24, 0], sizes = [8, 512], strides = [1, 1]} : vector<40x1024xf32> to vector<8x512xf32>
    %546 = vector.extract_strided_slice %544 {offsets = [0, 0], sizes = [8, 512], strides = [1, 1]} : vector<8x1024xf32> to vector<8x512xf32>
    %547 = arith.addf %545, %546 : vector<8x512xf32>
    %548 = vector.extract_strided_slice %356 {offsets = [8, 512], sizes = [8, 512], strides = [1, 1]} : vector<40x1024xf32> to vector<8x512xf32>
    %549 = vector.extract_strided_slice %544 {offsets = [0, 512], sizes = [8, 512], strides = [1, 1]} : vector<8x1024xf32> to vector<8x512xf32>
    %550 = arith.addf %548, %549 : vector<8x512xf32>
    %551 = vector.extract_strided_slice %547 {offsets = [0, 0], sizes = [8, 128], strides = [1, 1]} : vector<8x512xf32> to vector<8x128xf32>
    %552 = arith.negf %551 : vector<8x128xf32>
    %553 = math.exp %552 : vector<8x128xf32>
    %cst_118 = arith.constant 1.000000e+00 : f32
    %554 = vector.broadcast %cst_118 : f32 to vector<8x128xf32>
    %555 = arith.addf %554, %553 : vector<8x128xf32>
    %556 = arith.divf %554, %555 : vector<8x128xf32>
    %557 = vector.extract_strided_slice %547 {offsets = [0, 128], sizes = [8, 128], strides = [1, 1]} : vector<8x512xf32> to vector<8x128xf32>
    %558 = arith.negf %557 : vector<8x128xf32>
    %559 = math.exp %558 : vector<8x128xf32>
    %cst_119 = arith.constant 1.000000e+00 : f32
    %560 = vector.broadcast %cst_119 : f32 to vector<8x128xf32>
    %561 = arith.addf %560, %559 : vector<8x128xf32>
    %562 = arith.divf %560, %561 : vector<8x128xf32>
    %563 = vector.extract_strided_slice %547 {offsets = [0, 256], sizes = [8, 128], strides = [1, 1]} : vector<8x512xf32> to vector<8x128xf32>
    %564 = math.tanh %563 : vector<8x128xf32>
    %565 = vector.extract_strided_slice %547 {offsets = [0, 384], sizes = [8, 128], strides = [1, 1]} : vector<8x512xf32> to vector<8x128xf32>
    %566 = arith.negf %565 : vector<8x128xf32>
    %567 = math.exp %566 : vector<8x128xf32>
    %cst_120 = arith.constant 1.000000e+00 : f32
    %568 = vector.broadcast %cst_120 : f32 to vector<8x128xf32>
    %569 = arith.addf %568, %567 : vector<8x128xf32>
    %570 = arith.divf %568, %569 : vector<8x128xf32>
    %571 = arith.mulf %562, %513 : vector<8x128xf32>
    %572 = arith.mulf %556, %564 : vector<8x128xf32>
    %573 = arith.addf %571, %572 : vector<8x128xf32>
    %574 = math.tanh %573 : vector<8x128xf32>
    %575 = arith.mulf %570, %574 : vector<8x128xf32>
    %576 = vector.extract_strided_slice %550 {offsets = [0, 0], sizes = [8, 128], strides = [1, 1]} : vector<8x512xf32> to vector<8x128xf32>
    %577 = arith.negf %576 : vector<8x128xf32>
    %578 = math.exp %577 : vector<8x128xf32>
    %cst_121 = arith.constant 1.000000e+00 : f32
    %579 = vector.broadcast %cst_121 : f32 to vector<8x128xf32>
    %580 = arith.addf %579, %578 : vector<8x128xf32>
    %581 = arith.divf %579, %580 : vector<8x128xf32>
    %582 = vector.extract_strided_slice %550 {offsets = [0, 128], sizes = [8, 128], strides = [1, 1]} : vector<8x512xf32> to vector<8x128xf32>
    %583 = arith.negf %582 : vector<8x128xf32>
    %584 = math.exp %583 : vector<8x128xf32>
    %cst_122 = arith.constant 1.000000e+00 : f32
    %585 = vector.broadcast %cst_122 : f32 to vector<8x128xf32>
    %586 = arith.addf %585, %584 : vector<8x128xf32>
    %587 = arith.divf %585, %586 : vector<8x128xf32>
    %588 = vector.extract_strided_slice %550 {offsets = [0, 256], sizes = [8, 128], strides = [1, 1]} : vector<8x512xf32> to vector<8x128xf32>
    %589 = math.tanh %588 : vector<8x128xf32>
    %590 = vector.extract_strided_slice %550 {offsets = [0, 384], sizes = [8, 128], strides = [1, 1]} : vector<8x512xf32> to vector<8x128xf32>
    %591 = arith.negf %590 : vector<8x128xf32>
    %592 = math.exp %591 : vector<8x128xf32>
    %cst_123 = arith.constant 1.000000e+00 : f32
    %593 = vector.broadcast %cst_123 : f32 to vector<8x128xf32>
    %594 = arith.addf %593, %592 : vector<8x128xf32>
    %595 = arith.divf %593, %594 : vector<8x128xf32>
    %596 = arith.mulf %587, %538 : vector<8x128xf32>
    %597 = arith.mulf %581, %589 : vector<8x128xf32>
    %598 = arith.addf %596, %597 : vector<8x128xf32>
    %599 = math.tanh %598 : vector<8x128xf32>
    %600 = arith.mulf %595, %599 : vector<8x128xf32>
    %601 = tpu.concatenate %575, %600 in 1 : vector<8x128xf32>, vector<8x128xf32> -> vector<8x256xf32>
    %602 = arith.truncf %601 : vector<8x256xf32> to vector<8x256xbf16>
    %c0_124 = arith.constant 0 : index
    %c0_125 = arith.constant 0 : index
    %603 = vector.load %arg12[%c0_124, %c0_125] : memref<256x1024xbf16, #tpu.memory_space<vmem>>, vector<256x1024xbf16>
    %cst_126 = arith.constant dense<0.000000e+00> : vector<8x1024xf32>
    %604 = tpu.matmul %602, %603, %cst_126 {dimension_numbers = #tpu.dot_dimension_numbers<[1], [0], [0], [1], [0, 0, 1, 1], [], []>} : vector<8x256xbf16>, vector<256x1024xbf16>, vector<8x1024xf32> -> vector<8x1024xf32>
    %605 = vector.extract_strided_slice %356 {offsets = [32, 0], sizes = [8, 512], strides = [1, 1]} : vector<40x1024xf32> to vector<8x512xf32>
    %606 = vector.extract_strided_slice %604 {offsets = [0, 0], sizes = [8, 512], strides = [1, 1]} : vector<8x1024xf32> to vector<8x512xf32>
    %607 = arith.addf %605, %606 : vector<8x512xf32>
    %608 = vector.extract_strided_slice %356 {offsets = [0, 512], sizes = [8, 512], strides = [1, 1]} : vector<40x1024xf32> to vector<8x512xf32>
    %609 = vector.extract_strided_slice %604 {offsets = [0, 512], sizes = [8, 512], strides = [1, 1]} : vector<8x1024xf32> to vector<8x512xf32>
    %610 = arith.addf %608, %609 : vector<8x512xf32>
    %611 = vector.extract_strided_slice %607 {offsets = [0, 0], sizes = [8, 128], strides = [1, 1]} : vector<8x512xf32> to vector<8x128xf32>
    %612 = arith.negf %611 : vector<8x128xf32>
    %613 = math.exp %612 : vector<8x128xf32>
    %cst_127 = arith.constant 1.000000e+00 : f32
    %614 = vector.broadcast %cst_127 : f32 to vector<8x128xf32>
    %615 = arith.addf %614, %613 : vector<8x128xf32>
    %616 = arith.divf %614, %615 : vector<8x128xf32>
    %617 = vector.extract_strided_slice %607 {offsets = [0, 128], sizes = [8, 128], strides = [1, 1]} : vector<8x512xf32> to vector<8x128xf32>
    %618 = arith.negf %617 : vector<8x128xf32>
    %619 = math.exp %618 : vector<8x128xf32>
    %cst_128 = arith.constant 1.000000e+00 : f32
    %620 = vector.broadcast %cst_128 : f32 to vector<8x128xf32>
    %621 = arith.addf %620, %619 : vector<8x128xf32>
    %622 = arith.divf %620, %621 : vector<8x128xf32>
    %623 = vector.extract_strided_slice %607 {offsets = [0, 256], sizes = [8, 128], strides = [1, 1]} : vector<8x512xf32> to vector<8x128xf32>
    %624 = math.tanh %623 : vector<8x128xf32>
    %625 = vector.extract_strided_slice %607 {offsets = [0, 384], sizes = [8, 128], strides = [1, 1]} : vector<8x512xf32> to vector<8x128xf32>
    %626 = arith.negf %625 : vector<8x128xf32>
    %627 = math.exp %626 : vector<8x128xf32>
    %cst_129 = arith.constant 1.000000e+00 : f32
    %628 = vector.broadcast %cst_129 : f32 to vector<8x128xf32>
    %629 = arith.addf %628, %627 : vector<8x128xf32>
    %630 = arith.divf %628, %629 : vector<8x128xf32>
    %631 = arith.mulf %622, %573 : vector<8x128xf32>
    %632 = arith.mulf %616, %624 : vector<8x128xf32>
    %633 = arith.addf %631, %632 : vector<8x128xf32>
    %634 = math.tanh %633 : vector<8x128xf32>
    %635 = arith.mulf %630, %634 : vector<8x128xf32>
    %636 = vector.extract_strided_slice %610 {offsets = [0, 0], sizes = [8, 128], strides = [1, 1]} : vector<8x512xf32> to vector<8x128xf32>
    %637 = arith.negf %636 : vector<8x128xf32>
    %638 = math.exp %637 : vector<8x128xf32>
    %cst_130 = arith.constant 1.000000e+00 : f32
    %639 = vector.broadcast %cst_130 : f32 to vector<8x128xf32>
    %640 = arith.addf %639, %638 : vector<8x128xf32>
    %641 = arith.divf %639, %640 : vector<8x128xf32>
    %642 = vector.extract_strided_slice %610 {offsets = [0, 128], sizes = [8, 128], strides = [1, 1]} : vector<8x512xf32> to vector<8x128xf32>
    %643 = arith.negf %642 : vector<8x128xf32>
    %644 = math.exp %643 : vector<8x128xf32>
    %cst_131 = arith.constant 1.000000e+00 : f32
    %645 = vector.broadcast %cst_131 : f32 to vector<8x128xf32>
    %646 = arith.addf %645, %644 : vector<8x128xf32>
    %647 = arith.divf %645, %646 : vector<8x128xf32>
    %648 = vector.extract_strided_slice %610 {offsets = [0, 256], sizes = [8, 128], strides = [1, 1]} : vector<8x512xf32> to vector<8x128xf32>
    %649 = math.tanh %648 : vector<8x128xf32>
    %650 = vector.extract_strided_slice %610 {offsets = [0, 384], sizes = [8, 128], strides = [1, 1]} : vector<8x512xf32> to vector<8x128xf32>
    %651 = arith.negf %650 : vector<8x128xf32>
    %652 = math.exp %651 : vector<8x128xf32>
    %cst_132 = arith.constant 1.000000e+00 : f32
    %653 = vector.broadcast %cst_132 : f32 to vector<8x128xf32>
    %654 = arith.addf %653, %652 : vector<8x128xf32>
    %655 = arith.divf %653, %654 : vector<8x128xf32>
    %656 = arith.mulf %647, %598 : vector<8x128xf32>
    %657 = arith.mulf %641, %649 : vector<8x128xf32>
    %658 = arith.addf %656, %657 : vector<8x128xf32>
    %659 = math.tanh %658 : vector<8x128xf32>
    %660 = arith.mulf %655, %659 : vector<8x128xf32>
    %661 = tpu.concatenate %395, %660 in 1 : vector<8x128xf32>, vector<8x128xf32> -> vector<8x256xf32>
    %662 = tpu.concatenate %455, %600 in 1 : vector<8x128xf32>, vector<8x128xf32> -> vector<8x256xf32>
    %663 = tpu.concatenate %515, %540 in 1 : vector<8x128xf32>, vector<8x128xf32> -> vector<8x256xf32>
    %664 = tpu.concatenate %575, %480 in 1 : vector<8x128xf32>, vector<8x128xf32> -> vector<8x256xf32>
    %665 = tpu.concatenate %635, %420 in 1 : vector<8x128xf32>, vector<8x128xf32> -> vector<8x256xf32>
    %666 = arith.addf %661, %662 : vector<8x256xf32>
    %667 = arith.addf %666, %663 : vector<8x256xf32>
    %668 = arith.addf %667, %664 : vector<8x256xf32>
    %669 = arith.addf %668, %665 : vector<8x256xf32>
    %cst_133 = arith.constant 2.000000e-01 : f32
    %670 = vector.broadcast %cst_133 : f32 to vector<8x256xf32>
    %671 = arith.mulf %669, %670 : vector<8x256xf32>
    %672 = arith.truncf %671 : vector<8x256xf32> to vector<8x256xbf16>
    %c0_134 = arith.constant 0 : index
    %c0_135 = arith.constant 0 : index
    %673 = vector.load %arg14[%c0_134, %c0_135] : memref<256x8xbf16, #tpu.memory_space<vmem>>, vector<256x8xbf16>
    %cst_136 = arith.constant dense<0.000000e+00> : vector<8x8xf32>
    %674 = tpu.matmul %672, %673, %cst_136 {dimension_numbers = #tpu.dot_dimension_numbers<[1], [0], [0], [1], [0, 0, 1, 1], [], []>} : vector<8x256xbf16>, vector<256x8xbf16>, vector<8x8xf32> -> vector<8x8xf32>
    %c0_137 = arith.constant 0 : index
    %c0_138 = arith.constant 0 : index
    %675 = vector.load %arg15[%c0_137, %c0_138] : memref<1x8xf32, #tpu.memory_space<vmem>>, vector<1x8xf32>
    %676 = vector.broadcast %675 : vector<1x8xf32> to vector<8x8xf32>
    %677 = arith.addf %674, %676 : vector<8x8xf32>
    %c0_139 = arith.constant 0 : index
    %c0_140 = arith.constant 0 : index
    %678 = vector.load %arg16[%c0_139, %c0_140] : memref<8x8xf32, #tpu.memory_space<vmem>>, vector<8x8xf32>
    tpu.vector_store %arg16[%c0_139, %c0_140], %677 {strides = array<i32>} : memref<8x8xf32, #tpu.memory_space<vmem>>, vector<8x8xf32>,
    return
  }
  func.func @transform_0(%arg0: i32) -> (i32, i32) {
    %c0_i32 = arith.constant 0 : i32
    %c0_i32_0 = arith.constant 0 : i32
    %c0_i32_1 = arith.constant 0 : i32
    return %c0_i32, %c0_i32_0 : i32, i32
  }
  func.func @transform_1(%arg0: i32) -> (i32, i32) {
    %c0_i32 = arith.constant 0 : i32
    %c0_i32_0 = arith.constant 0 : i32
    %c0_i32_1 = arith.constant 0 : i32
    return %c0_i32, %c0_i32_0 : i32, i32
  }
  func.func @transform_2(%arg0: i32) -> (i32, i32) {
    %c0_i32 = arith.constant 0 : i32
    %c0_i32_0 = arith.constant 0 : i32
    %c0_i32_1 = arith.constant 0 : i32
    return %c0_i32, %c0_i32_0 : i32, i32
  }
  func.func @transform_3(%arg0: i32) -> (i32, i32) {
    %c0_i32 = arith.constant 0 : i32
    %c0_i32_0 = arith.constant 0 : i32
    %c0_i32_1 = arith.constant 0 : i32
    return %c0_i32, %c0_i32_0 : i32, i32
  }
  func.func @transform_4(%arg0: i32) -> (i32, i32) {
    %c0_i32 = arith.constant 0 : i32
    %c0_i32_0 = arith.constant 0 : i32
    %c0_i32_1 = arith.constant 0 : i32
    return %c0_i32, %c0_i32_0 : i32, i32
  }
  func.func @transform_5(%arg0: i32) -> (i32, i32) {
    %c0_i32 = arith.constant 0 : i32
    %c0_i32_0 = arith.constant 0 : i32
    %c0_i32_1 = arith.constant 0 : i32
    return %c0_i32, %c0_i32_0 : i32, i32
  }
  func.func @transform_6(%arg0: i32) -> (i32, i32) {
    %c0_i32 = arith.constant 0 : i32
    %c0_i32_0 = arith.constant 0 : i32
    %c0_i32_1 = arith.constant 0 : i32
    return %c0_i32, %c0_i32_0 : i32, i32
  }
  func.func @transform_7(%arg0: i32) -> (i32, i32) {
    %c0_i32 = arith.constant 0 : i32
    %c0_i32_0 = arith.constant 0 : i32
    %c0_i32_1 = arith.constant 0 : i32
    return %c0_i32, %c0_i32_0 : i32, i32
  }
  func.func @transform_8(%arg0: i32) -> (i32, i32) {
    %c0_i32 = arith.constant 0 : i32
    %c0_i32_0 = arith.constant 0 : i32
    %c0_i32_1 = arith.constant 0 : i32
    return %c0_i32, %c0_i32_0 : i32, i32
  }
  func.func @transform_9(%arg0: i32) -> (i32, i32) {
    %c0_i32 = arith.constant 0 : i32
    %c0_i32_0 = arith.constant 0 : i32
    %c0_i32_1 = arith.constant 0 : i32
    return %c0_i32, %c0_i32_0 : i32, i32
  }
  func.func @transform_10(%arg0: i32) -> (i32, i32) {
    %c0_i32 = arith.constant 0 : i32
    %c0_i32_0 = arith.constant 0 : i32
    %c0_i32_1 = arith.constant 0 : i32
    return %c0_i32, %c0_i32_0 : i32, i32
  }
  func.func @transform_11(%arg0: i32) -> (i32, i32) {
    %c0_i32 = arith.constant 0 : i32
    %c0_i32_0 = arith.constant 0 : i32
    %c0_i32_1 = arith.constant 0 : i32
    return %c0_i32, %c0_i32_0 : i32, i32
  }
  func.func @transform_12(%arg0: i32) -> (i32, i32) {
    %c0_i32 = arith.constant 0 : i32
    %c0_i32_0 = arith.constant 0 : i32
    %c0_i32_1 = arith.constant 0 : i32
    return %c0_i32, %c0_i32_0 : i32, i32
  }
  func.func @transform_13(%arg0: i32) -> (i32, i32) {
    %c0_i32 = arith.constant 0 : i32
    %c0_i32_0 = arith.constant 0 : i32
    %c0_i32_1 = arith.constant 0 : i32
    return %c0_i32, %c0_i32_0 : i32, i32
  }
  func.func @transform_14(%arg0: i32) -> (i32, i32) {
    %c0_i32 = arith.constant 0 : i32
    %c0_i32_0 = arith.constant 0 : i32
    %c0_i32_1 = arith.constant 0 : i32
    return %c0_i32, %c0_i32_0 : i32, i32
  }
  func.func @transform_15(%arg0: i32) -> (i32, i32) {
    %c0_i32 = arith.constant 0 : i32
    %c0_i32_0 = arith.constant 0 : i32
    %c0_i32_1 = arith.constant 0 : i32
    return %c0_i32, %c0_i32_0 : i32, i32
  }
}

</mosaic_0001>

<bundles_post_ra>
// kernel: conv_model_forward.1
= control target key start
LH: loop header
LB: loop body
LE: loop exit
PB: predicated region body
PF: predicated region fallthrough
CT: control target
= control target key end

     0   :  { %v7435_v0 = vmov 0   ;;  %vm194_vm0 = vcmask 523264   ;;  %v7436_v22 = vmov 0.0   ;;  %vm7437_vm1 = vmmov 0   ;;  %s7439_s29 = smov 64   ;;  %s11518_s1 = inlined_call_operand.vmem [shape: bf16[192,32], index: 1, kind: input, shape index: {}]   ;;  %s11519_s0 = inlined_call_operand.vmem [shape: bf16[56,192], index: 0, kind: input, shape index: {}]   ;;  %s11520_s3 = inlined_call_operand.vmem [shape: bf16[96,128], index: 3, kind: input, shape index: {}]   ;;  %s11521_s2 = inlined_call_operand.vmem [shape: f32[56,32], index: 2, kind: input, shape index: {}]   ;;  %s11522_s5 = inlined_call_operand.vmem [shape: bf16[384,64], index: 5, kind: input, shape index: {}]   ;;  %s11523_s7 = inlined_call_operand.vmem [shape: bf16[64,1024], index: 7, kind: input, shape index: {}]   ;;  %s11524_s4 = inlined_call_operand.vmem [shape: f32[1,128], index: 4, kind: input, shape index: {}]   ;;  %s11525_s6 = inlined_call_operand.vmem [shape: f32[1,64], index: 6, kind: input, shape index: {}]   ;;  %s11526_s8 = inlined_call_operand.vmem [shape: bf16[256,1024], index: 8, kind: input, shape index: {}]   ;;  %s11527_s9 = inlined_call_operand.vmem [shape: f32[1,1024], index: 9, kind: input, shape index: {}]   ;;  %s11528_s10 = inlined_call_operand.vmem [shape: bf16[256,1024], index: 10, kind: input, shape index: {}]   ;;  %s11529_s11 = inlined_call_operand.vmem [shape: bf16[256,1024], index: 11, kind: input, shape index: {}]   ;;  %s11530_s12 = inlined_call_operand.vmem [shape: f32[1,1024], index: 12, kind: input, shape index: {}]   ;;  %s11531_s13 = inlined_call_operand.vmem [shape: bf16[256,8], index: 13, kind: input, shape index: {}]   ;;  %s11532_s14 = inlined_call_operand.vmem [shape: f32[1,8], index: 14, kind: input, shape index: {}]   ;;  %s11533_s15 = inlined_call_operand.vmem [shape: f32[8,8], index: 15, kind: output, shape index: {}]  }
   0x1   :  { %207 = vmatprep.subr.bf16.mxu0 %v7435_v0  ;;  %v7046_v1 = vld [vmem:[%s11518_s1] sm:$0xff]   ;;  %v7047_v2 = vld [vmem:[%s11518_s1 + $0x8] sm:$0xff]   ;;  %v7048_v3 = vld [vmem:[%s11518_s1 + $0x10] sm:$0xff]   ;;  %6920 = vmatprep.subr.bf16.mxu1 %v7436_v22  ;;  %vm307_vm2 = vcmask 261120   ;;  %vm376_vm3 = vcmask 785408   ;;  %vm6274_vm4 = vcmask 64512  }
   0x2   :  { %208 = vmatpush1.bf16.msra.mxu0 %v7046_v1  ;;  %v7049_v4 = vld [vmem:[%s11518_s1 + $0x18] sm:$0xff]   ;;  %v7060_v5 = vld [vmem:[%s11519_s0 + $0x4] ss:$8 sps:$4 sm:$0xff]   ;;  %v7052_v8 = vld [vmem:[%s11518_s1 + $0x30] sm:$0xff]   ;;  %6932 = vmatprep.mubr.msk.bf16.mxu1 %vm7437_vm1, %v7436_v22 }
   0x3   :  { %209 = vmatprep.subr.bf16.mxu0 %v7435_v0  ;;  %v7050_v6 = vld [vmem:[%s11518_s1 + $0x20] sm:$0xff]   ;;  %6300 = vmatprep.mubr.msk.bf16.mxu0 %vm194_vm0, %v7060_v5  ;;  %v7051_v7 = vld [vmem:[%s11518_s1 + $0x28] sm:$0xff]   ;;  %v7053_v9 = vld [vmem:[%s11518_s1 + $0x38] sm:$0xff]  }
   0x4   :  { %v7054_v10 = vld [vmem:[%s11518_s1 + $0x40] sm:$0xff]   ;;  %v7055_v11 = vld [vmem:[%s11518_s1 + $0x48] sm:$0xff]   ;;  %v7056_v12 = vld [vmem:[%s11518_s1 + $0x50] sm:$0xff]  }
   0x5   :  { %v7057_v13 = vld [vmem:[%s11518_s1 + $0x58] sm:$0xff]   ;;  %v7058_v14 = vld [vmem:[%s11519_s0] ss:$8 sps:$4 sm:$0xff]   ;;  %v7064_v17 = vld [vmem:[%s11519_s0 + $0x24] ss:$8 sps:$4 sm:$0xff]  }
   0x6   :  { %210 = vmatpush1.bf16.msra.mxu0 %v7047_v2  ;;  %v7061_v15 = vld [vmem:[%s11519_s0 + $0x14] ss:$8 sps:$4 sm:$0xff]   ;;  %v7063_v16 = vld [vmem:[%s11519_s0 + $0x10] ss:$8 sps:$4 sm:$0xff]   ;;  %v7066_v19 = vld [vmem:[%s11519_s0 + $0x20] ss:$8 sps:$4 sm:$0xff]  }
   0x7   :  { %211 = vmatprep.subr.bf16.mxu0 %v7435_v0  ;;  %v57_v18 = vld [vmem:[%s11519_s0 + $0x30] sm:$0xff]  ;;  %v7069_v23 = vld [vmem:[%s11520_s3] sm:$0xff]   ;;  %v7070_v24 = vld [vmem:[%s11520_s3 + $0x8] sm:$0xff]  }
   0x8   :  { %v6287_v20 = vcombine.high %v57_v18, %v57_v18  ;;  %v6286_v21 = vcombine.low %v57_v18, %v57_v18  ;;  %6921 = vmatpush3.bf16.msra.mxu1 %v7069_v23  ;;  %v7071_v25 = vld [vmem:[%s11520_s3 + $0x10] sm:$0xff]   ;;  %v7072_v26 = vld [vmem:[%s11520_s3 + $0x18] sm:$0xff]   ;;  %v7073_v28 = vld [vmem:[%s11520_s3 + $0x20] sm:$0xff]  }
   0x9   :  { %6922 = vmatprep.subr.bf16.mxu1 %v7436_v22  ;;  %v7074_v32 = vld [vmem:[%s11520_s3 + $0x28] sm:$0xff]   ;;  %v84_v34 = vld [vmem:[%s11521_s2 + $0x10] sm:$0xff]  ;;  %v85_v36 = vld [vmem:[%s11521_s2 + $0x18] sm:$0xff]  ;;  %s7438_s3 = smov 32  }
   0xa   :  { %212 = vmatpush1.bf16.msra.mxu0 %v7048_v3  ;;  %v83_v33 = vld [vmem:[%s11521_s2 + $0x8] sm:$0xff]  ;;  %v86_v44 = vld [vmem:[%s11521_s2 + $0x20] sm:$0xff]  ;;  %v88_v54 = vld [vmem:[%s11521_s2 + $0x30] sm:$0xff] }
   0xb   :  { %213 = vmatprep.subr.bf16.mxu0 %v7435_v0  ;;  %v87_v47 = vld [vmem:[%s11521_s2 + $0x28] sm:$0xff]  ;;  %v7075_v60 = vld [vmem:[%s11522_s5 + $0x40] sm:$0xff]   ;;  %v7085_v1 = vld [vmem:[%s11522_s5 + $0x90] sm:$0xff]  }
   0xc   :  { %6923 = vmatpush3.bf16.msra.mxu1 %v7070_v24  ;;  %v7079_v62 = vld [vmem:[%s11522_s5 + $0x80] sm:$0xff]   ;;  %v7082_v63 = vld [vmem:[%s11522_s5 + $0x88] sm:$0xff]   ;;  %v7088_v2 = vld [vmem:[%s11522_s5 + $0x98] sm:$0xff]  }
   0xd   :  { %6924 = vmatprep.subr.bf16.mxu1 %v7436_v22  ;;  %v7091_v3 = vld [vmem:[%s11522_s5 + $0xa0] sm:$0xff]   ;;  %v7078_v23 = vld [vmem:[%s11522_s5 + $0x8] sm:$0xff]  }
   0xe   :  { %214 = vmatpush1.bf16.msra.mxu0 %v7049_v4  ;;  %v82_v5 = vld [vmem:[%s11521_s2] sm:$0xff] }
   0xf   :  { %215 = vmatprep.subr.bf16.mxu0 %v7435_v0 }
  0x10   :  { %6925 = vmatpush3.bf16.msra.mxu1 %v7071_v25  ;;  %v7080_v25 = vld [vmem:[%s11522_s5 + $0x50] sm:$0xff]  }
  0x11   :  { %6926 = vmatprep.subr.bf16.mxu1 %v7436_v22 }
  0x12   :  { %216 = vmatpush1.bf16.msra.mxu0 %v7050_v6 }
  0x13   :  { %217 = vmatprep.subr.bf16.mxu0 %v7435_v0 }
  0x14   :  { %6927 = vmatpush3.bf16.msra.mxu1 %v7072_v26 }
  0x15   :  { %6928 = vmatprep.subr.bf16.mxu1 %v7436_v22 }
  0x16   :  { %218 = vmatpush1.bf16.msra.mxu0 %v7051_v7 }
  0x17   :  { %219 = vmatprep.subr.bf16.mxu0 %v7435_v0 }
  0x18   :  { %6929 = vmatpush3.bf16.msra.mxu1 %v7073_v28 }
  0x19   :  { %6930 = vmatprep.subr.bf16.mxu1 %v7436_v22 }
  0x1a   :  { %220 = vmatpush1.bf16.msra.mxu0 %v7052_v8 }
  0x1b   :  { %221 = vmatprep.subr.bf16.mxu0 %v7435_v0 }
  0x1c   :  { %6931 = vmatpush3.bf16.msra.mxu1 %v7074_v32  ;;  %v7081_v32 = vld [vmem:[%s11522_s5 + $0x10] sm:$0xff]  }
  0x1d   :  { %6853 = vmatprep.subr.bf16.mxu1 %v7075_v60  ;;  %v6304_v60 = vld [vmem:[%s11524_s4] ss:$0 sm:$0xff] }
  0x1e   :  { %222 = vmatpush1.bf16.msra.mxu0 %v7053_v9 }
  0x1f   :  { %223 = vmatprep.subr.bf16.mxu0 %v7435_v0 }
  0x22   :  { %224 = vmatpush1.bf16.msra.mxu0 %v7054_v10 }
  0x23   :  { %225 = vmatprep.subr.bf16.mxu0 %v7435_v0 }
  0x26   :  { %226 = vmatpush1.bf16.msra.mxu0 %v7055_v11 }
  0x27   :  { %227 = vmatprep.subr.bf16.mxu0 %v7435_v0 }
  0x2a   :  { %228 = vmatpush1.bf16.msra.mxu0 %v7056_v12 }
  0x2b   :  { %229 = vmatprep.subr.bf16.mxu0 %v7435_v0 }
  0x2e   :  { %230 = vmatpush1.bf16.msra.mxu0 %v7057_v13 }
  0x2f   :  { %6944 = vmatprep.subr.bf16.mxu0 %v7436_v22 }
  0x31   :  { %240 = vmatmul.mubr.bf16.vlgmr.msra.gmra.mrb[0].mxu0 %v7058_v14 }
  0x32   :  { %6301 = vmatprep.mubr.msk.bf16.mxu0 %vm194_vm0, %v7061_v15  ;;  %6945 = vmatpush3.bf16.msra.mxu0 %v7079_v62 }
  0x33   :  { %6946 = vmatprep.subr.bf16.mxu0 %v7436_v22 }
  0x36   :  { %6947 = vmatpush3.bf16.msra.mxu0 %v7082_v63 }
  0x37   :  { %6948 = vmatprep.subr.bf16.mxu0 %v7436_v22 }
  0x39   :  { %248 = vmatmul.mubr.bf16.gmra.mrb[4].mxu0 %v7063_v16  ;;  %v7076_v16 = vld [vmem:[%s11522_s5] sm:$0xff]  }
  0x3a   :  { %6302 = vmatprep.mubr.msk.bf16.mxu0 %vm194_vm0, %v7064_v17  ;;  %6949 = vmatpush3.bf16.msra.mxu0 %v7085_v1 }
  0x3b   :  { %6950 = vmatprep.subr.bf16.mxu0 %v7436_v22 }
  0x3e   :  { %6951 = vmatpush3.bf16.msra.mxu0 %v7088_v2 }
  0x3f   :  { %6952 = vmatprep.subr.bf16.mxu0 %v7436_v22 }
  0x41   :  { %256 = vmatmul.mubr.bf16.gmra.mrb[8].mxu0 %v7066_v19  ;;  %v7077_v19 = vld [vmem:[%s11522_s5 + $0x48] sm:$0xff]  }
  0x42   :  { %6303 = vmatprep.mubr.msk.bf16.mxu0 %vm194_vm0, %v6287_v20  ;;  %6953 = vmatpush3.bf16.msra.mxu0 %v7091_v3 }
  0x43   :  { %6954 = vmatprep.subr.bf16.mxu0 %v7436_v22 }
  0x49   :  { %264 = vmatmul.mubr.bf16.gmra.mrb[12].mxu0 %v6286_v21 }
  0x4a   :  { %6960 = vmatprep.mubr.msk.bf16.mxu0 %vm7437_vm1, %v7436_v22 }
 0x104   :  { %v7612_v27 = vpop.f32.mrb[0].mxu0 }
 0x105   :  { %v243_v29 = vpop.f32.mrb[1].mxu0  ;;  %v242_v8 = vadd.f32 %v7612_v27, %v82_v5 }
 0x106   :  { %v244_v30 = vpop.f32.mrb[2].mxu0 }
 0x107   :  { %v246_v31 = vpop.f32.mrb[3].mxu0  ;;  %v245_v37 = vadd.f32 %v244_v30, %v83_v33 }
 0x10c   :  { %v249_v35 = vpop.f32.mrb[4].mxu0 }
 0x10d   :  { %v7634_v38 = vadd.f32 %v249_v35, %v84_v34  ;;  %v251_v39 = vpop.f32.mrb[5].mxu0  ;;  %v7083_v34 = vld [vmem:[%s11522_s5 + $0x58] sm:$0xff]  }
 0x10e   :  { %v252_v40 = vpop.f32.mrb[6].mxu0  ;;  %v7086_v39 = vld [vmem:[%s11522_s5 + $0x60] sm:$0xff]  }
 0x10f   :  { %v7636_v41 = vadd.f32 %v252_v40, %v85_v36  ;;  %v254_v42 = vpop.f32.mrb[7].mxu0  ;;  %v7026_v43 = vpack.i.bf16 %v7634_v38, %v245_v37 }
 0x111   :  { %7027 = vrot.lane.b32.xlu0 %v7026_v43, %s7438_s3  ;;  %v7031_v45 = vpack.i.bf16 %v7636_v41, %v7634_v38  ;;  %v7089_v43 = vld [vmem:[%s11522_s5 + $0x68] sm:$0xff]  }
 0x114   :  { %v257_v46 = vpop.f32.mrb[8].mxu0 }
 0x115   :  { %v7647_v48 = vadd.f32 %v257_v46, %v86_v44  ;;  %v259_v49 = vpop.f32.mrb[9].mxu0  ;;  %7032 = vrot.lane.b32.xlu0 %v7031_v45, %s7439_s29  ;;  %v7090_v44 = vld [vmem:[%s11522_s5 + $0x28] sm:$0xff]   ;;  %v7092_v45 = vld [vmem:[%s11522_s5 + $0x70] sm:$0xff]  }
 0x116   :  { %v260_v50 = vpop.f32.mrb[10].mxu0  ;;  %v7093_v46 = vld [vmem:[%s11522_s5 + $0x30] sm:$0xff]   ;;  %v7096_v49 = vld [vmem:[%s11522_s5 + $0x38] sm:$0xff]  }
 0x117   :  { %v261_v51 = vadd.f32 %v260_v50, %v87_v47  ;;  %v262_v52 = vpop.f32.mrb[11].mxu0  ;;  %v7036_v53 = vpack.i.bf16 %v7647_v48, %v7636_v41  ;;  %v7094_v47 = vld [vmem:[%s11522_s5 + $0xa8] sm:$0xff]   ;;  %v7097_v50 = vld [vmem:[%s11522_s5 + $0xb0] sm:$0xff]  }
 0x118   :  { %6955 = vmatpush3.bf16.msra.mxu0 %v7094_v47  ;;  %v788_v52 = vld [vmem:[%s11523_s7] sm:$0xff] }
 0x119   :  { %7037 = vrot.lane.b32.xlu1 %v7036_v53, %s7438_s3  ;;  %284 = vrot.lane.b32.xlu0 %v261_v51, %s7438_s3  ;;  %v7041_v55 = vpack.i.bf16 %v261_v51, %v7647_v48  ;;  %v7098_v51 = vld [vmem:[%s11522_s5 + $0xb8] sm:$0xff]   ;;  %v792_v53 = vld [vmem:[%s11523_s7 + $0x20] sm:$0xff] }
 0x11a   :  { %6956 = vmatprep.subr.bf16.mxu0 %v7436_v22 }
 0x11c   :  { %v265_v56 = vpop.f32.mrb[12].mxu0  ;;  %6957 = vmatpush3.bf16.msra.mxu0 %v7097_v50 }
 0x11d   :  { %7042 = vrot.lane.b32.xlu1 %v7041_v55, %s7439_s29  ;;  %v266_v57 = vadd.f32 %v265_v56, %v88_v54  ;;  %v267_v58 = vpop.f32.mrb[13].mxu0  ;;  %6958 = vmatprep.subr.bf16.mxu0 %v7436_v22  ;;  %v6339_v54 = vcombine.low %v788_v52, %v792_v53  ;;  %v6340_v55 = vcombine.high %v788_v52, %v792_v53  ;;  %v789_v56 = vld [vmem:[%s11523_s7 + $0x8] sm:$0xff]  ;;  %v790_v52 = vld [vmem:[%s11523_s7 + $0x10] sm:$0xff] }
 0x11e   :  { %v268_v59 = vpop.f32.mrb[14].mxu0  ;;  %v794_v53 = vld [vmem:[%s11523_s7 + $0x30] sm:$0xff] }
 0x11f   :  { %v269_v61 = vpop.f32.mrb[15].mxu0 }
 0x120   :  { %6959 = vmatpush3.bf16.msra.mxu0 %v7098_v51 }
 0x121   :  { %300 = vrot.lane.b32.xlu1 %v266_v57, %s7439_s29  ;;  %v793_v57 = vld [vmem:[%s11523_s7 + $0x28] sm:$0xff] }
 0x122   :  { %v6341_v58 = vcombine.low %v789_v56, %v793_v57  ;;  %v6342_v59 = vcombine.high %v789_v56, %v793_v57  ;;  %v791_v56 = vld [vmem:[%s11523_s7 + $0x18] sm:$0xff] }
 0x123   :  { %v795_v57 = vld [vmem:[%s11523_s7 + $0x38] sm:$0xff] }
 0x124   :  { %1092 = vmatprep.subr.bf16.mxu0 %v6342_v59  ;;  %v6345_v59 = vcombine.low %v791_v56, %v795_v57 }
 0x183   :  { %v7028_v4 = vpop.permute.xlu0 %7027 }
 0x184   :  { %v7030_v6 = vunpack.i.h.bf16 %v7028_v4  ;;  %v7029_v7 = vunpack.i.l.bf16 %v7028_v4 }
 0x186   :  { %v309_v12 = vsel %vm307_vm2, %v245_v37, %v7030_v6  ;;  %v308_v13 = vsel %vm307_vm2, %v242_v8, %v7029_v7  ;;  %v7084_v37 = vld [vmem:[%s11522_s5 + $0x18] sm:$0xff]   ;;  %v796_v6 = vld [vmem:[%s11523_s7 + $0x40] sm:$0xff] }
 0x187   :  { %v7033_v9 = vpop.permute.xlu0 %7032  ;;  %v800_v7 = vld [vmem:[%s11523_s7 + $0x60] sm:$0xff] }
 0x188   :  { %v7035_v10 = vunpack.i.h.bf16 %v7033_v9  ;;  %v7034_v11 = vunpack.i.l.bf16 %v7033_v9 }
 0x18a   :  { %v313_v14 = vsel %vm194_vm0, %v308_v13, %v7034_v11  ;;  %v314_v15 = vsel %vm194_vm0, %v309_v12, %v7035_v10  ;;  %v6348_v11 = vcombine.high %v796_v6, %v800_v7 }
 0x18b   :  { %v318_v17 = vpack.c.bf16 %v314_v15, %v313_v14  ;;  %v7038_v18 = vpop.permute.xlu1 %7037  ;;  %v285_v35 = vpop.permute.xlu0 %284 }
 0x18c   :  { %v7040_v20 = vunpack.i.h.bf16 %v7038_v18  ;;  %v7039_v21 = vunpack.i.l.bf16 %v7038_v18  ;;  %v6347_v18 = vcombine.low %v796_v6, %v800_v7 }
 0x18d   :  { %6933 = vmatmul.mubr.msk.bf16.vlgmr.msra.gmra.mrb[0].mxu1 %vm376_vm3, %v318_v17 }
 0x18e   :  { %6936 = vmatprep.mubr.msk.bf16.mxu1 %vm7437_vm1, %v7436_v22  ;;  %6854 = vmatpush3.bf16.msra.mxu1 %v7076_v16  ;;  %v311_v28 = vsel %vm307_vm2, %v7636_v41, %v7040_v20  ;;  %v310_v29 = vsel %vm307_vm2, %v7634_v38, %v7039_v21  ;;  %v312_v38 = vsel %vm307_vm2, %v7647_v48, %v285_v35  ;;  %v7087_v41 = vld [vmem:[%s11522_s5 + $0x20] sm:$0xff]   ;;  %v7095_v48 = vld [vmem:[%s11522_s5 + $0x78] sm:$0xff]  }
 0x18f   :  { %v7043_v24 = vpop.permute.xlu1 %7042  ;;  %6855 = vmatprep.subr.bf16.mxu1 %v7077_v19 }
 0x190   :  { %v7045_v26 = vunpack.i.h.bf16 %v7043_v24  ;;  %v7044_v27 = vunpack.i.l.bf16 %v7043_v24 }
 0x192   :  { %v315_v30 = vsel %vm194_vm0, %v310_v29, %v7044_v27  ;;  %v316_v31 = vsel %vm194_vm0, %v311_v28, %v7045_v26  ;;  %6856 = vmatpush3.bf16.msra.mxu1 %v7078_v23 }
 0x193   :  { %v319_v33 = vpack.c.bf16 %v316_v31, %v315_v30  ;;  %6857 = vmatprep.subr.bf16.mxu1 %v7080_v25  ;;  %v301_v36 = vpop.permute.xlu1 %300 }
 0x194   :  { %v317_v40 = vsel %vm194_vm0, %v312_v38, %v301_v36 }
 0x195   :  { %6937 = vmatmul.mubr.msk.bf16.gmra.mrb[4].mxu1 %vm376_vm3, %v319_v33  ;;  %v320_v42 = vpack.c.bf16 %v317_v40, %v317_v40  ;;  %v797_v33 = vld [vmem:[%s11523_s7 + $0x48] sm:$0xff] }
 0x196   :  { %6940 = vmatprep.mubr.msk.bf16.mxu1 %vm7437_vm1, %v7436_v22  ;;  %6858 = vmatpush3.bf16.msra.mxu1 %v7081_v32  ;;  %v11534_v32 = vmov 0.0|0.0   ;;  %v805_v40 = vld [vmem:[%s11523_s7 + $0x88] sm:$0xff] }
 0x197   :  { %6859 = vmatprep.subr.bf16.mxu1 %v7083_v34  ;;  %v801_v34 = vld [vmem:[%s11523_s7 + $0x68] sm:$0xff] }
 0x198   :  { %v6350_v35 = vcombine.high %v797_v33, %v801_v34  ;;  %v6349_v36 = vcombine.low %v797_v33, %v801_v34 }
 0x19a   :  { %6860 = vmatpush3.bf16.msra.mxu1 %v7084_v37  ;;  %v808_v37 = vld [vmem:[%s11523_s7 + $0xa0] sm:$0xff] }
 0x19b   :  { %6861 = vmatprep.subr.bf16.mxu1 %v7086_v39 }
 0x19d   :  { %6941 = vmatmul.mubr.msk.bf16.gmra.mrb[8].mxu1 %vm376_vm3, %v320_v42 }
 0x19e   :  { %6862 = vmatpush3.bf16.msra.mxu1 %v7087_v41  ;;  %v809_v41 = vld [vmem:[%s11523_s7 + $0xa8] sm:$0xff] }
 0x19f   :  { %6863 = vmatprep.subr.bf16.mxu1 %v7089_v43  ;;  %v6358_v42 = vcombine.high %v805_v40, %v809_v41  ;;  %v6357_v43 = vcombine.low %v805_v40, %v809_v41 }
 0x1a2   :  { %6864 = vmatpush3.bf16.msra.mxu1 %v7090_v44  ;;  %v812_v44 = vld [vmem:[%s11523_s7 + $0xc0] sm:$0xff] }
 0x1a3   :  { %6865 = vmatprep.subr.bf16.mxu1 %v7092_v45  ;;  %v816_v45 = vld [vmem:[%s11523_s7 + $0xe0] sm:$0xff] }
 0x1a4   :  { %v6364_v47 = vcombine.high %v812_v44, %v816_v45 }
 0x1a6   :  { %6866 = vmatpush3.bf16.msra.mxu1 %v7093_v46  ;;  %v813_v46 = vld [vmem:[%s11523_s7 + $0xc8] sm:$0xff] }
 0x1a7   :  { %6867 = vmatprep.subr.bf16.mxu1 %v7095_v48  ;;  %v817_v48 = vld [vmem:[%s11523_s7 + $0xe8] sm:$0xff] }
 0x1a8   :  { %v6365_v50 = vcombine.low %v813_v46, %v817_v48  ;;  %v6366_v51 = vcombine.high %v813_v46, %v817_v48 }
 0x1aa   :  { %6868 = vmatpush3.bf16.msra.mxu1 %v7096_v49  ;;  %v6363_v49 = vcombine.low %v812_v44, %v816_v45  ;;  %v811_v44 = vld [vmem:[%s11523_s7 + $0xb8] sm:$0xff] }
 0x1ab   :  { %1031 = vmatprep.subr.bf16.mxu1 %v6340_v55  ;;  %v6344_v55 = vcombine.high %v790_v52, %v794_v53 }
 0x260   :  { %v420_v61 = vpop.f32.mrb[0].mxu1 }
 0x261   :  { %v421_v62 = vadd.f32 %v6304_v60, %v420_v61  ;;  %v6934_v63 = vpop.f32.mrb[1].mxu1 }
 0x262   :  { %v423_v1 = vpop.f32.mrb[2].mxu1 }
 0x263   :  { %v424_v2 = vadd.f32 %v6304_v60, %v423_v1  ;;  %v6935_v3 = vpop.f32.mrb[3].mxu1  ;;  %v442_v4 = vmax.f32 %v421_v62, 0.0  ;;  %v7832_v62 = vld [vmem:[%s11525_s6] ss:$0 sm:$0xff] }
 0x265   :  { %v443_v5 = vmax.f32 %v424_v2, 0.0  ;;  %v461_v9 = vpack.c.bf16 %v442_v4, %v7436_v22 }
 0x267   :  { %v462_v8 = vpack.c.bf16 %v443_v5, %v442_v4 }
 0x268   :  { %v428_v10 = vpop.f32.mrb[4].mxu1 }
 0x269   :  { %v429_v12 = vadd.f32 %v6304_v60, %v428_v10  ;;  %v6938_v13 = vpop.f32.mrb[5].mxu1  ;;  %700 = vmatprep.mubr.bf16.mxu1 %v462_v8 }
 0x26a   :  { %v431_v14 = vpop.f32.mrb[6].mxu1  ;;  %701 = vmatmul.mubr.bf16.vlgmr.msra.gmra.mrb[12].mxu1 %v461_v9 }
 0x26b   :  { %v444_v15 = vmax.f32 %v429_v12, 0.0  ;;  %v432_v16 = vadd.f32 %v6304_v60, %v431_v14  ;;  %v6939_v17 = vpop.f32.mrb[7].mxu1  ;;  %1032 = vmatpush1.bf16.msra.mxu1 %v6339_v54  ;;  %v6343_v54 = vcombine.low %v790_v52, %v794_v53  ;;  %v798_v14 = vld [vmem:[%s11523_s7 + $0x50] sm:$0xff]  ;;  %v815_v53 = vld [vmem:[%s11523_s7 + $0xd8] sm:$0xff] }
 0x26c   :  { %1033 = vmatprep.subr.bf16.mxu1 %v6348_v11 }
 0x26d   :  { %v463_v19 = vpack.c.bf16 %v444_v15, %v443_v5  ;;  %v445_v20 = vmax.f32 %v432_v16, 0.0 }
 0x26f   :  { %6961 = vmatmul.mubr.bf16.vlgmr.msra.gmra.mrb[16].mxu0 %v463_v19  ;;  %v464_v21 = vpack.c.bf16 %v445_v20, %v444_v15  ;;  %1034 = vmatpush1.bf16.msra.mxu1 %v6347_v18  ;;  %v466_v31 = vpack.c.bf16 %v445_v20, %v445_v20  ;;  %v802_v15 = vld [vmem:[%s11523_s7 + $0x70] sm:$0xff] }
 0x270   :  { %v436_v23 = vpop.f32.mrb[8].mxu1  ;;  %6964 = vmatprep.mubr.msk.bf16.mxu0 %vm7437_vm1, %v7436_v22  ;;  %1093 = vmatpush1.bf16.msra.mxu0 %v6341_v58  ;;  %v6346_v58 = vcombine.high %v791_v56, %v795_v57 }
 0x271   :  { %v437_v24 = vadd.f32 %v6304_v60, %v436_v23  ;;  %v6942_v25 = vpop.f32.mrb[9].mxu1  ;;  %708 = vmatprep.mubr.bf16.mxu1 %v464_v21  ;;  %1094 = vmatprep.subr.bf16.mxu0 %v6350_v35  ;;  %v799_v21 = vld [vmem:[%s11523_s7 + $0x58] sm:$0xff] }
 0x272   :  { %v439_v26 = vpop.f32.mrb[10].mxu1  ;;  %709 = vmatmul.mubr.bf16.gmra.mrb[16].mxu1 %v463_v19  ;;  %v803_v23 = vld [vmem:[%s11523_s7 + $0x78] sm:$0xff] }
 0x273   :  { %v446_v27 = vmax.f32 %v437_v24, 0.0  ;;  %v6943_v28 = vpop.f32.mrb[11].mxu1  ;;  %v6354_v35 = vcombine.high %v799_v21, %v803_v23 }
 0x274   :  { %1095 = vmatpush1.bf16.msra.mxu0 %v6349_v36 }
 0x275   :  { %v465_v29 = vpack.c.bf16 %v446_v27, %v445_v20  ;;  %v467_v30 = vpack.c.bf16 %v446_v27, %v446_v27  ;;  %1096 = vmatprep.subr.bf16.mxu0 %v6358_v42  ;;  %v6352_v27 = vcombine.high %v798_v14, %v802_v15  ;;  %v6353_v42 = vcombine.low %v799_v21, %v803_v23  ;;  %v1292_v21 = vld [vmem:[%s11526_s8 + $0x80] sm:$0xff] }
 0x276   :  { %v1296_v23 = vld [vmem:[%s11526_s8 + $0xa0] sm:$0xff] }
 0x277   :  { %716 = vmatprep.mubr.bf16.mxu1 %v467_v30  ;;  %6965 = vmatmul.mubr.bf16.gmra.mrb[20].mxu0 %v465_v29  ;;  %v806_v29 = vld [vmem:[%s11523_s7 + $0x90] sm:$0xff] }
 0x278   :  { %6968 = vmatprep.mubr.msk.bf16.mxu0 %vm7437_vm1, %v7436_v22  ;;  %v804_v22 = vld [vmem:[%s11523_s7 + $0x80] sm:$0xff]  ;;  %1097 = vmatpush1.bf16.msra.mxu0 %v6357_v43  ;;  %v810_v30 = vld [vmem:[%s11523_s7 + $0xb0] sm:$0xff]  ;;  %v807_v43 = vld [vmem:[%s11523_s7 + $0x98] sm:$0xff] }
 0x279   :  { %v6355_v38 = vcombine.low %v804_v22, %v808_v37  ;;  %v6356_v39 = vcombine.high %v804_v22, %v808_v37  ;;  %1098 = vmatprep.subr.bf16.mxu0 %v6366_v51  ;;  %v6351_v22 = vcombine.low %v798_v14, %v802_v15  ;;  %v6360_v40 = vcombine.high %v806_v29, %v810_v30  ;;  %v1288_v14 = vld [vmem:[%s11526_s8 + $0x60] sm:$0xff]  ;;  %v1285_v15 = vld [vmem:[%s11526_s8 + $0x48] sm:$0xff] }
 0x27a   :  { %717 = vmatmul.mubr.bf16.gmra.mrb[20].mxu1 %v466_v31  ;;  %v6359_v52 = vcombine.low %v806_v29, %v810_v30  ;;  %v6362_v57 = vcombine.high %v807_v43, %v811_v44  ;;  %v7961_v29 = vcombine.high %v1292_v21, %v1296_v23 }
 0x27b   :  { %1063 = vmatprep.mubr.bf16.mxu1 %v7435_v0  ;;  %1035 = vmatprep.subr.bf16.mxu1 %v6356_v39 }
 0x27c   :  { %1036 = vmatpush1.bf16.msra.mxu1 %v6355_v38  ;;  %1099 = vmatpush1.bf16.msra.mxu0 %v6365_v50  ;;  %v818_v50 = vld [vmem:[%s11523_s7 + $0xf0] sm:$0xff]  ;;  %12120 = vst [vmem:[#allocation11_spill] sm:$0xff] %v7961_v29 }
 0x27d   :  { %1037 = vmatprep.subr.bf16.mxu1 %v6364_v47  ;;  %1214 = vmatprep.subr.bf16.mxu0 %v6346_v58 }
 0x27f   :  { %6969 = vmatmul.mubr.bf16.gmra.mrb[24].mxu0 %v11534_v32 }
 0x280   :  { %1124 = vmatprep.mubr.bf16.mxu0 %v7435_v0  ;;  %1038 = vmatpush1.bf16.msra.mxu1 %v6363_v49  ;;  %v814_v49 = vld [vmem:[%s11523_s7 + $0xd0] sm:$0xff] }
 0x281   :  { %1153 = vmatprep.subr.bf16.mxu1 %v6344_v55 }
 0x33d   :  { %v6869_v60 = vpop.f32.mrb[12].mxu1 }
 0x33e   :  { %v6870_v61 = vpop.f32.mrb[13].mxu1 }
 0x33f   :  { %v6871_v63 = vadd.f32 %v6870_v61, %v6869_v60  ;;  %v6872_v1 = vpop.f32.mrb[14].mxu1  ;;  %v6368_v60 = vcombine.high %v814_v49, %v818_v50  ;;  %v1276_v61 = vld [vmem:[%s11526_s8] sm:$0xff] }
 0x340   :  { %v6873_v2 = vpop.f32.mrb[15].mxu1 }
 0x341   :  { %v6874_v3 = vadd.f32 %v6873_v2, %v6872_v1  ;;  %v703_v4 = vadd.f32 %v6871_v63, %v7832_v62  ;;  %v1280_v63 = vld [vmem:[%s11526_s8 + $0x20] sm:$0xff] }
 0x342   :  { %v758_v5 = vpop.f32.mrb[16].mxu0 }
 0x343   :  { %v759_v6 = vadd.f32 %v758_v5, %v703_v4  ;;  %v6962_v7 = vpop.f32.mrb[17].mxu0  ;;  %v706_v8 = vadd.f32 %v6874_v3, %v7832_v62  ;;  %v6367_v4 = vcombine.low %v814_v49, %v818_v50  ;;  %v1321_v49 = vld [vmem:[%s11526_s8 + $0x168] sm:$0xff] }
 0x344   :  { %v761_v9 = vpop.f32.mrb[18].mxu0  ;;  %v7897_v7 = vcombine.high %v1276_v61, %v1280_v63 }
 0x345   :  { %v762_v10 = vadd.f32 %v761_v9, %v706_v8  ;;  %v6875_v11 = vpop.f32.mrb[16].mxu1  ;;  %v6963_v12 = vpop.f32.mrb[19].mxu0  ;;  %v780_v16 = vmax.f32 %v759_v6, 0.0  ;;  %v1277_v9 = vld [vmem:[%s11526_s8 + $0x8] sm:$0xff] }
 0x346   :  { %v6876_v13 = vpop.f32.mrb[17].mxu1  ;;  %12112 = vst [vmem:[#allocation3_spill] sm:$0xff] %v7897_v7 }
 0x347   :  { %v781_v17 = vmax.f32 %v762_v10, 0.0  ;;  %v6877_v18 = vadd.f32 %v6876_v13, %v6875_v11  ;;  %v6878_v19 = vpop.f32.mrb[18].mxu1  ;;  %v1281_v10 = vld [vmem:[%s11526_s8 + $0x28] sm:$0xff]  ;;  %v1284_v13 = vld [vmem:[%s11526_s8 + $0x40] sm:$0xff] }
 0x348   :  { %v6879_v20 = vpop.f32.mrb[19].mxu1  ;;  %v7908_v12 = vcombine.high %v1277_v9, %v1281_v10 }
 0x349   :  { %v7848_v24 = vpack.c.bf16 %v781_v17, %v780_v16  ;;  %v6880_v25 = vadd.f32 %v6879_v20, %v6878_v19  ;;  %v711_v26 = vadd.f32 %v6877_v18, %v7832_v62  ;;  %v1289_v16 = vld [vmem:[%s11526_s8 + $0x68] sm:$0xff]  ;;  %v7929_v17 = vcombine.low %v1276_v61, %v1280_v63  ;;  %v1332_v61 = vld [vmem:[%s11526_s8 + $0x1c0] sm:$0xff] }
 0x34a   :  { %v766_v28 = vpop.f32.mrb[20].mxu0  ;;  %12113 = vst [vmem:[#allocation4_spill] sm:$0xff] %v7908_v12  ;;  %v7931_v18 = vcombine.low %v1277_v9, %v1281_v10  ;;  %v7933_v19 = vcombine.high %v1284_v13, %v1288_v14  ;;  %v7935_v20 = vcombine.high %v1285_v15, %v1289_v16  ;;  %v1336_v63 = vld [vmem:[%s11526_s8 + $0x1e0] sm:$0xff]  ;;  %v1341_v9 = vld [vmem:[%s11526_s8 + $0x208] sm:$0xff] }
 0x34b   :  { %v767_v31 = vadd.f32 %v766_v28, %v711_v26  ;;  %v6966_v33 = vpop.f32.mrb[21].mxu0  ;;  %6371 = vmatmul.mubr.msk.bf16.vlgmr.msra.gmra.mrb[24].mxu1 %vm194_vm0, %v7848_v24  ;;  %6374 = vmatmul.mubr.msk.bf16.vlgmr.msra.gmra.mrb[28].mxu0 %vm194_vm0, %v7848_v24  ;;  %v714_v34 = vadd.f32 %v6880_v25, %v7832_v62  ;;  %12114 = vst [vmem:[#allocation5_spill] sm:$0xff] %v7929_v17  ;;  %v1293_v25 = vld [vmem:[%s11526_s8 + $0x88] sm:$0xff] }
 0x34c   :  { %1154 = vmatpush1.bf16.msra.mxu1 %v6343_v54  ;;  %v769_v36 = vpop.f32.mrb[22].mxu0  ;;  %1073 = vmatprep.mubr.bf16.mxu1 %v7435_v0  ;;  %v819_v54 = vld [vmem:[%s11523_s7 + $0xf8] sm:$0xff]  ;;  %12115 = vst [vmem:[#allocation6_spill] sm:$0xff] %v7931_v18  ;;  %12116 = vst [vmem:[#allocation7_spill] sm:$0xff] %v7933_v19  ;;  %v1297_v26 = vld [vmem:[%s11526_s8 + $0xa8] sm:$0xff]  ;;  %v7957_v28 = vcombine.low %v1285_v15, %v1289_v16 }
 0x34d   :  { %v770_v37 = vadd.f32 %v769_v36, %v714_v34  ;;  %v6881_v38 = vpop.f32.mrb[20].mxu1  ;;  %v6967_v39 = vpop.f32.mrb[23].mxu0  ;;  %1155 = vmatprep.subr.bf16.mxu1 %v6352_v27  ;;  %1134 = vmatprep.mubr.bf16.mxu0 %v7435_v0  ;;  %v782_v45 = vmax.f32 %v767_v31, 0.0  ;;  %v6369_v8 = vcombine.low %v815_v53, %v819_v54  ;;  %12117 = vst [vmem:[#allocation8_spill] sm:$0xff] %v7935_v20  ;;  %v1304_v31 = vld [vmem:[%s11526_s8 + $0xe0] sm:$0xff]  ;;  %v1301_v33 = vld [vmem:[%s11526_s8 + $0xc8] sm:$0xff] }
 0x34e   :  { %v6882_v41 = vpop.f32.mrb[21].mxu1  ;;  %1215 = vmatpush1.bf16.msra.mxu0 %v6345_v59  ;;  %v6361_v59 = vcombine.low %v807_v43, %v811_v44  ;;  %v7955_v27 = vcombine.low %v1284_v13, %v1288_v14  ;;  %12119 = vst [vmem:[#allocation10_spill] sm:$0xff] %v7957_v28  ;;  %v7963_v30 = vcombine.high %v1293_v25, %v1297_v26  ;;  %v1305_v34 = vld [vmem:[%s11526_s8 + $0xe8] sm:$0xff]  ;;  %v1312_v39 = vld [vmem:[%s11526_s8 + $0x120] sm:$0xff] }
 0x34f   :  { %v783_v46 = vmax.f32 %v770_v37, 0.0  ;;  %v6883_v47 = vadd.f32 %v6882_v41, %v6881_v38  ;;  %v6884_v48 = vpop.f32.mrb[22].mxu1  ;;  %1216 = vmatprep.subr.bf16.mxu0 %v6354_v35  ;;  %v7981_v35 = vcombine.low %v1292_v21, %v1296_v23  ;;  %v7983_v36 = vcombine.low %v1293_v25, %v1297_v26  ;;  %v1308_v38 = vld [vmem:[%s11526_s8 + $0x100] sm:$0xff]  ;;  %v1313_v41 = vld [vmem:[%s11526_s8 + $0x128] sm:$0xff] }
 0x350   :  { %v6885_v51 = vpop.f32.mrb[23].mxu1  ;;  %1156 = vmatpush1.bf16.msra.mxu1 %v6351_v22  ;;  %12118 = vst [vmem:[#allocation9_spill] sm:$0xff] %v7955_v27  ;;  %12121 = vst [vmem:[#allocation12_spill] sm:$0xff] %v7963_v30  ;;  %v7989_v37 = vcombine.high %v1301_v33, %v1305_v34  ;;  %v8011_v43 = vcombine.low %v1301_v33, %v1305_v34  ;;  %v8015_v44 = vcombine.high %v1308_v38, %v1312_v39  ;;  %v1317_v48 = vld [vmem:[%s11526_s8 + $0x148] sm:$0xff]  ;;  %v1348_v16 = vld [vmem:[%s11526_s8 + $0x240] sm:$0xff] }
 0x351   :  { %v7882_v55 = vpack.c.bf16 %v783_v46, %v782_v45  ;;  %v719_v56 = vadd.f32 %v6883_v47, %v7832_v62  ;;  %1157 = vmatprep.subr.bf16.mxu1 %v6360_v40  ;;  %v6370_v62 = vcombine.high %v815_v53, %v819_v54  ;;  %12122 = vst [vmem:[#allocation13_spill] sm:$0xff] %v7981_v35  ;;  %12123 = vst [vmem:[#allocation14_spill] sm:$0xff] %v7983_v36  ;;  %v1309_v40 = vld [vmem:[%s11526_s8 + $0x108] sm:$0xff]  ;;  %v1316_v46 = vld [vmem:[%s11526_s8 + $0x140] sm:$0xff] }
 0x352   :  { %v774_v58 = vpop.f32.mrb[24].mxu0  ;;  %1217 = vmatpush1.bf16.msra.mxu0 %v6353_v42  ;;  %12125 = vst [vmem:[#allocation16_spill] sm:$0xff] %v7989_v37  ;;  %12127 = vst [vmem:[#allocation18_spill] sm:$0xff] %v8011_v43  ;;  %v8017_v45 = vcombine.high %v1309_v40, %v1313_v41  ;;  %v1320_v47 = vld [vmem:[%s11526_s8 + $0x160] sm:$0xff]  ;;  %v8035_v50 = vcombine.low %v1308_v38, %v1312_v39  ;;  %v8037_v51 = vcombine.low %v1309_v40, %v1313_v41  ;;  %v1345_v10 = vld [vmem:[%s11526_s8 + $0x228] sm:$0xff] }
 0x353   :  { %v775_v1 = vadd.f32 %v774_v58, %v719_v56  ;;  %v6970_v2 = vpop.f32.mrb[25].mxu0  ;;  %6372 = vmatmul.mubr.msk.bf16.gmra.mrb[28].mxu1 %vm194_vm0, %v7882_v55  ;;  %6375 = vmatmul.mubr.msk.bf16.gmra.mrb[32].mxu0 %vm194_vm0, %v7882_v55  ;;  %12128 = vst [vmem:[#allocation19_spill] sm:$0xff] %v8015_v44  ;;  %v1324_v53 = vld [vmem:[%s11526_s8 + $0x180] sm:$0xff]  ;;  %v1329_v56 = vld [vmem:[%s11526_s8 + $0x1a8] sm:$0xff]  ;;  %v8065_v58 = vcombine.low %v1317_v48, %v1321_v49 }
 0x354   :  { %v777_v3 = vpop.f32.mrb[26].mxu0  ;;  %1158 = vmatpush1.bf16.msra.mxu1 %v6359_v52  ;;  %1083 = vmatprep.mubr.bf16.mxu1 %v7435_v0  ;;  %12129 = vst [vmem:[#allocation20_spill] sm:$0xff] %v8017_v45  ;;  %12130 = vst [vmem:[#allocation21_spill] sm:$0xff] %v8035_v50  ;;  %v8043_v52 = vcombine.high %v1317_v48, %v1321_v49  ;;  %v1328_v54 = vld [vmem:[%s11526_s8 + $0x1a0] sm:$0xff]  ;;  %v1337_v2 = vld [vmem:[%s11526_s8 + $0x1e8] sm:$0xff]  ;;  %v8121_v15 = vcombine.high %v1341_v9, %v1345_v10 }
 0x355   :  { %v784_v5 = vmax.f32 %v775_v1, 0.0  ;;  %v6971_v6 = vpop.f32.mrb[27].mxu0  ;;  %1144 = vmatprep.mubr.bf16.mxu0 %v7435_v0  ;;  %1218 = vmatprep.subr.bf16.mxu0 %v6362_v57  ;;  %12131 = vst [vmem:[#allocation22_spill] sm:$0xff] %v8037_v51  ;;  %v8063_v57 = vcombine.low %v1316_v46, %v1320_v47  ;;  %12135 = vst [vmem:[#allocation26_spill] sm:$0xff] %v8065_v58  ;;  %v1333_v1 = vld [vmem:[%s11526_s8 + $0x1c8] sm:$0xff]  ;;  %v1352_v21 = vld [vmem:[%s11526_s8 + $0x260] sm:$0xff] }
 0x356   :  { %1219 = vmatpush1.bf16.msra.mxu0 %v6361_v59  ;;  %1159 = vmatprep.subr.bf16.mxu1 %v6368_v60  ;;  %12133 = vst [vmem:[#allocation24_spill] sm:$0xff] %v8043_v52  ;;  %v8069_v59 = vcombine.high %v1324_v53, %v1328_v54  ;;  %v1340_v6 = vld [vmem:[%s11526_s8 + $0x200] sm:$0xff]  ;;  %v8115_v13 = vcombine.low %v1333_v1, %v1337_v2  ;;  %12145 = vst [vmem:[#allocation36_spill] sm:$0xff] %v8121_v15  ;;  %v1349_v23 = vld [vmem:[%s11526_s8 + $0x248] sm:$0xff] }
 0x357   :  { %1220 = vmatprep.subr.bf16.mxu0 %v6370_v62  ;;  %v7905_v11 = vpack.c.bf16 %v784_v5, %v784_v5  ;;  %12134 = vst [vmem:[#allocation25_spill] sm:$0xff] %v8063_v57  ;;  %v8089_v62 = vcombine.low %v1324_v53, %v1328_v54  ;;  %v8097_v5 = vcombine.high %v1333_v1, %v1337_v2  ;;  %v1353_v25 = vld [vmem:[%s11526_s8 + $0x268] sm:$0xff]  ;;  %v1356_v34 = vld [vmem:[%s11526_s8 + $0x280] sm:$0xff] }
 0x358   :  { %1160 = vmatpush1.bf16.msra.mxu1 %v6367_v4  ;;  %12136 = vst [vmem:[#allocation27_spill] sm:$0xff] %v8069_v59  ;;  %v8095_v4 = vcombine.high %v1332_v61, %v1336_v63  ;;  %12143 = vst [vmem:[#allocation34_spill] sm:$0xff] %v8115_v13  ;;  %v8145_v33 = vcombine.high %v1349_v23, %v1353_v25  ;;  %v1360_v38 = vld [vmem:[%s11526_s8 + $0x2a0] sm:$0xff]  ;;  %v1357_v39 = vld [vmem:[%s11526_s8 + $0x288] sm:$0xff]  ;;  %v8161_v41 = vcombine.low %v1348_v16, %v1352_v21 }
 0x359   :  { %2044 = vmatprep.subr.bf16.mxu1 %v7897_v7  ;;  %12138 = vst [vmem:[#allocation29_spill] sm:$0xff] %v8089_v62  ;;  %12141 = vst [vmem:[#allocation32_spill] sm:$0xff] %v8097_v5  ;;  %v1361_v40 = vld [vmem:[%s11526_s8 + $0x2a8] sm:$0xff]  ;;  %v1364_v49 = vld [vmem:[%s11526_s8 + $0x2c0] sm:$0xff] }
 0x35a   :  { %1221 = vmatpush1.bf16.msra.mxu0 %v6369_v8  ;;  %12140 = vst [vmem:[#allocation31_spill] sm:$0xff] %v8095_v4  ;;  %v1344_v8 = vld [vmem:[%s11526_s8 + $0x220] sm:$0xff]  ;;  %12149 = vst [vmem:[#allocation40_spill] sm:$0xff] %v8145_v33  ;;  %v8169_v48 = vcombine.high %v1357_v39, %v1361_v40  ;;  %v1365_v54 = vld [vmem:[%s11526_s8 + $0x2c8] sm:$0xff] }
 0x35b   :  { %6373 = vmatmul.mubr.msk.bf16.gmra.mrb[32].mxu1 %vm194_vm0, %v7905_v11  ;;  %6376 = vmatmul.mubr.msk.bf16.gmra.mrb[36].mxu0 %vm194_vm0, %v7905_v11  ;;  %v8119_v14 = vcombine.high %v1340_v6, %v1344_v8  ;;  %v8137_v26 = vcombine.low %v1340_v6, %v1344_v8  ;;  %12150 = vst [vmem:[#allocation41_spill] sm:$0xff] %v8161_v41  ;;  %v1368_v53 = vld [vmem:[%s11526_s8 + $0x2e0] sm:$0xff]  ;;  %v1373_v8 = vld [vmem:[%s11526_s8 + $0x308] sm:$0xff] }
 0x35c   :  { %1185 = vmatprep.mubr.bf16.mxu1 %v7435_v0  ;;  %1246 = vmatprep.mubr.bf16.mxu0 %v7435_v0  ;;  %12153 = vst [vmem:[#allocation44_spill] sm:$0xff] %v8169_v48  ;;  %v1372_v2 = vld [vmem:[%s11526_s8 + $0x300] sm:$0xff] }
 0x35d   :  { %2085 = vmatprep.subr.bf16.mxu0 %v7908_v12  ;;  %12144 = vst [vmem:[#allocation35_spill] sm:$0xff] %v8119_v14  ;;  %12146 = vst [vmem:[#allocation37_spill] sm:$0xff] %v8137_v26  ;;  %v1376_v6 = vld [vmem:[%s11526_s8 + $0x320] sm:$0xff] }
 0x363   :  { %6377 = vmatmul.mubr.msk.bf16.vlgmr.msra.gmra.mrb[36].mxu1 %vm194_vm0, %v7848_v24  ;;  %6380 = vmatmul.mubr.msk.bf16.vlgmr.msra.gmra.mrb[40].mxu0 %vm194_vm0, %v7848_v24  ;;  %v1300_v24 = vld [vmem:[%s11526_s8 + $0xc0] sm:$0xff] }
 0x364   :  { %2045 = vmatpush1.bf16.msra.mxu1 %v7929_v17  ;;  %2086 = vmatpush1.bf16.msra.mxu0 %v7931_v18  ;;  %v7987_v22 = vcombine.high %v1300_v24, %v1304_v31  ;;  %v8009_v42 = vcombine.low %v1300_v24, %v1304_v31  ;;  %v8139_v24 = vcombine.low %v1341_v9, %v1345_v10  ;;  %v1377_v9 = vld [vmem:[%s11526_s8 + $0x328] sm:$0xff] }
 0x365   :  { %2046 = vmatprep.subr.bf16.mxu1 %v7933_v19  ;;  %2087 = vmatprep.subr.bf16.mxu0 %v7935_v20  ;;  %v8143_v31 = vcombine.high %v1348_v16, %v1352_v21  ;;  %v8209_v10 = vcombine.low %v1364_v49, %v1368_v53  ;;  %v8215_v21 = vcombine.high %v1372_v2, %v1376_v6 }
 0x366   :  { %1195 = vmatprep.mubr.bf16.mxu1 %v7435_v0  ;;  %1256 = vmatprep.mubr.bf16.mxu0 %v7435_v0  ;;  %12124 = vst [vmem:[#allocation15_spill] sm:$0xff] %v7987_v22  ;;  %12126 = vst [vmem:[#allocation17_spill] sm:$0xff] %v8009_v42 }
 0x367   :  { %12147 = vst [vmem:[#allocation38_spill] sm:$0xff] %v8139_v24  ;;  %12148 = vst [vmem:[#allocation39_spill] sm:$0xff] %v8143_v31 }
 0x368   :  { %2047 = vmatpush1.bf16.msra.mxu1 %v7955_v27  ;;  %2088 = vmatpush1.bf16.msra.mxu0 %v7957_v28  ;;  %12158 = vst [vmem:[#allocation49_spill] sm:$0xff] %v8209_v10  ;;  %12160 = vst [vmem:[#allocation51_spill] sm:$0xff] %v8215_v21 }
 0x369   :  { %2048 = vmatprep.subr.bf16.mxu1 %v7961_v29  ;;  %2089 = vmatprep.subr.bf16.mxu0 %v7963_v30 }
 0x36b   :  { %6378 = vmatmul.mubr.msk.bf16.gmra.mrb[40].mxu1 %vm194_vm0, %v7882_v55  ;;  %6381 = vmatmul.mubr.msk.bf16.gmra.mrb[44].mxu0 %vm194_vm0, %v7882_v55  ;;  %v1325_v55 = vld [vmem:[%s11526_s8 + $0x188] sm:$0xff] }
 0x36c   :  { %2049 = vmatpush1.bf16.msra.mxu1 %v7981_v35  ;;  %2090 = vmatpush1.bf16.msra.mxu0 %v7983_v36  ;;  %v8071_v60 = vcombine.high %v1325_v55, %v1329_v56  ;;  %v8091_v3 = vcombine.low %v1325_v55, %v1329_v56  ;;  %v1369_v55 = vld [vmem:[%s11526_s8 + $0x2e8] sm:$0xff]  ;;  %v8185_v56 = vcombine.low %v1356_v34, %v1360_v38 }
 0x36d   :  { %2050 = vmatprep.subr.bf16.mxu1 %v7987_v22  ;;  %2091 = vmatprep.subr.bf16.mxu0 %v7989_v37  ;;  %v8193_v1 = vcombine.high %v1365_v54, %v1369_v55  ;;  %v8211_v16 = vcombine.low %v1365_v54, %v1369_v55  ;;  %v1388_v55 = vld [vmem:[%s11526_s8 + $0x380] sm:$0xff] }
 0x36e   :  { %1205 = vmatprep.mubr.bf16.mxu1 %v7435_v0  ;;  %1266 = vmatprep.mubr.bf16.mxu0 %v7435_v0  ;;  %v8041_v0 = vcombine.high %v1316_v46, %v1320_v47  ;;  %12137 = vst [vmem:[#allocation28_spill] sm:$0xff] %v8071_v60  ;;  %12139 = vst [vmem:[#allocation30_spill] sm:$0xff] %v8091_v3  ;;  %v8163_v46 = vcombine.low %v1349_v23, %v1353_v25  ;;  %v1380_v25 = vld [vmem:[%s11526_s8 + $0x340] sm:$0xff] }
 0x36f   :  { %v8167_v47 = vcombine.high %v1356_v34, %v1360_v38  ;;  %12154 = vst [vmem:[#allocation45_spill] sm:$0xff] %v8185_v56  ;;  %12157 = vst [vmem:[#allocation48_spill] sm:$0xff] %v8193_v1  ;;  %v8217_v23 = vcombine.high %v1373_v8, %v1377_v9  ;;  %v1384_v34 = vld [vmem:[%s11526_s8 + $0x360] sm:$0xff]  ;;  %v1381_v38 = vld [vmem:[%s11526_s8 + $0x348] sm:$0xff] }
 0x370   :  { %2051 = vmatpush1.bf16.msra.mxu1 %v8009_v42  ;;  %2092 = vmatpush1.bf16.msra.mxu0 %v8011_v43  ;;  %12132 = vst [vmem:[#allocation23_spill] sm:$0xff] %v8041_v0  ;;  %12151 = vst [vmem:[#allocation42_spill] sm:$0xff] %v8163_v46 }
 0x371   :  { %2052 = vmatprep.subr.bf16.mxu1 %v8015_v44  ;;  %2093 = vmatprep.subr.bf16.mxu0 %v8017_v45  ;;  %12152 = vst [vmem:[#allocation43_spill] sm:$0xff] %v8167_v47  ;;  %12159 = vst [vmem:[#allocation50_spill] sm:$0xff] %v8211_v16 }
 0x372   :  { %12161 = vst [vmem:[#allocation52_spill] sm:$0xff] %v8217_v23 }
 0x373   :  { %6379 = vmatmul.mubr.msk.bf16.gmra.mrb[44].mxu1 %vm194_vm0, %v7905_v11  ;;  %6382 = vmatmul.mubr.msk.bf16.gmra.mrb[48].mxu0 %vm194_vm0, %v7905_v11  ;;  %v8113_v11 = vcombine.low %v1332_v61, %v1336_v63  ;;  %v8187_v61 = vcombine.low %v1357_v39, %v1361_v40  ;;  %v8191_v63 = vcombine.high %v1364_v49, %v1368_v53  ;;  %v1385_v39 = vld [vmem:[%s11526_s8 + $0x368] sm:$0xff] }
 0x374   :  { %2053 = vmatpush1.bf16.msra.mxu1 %v8035_v50  ;;  %2094 = vmatpush1.bf16.msra.mxu0 %v8037_v51  ;;  %v8233_v40 = vcombine.low %v1372_v2, %v1376_v6  ;;  %v8235_v49 = vcombine.low %v1373_v8, %v1377_v9  ;;  %v8239_v53 = vcombine.high %v1380_v25, %v1384_v34  ;;  %v1389_v2 = vld [vmem:[%s11526_s8 + $0x388] sm:$0xff] }
 0x375   :  { %2054 = vmatprep.subr.bf16.mxu1 %v8041_v0  ;;  %2095 = vmatprep.subr.bf16.mxu0 %v8043_v52  ;;  %12142 = vst [vmem:[#allocation33_spill] sm:$0xff] %v8113_v11  ;;  %12155 = vst [vmem:[#allocation46_spill] sm:$0xff] %v8187_v61  ;;  %v8241_v54 = vcombine.high %v1381_v38, %v1385_v39  ;;  %v1393_v6 = vld [vmem:[%s11526_s8 + $0x3a8] sm:$0xff]  ;;  %v8257_v8 = vcombine.low %v1380_v25, %v1384_v34 }
 0x376   :  { %2076 = vmatprep.mubr.bf16.mxu1 %v11534_v32  ;;  %2117 = vmatprep.mubr.bf16.mxu0 %v11534_v32  ;;  %12156 = vst [vmem:[#allocation47_spill] sm:$0xff] %v8191_v63  ;;  %12162 = vst [vmem:[#allocation53_spill] sm:$0xff] %v8233_v40  ;;  %v1392_v32 = vld [vmem:[%s11526_s8 + $0x3a0] sm:$0xff]  ;;  %v8259_v9 = vcombine.low %v1381_v38, %v1385_v39  ;;  %v1397_v25 = vld [vmem:[%s11526_s8 + $0x3c8] sm:$0xff]  ;;  %v8283_v39 = vcombine.low %v1389_v2, %v1393_v6 }
 0x377   :  { %12163 = vst [vmem:[#allocation54_spill] sm:$0xff] %v8235_v49  ;;  %12164 = vst [vmem:[#allocation55_spill] sm:$0xff] %v8239_v53  ;;  %v1401_v34 = vld [vmem:[%s11526_s8 + $0x3e8] sm:$0xff]  ;;  %v8281_v38 = vcombine.low %v1388_v55, %v1392_v32 }
 0x378   :  { %2055 = vmatpush1.bf16.msra.mxu1 %v8063_v57  ;;  %2096 = vmatpush1.bf16.msra.mxu0 %v8065_v58  ;;  %12165 = vst [vmem:[#allocation56_spill] sm:$0xff] %v8241_v54  ;;  %12166 = vst [vmem:[#allocation57_spill] sm:$0xff] %v8257_v8 }
 0x379   :  { %2056 = vmatprep.subr.bf16.mxu1 %v8069_v59  ;;  %2097 = vmatprep.subr.bf16.mxu0 %v8071_v60  ;;  %12167 = vst [vmem:[#allocation58_spill] sm:$0xff] %v8259_v9  ;;  %12170 = vst [vmem:[#allocation61_spill] sm:$0xff] %v8281_v38 }
 0x37a   :  { %12171 = vst [vmem:[#allocation62_spill] sm:$0xff] %v8283_v39 }
 0x37c   :  { %2057 = vmatpush1.bf16.msra.mxu1 %v8089_v62  ;;  %2098 = vmatpush1.bf16.msra.mxu0 %v8091_v3 }
 0x37d   :  { %2058 = vmatprep.subr.bf16.mxu1 %v8095_v4  ;;  %2099 = vmatprep.subr.bf16.mxu0 %v8097_v5 }
 0x380   :  { %2059 = vmatpush1.bf16.msra.mxu1 %v8113_v11  ;;  %2100 = vmatpush1.bf16.msra.mxu0 %v8115_v13 }
 0x381   :  { %2060 = vmatprep.subr.bf16.mxu1 %v8119_v14  ;;  %2101 = vmatprep.subr.bf16.mxu0 %v8121_v15 }
 0x384   :  { %2061 = vmatpush1.bf16.msra.mxu1 %v8137_v26  ;;  %2102 = vmatpush1.bf16.msra.mxu0 %v8139_v24 }
 0x385   :  { %2062 = vmatprep.subr.bf16.mxu1 %v8143_v31  ;;  %2103 = vmatprep.subr.bf16.mxu0 %v8145_v33 }
 0x388   :  { %2063 = vmatpush1.bf16.msra.mxu1 %v8161_v41  ;;  %2104 = vmatpush1.bf16.msra.mxu0 %v8163_v46 }
 0x389   :  { %2064 = vmatprep.subr.bf16.mxu1 %v8167_v47  ;;  %2105 = vmatprep.subr.bf16.mxu0 %v8169_v48 }
 0x38c   :  { %2065 = vmatpush1.bf16.msra.mxu1 %v8185_v56  ;;  %2106 = vmatpush1.bf16.msra.mxu0 %v8187_v61 }
 0x38d   :  { %2066 = vmatprep.subr.bf16.mxu1 %v8191_v63  ;;  %2107 = vmatprep.subr.bf16.mxu0 %v8193_v1 }
 0x390   :  { %2067 = vmatpush1.bf16.msra.mxu1 %v8209_v10  ;;  %2108 = vmatpush1.bf16.msra.mxu0 %v8211_v16  ;;  %v1396_v16 = vld [vmem:[%s11526_s8 + $0x3c0] sm:$0xff]  ;;  %v1302_v10 = vld [vmem:[%s11526_s8 + $0xd0] sm:$0xff] }
 0x391   :  { %2068 = vmatprep.subr.bf16.mxu1 %v8215_v21  ;;  %2109 = vmatprep.subr.bf16.mxu0 %v8217_v23  ;;  %v8263_v23 = vcombine.high %v1388_v55, %v1392_v32  ;;  %v8265_v21 = vcombine.high %v1389_v2, %v1393_v6  ;;  %v1279_v32 = vld [vmem:[%s11526_s8 + $0x18] sm:$0xff]  ;;  %v8307_v6 = vcombine.low %v1397_v25, %v1401_v34 }
 0x392   :  { %v1283_v55 = vld [vmem:[%s11526_s8 + $0x38] sm:$0xff] }
 0x393   :  { %12168 = vst [vmem:[#allocation59_spill] sm:$0xff] %v8263_v23  ;;  %12169 = vst [vmem:[#allocation60_spill] sm:$0xff] %v8265_v21 }
 0x394   :  { %2069 = vmatpush1.bf16.msra.mxu1 %v8233_v40  ;;  %2110 = vmatpush1.bf16.msra.mxu0 %v8235_v49  ;;  %v1400_v49 = vld [vmem:[%s11526_s8 + $0x3e0] sm:$0xff]  ;;  %v1278_v40 = vld [vmem:[%s11526_s8 + $0x10] sm:$0xff]  ;;  %12175 = vst [vmem:[#allocation66_spill] sm:$0xff] %v8307_v6 }
 0x395   :  { %2070 = vmatprep.subr.bf16.mxu1 %v8239_v53  ;;  %2111 = vmatprep.subr.bf16.mxu0 %v8241_v54  ;;  %v8287_v54 = vcombine.high %v1396_v16, %v1400_v49  ;;  %v8289_v53 = vcombine.high %v1397_v25, %v1401_v34  ;;  %v8305_v2 = vcombine.low %v1396_v16, %v1400_v49  ;;  %v1287_v16 = vld [vmem:[%s11526_s8 + $0x58] sm:$0xff] }
 0x396   :  { %v1291_v49 = vld [vmem:[%s11526_s8 + $0x78] sm:$0xff]  ;;  %v8331_v34 = vcombine.low %v1279_v32, %v1283_v55 }
 0x397   :  { %12172 = vst [vmem:[#allocation63_spill] sm:$0xff] %v8287_v54  ;;  %12173 = vst [vmem:[#allocation64_spill] sm:$0xff] %v8289_v53 }
 0x398   :  { %2071 = vmatpush1.bf16.msra.mxu1 %v8257_v8  ;;  %2112 = vmatpush1.bf16.msra.mxu0 %v8259_v9  ;;  %v1282_v9 = vld [vmem:[%s11526_s8 + $0x30] sm:$0xff]  ;;  %12174 = vst [vmem:[#allocation65_spill] sm:$0xff] %v8305_v2  ;;  %12179 = vst [vmem:[#allocation70_spill] sm:$0xff] %v8331_v34 }
 0x399   :  { %2072 = vmatprep.subr.bf16.mxu1 %v8263_v23  ;;  %2113 = vmatprep.subr.bf16.mxu0 %v8265_v21  ;;  %v8311_v21 = vcombine.high %v1278_v40, %v1282_v9  ;;  %v8313_v23 = vcombine.high %v1279_v32, %v1283_v55  ;;  %v1286_v8 = vld [vmem:[%s11526_s8 + $0x50] sm:$0xff]  ;;  %v8329_v25 = vcombine.low %v1278_v40, %v1282_v9  ;;  %v1295_v40 = vld [vmem:[%s11526_s8 + $0x98] sm:$0xff]  ;;  %v12182_v32 = vmov 0.0|0.0  }
 0x39a   :  { %v1299_v9 = vld [vmem:[%s11526_s8 + $0xb8] sm:$0xff] }
 0x39b   :  { %12176 = vst [vmem:[#allocation67_spill] sm:$0xff] %v8311_v21  ;;  %12177 = vst [vmem:[#allocation68_spill] sm:$0xff] %v8313_v23 }
 0x39c   :  { %2073 = vmatpush1.bf16.msra.mxu1 %v8281_v38  ;;  %2114 = vmatpush1.bf16.msra.mxu0 %v8283_v39  ;;  %v1290_v39 = vld [vmem:[%s11526_s8 + $0x70] sm:$0xff]  ;;  %12178 = vst [vmem:[#allocation69_spill] sm:$0xff] %v8329_v25 }
 0x39d   :  { %2074 = vmatprep.subr.bf16.mxu1 %v8287_v54  ;;  %2115 = vmatprep.subr.bf16.mxu0 %v8289_v53  ;;  %v8335_v53 = vcombine.high %v1286_v8, %v1290_v39  ;;  %v8337_v54 = vcombine.high %v1287_v16, %v1291_v49  ;;  %v1294_v38 = vld [vmem:[%s11526_s8 + $0x90] sm:$0xff]  ;;  %v8355_v55 = vcombine.low %v1286_v8, %v1290_v39  ;;  %v1303_v8 = vld [vmem:[%s11526_s8 + $0xd8] sm:$0xff] }
 0x39e   :  { %v1307_v39 = vld [vmem:[%s11526_s8 + $0xf8] sm:$0xff] }
 0x39f   :  { %12180 = vst [vmem:[#allocation71_spill] sm:$0xff] %v8335_v53  ;;  %12181 = vst [vmem:[#allocation72_spill] sm:$0xff] %v8337_v54 }
 0x3a0   :  { %2075 = vmatpush1.bf16.msra.mxu1 %v8305_v2  ;;  %2116 = vmatpush1.bf16.msra.mxu0 %v8307_v6  ;;  %v1298_v6 = vld [vmem:[%s11526_s8 + $0xb0] sm:$0xff]  ;;  %12183 = vst [vmem:[#allocation73_spill] sm:$0xff] %v8355_v55  ;;  %v8363_v2 = vcombine.high %v1295_v40, %v1299_v9 }
 0x3a1   :  { %2126 = vmatprep.subr.bf16.mxu1 %v8311_v21  ;;  %2167 = vmatprep.subr.bf16.mxu0 %v8313_v23  ;;  %v8357_v23 = vcombine.low %v1287_v16, %v1291_v49  ;;  %v8361_v21 = vcombine.high %v1294_v38, %v1298_v6  ;;  %v8381_v16 = vcombine.low %v1294_v38, %v1298_v6  ;;  %v1311_v38 = vld [vmem:[%s11526_s8 + $0x118] sm:$0xff] }
 0x3a2   :  { %12186 = vst [vmem:[#allocation76_spill] sm:$0xff] %v8363_v2  ;;  %v8383_v49 = vcombine.low %v1295_v40, %v1299_v9  ;;  %v1315_v6 = vld [vmem:[%s11526_s8 + $0x138] sm:$0xff]  ;;  %v8407_v9 = vcombine.low %v1303_v8, %v1307_v39 }
 0x3a3   :  { %2077 = vmatmul.mubr.bf16.vlgmr.msra.gmra.mrb[48].mxu1 %v12182_v32  ;;  %2118 = vmatmul.mubr.bf16.vlgmr.msra.gmra.mrb[52].mxu0 %v12182_v32  ;;  %12184 = vst [vmem:[#allocation74_spill] sm:$0xff] %v8357_v23  ;;  %12185 = vst [vmem:[#allocation75_spill] sm:$0xff] %v8361_v21 }
 0x3a4   :  { %2127 = vmatpush1.bf16.msra.mxu1 %v8329_v25  ;;  %2168 = vmatpush1.bf16.msra.mxu0 %v8331_v34  ;;  %v1306_v34 = vld [vmem:[%s11526_s8 + $0xf0] sm:$0xff]  ;;  %12187 = vst [vmem:[#allocation77_spill] sm:$0xff] %v8381_v16  ;;  %12188 = vst [vmem:[#allocation78_spill] sm:$0xff] %v8383_v49 }
 0x3a5   :  { %2128 = vmatprep.subr.bf16.mxu1 %v8335_v53  ;;  %2169 = vmatprep.subr.bf16.mxu0 %v8337_v54  ;;  %v8387_v54 = vcombine.high %v1302_v10, %v1306_v34  ;;  %v8389_v53 = vcombine.high %v1303_v8, %v1307_v39  ;;  %v1310_v25 = vld [vmem:[%s11526_s8 + $0x110] sm:$0xff]  ;;  %v8405_v40 = vcombine.low %v1302_v10, %v1306_v34  ;;  %v1319_v10 = vld [vmem:[%s11526_s8 + $0x158] sm:$0xff] }
 0x3a6   :  { %2158 = vmatprep.mubr.bf16.mxu1 %v12182_v32  ;;  %2199 = vmatprep.mubr.bf16.mxu0 %v12182_v32  ;;  %12192 = vst [vmem:[#allocation82_spill] sm:$0xff] %v8407_v9  ;;  %v1323_v34 = vld [vmem:[%s11526_s8 + $0x178] sm:$0xff]  ;;  %v8431_v39 = vcombine.low %v1311_v38, %v1315_v6 }
 0x3a7   :  { %12189 = vst [vmem:[#allocation79_spill] sm:$0xff] %v8387_v54  ;;  %12190 = vst [vmem:[#allocation80_spill] sm:$0xff] %v8389_v53 }
 0x3a8   :  { %2129 = vmatpush1.bf16.msra.mxu1 %v8355_v55  ;;  %2170 = vmatpush1.bf16.msra.mxu0 %v8357_v23  ;;  %v1314_v23 = vld [vmem:[%s11526_s8 + $0x130] sm:$0xff]  ;;  %12191 = vst [vmem:[#allocation81_spill] sm:$0xff] %v8405_v40  ;;  %12196 = vst [vmem:[#allocation86_spill] sm:$0xff] %v8431_v39 }
 0x3a9   :  { %2130 = vmatprep.subr.bf16.mxu1 %v8361_v21  ;;  %2171 = vmatprep.subr.bf16.mxu0 %v8363_v2  ;;  %v8411_v2 = vcombine.high %v1310_v25, %v1314_v23  ;;  %v8413_v21 = vcombine.high %v1311_v38, %v1315_v6  ;;  %v1318_v55 = vld [vmem:[%s11526_s8 + $0x150] sm:$0xff]  ;;  %v8429_v8 = vcombine.low %v1310_v25, %v1314_v23  ;;  %v1327_v23 = vld [vmem:[%s11526_s8 + $0x198] sm:$0xff] }
 0x3aa   :  { %v1331_v25 = vld [vmem:[%s11526_s8 + $0x1b8] sm:$0xff]  ;;  %v8455_v6 = vcombine.low %v1319_v10, %v1323_v34 }
 0x3ab   :  { %12193 = vst [vmem:[#allocation83_spill] sm:$0xff] %v8411_v2  ;;  %12194 = vst [vmem:[#allocation84_spill] sm:$0xff] %v8413_v21 }
 0x3ac   :  { %2131 = vmatpush1.bf16.msra.mxu1 %v8381_v16  ;;  %2172 = vmatpush1.bf16.msra.mxu0 %v8383_v49  ;;  %v1322_v49 = vld [vmem:[%s11526_s8 + $0x170] sm:$0xff]  ;;  %12195 = vst [vmem:[#allocation85_spill] sm:$0xff] %v8429_v8  ;;  %12200 = vst [vmem:[#allocation90_spill] sm:$0xff] %v8455_v6 }
 0x3ad   :  { %2132 = vmatprep.subr.bf16.mxu1 %v8387_v54  ;;  %2173 = vmatprep.subr.bf16.mxu0 %v8389_v53  ;;  %v8435_v53 = vcombine.high %v1318_v55, %v1322_v49  ;;  %v8437_v54 = vcombine.high %v1319_v10, %v1323_v34  ;;  %v1326_v16 = vld [vmem:[%s11526_s8 + $0x190] sm:$0xff]  ;;  %v8453_v38 = vcombine.low %v1318_v55, %v1322_v49  ;;  %v1335_v55 = vld [vmem:[%s11526_s8 + $0x1d8] sm:$0xff] }
 0x3ae   :  { %v1339_v49 = vld [vmem:[%s11526_s8 + $0x1f8] sm:$0xff]  ;;  %v8479_v34 = vcombine.low %v1327_v23, %v1331_v25 }
 0x3af   :  { %12197 = vst [vmem:[#allocation87_spill] sm:$0xff] %v8435_v53  ;;  %12198 = vst [vmem:[#allocation88_spill] sm:$0xff] %v8437_v54 }
 0x3b0   :  { %2133 = vmatpush1.bf16.msra.mxu1 %v8405_v40  ;;  %2174 = vmatpush1.bf16.msra.mxu0 %v8407_v9  ;;  %v1330_v9 = vld [vmem:[%s11526_s8 + $0x1b0] sm:$0xff]  ;;  %12199 = vst [vmem:[#allocation89_spill] sm:$0xff] %v8453_v38  ;;  %12204 = vst [vmem:[#allocation94_spill] sm:$0xff] %v8479_v34 }
 0x3b1   :  { %2134 = vmatprep.subr.bf16.mxu1 %v8411_v2  ;;  %2175 = vmatprep.subr.bf16.mxu0 %v8413_v21  ;;  %v8459_v21 = vcombine.high %v1326_v16, %v1330_v9  ;;  %v8461_v2 = vcombine.high %v1327_v23, %v1331_v25  ;;  %v1334_v40 = vld [vmem:[%s11526_s8 + $0x1d0] sm:$0xff]  ;;  %v8477_v10 = vcombine.low %v1326_v16, %v1330_v9  ;;  %v1343_v16 = vld [vmem:[%s11526_s8 + $0x218] sm:$0xff] }
 0x3b2   :  { %v1347_v9 = vld [vmem:[%s11526_s8 + $0x238] sm:$0xff]  ;;  %v8503_v25 = vcombine.low %v1335_v55, %v1339_v49 }
 0x3b3   :  { %12201 = vst [vmem:[#allocation91_spill] sm:$0xff] %v8459_v21  ;;  %12202 = vst [vmem:[#allocation92_spill] sm:$0xff] %v8461_v2 }
 0x3b4   :  { %2135 = vmatpush1.bf16.msra.mxu1 %v8429_v8  ;;  %2176 = vmatpush1.bf16.msra.mxu0 %v8431_v39  ;;  %v1338_v39 = vld [vmem:[%s11526_s8 + $0x1f0] sm:$0xff]  ;;  %12203 = vst [vmem:[#allocation93_spill] sm:$0xff] %v8477_v10  ;;  %12208 = vst [vmem:[#allocation98_spill] sm:$0xff] %v8503_v25 }
 0x3b5   :  { %2136 = vmatprep.subr.bf16.mxu1 %v8435_v53  ;;  %2177 = vmatprep.subr.bf16.mxu0 %v8437_v54  ;;  %v8483_v54 = vcombine.high %v1334_v40, %v1338_v39  ;;  %v8485_v53 = vcombine.high %v1335_v55, %v1339_v49  ;;  %v1342_v8 = vld [vmem:[%s11526_s8 + $0x210] sm:$0xff]  ;;  %v8501_v23 = vcombine.low %v1334_v40, %v1338_v39  ;;  %v1351_v40 = vld [vmem:[%s11526_s8 + $0x258] sm:$0xff] }
 0x3b6   :  { %v1355_v39 = vld [vmem:[%s11526_s8 + $0x278] sm:$0xff]  ;;  %v8527_v49 = vcombine.low %v1343_v16, %v1347_v9 }
 0x3b7   :  { %12205 = vst [vmem:[#allocation95_spill] sm:$0xff] %v8483_v54  ;;  %12206 = vst [vmem:[#allocation96_spill] sm:$0xff] %v8485_v53 }
 0x3b8   :  { %2137 = vmatpush1.bf16.msra.mxu1 %v8453_v38  ;;  %2178 = vmatpush1.bf16.msra.mxu0 %v8455_v6  ;;  %v1346_v6 = vld [vmem:[%s11526_s8 + $0x230] sm:$0xff]  ;;  %12207 = vst [vmem:[#allocation97_spill] sm:$0xff] %v8501_v23  ;;  %12212 = vst [vmem:[#allocation102_spill] sm:$0xff] %v8527_v49 }
 0x3b9   :  { %2138 = vmatprep.subr.bf16.mxu1 %v8459_v21  ;;  %2179 = vmatprep.subr.bf16.mxu0 %v8461_v2  ;;  %v8507_v2 = vcombine.high %v1342_v8, %v1346_v6  ;;  %v8509_v21 = vcombine.high %v1343_v16, %v1347_v9  ;;  %v1350_v38 = vld [vmem:[%s11526_s8 + $0x250] sm:$0xff]  ;;  %v8525_v55 = vcombine.low %v1342_v8, %v1346_v6  ;;  %v1359_v8 = vld [vmem:[%s11526_s8 + $0x298] sm:$0xff] }
 0x3ba   :  { %v1363_v6 = vld [vmem:[%s11526_s8 + $0x2b8] sm:$0xff]  ;;  %v8551_v9 = vcombine.low %v1351_v40, %v1355_v39 }
 0x3bb   :  { %12209 = vst [vmem:[#allocation99_spill] sm:$0xff] %v8507_v2  ;;  %12210 = vst [vmem:[#allocation100_spill] sm:$0xff] %v8509_v21 }
 0x3bc   :  { %2139 = vmatpush1.bf16.msra.mxu1 %v8477_v10  ;;  %2180 = vmatpush1.bf16.msra.mxu0 %v8479_v34  ;;  %v1354_v34 = vld [vmem:[%s11526_s8 + $0x270] sm:$0xff]  ;;  %12211 = vst [vmem:[#allocation101_spill] sm:$0xff] %v8525_v55  ;;  %12216 = vst [vmem:[#allocation106_spill] sm:$0xff] %v8551_v9 }
 0x3bd   :  { %2140 = vmatprep.subr.bf16.mxu1 %v8483_v54  ;;  %2181 = vmatprep.subr.bf16.mxu0 %v8485_v53  ;;  %v8531_v53 = vcombine.high %v1350_v38, %v1354_v34  ;;  %v8533_v54 = vcombine.high %v1351_v40, %v1355_v39  ;;  %v1358_v10 = vld [vmem:[%s11526_s8 + $0x290] sm:$0xff]  ;;  %v8549_v16 = vcombine.low %v1350_v38, %v1354_v34  ;;  %v1367_v38 = vld [vmem:[%s11526_s8 + $0x2d8] sm:$0xff] }
 0x3be   :  { %v1371_v34 = vld [vmem:[%s11526_s8 + $0x2f8] sm:$0xff]  ;;  %v8575_v39 = vcombine.low %v1359_v8, %v1363_v6 }
 0x3bf   :  { %12213 = vst [vmem:[#allocation103_spill] sm:$0xff] %v8531_v53  ;;  %12214 = vst [vmem:[#allocation104_spill] sm:$0xff] %v8533_v54 }
 0x3c0   :  { %2141 = vmatpush1.bf16.msra.mxu1 %v8501_v23  ;;  %2182 = vmatpush1.bf16.msra.mxu0 %v8503_v25  ;;  %v1362_v25 = vld [vmem:[%s11526_s8 + $0x2b0] sm:$0xff]  ;;  %12215 = vst [vmem:[#allocation105_spill] sm:$0xff] %v8549_v16  ;;  %12220 = vst [vmem:[#allocation110_spill] sm:$0xff] %v8575_v39 }
 0x3c1   :  { %2142 = vmatprep.subr.bf16.mxu1 %v8507_v2  ;;  %2183 = vmatprep.subr.bf16.mxu0 %v8509_v21  ;;  %v8555_v21 = vcombine.high %v1358_v10, %v1362_v25  ;;  %v8557_v2 = vcombine.high %v1359_v8, %v1363_v6  ;;  %v1366_v23 = vld [vmem:[%s11526_s8 + $0x2d0] sm:$0xff]  ;;  %v8573_v40 = vcombine.low %v1358_v10, %v1362_v25  ;;  %v1375_v10 = vld [vmem:[%s11526_s8 + $0x318] sm:$0xff] }
 0x3c2   :  { %v1379_v25 = vld [vmem:[%s11526_s8 + $0x338] sm:$0xff]  ;;  %v8599_v6 = vcombine.low %v1367_v38, %v1371_v34 }
 0x3c3   :  { %12217 = vst [vmem:[#allocation107_spill] sm:$0xff] %v8555_v21  ;;  %12218 = vst [vmem:[#allocation108_spill] sm:$0xff] %v8557_v2 }
 0x3c4   :  { %2143 = vmatpush1.bf16.msra.mxu1 %v8525_v55  ;;  %2184 = vmatpush1.bf16.msra.mxu0 %v8527_v49  ;;  %v1370_v49 = vld [vmem:[%s11526_s8 + $0x2f0] sm:$0xff]  ;;  %12219 = vst [vmem:[#allocation109_spill] sm:$0xff] %v8573_v40  ;;  %12224 = vst [vmem:[#allocation114_spill] sm:$0xff] %v8599_v6 }
 0x3c5   :  { %2144 = vmatprep.subr.bf16.mxu1 %v8531_v53  ;;  %2185 = vmatprep.subr.bf16.mxu0 %v8533_v54  ;;  %v8579_v54 = vcombine.high %v1366_v23, %v1370_v49  ;;  %v8581_v53 = vcombine.high %v1367_v38, %v1371_v34  ;;  %v1374_v55 = vld [vmem:[%s11526_s8 + $0x310] sm:$0xff]  ;;  %v8597_v8 = vcombine.low %v1366_v23, %v1370_v49  ;;  %v1383_v23 = vld [vmem:[%s11526_s8 + $0x358] sm:$0xff] }
 0x3c6   :  { %v1387_v49 = vld [vmem:[%s11526_s8 + $0x378] sm:$0xff]  ;;  %v8623_v34 = vcombine.low %v1375_v10, %v1379_v25 }
 0x3c7   :  { %12221 = vst [vmem:[#allocation111_spill] sm:$0xff] %v8579_v54  ;;  %12222 = vst [vmem:[#allocation112_spill] sm:$0xff] %v8581_v53 }
 0x3c8   :  { %2145 = vmatpush1.bf16.msra.mxu1 %v8549_v16  ;;  %2186 = vmatpush1.bf16.msra.mxu0 %v8551_v9  ;;  %v1378_v9 = vld [vmem:[%s11526_s8 + $0x330] sm:$0xff]  ;;  %12223 = vst [vmem:[#allocation113_spill] sm:$0xff] %v8597_v8  ;;  %12228 = vst [vmem:[#allocation118_spill] sm:$0xff] %v8623_v34 }
 0x3c9   :  { %2146 = vmatprep.subr.bf16.mxu1 %v8555_v21  ;;  %2187 = vmatprep.subr.bf16.mxu0 %v8557_v2  ;;  %v8603_v2 = vcombine.high %v1374_v55, %v1378_v9  ;;  %v8605_v21 = vcombine.high %v1375_v10, %v1379_v25  ;;  %v1382_v16 = vld [vmem:[%s11526_s8 + $0x350] sm:$0xff]  ;;  %v8621_v38 = vcombine.low %v1374_v55, %v1378_v9  ;;  %v1391_v55 = vld [vmem:[%s11526_s8 + $0x398] sm:$0xff] }
 0x3ca   :  { %v1395_v9 = vld [vmem:[%s11526_s8 + $0x3b8] sm:$0xff]  ;;  %v8647_v25 = vcombine.low %v1383_v23, %v1387_v49 }
 0x3cb   :  { %12225 = vst [vmem:[#allocation115_spill] sm:$0xff] %v8603_v2  ;;  %12226 = vst [vmem:[#allocation116_spill] sm:$0xff] %v8605_v21 }
 0x3cc   :  { %2147 = vmatpush1.bf16.msra.mxu1 %v8573_v40  ;;  %2188 = vmatpush1.bf16.msra.mxu0 %v8575_v39  ;;  %v1386_v39 = vld [vmem:[%s11526_s8 + $0x370] sm:$0xff]  ;;  %12227 = vst [vmem:[#allocation117_spill] sm:$0xff] %v8621_v38  ;;  %12232 = vst [vmem:[#allocation122_spill] sm:$0xff] %v8647_v25 }
 0x3cd   :  { %2148 = vmatprep.subr.bf16.mxu1 %v8579_v54  ;;  %2189 = vmatprep.subr.bf16.mxu0 %v8581_v53  ;;  %v8627_v53 = vcombine.high %v1382_v16, %v1386_v39  ;;  %v8629_v54 = vcombine.high %v1383_v23, %v1387_v49  ;;  %v1390_v40 = vld [vmem:[%s11526_s8 + $0x390] sm:$0xff]  ;;  %v8645_v10 = vcombine.low %v1382_v16, %v1386_v39  ;;  %v1399_v16 = vld [vmem:[%s11526_s8 + $0x3d8] sm:$0xff] }
 0x3ce   :  { %v1403_v39 = vld [vmem:[%s11526_s8 + $0x3f8] sm:$0xff]  ;;  %v8671_v49 = vcombine.low %v1391_v55, %v1395_v9 }
 0x3cf   :  { %12229 = vst [vmem:[#allocation119_spill] sm:$0xff] %v8627_v53  ;;  %12230 = vst [vmem:[#allocation120_spill] sm:$0xff] %v8629_v54 }
 0x3d0   :  { %2149 = vmatpush1.bf16.msra.mxu1 %v8597_v8  ;;  %2190 = vmatpush1.bf16.msra.mxu0 %v8599_v6  ;;  %v1394_v6 = vld [vmem:[%s11526_s8 + $0x3b0] sm:$0xff]  ;;  %12231 = vst [vmem:[#allocation121_spill] sm:$0xff] %v8645_v10  ;;  %12236 = vst [vmem:[#allocation126_spill] sm:$0xff] %v8671_v49 }
 0x3d1   :  { %2150 = vmatprep.subr.bf16.mxu1 %v8603_v2  ;;  %2191 = vmatprep.subr.bf16.mxu0 %v8605_v21  ;;  %v8651_v21 = vcombine.high %v1390_v40, %v1394_v6  ;;  %v8653_v2 = vcombine.high %v1391_v55, %v1395_v9  ;;  %v1398_v8 = vld [vmem:[%s11526_s8 + $0x3d0] sm:$0xff]  ;;  %v8669_v23 = vcombine.low %v1390_v40, %v1394_v6  ;;  %v12243_v6 = vld [vmem:[#allocation51_spill] sm:$0xff]  ;;  %v12246_v9 = vld [vmem:[#allocation54_spill] sm:$0xff] }
 0x3d2   :  { %v12241_v40 = vld [vmem:[#allocation49_spill] sm:$0xff] }
 0x3d3   :  { %12233 = vst [vmem:[#allocation123_spill] sm:$0xff] %v8651_v21  ;;  %12234 = vst [vmem:[#allocation124_spill] sm:$0xff] %v8653_v2  ;;  %v12245_v55 = vld [vmem:[#allocation53_spill] sm:$0xff] }
 0x3d4   :  { %2151 = vmatpush1.bf16.msra.mxu1 %v8621_v38  ;;  %2192 = vmatpush1.bf16.msra.mxu0 %v8623_v34  ;;  %v1402_v34 = vld [vmem:[%s11526_s8 + $0x3f0] sm:$0xff]  ;;  %12235 = vst [vmem:[#allocation125_spill] sm:$0xff] %v8669_v23 }
 0x3d5   :  { %2152 = vmatprep.subr.bf16.mxu1 %v8627_v53  ;;  %2193 = vmatprep.subr.bf16.mxu0 %v8629_v54  ;;  %v8675_v54 = vcombine.high %v1398_v8, %v1402_v34  ;;  %v8677_v53 = vcombine.high %v1399_v16, %v1403_v39  ;;  %v8681_v38 = vcombine.low %v1398_v8, %v1402_v34  ;;  %v12242_v8 = vld [vmem:[#allocation50_spill] sm:$0xff]  ;;  %v12244_v34 = vld [vmem:[#allocation52_spill] sm:$0xff] }
 0x3d7   :  { %12237 = vst [vmem:[#allocation127_spill] sm:$0xff] %v8675_v54  ;;  %12238 = vst [vmem:[#allocation128_spill] sm:$0xff] %v8677_v53 }
 0x3d8   :  { %2153 = vmatpush1.bf16.msra.mxu1 %v8645_v10  ;;  %2194 = vmatpush1.bf16.msra.mxu0 %v8647_v25  ;;  %12239 = vst [vmem:[#allocation129_spill] sm:$0xff] %v8681_v38  ;;  %v8683_v10 = vcombine.low %v1399_v16, %v1403_v39  ;;  %v12247_v16 = vld [vmem:[#allocation55_spill] sm:$0xff]  ;;  %v12248_v39 = vld [vmem:[#allocation56_spill] sm:$0xff] }
 0x3d9   :  { %2154 = vmatprep.subr.bf16.mxu1 %v8651_v21  ;;  %2195 = vmatprep.subr.bf16.mxu0 %v8653_v2 }
 0x3da   :  { %12240 = vst [vmem:[#allocation130_spill] sm:$0xff] %v8683_v10 }
 0x3dc   :  { %2155 = vmatpush1.bf16.msra.mxu1 %v8669_v23  ;;  %2196 = vmatpush1.bf16.msra.mxu0 %v8671_v49 }
 0x3dd   :  { %2156 = vmatprep.subr.bf16.mxu1 %v8675_v54  ;;  %2197 = vmatprep.subr.bf16.mxu0 %v8677_v53 }
 0x3e0   :  { %2157 = vmatpush1.bf16.msra.mxu1 %v8681_v38  ;;  %2198 = vmatpush1.bf16.msra.mxu0 %v8683_v10 }
 0x3e1   :  { %2266 = vmatprep.subr.bf16.mxu1 %v7897_v7  ;;  %2307 = vmatprep.subr.bf16.mxu0 %v7908_v12 }
 0x3e3   :  { %2159 = vmatmul.mubr.bf16.vlgmr.msra.gmra.mrb[44].mxu1 %v12182_v32  ;;  %2200 = vmatmul.mubr.bf16.vlgmr.msra.gmra.mrb[48].mxu0 %v12182_v32  ;;  %v12249_v32 = vld [vmem:[#allocation57_spill] sm:$0xff] }
 0x3e4   :  { %2267 = vmatpush1.bf16.msra.mxu1 %v7929_v17  ;;  %2308 = vmatpush1.bf16.msra.mxu0 %v7931_v18 }
 0x3e5   :  { %2268 = vmatprep.subr.bf16.mxu1 %v7933_v19  ;;  %2309 = vmatprep.subr.bf16.mxu0 %v7935_v20 }
 0x3e8   :  { %2269 = vmatpush1.bf16.msra.mxu1 %v7955_v27  ;;  %2310 = vmatpush1.bf16.msra.mxu0 %v7957_v28 }
 0x3e9   :  { %2270 = vmatprep.subr.bf16.mxu1 %v7961_v29  ;;  %2311 = vmatprep.subr.bf16.mxu0 %v7963_v30 }
 0x3ec   :  { %2271 = vmatpush1.bf16.msra.mxu1 %v7981_v35  ;;  %2312 = vmatpush1.bf16.msra.mxu0 %v7983_v36 }
 0x3ed   :  { %2272 = vmatprep.subr.bf16.mxu1 %v7987_v22  ;;  %2313 = vmatprep.subr.bf16.mxu0 %v7989_v37 }
 0x3f0   :  { %2273 = vmatpush1.bf16.msra.mxu1 %v8009_v42  ;;  %2314 = vmatpush1.bf16.msra.mxu0 %v8011_v43 }
 0x3f1   :  { %2274 = vmatprep.subr.bf16.mxu1 %v8015_v44  ;;  %2315 = vmatprep.subr.bf16.mxu0 %v8017_v45 }
 0x3f4   :  { %2275 = vmatpush1.bf16.msra.mxu1 %v8035_v50  ;;  %2316 = vmatpush1.bf16.msra.mxu0 %v8037_v51 }
 0x3f5   :  { %2276 = vmatprep.subr.bf16.mxu1 %v8041_v0  ;;  %2317 = vmatprep.subr.bf16.mxu0 %v8043_v52 }
 0x3f8   :  { %2277 = vmatpush1.bf16.msra.mxu1 %v8063_v57  ;;  %2318 = vmatpush1.bf16.msra.mxu0 %v8065_v58 }
 0x3f9   :  { %2278 = vmatprep.subr.bf16.mxu1 %v8069_v59  ;;  %2319 = vmatprep.subr.bf16.mxu0 %v8071_v60 }
 0x3fc   :  { %2279 = vmatpush1.bf16.msra.mxu1 %v8089_v62  ;;  %2320 = vmatpush1.bf16.msra.mxu0 %v8091_v3 }
 0x3fd   :  { %2280 = vmatprep.subr.bf16.mxu1 %v8095_v4  ;;  %2321 = vmatprep.subr.bf16.mxu0 %v8097_v5 }
 0x400   :  { %2281 = vmatpush1.bf16.msra.mxu1 %v8113_v11  ;;  %2322 = vmatpush1.bf16.msra.mxu0 %v8115_v13 }
 0x401   :  { %2282 = vmatprep.subr.bf16.mxu1 %v8119_v14  ;;  %2323 = vmatprep.subr.bf16.mxu0 %v8121_v15 }
 0x404   :  { %2283 = vmatpush1.bf16.msra.mxu1 %v8137_v26  ;;  %2324 = vmatpush1.bf16.msra.mxu0 %v8139_v24 }
 0x405   :  { %2284 = vmatprep.subr.bf16.mxu1 %v8143_v31  ;;  %2325 = vmatprep.subr.bf16.mxu0 %v8145_v33 }
 0x408   :  { %2285 = vmatpush1.bf16.msra.mxu1 %v8161_v41  ;;  %2326 = vmatpush1.bf16.msra.mxu0 %v8163_v46 }
 0x409   :  { %2286 = vmatprep.subr.bf16.mxu1 %v8167_v47  ;;  %2327 = vmatprep.subr.bf16.mxu0 %v8169_v48 }
 0x40c   :  { %2287 = vmatpush1.bf16.msra.mxu1 %v8185_v56  ;;  %2328 = vmatpush1.bf16.msra.mxu0 %v8187_v61 }
 0x40d   :  { %2288 = vmatprep.subr.bf16.mxu1 %v8191_v63  ;;  %2329 = vmatprep.subr.bf16.mxu0 %v8193_v1  ;;  %v12250_v63 = vld [vmem:[#allocation58_spill] sm:$0xff]  ;;  %v12251_v1 = vld [vmem:[#allocation59_spill] sm:$0xff] }
 0x410   :  { %2289 = vmatpush1.bf16.msra.mxu1 %v12241_v40  ;;  %2330 = vmatpush1.bf16.msra.mxu0 %v12242_v8  ;;  %v12252_v40 = vld [vmem:[#allocation60_spill] sm:$0xff]  ;;  %v12253_v8 = vld [vmem:[#allocation61_spill] sm:$0xff] }
 0x411   :  { %2290 = vmatprep.subr.bf16.mxu1 %v12243_v6  ;;  %2331 = vmatprep.subr.bf16.mxu0 %v12244_v34  ;;  %v12254_v6 = vld [vmem:[#allocation62_spill] sm:$0xff]  ;;  %v12255_v34 = vld [vmem:[#allocation63_spill] sm:$0xff] }
 0x414   :  { %2291 = vmatpush1.bf16.msra.mxu1 %v12245_v55  ;;  %2332 = vmatpush1.bf16.msra.mxu0 %v12246_v9  ;;  %v12256_v55 = vld [vmem:[#allocation64_spill] sm:$0xff] }
 0x415   :  { %2292 = vmatprep.subr.bf16.mxu1 %v12247_v16  ;;  %2333 = vmatprep.subr.bf16.mxu0 %v12248_v39 }
 0x418   :  { %2293 = vmatpush1.bf16.msra.mxu1 %v12249_v32  ;;  %2334 = vmatpush1.bf16.msra.mxu0 %v12250_v63  ;;  %v12259_v63 = vld [vmem:[#allocation65_spill] sm:$0xff] }
 0x419   :  { %2294 = vmatprep.subr.bf16.mxu1 %v12251_v1  ;;  %2335 = vmatprep.subr.bf16.mxu0 %v12252_v40  ;;  %v12260_v1 = vld [vmem:[#allocation66_spill] sm:$0xff] }
 0x41c   :  { %2295 = vmatpush1.bf16.msra.mxu1 %v12253_v8  ;;  %2336 = vmatpush1.bf16.msra.mxu0 %v12254_v6  ;;  %v12263_v6 = vld [vmem:[#allocation67_spill] sm:$0xff] }
 0x41d   :  { %2296 = vmatprep.subr.bf16.mxu1 %v12255_v34  ;;  %2337 = vmatprep.subr.bf16.mxu0 %v12256_v55  ;;  %v12264_v34 = vld [vmem:[#allocation68_spill] sm:$0xff] }
 0x41e   :  { %v1065_v9 = vpop.f32.mrb[24].mxu1  ;;  %v1126_v16 = vpop.f32.mrb[28].mxu0 }
 0x41f   :  { %v1067_v61 = vpop.f32.mrb[25].mxu1  ;;  %v1128_v39 = vpop.f32.mrb[29].mxu0 }
 0x420   :  { %v8753_v56 = vpop.f32.mrb[26].mxu1  ;;  %v8755_v32 = vpop.f32.mrb[30].mxu0  ;;  %2297 = vmatpush1.bf16.msra.mxu1 %v12259_v63  ;;  %2338 = vmatpush1.bf16.msra.mxu0 %v12260_v1 }
 0x421   :  { %12257 = vst [vmem:[#allocation131_spill] sm:$0xff] %v8753_v56  ;;  %12258 = vst [vmem:[#allocation132_spill] sm:$0xff] %v8755_v32  ;;  %v8759_v40 = vpop.f32.mrb[27].mxu1  ;;  %v8761_v8 = vpop.f32.mrb[31].mxu0  ;;  %2348 = vmatprep.subr.bf16.mxu1 %v12263_v6  ;;  %2389 = vmatprep.subr.bf16.mxu0 %v12264_v34 }
 0x422   :  { %12261 = vst [vmem:[#allocation133_spill] sm:$0xff] %v8759_v40  ;;  %12262 = vst [vmem:[#allocation134_spill] sm:$0xff] %v8761_v8 }
 0x426   :  { %v8765_v55 = vpop.f32.mrb[28].mxu1  ;;  %v8767_v48 = vpop.f32.mrb[32].mxu0 }
 0x427   :  { %12265 = vst [vmem:[#allocation135_spill] sm:$0xff] %v8765_v55  ;;  %12266 = vst [vmem:[#allocation136_spill] sm:$0xff] %v8767_v48  ;;  %v8769_v47 = vpop.f32.mrb[29].mxu1  ;;  %v8771_v56 = vpop.f32.mrb[33].mxu0 }
 0x428   :  { %12267 = vst [vmem:[#allocation137_spill] sm:$0xff] %v8769_v47  ;;  %12268 = vst [vmem:[#allocation138_spill] sm:$0xff] %v8771_v56  ;;  %v8773_v32 = vpop.f32.mrb[30].mxu1  ;;  %v8775_v63 = vpop.f32.mrb[34].mxu0 }
 0x429   :  { %12269 = vst [vmem:[#allocation139_spill] sm:$0xff] %v8773_v32  ;;  %12270 = vst [vmem:[#allocation140_spill] sm:$0xff] %v8775_v63  ;;  %v8777_v1 = vpop.f32.mrb[31].mxu1  ;;  %v8779_v40 = vpop.f32.mrb[35].mxu0 }
 0x42a   :  { %12271 = vst [vmem:[#allocation141_spill] sm:$0xff] %v8777_v1  ;;  %12272 = vst [vmem:[#allocation142_spill] sm:$0xff] %v8779_v40 }
 0x436   :  { %v8781_v8 = vpop.f32.mrb[36].mxu1  ;;  %v8783_v6 = vpop.f32.mrb[40].mxu0 }
 0x437   :  { %12273 = vst [vmem:[#allocation143_spill] sm:$0xff] %v8781_v8  ;;  %12274 = vst [vmem:[#allocation144_spill] sm:$0xff] %v8783_v6  ;;  %v8785_v34 = vpop.f32.mrb[37].mxu1  ;;  %v8787_v55 = vpop.f32.mrb[41].mxu0 }
 0x438   :  { %12275 = vst [vmem:[#allocation145_spill] sm:$0xff] %v8785_v34  ;;  %12276 = vst [vmem:[#allocation146_spill] sm:$0xff] %v8787_v55  ;;  %v8789_v48 = vpop.f32.mrb[38].mxu1  ;;  %v8791_v47 = vpop.f32.mrb[42].mxu0 }
 0x439   :  { %12277 = vst [vmem:[#allocation147_spill] sm:$0xff] %v8789_v48  ;;  %12278 = vst [vmem:[#allocation148_spill] sm:$0xff] %v8791_v47  ;;  %v8793_v56 = vpop.f32.mrb[39].mxu1  ;;  %v8795_v32 = vpop.f32.mrb[43].mxu0  ;;  %v822_v47 = vlaneseq }
 0x43a   :  { %12279 = vst [vmem:[#allocation149_spill] sm:$0xff] %v8793_v56  ;;  %12280 = vst [vmem:[#allocation150_spill] sm:$0xff] %v8795_v32 }
 0x43b   :  { %v8813_v56 = vshrl.u32 %v822_v47, 7 }
 0x43d   :  { %12289 = vst [vmem:[#allocation159_spill] sm:$0xff] %v8813_v56  ;;  %v11699_v32 = vsub.s32 0, %v8813_v56 }
 0x43e   :  { %v8797_v63 = vpop.f32.mrb[40].mxu1  ;;  %v8799_v1 = vpop.f32.mrb[44].mxu0 }
 0x43f   :  { %12281 = vst [vmem:[#allocation151_spill] sm:$0xff] %v8797_v63  ;;  %12282 = vst [vmem:[#allocation152_spill] sm:$0xff] %v8799_v1  ;;  %v8801_v40 = vpop.f32.mrb[41].mxu1  ;;  %v8803_v8 = vpop.f32.mrb[45].mxu0  ;;  %v11704_v63 = vsub.s32 2, %v8813_v56  ;;  %v11718_v1 = vsub.s32 3, %v8813_v56 }
 0x440   :  { %12283 = vst [vmem:[#allocation153_spill] sm:$0xff] %v8801_v40  ;;  %12284 = vst [vmem:[#allocation154_spill] sm:$0xff] %v8803_v8  ;;  %v8805_v6 = vpop.f32.mrb[42].mxu1  ;;  %v8807_v34 = vpop.f32.mrb[46].mxu0  ;;  %v820_v40 = vld [vmem:[%s11527_s9] sm:$0xff]  ;;  %v11711_v8 = vsub.s32 1, %v8813_v56 }
 0x441   :  { %12285 = vst [vmem:[#allocation155_spill] sm:$0xff] %v8805_v6  ;;  %12286 = vst [vmem:[#allocation156_spill] sm:$0xff] %v8807_v34  ;;  %v8809_v55 = vpop.f32.mrb[43].mxu1  ;;  %v8811_v48 = vpop.f32.mrb[47].mxu0  ;;  %v8828_v47 = vrot.slane %v820_v40, %v11704_v63  ;;  %v8836_v34 = vrot.slane %v820_v40, %v11718_v1 }
 0x442   :  { %12287 = vst [vmem:[#allocation157_spill] sm:$0xff] %v8809_v55  ;;  %12288 = vst [vmem:[#allocation158_spill] sm:$0xff] %v8811_v48  ;;  %v8824_v55 = vrot.slane %v820_v40, %v11699_v32  ;;  %v8832_v48 = vrot.slane %v820_v40, %v11711_v8 }
 0x443   :  { %12291 = vst [vmem:[#allocation161_spill] sm:$0xff] %v8828_v47  ;;  %12293 = vst [vmem:[#allocation163_spill] sm:$0xff] %v8836_v34  ;;  %v1127_v46 = vadd.f32 %v1126_v16, %v8828_v47  ;;  %v1129_v32 = vadd.f32 %v1128_v39, %v8836_v34 }
 0x444   :  { %12290 = vst [vmem:[#allocation160_spill] sm:$0xff] %v8824_v55  ;;  %12292 = vst [vmem:[#allocation162_spill] sm:$0xff] %v8832_v48  ;;  %v1066_v6 = vadd.f32 %v1065_v9, %v8824_v55  ;;  %v1068_v41 = vadd.f32 %v1067_v61, %v8832_v48 }
 0x476   :  { %v2078_v33 = vpop.f32.mrb[48].mxu1  ;;  %v2119_v31 = vpop.f32.mrb[52].mxu0 }
 0x477   :  { %v2208_v63 = vadd.f32 %v2078_v33, %v1066_v6  ;;  %v2210_v24 = vadd.f32 %v2119_v31, %v1127_v46  ;;  %v2080_v26 = vpop.f32.mrb[49].mxu1  ;;  %v2121_v15 = vpop.f32.mrb[53].mxu0 }
 0x478   :  { %v2209_v8 = vadd.f32 %v2080_v26, %v1068_v41  ;;  %v2211_v14 = vadd.f32 %v2121_v15, %v1129_v32  ;;  %v2082_v13 = vpop.f32.mrb[50].mxu1  ;;  %v2123_v11 = vpop.f32.mrb[54].mxu0 }
 0x479   :  { %v6511_v1 = vmul.f32 -1.442695, %v2208_v63  ;;  %v2083_v5 = vpop.f32.mrb[51].mxu1  ;;  %v2124_v4 = vpop.f32.mrb[55].mxu0 }
 0x47a   :  { %v6512_v9 = vmul.f32 -1.442695, %v2209_v8  ;;  %v11728_v5 = vsub.s32 4, %v8813_v56  ;;  %v11726_v4 = vsub.s32 5, %v8813_v56  ;;  %v11725_v8 = vsub.s32 7, %v8813_v56 }
 0x47b   :  { %7115 = vpow2.f32 %v6511_v1 }
 0x47c   :  { %7117 = vpow2.f32 %v6512_v9  ;;  %v8848_v11 = vrot.slane %v820_v40, %v11728_v5  ;;  %v12313_v5 = vld [vmem:[#allocation82_spill] sm:$0xff] }
 0x47d   :  { %7119 = vtanh.f32 %v2210_v24  ;;  %v8852_v24 = vrot.slane %v820_v40, %v11726_v4 }
 0x47e   :  { %12294 = vst [vmem:[#allocation164_spill] sm:$0xff] %v8848_v11 }
 0x47f   :  { %12295 = vst [vmem:[#allocation165_spill] sm:$0xff] %v8852_v24 }
 0x485   :  { %v7116_v16 = vpop.eup %7115 }
 0x486   :  { %v7118_v61 = vpop.eup %7117  ;;  %v2219_v48 = vadd.f32 1.0, %v7116_v16 }
 0x487   :  { %v2225_v39 = vadd.f32 1.0, %v7118_v61  ;;  %v7120_v31 = vpop.eup %7119 }
 0x488   :  { %7121 = vrcp.f32 %v2219_v48 }
 0x489   :  { %7123 = vrcp.f32 %v2225_v39 }
 0x492   :  { %v7122_v33 = vpop.eup %7121 }
 0x493   :  { %v7124_v46 = vpop.eup %7123  ;;  %v2236_v26 = vmul.f32 %v7122_v33, %v7120_v31 }
 0x494   :  { %v2235_v15 = vmul.f32 0.0, %v7124_v46  ;;  %v8859_v46 = vrot.slane %v820_v40, %v11725_v8 }
 0x496   :  { %v8842_v13 = vadd.f32 %v2236_v26, %v2235_v15  ;;  %12296 = vst [vmem:[#allocation166_spill] sm:$0xff] %v8859_v46  ;;  %v11727_v26 = vsub.s32 6, %v8813_v56  ;;  %v12314_v56 = vld [vmem:[#allocation83_spill] sm:$0xff] }
 0x4b6   :  { %v2160_v41 = vpop.f32.mrb[44].mxu1  ;;  %v2201_v48 = vpop.f32.mrb[48].mxu0 }
 0x4b7   :  { %v6976_v63 = vadd.f32 %v2160_v41, %v8848_v11  ;;  %v2162_v1 = vpop.f32.mrb[45].mxu1  ;;  %v2203_v32 = vpop.f32.mrb[49].mxu0  ;;  %v8865_v41 = vrot.slane %v820_v40, %v11727_v26 }
 0x4b8   :  { %v6977_v6 = vadd.f32 %v2162_v1, %v8852_v24  ;;  %v2164_v9 = vpop.f32.mrb[46].mxu1  ;;  %v2205_v16 = vpop.f32.mrb[50].mxu0  ;;  %v6979_v15 = vadd.f32 %v2203_v32, %v8859_v46  ;;  %v6513_v1 = vmul.f32 -1.442695, %v2211_v14 }
 0x4b9   :  { %v6514_v61 = vmul.f32 -1.442695, %v6976_v63  ;;  %v2165_v39 = vpop.f32.mrb[47].mxu1  ;;  %v2206_v31 = vpop.f32.mrb[51].mxu0  ;;  %12297 = vst [vmem:[#allocation167_spill] sm:$0xff] %v8865_v41  ;;  %v6978_v63 = vadd.f32 %v2201_v48, %v8865_v41 }
 0x4ba   :  { %v6515_v33 = vmul.f32 -1.442695, %v6977_v6  ;;  %v6516_v9 = vmul.f32 -1.442695, %v6979_v15 }
 0x4bb   :  { %7125 = vpow2.f32 %v6514_v61 }
 0x4bc   :  { %7127 = vpow2.f32 %v6515_v33 }
 0x4bd   :  { %7129 = vpow2.f32 %v6513_v1 }
 0x4be   :  { %7131 = vpow2.f32 %v6516_v9 }
 0x4bf   :  { %7133 = vtanh.f32 %v6978_v63 }
 0x4c5   :  { %v7126_v16 = vpop.eup %7125 }
 0x4c6   :  { %v7128_v6 = vpop.eup %7127  ;;  %v2243_v61 = vadd.f32 1.0, %v7126_v16 }
 0x4c7   :  { %v2249_v39 = vadd.f32 1.0, %v7128_v6  ;;  %v7130_v31 = vpop.eup %7129 }
 0x4c8   :  { %7135 = vrcp.f32 %v2243_v61  ;;  %v7132_v33 = vpop.eup %7131  ;;  %v2232_v4 = vadd.f32 1.0, %v7130_v31  ;;  %v12302_v31 = vld [vmem:[#allocation71_spill] sm:$0xff] }
 0x4c9   :  { %7137 = vrcp.f32 %v2249_v39  ;;  %v7134_v32 = vpop.eup %7133  ;;  %v2256_v14 = vadd.f32 1.0, %v7132_v33  ;;  %v12303_v33 = vld [vmem:[#allocation72_spill] sm:$0xff] }
 0x4ca   :  { %7139 = vtanh.f32 %v8842_v13 }
 0x4cb   :  { %7141 = vrcp.f32 %v2232_v4  ;;  %v12300_v4 = vld [vmem:[#allocation69_spill] sm:$0xff] }
 0x4cc   :  { %7143 = vrcp.f32 %v2256_v14  ;;  %v12306_v14 = vld [vmem:[#allocation75_spill] sm:$0xff] }
 0x4d2   :  { %v7136_v8 = vpop.eup %7135 }
 0x4d3   :  { %v7138_v40 = vpop.eup %7137  ;;  %v2260_v26 = vmul.f32 %v7136_v8, %v7134_v32  ;;  %v12304_v32 = vld [vmem:[#allocation73_spill] sm:$0xff] }
 0x4d4   :  { %v2259_v15 = vmul.f32 0.0, %v7138_v40  ;;  %v7140_v1 = vpop.eup %7139  ;;  %v12305_v40 = vld [vmem:[#allocation74_spill] sm:$0xff] }
 0x4d5   :  { %v7142_v9 = vpop.eup %7141 }
 0x4d6   :  { %v8869_v48 = vadd.f32 %v2260_v26, %v2259_v15  ;;  %v7144_v63 = vpop.eup %7143  ;;  %v8872_v6 = vmul.f32 %v7142_v9, %v7140_v1  ;;  %v12301_v26 = vld [vmem:[#allocation70_spill] sm:$0xff]  ;;  %v12307_v15 = vld [vmem:[#allocation76_spill] sm:$0xff]  ;;  %v12308_v1 = vld [vmem:[#allocation77_spill] sm:$0xff] }
 0x4d7   :  { %v12309_v9 = vld [vmem:[#allocation78_spill] sm:$0xff] }
 0x4d8   :  { %7145 = vtanh.f32 %v8869_v48  ;;  %12298 = vst [vmem:[#allocation168_spill] sm:$0xff] %v8872_v6  ;;  %v8878_v8 = vpack.c.bf16 %v8872_v6, %v8872_v6  ;;  %v12316_v6 = vld [vmem:[#allocation85_spill] sm:$0xff] }
 0x4e2   :  { %v7146_v16 = vpop.eup %7145 }
 0x4e3   :  { %v2263_v61 = vmul.f32 %v7146_v16, %v7144_v63  ;;  %v12310_v63 = vld [vmem:[#allocation79_spill] sm:$0xff]  ;;  %v12311_v16 = vld [vmem:[#allocation80_spill] sm:$0xff] }
 0x4e5   :  { %v8874_v39 = vpack.c.bf16 %v2263_v61, %v2263_v61  ;;  %v12312_v61 = vld [vmem:[#allocation81_spill] sm:$0xff] }
 0x4e7   :  { %12299 = vst [vmem:[#allocation169_spill] sm:$0xff] %v8874_v39  ;;  %2298 = vmatprep.mubr.bf16.mxu1 %v8874_v39  ;;  %2339 = vmatprep.mubr.bf16.mxu0 %v8874_v39 }
 0x4e8   :  { %2299 = vmatmul.mubr.bf16.vlgmr.msra.gmra.mrb[52].mxu1 %v8878_v8  ;;  %2340 = vmatmul.mubr.bf16.vlgmr.msra.gmra.mrb[56].mxu0 %v8878_v8 }
 0x4e9   :  { %2349 = vmatpush1.bf16.msra.mxu1 %v12300_v4  ;;  %2390 = vmatpush1.bf16.msra.mxu0 %v12301_v26 }
 0x4ea   :  { %2380 = vmatprep.mubr.bf16.mxu1 %v8874_v39  ;;  %2421 = vmatprep.mubr.bf16.mxu0 %v8874_v39  ;;  %v12315_v39 = vld [vmem:[#allocation84_spill] sm:$0xff] }
 0x4eb   :  { %2350 = vmatprep.subr.bf16.mxu1 %v12302_v31  ;;  %2391 = vmatprep.subr.bf16.mxu0 %v12303_v33 }
 0x4ed   :  { %2351 = vmatpush1.bf16.msra.mxu1 %v12304_v32  ;;  %2392 = vmatpush1.bf16.msra.mxu0 %v12305_v40 }
 0x4ee   :  { %2352 = vmatprep.subr.bf16.mxu1 %v12306_v14  ;;  %2393 = vmatprep.subr.bf16.mxu0 %v12307_v15  ;;  %v12317_v14 = vld [vmem:[#allocation86_spill] sm:$0xff]  ;;  %v12318_v15 = vld [vmem:[#allocation87_spill] sm:$0xff] }
 0x4f1   :  { %2353 = vmatpush1.bf16.msra.mxu1 %v12308_v1  ;;  %2394 = vmatpush1.bf16.msra.mxu0 %v12309_v9  ;;  %v12319_v1 = vld [vmem:[#allocation88_spill] sm:$0xff]  ;;  %v12320_v9 = vld [vmem:[#allocation89_spill] sm:$0xff] }
 0x4f2   :  { %2354 = vmatprep.subr.bf16.mxu1 %v12310_v63  ;;  %2395 = vmatprep.subr.bf16.mxu0 %v12311_v16  ;;  %v12321_v63 = vld [vmem:[#allocation90_spill] sm:$0xff]  ;;  %v12322_v16 = vld [vmem:[#allocation91_spill] sm:$0xff] }
 0x4f5   :  { %2355 = vmatpush1.bf16.msra.mxu1 %v12312_v61  ;;  %2396 = vmatpush1.bf16.msra.mxu0 %v12313_v5  ;;  %v12323_v61 = vld [vmem:[#allocation92_spill] sm:$0xff]  ;;  %v12324_v5 = vld [vmem:[#allocation93_spill] sm:$0xff] }
 0x4f6   :  { %2356 = vmatprep.subr.bf16.mxu1 %v12314_v56  ;;  %2397 = vmatprep.subr.bf16.mxu0 %v12315_v39  ;;  %v12325_v56 = vld [vmem:[#allocation94_spill] sm:$0xff]  ;;  %v12326_v39 = vld [vmem:[#allocation95_spill] sm:$0xff] }
 0x4f9   :  { %2357 = vmatpush1.bf16.msra.mxu1 %v12316_v6  ;;  %2398 = vmatpush1.bf16.msra.mxu0 %v12317_v14  ;;  %v12327_v6 = vld [vmem:[#allocation96_spill] sm:$0xff]  ;;  %v12328_v14 = vld [vmem:[#allocation97_spill] sm:$0xff] }
 0x4fa   :  { %2358 = vmatprep.subr.bf16.mxu1 %v12318_v15  ;;  %2399 = vmatprep.subr.bf16.mxu0 %v12319_v1  ;;  %v12329_v15 = vld [vmem:[#allocation98_spill] sm:$0xff]  ;;  %v12330_v1 = vld [vmem:[#allocation99_spill] sm:$0xff] }
 0x4fd   :  { %2359 = vmatpush1.bf16.msra.mxu1 %v12320_v9  ;;  %2400 = vmatpush1.bf16.msra.mxu0 %v12321_v63  ;;  %v12331_v9 = vld [vmem:[#allocation100_spill] sm:$0xff]  ;;  %v12332_v63 = vld [vmem:[#allocation101_spill] sm:$0xff] }
 0x4fe   :  { %2360 = vmatprep.subr.bf16.mxu1 %v12322_v16  ;;  %2401 = vmatprep.subr.bf16.mxu0 %v12323_v61  ;;  %v12333_v16 = vld [vmem:[#allocation102_spill] sm:$0xff]  ;;  %v12334_v61 = vld [vmem:[#allocation103_spill] sm:$0xff] }
 0x501   :  { %2361 = vmatpush1.bf16.msra.mxu1 %v12324_v5  ;;  %2402 = vmatpush1.bf16.msra.mxu0 %v12325_v56  ;;  %v12335_v5 = vld [vmem:[#allocation104_spill] sm:$0xff]  ;;  %v12336_v56 = vld [vmem:[#allocation105_spill] sm:$0xff] }
 0x502   :  { %2362 = vmatprep.subr.bf16.mxu1 %v12326_v39  ;;  %2403 = vmatprep.subr.bf16.mxu0 %v12327_v6  ;;  %v12337_v39 = vld [vmem:[#allocation106_spill] sm:$0xff]  ;;  %v12338_v6 = vld [vmem:[#allocation107_spill] sm:$0xff] }
 0x505   :  { %2363 = vmatpush1.bf16.msra.mxu1 %v12328_v14  ;;  %2404 = vmatpush1.bf16.msra.mxu0 %v12329_v15  ;;  %v12339_v14 = vld [vmem:[#allocation108_spill] sm:$0xff]  ;;  %v12340_v15 = vld [vmem:[#allocation109_spill] sm:$0xff] }
 0x506   :  { %2364 = vmatprep.subr.bf16.mxu1 %v12330_v1  ;;  %2405 = vmatprep.subr.bf16.mxu0 %v12331_v9  ;;  %v12341_v1 = vld [vmem:[#allocation110_spill] sm:$0xff]  ;;  %v12342_v9 = vld [vmem:[#allocation111_spill] sm:$0xff] }
 0x509   :  { %2365 = vmatpush1.bf16.msra.mxu1 %v12332_v63  ;;  %2406 = vmatpush1.bf16.msra.mxu0 %v12333_v16  ;;  %v12343_v63 = vld [vmem:[#allocation112_spill] sm:$0xff]  ;;  %v12344_v16 = vld [vmem:[#allocation113_spill] sm:$0xff] }
 0x50a   :  { %2366 = vmatprep.subr.bf16.mxu1 %v12334_v61  ;;  %2407 = vmatprep.subr.bf16.mxu0 %v12335_v5  ;;  %v12345_v61 = vld [vmem:[#allocation114_spill] sm:$0xff]  ;;  %v12346_v5 = vld [vmem:[#allocation115_spill] sm:$0xff] }
 0x50d   :  { %2367 = vmatpush1.bf16.msra.mxu1 %v12336_v56  ;;  %2408 = vmatpush1.bf16.msra.mxu0 %v12337_v39  ;;  %v12347_v56 = vld [vmem:[#allocation116_spill] sm:$0xff]  ;;  %v12348_v39 = vld [vmem:[#allocation117_spill] sm:$0xff] }
 0x50e   :  { %2368 = vmatprep.subr.bf16.mxu1 %v12338_v6  ;;  %2409 = vmatprep.subr.bf16.mxu0 %v12339_v14  ;;  %v12349_v6 = vld [vmem:[#allocation118_spill] sm:$0xff]  ;;  %v12350_v14 = vld [vmem:[#allocation119_spill] sm:$0xff] }
 0x511   :  { %2369 = vmatpush1.bf16.msra.mxu1 %v12340_v15  ;;  %2410 = vmatpush1.bf16.msra.mxu0 %v12341_v1  ;;  %v12351_v15 = vld [vmem:[#allocation120_spill] sm:$0xff]  ;;  %v12352_v1 = vld [vmem:[#allocation121_spill] sm:$0xff] }
 0x512   :  { %2370 = vmatprep.subr.bf16.mxu1 %v12342_v9  ;;  %2411 = vmatprep.subr.bf16.mxu0 %v12343_v63 }
 0x515   :  { %2371 = vmatpush1.bf16.msra.mxu1 %v12344_v16  ;;  %2412 = vmatpush1.bf16.msra.mxu0 %v12345_v61 }
 0x516   :  { %2372 = vmatprep.subr.bf16.mxu1 %v12346_v5  ;;  %2413 = vmatprep.subr.bf16.mxu0 %v12347_v56 }
 0x519   :  { %2373 = vmatpush1.bf16.msra.mxu1 %v12348_v39  ;;  %2414 = vmatpush1.bf16.msra.mxu0 %v12349_v6 }
 0x51a   :  { %2374 = vmatprep.subr.bf16.mxu1 %v12350_v14  ;;  %2415 = vmatprep.subr.bf16.mxu0 %v12351_v15 }
 0x51d   :  { %2375 = vmatpush1.bf16.msra.mxu1 %v12352_v1  ;;  %2416 = vmatpush1.bf16.msra.mxu0 %v8647_v25 }
 0x51e   :  { %2376 = vmatprep.subr.bf16.mxu1 %v8651_v21  ;;  %2417 = vmatprep.subr.bf16.mxu0 %v8653_v2 }
 0x521   :  { %2377 = vmatpush1.bf16.msra.mxu1 %v8669_v23  ;;  %2418 = vmatpush1.bf16.msra.mxu0 %v8671_v49 }
 0x522   :  { %2378 = vmatprep.subr.bf16.mxu1 %v8675_v54  ;;  %2419 = vmatprep.subr.bf16.mxu0 %v8677_v53 }
 0x525   :  { %2379 = vmatpush1.bf16.msra.mxu1 %v8681_v38  ;;  %2420 = vmatpush1.bf16.msra.mxu0 %v8683_v10 }
 0x526   :  { %2488 = vmatprep.subr.bf16.mxu1 %v7897_v7  ;;  %2529 = vmatprep.subr.bf16.mxu0 %v7908_v12 }
 0x528   :  { %2381 = vmatmul.mubr.bf16.vlgmr.msra.gmra.mrb[56].mxu1 %v8878_v8  ;;  %2422 = vmatmul.mubr.bf16.vlgmr.msra.gmra.mrb[60].mxu0 %v8878_v8  ;;  %v12353_v8 = vld [vmem:[#allocation31_spill] sm:$0xff] }
 0x529   :  { %2489 = vmatpush1.bf16.msra.mxu1 %v7929_v17  ;;  %2530 = vmatpush1.bf16.msra.mxu0 %v7931_v18 }
 0x52a   :  { %2490 = vmatprep.subr.bf16.mxu1 %v7933_v19  ;;  %2531 = vmatprep.subr.bf16.mxu0 %v7935_v20 }
 0x52d   :  { %2491 = vmatpush1.bf16.msra.mxu1 %v7955_v27  ;;  %2532 = vmatpush1.bf16.msra.mxu0 %v7957_v28 }
 0x52e   :  { %2492 = vmatprep.subr.bf16.mxu1 %v7961_v29  ;;  %2533 = vmatprep.subr.bf16.mxu0 %v7963_v30 }
 0x531   :  { %2493 = vmatpush1.bf16.msra.mxu1 %v7981_v35  ;;  %2534 = vmatpush1.bf16.msra.mxu0 %v7983_v36 }
 0x532   :  { %2494 = vmatprep.subr.bf16.mxu1 %v7987_v22  ;;  %2535 = vmatprep.subr.bf16.mxu0 %v7989_v37 }
 0x535   :  { %2495 = vmatpush1.bf16.msra.mxu1 %v8009_v42  ;;  %2536 = vmatpush1.bf16.msra.mxu0 %v8011_v43 }
 0x536   :  { %2496 = vmatprep.subr.bf16.mxu1 %v8015_v44  ;;  %2537 = vmatprep.subr.bf16.mxu0 %v8017_v45  ;;  %v12393_v45 = vld [vmem:[#allocation162_spill] sm:$0xff] }
 0x539   :  { %2497 = vmatpush1.bf16.msra.mxu1 %v8035_v50  ;;  %2538 = vmatpush1.bf16.msra.mxu0 %v8037_v51  ;;  %v12354_v50 = vld [vmem:[#allocation32_spill] sm:$0xff]  ;;  %v12355_v51 = vld [vmem:[#allocation33_spill] sm:$0xff] }
 0x53a   :  { %2498 = vmatprep.subr.bf16.mxu1 %v8041_v0  ;;  %2539 = vmatprep.subr.bf16.mxu0 %v8043_v52  ;;  %v12356_v0 = vld [vmem:[#allocation34_spill] sm:$0xff]  ;;  %v12357_v52 = vld [vmem:[#allocation35_spill] sm:$0xff] }
 0x53d   :  { %2499 = vmatpush1.bf16.msra.mxu1 %v8063_v57  ;;  %2540 = vmatpush1.bf16.msra.mxu0 %v8065_v58  ;;  %v12358_v57 = vld [vmem:[#allocation36_spill] sm:$0xff]  ;;  %v12359_v58 = vld [vmem:[#allocation37_spill] sm:$0xff] }
 0x53e   :  { %2500 = vmatprep.subr.bf16.mxu1 %v8069_v59  ;;  %2541 = vmatprep.subr.bf16.mxu0 %v8071_v60  ;;  %v12360_v59 = vld [vmem:[#allocation38_spill] sm:$0xff]  ;;  %v12361_v60 = vld [vmem:[#allocation39_spill] sm:$0xff] }
 0x541   :  { %2501 = vmatpush1.bf16.msra.mxu1 %v8089_v62  ;;  %2542 = vmatpush1.bf16.msra.mxu0 %v8091_v3  ;;  %v12362_v62 = vld [vmem:[#allocation40_spill] sm:$0xff]  ;;  %v12363_v3 = vld [vmem:[#allocation41_spill] sm:$0xff] }
 0x542   :  { %2502 = vmatprep.subr.bf16.mxu1 %v12353_v8  ;;  %2543 = vmatprep.subr.bf16.mxu0 %v12354_v50  ;;  %v12364_v8 = vld [vmem:[#allocation42_spill] sm:$0xff]  ;;  %v12365_v50 = vld [vmem:[#allocation43_spill] sm:$0xff] }
 0x545   :  { %2503 = vmatpush1.bf16.msra.mxu1 %v12355_v51  ;;  %2544 = vmatpush1.bf16.msra.mxu0 %v12356_v0  ;;  %v12366_v51 = vld [vmem:[#allocation44_spill] sm:$0xff]  ;;  %v12367_v0 = vld [vmem:[#allocation45_spill] sm:$0xff] }
 0x546   :  { %2504 = vmatprep.subr.bf16.mxu1 %v12357_v52  ;;  %2545 = vmatprep.subr.bf16.mxu0 %v12358_v57  ;;  %v12368_v52 = vld [vmem:[#allocation46_spill] sm:$0xff]  ;;  %v12369_v57 = vld [vmem:[#allocation47_spill] sm:$0xff] }
 0x549   :  { %2505 = vmatpush1.bf16.msra.mxu1 %v12359_v58  ;;  %2546 = vmatpush1.bf16.msra.mxu0 %v12360_v59  ;;  %v12370_v58 = vld [vmem:[#allocation48_spill] sm:$0xff]  ;;  %v12371_v59 = vld [vmem:[#allocation49_spill] sm:$0xff] }
 0x54a   :  { %2506 = vmatprep.subr.bf16.mxu1 %v12361_v60  ;;  %2547 = vmatprep.subr.bf16.mxu0 %v12362_v62  ;;  %v12372_v60 = vld [vmem:[#allocation50_spill] sm:$0xff]  ;;  %v12373_v62 = vld [vmem:[#allocation51_spill] sm:$0xff] }
 0x54d   :  { %2507 = vmatpush1.bf16.msra.mxu1 %v12363_v3  ;;  %2548 = vmatpush1.bf16.msra.mxu0 %v12364_v8  ;;  %v12374_v3 = vld [vmem:[#allocation52_spill] sm:$0xff]  ;;  %v12375_v8 = vld [vmem:[#allocation53_spill] sm:$0xff] }
 0x54e   :  { %2508 = vmatprep.subr.bf16.mxu1 %v12365_v50  ;;  %2549 = vmatprep.subr.bf16.mxu0 %v12366_v51  ;;  %v12376_v50 = vld [vmem:[#allocation54_spill] sm:$0xff]  ;;  %v12377_v51 = vld [vmem:[#allocation55_spill] sm:$0xff] }
 0x551   :  { %2509 = vmatpush1.bf16.msra.mxu1 %v12367_v0  ;;  %2550 = vmatpush1.bf16.msra.mxu0 %v12368_v52  ;;  %v12378_v0 = vld [vmem:[#allocation56_spill] sm:$0xff]  ;;  %v12379_v52 = vld [vmem:[#allocation57_spill] sm:$0xff] }
 0x552   :  { %2510 = vmatprep.subr.bf16.mxu1 %v12369_v57  ;;  %2551 = vmatprep.subr.bf16.mxu0 %v12370_v58  ;;  %v12380_v57 = vld [vmem:[#allocation58_spill] sm:$0xff]  ;;  %v12381_v58 = vld [vmem:[#allocation59_spill] sm:$0xff] }
 0x555   :  { %2511 = vmatpush1.bf16.msra.mxu1 %v12371_v59  ;;  %2552 = vmatpush1.bf16.msra.mxu0 %v12372_v60  ;;  %v12382_v59 = vld [vmem:[#allocation60_spill] sm:$0xff]  ;;  %v12383_v60 = vld [vmem:[#allocation61_spill] sm:$0xff] }
 0x556   :  { %2512 = vmatprep.subr.bf16.mxu1 %v12373_v62  ;;  %2553 = vmatprep.subr.bf16.mxu0 %v12374_v3  ;;  %v12384_v62 = vld [vmem:[#allocation62_spill] sm:$0xff]  ;;  %v12385_v3 = vld [vmem:[#allocation63_spill] sm:$0xff] }
 0x559   :  { %2513 = vmatpush1.bf16.msra.mxu1 %v12375_v8  ;;  %2554 = vmatpush1.bf16.msra.mxu0 %v12376_v50  ;;  %v12386_v8 = vld [vmem:[#allocation64_spill] sm:$0xff]  ;;  %v12387_v50 = vld [vmem:[#allocation65_spill] sm:$0xff] }
 0x55a   :  { %2514 = vmatprep.subr.bf16.mxu1 %v12377_v51  ;;  %2555 = vmatprep.subr.bf16.mxu0 %v12378_v0  ;;  %v12388_v51 = vld [vmem:[#allocation66_spill] sm:$0xff]  ;;  %v12389_v0 = vld [vmem:[#allocation67_spill] sm:$0xff] }
 0x55d   :  { %2515 = vmatpush1.bf16.msra.mxu1 %v12379_v52  ;;  %2556 = vmatpush1.bf16.msra.mxu0 %v12380_v57  ;;  %v12390_v52 = vld [vmem:[#allocation68_spill] sm:$0xff] }
 0x55e   :  { %2516 = vmatprep.subr.bf16.mxu1 %v12381_v58  ;;  %2557 = vmatprep.subr.bf16.mxu0 %v12382_v59  ;;  %v12391_v58 = vld [vmem:[#allocation131_spill] sm:$0xff]  ;;  %v12392_v59 = vld [vmem:[#allocation132_spill] sm:$0xff] }
 0x55f   :  { %v1070_v57 = vadd.f32 %v12391_v58, %v8824_v55 }
 0x561   :  { %2517 = vmatpush1.bf16.msra.mxu1 %v12383_v60  ;;  %2558 = vmatpush1.bf16.msra.mxu0 %v12384_v62  ;;  %v1131_v60 = vadd.f32 %v12392_v59, %v8828_v47  ;;  %v12394_v62 = vld [vmem:[#allocation133_spill] sm:$0xff] }
 0x562   :  { %2518 = vmatprep.subr.bf16.mxu1 %v12385_v3  ;;  %2559 = vmatprep.subr.bf16.mxu0 %v12386_v8  ;;  %v1072_v44 = vadd.f32 %v12394_v62, %v12393_v45  ;;  %v12395_v3 = vld [vmem:[#allocation134_spill] sm:$0xff] }
 0x563   :  { %v1133_v8 = vadd.f32 %v12395_v3, %v8836_v34 }
 0x565   :  { %2519 = vmatpush1.bf16.msra.mxu1 %v12387_v50  ;;  %2560 = vmatpush1.bf16.msra.mxu0 %v12388_v51 }
 0x566   :  { %2570 = vmatprep.subr.bf16.mxu1 %v12389_v0  ;;  %2611 = vmatprep.subr.bf16.mxu0 %v12390_v52 }
 0x5bb   :  { %v2300_v43 = vpop.f32.mrb[52].mxu1  ;;  %v2341_v50 = vpop.f32.mrb[56].mxu0 }
 0x5bc   :  { %v2430_v42 = vadd.f32 %v2300_v43, %v1070_v57  ;;  %v2432_v51 = vadd.f32 %v2341_v50, %v1131_v60  ;;  %v2302_v37 = vpop.f32.mrb[53].mxu1  ;;  %v2343_v0 = vpop.f32.mrb[57].mxu0 }
 0x5bd   :  { %v2431_v22 = vadd.f32 %v2302_v37, %v1072_v44  ;;  %v2433_v52 = vadd.f32 %v2343_v0, %v1133_v8  ;;  %v2304_v36 = vpop.f32.mrb[54].mxu1  ;;  %v2345_v35 = vpop.f32.mrb[58].mxu0  ;;  %v12398_v0 = vld [vmem:[#allocation157_spill] sm:$0xff] }
 0x5be   :  { %v6517_v58 = vmul.f32 -1.442695, %v2430_v42  ;;  %v2305_v55 = vpop.f32.mrb[55].mxu1  ;;  %v2346_v30 = vpop.f32.mrb[59].mxu0  ;;  %v12397_v42 = vld [vmem:[#allocation156_spill] sm:$0xff] }
 0x5bf   :  { %v6518_v59 = vmul.f32 -1.442695, %v2431_v22  ;;  %v12396_v30 = vld [vmem:[#allocation155_spill] sm:$0xff]  ;;  %v1263_v44 = vadd.f32 %v12397_v42, %v8865_v41  ;;  %v6519_v42 = vmul.f32 -1.442695, %v2433_v52 }
 0x5c0   :  { %7147 = vpow2.f32 %v6517_v58  ;;  %v1202_v22 = vadd.f32 %v12396_v30, %v8848_v11 }
 0x5c1   :  { %7149 = vpow2.f32 %v6518_v59 }
 0x5c2   :  { %7151 = vtanh.f32 %v2432_v51  ;;  %v1204_v51 = vadd.f32 %v12398_v0, %v8852_v24 }
 0x5ca   :  { %v7148_v62 = vpop.eup %7147 }
 0x5cb   :  { %v7150_v45 = vpop.eup %7149  ;;  %v2441_v47 = vadd.f32 1.0, %v7148_v62 }
 0x5cc   :  { %v2447_v3 = vadd.f32 1.0, %v7150_v45  ;;  %v7152_v43 = vpop.eup %7151  ;;  %v12399_v45 = vld [vmem:[#allocation158_spill] sm:$0xff] }
 0x5cd   :  { %7153 = vrcp.f32 %v2441_v47  ;;  %v1265_v60 = vadd.f32 %v12399_v45, %v8859_v46 }
 0x5ce   :  { %7155 = vrcp.f32 %v2447_v3 }
 0x5d7   :  { %v7154_v50 = vpop.eup %7153 }
 0x5d8   :  { %v7156_v57 = vpop.eup %7155  ;;  %v2458_v37 = vmul.f32 %v7154_v50, %v7152_v43 }
 0x5d9   :  { %v2457_v36 = vmul.f32 %v7156_v57, %v8842_v13 }
 0x5db   :  { %v9025_v35 = vadd.f32 %v2458_v37, %v2457_v36 }
 0x5fb   :  { %v2382_v55 = vpop.f32.mrb[56].mxu1  ;;  %v2423_v47 = vpop.f32.mrb[60].mxu0 }
 0x5fc   :  { %v2434_v8 = vadd.f32 %v2382_v55, %v1202_v22  ;;  %v2436_v58 = vadd.f32 %v2423_v47, %v1263_v44  ;;  %v2384_v59 = vpop.f32.mrb[57].mxu1  ;;  %v2425_v13 = vpop.f32.mrb[61].mxu0 }
 0x5fd   :  { %v2435_v62 = vadd.f32 %v2384_v59, %v1204_v51  ;;  %v2437_v3 = vadd.f32 %v2425_v13, %v1265_v60  ;;  %v2386_v43 = vpop.f32.mrb[58].mxu1  ;;  %v2427_v50 = vpop.f32.mrb[62].mxu0 }
 0x5fe   :  { %v6520_v57 = vmul.f32 -1.442695, %v2434_v8  ;;  %v2387_v37 = vpop.f32.mrb[59].mxu1  ;;  %v2428_v36 = vpop.f32.mrb[63].mxu0 }
 0x5ff   :  { %v6521_v30 = vmul.f32 -1.442695, %v2435_v62  ;;  %v6522_v0 = vmul.f32 -1.442695, %v2437_v3  ;;  %v12402_v37 = vld [vmem:[#allocation75_spill] sm:$0xff]  ;;  %v12403_v36 = vld [vmem:[#allocation76_spill] sm:$0xff] }
 0x600   :  { %7157 = vpow2.f32 %v6520_v57 }
 0x601   :  { %7159 = vpow2.f32 %v6521_v30  ;;  %v12404_v30 = vld [vmem:[#allocation77_spill] sm:$0xff] }
 0x602   :  { %7161 = vpow2.f32 %v6519_v42  ;;  %v12405_v42 = vld [vmem:[#allocation78_spill] sm:$0xff] }
 0x603   :  { %7163 = vpow2.f32 %v6522_v0  ;;  %v12406_v0 = vld [vmem:[#allocation79_spill] sm:$0xff] }
 0x604   :  { %7165 = vtanh.f32 %v2436_v58 }
 0x60a   :  { %v7158_v24 = vpop.eup %7157 }
 0x60b   :  { %v7160_v45 = vpop.eup %7159  ;;  %v2465_v46 = vadd.f32 1.0, %v7158_v24 }
 0x60c   :  { %v2471_v22 = vadd.f32 1.0, %v7160_v45  ;;  %v7162_v44 = vpop.eup %7161  ;;  %v12407_v45 = vld [vmem:[#allocation80_spill] sm:$0xff] }
 0x60d   :  { %7167 = vrcp.f32 %v2465_v46  ;;  %v7164_v51 = vpop.eup %7163  ;;  %v2454_v47 = vadd.f32 1.0, %v7162_v44  ;;  %v12409_v44 = vld [vmem:[#allocation82_spill] sm:$0xff] }
 0x60e   :  { %7169 = vrcp.f32 %v2471_v22  ;;  %v7166_v60 = vpop.eup %7165  ;;  %v2478_v13 = vadd.f32 1.0, %v7164_v51  ;;  %v12408_v22 = vld [vmem:[#allocation81_spill] sm:$0xff]  ;;  %v12410_v51 = vld [vmem:[#allocation83_spill] sm:$0xff] }
 0x60f   :  { %7171 = vtanh.f32 %v9025_v35 }
 0x610   :  { %7173 = vrcp.f32 %v2454_v47  ;;  %v12413_v47 = vld [vmem:[#allocation86_spill] sm:$0xff] }
 0x611   :  { %7175 = vrcp.f32 %v2478_v13  ;;  %v12416_v13 = vld [vmem:[#allocation89_spill] sm:$0xff] }
 0x617   :  { %v7168_v55 = vpop.eup %7167 }
 0x618   :  { %v7170_v8 = vpop.eup %7169  ;;  %v2482_v59 = vmul.f32 %v7168_v55, %v7166_v60  ;;  %v12411_v60 = vld [vmem:[#allocation84_spill] sm:$0xff]  ;;  %v12412_v55 = vld [vmem:[#allocation85_spill] sm:$0xff] }
 0x619   :  { %v2481_v52 = vmul.f32 %v7170_v8, %v8869_v48  ;;  %v7172_v24 = vpop.eup %7171  ;;  %v12414_v8 = vld [vmem:[#allocation87_spill] sm:$0xff] }
 0x61a   :  { %v7174_v46 = vpop.eup %7173 }
 0x61b   :  { %v9037_v62 = vadd.f32 %v2482_v59, %v2481_v52  ;;  %v7176_v58 = vpop.eup %7175  ;;  %v9040_v43 = vmul.f32 %v7174_v46, %v7172_v24  ;;  %v12415_v59 = vld [vmem:[#allocation88_spill] sm:$0xff]  ;;  %v12417_v52 = vld [vmem:[#allocation90_spill] sm:$0xff]  ;;  %v12418_v24 = vld [vmem:[#allocation91_spill] sm:$0xff] }
 0x61c   :  { %v12419_v46 = vld [vmem:[#allocation92_spill] sm:$0xff] }
 0x61d   :  { %7177 = vtanh.f32 %v9037_v62  ;;  %12400 = vst [vmem:[#allocation69_spill] sm:$0xff] %v9040_v43  ;;  %v9048_v48 = vpack.c.bf16 %v9040_v43, %v9040_v43  ;;  %v12424_v43 = vld [vmem:[#allocation97_spill] sm:$0xff] }
 0x627   :  { %v7178_v3 = vpop.eup %7177 }
 0x628   :  { %v9042_v50 = vmul.f32 %v7178_v3, %v7176_v58  ;;  %v12420_v58 = vld [vmem:[#allocation93_spill] sm:$0xff]  ;;  %v12421_v3 = vld [vmem:[#allocation94_spill] sm:$0xff] }
 0x62a   :  { %12401 = vst [vmem:[#allocation70_spill] sm:$0xff] %v9042_v50  ;;  %v2487_v57 = vpack.c.bf16 %v9042_v50, %v9042_v50  ;;  %v12423_v50 = vld [vmem:[#allocation96_spill] sm:$0xff] }
 0x62c   :  { %2520 = vmatprep.mubr.bf16.mxu1 %v2487_v57  ;;  %2561 = vmatprep.mubr.bf16.mxu0 %v2487_v57 }
 0x62d   :  { %2521 = vmatmul.mubr.bf16.vlgmr.msra.gmra.mrb[60].mxu1 %v9048_v48  ;;  %2562 = vmatmul.mubr.bf16.vlgmr.msra.gmra.mrb[64].mxu0 %v9048_v48 }
 0x62e   :  { %2571 = vmatpush1.bf16.msra.mxu1 %v12300_v4  ;;  %2612 = vmatpush1.bf16.msra.mxu0 %v12301_v26 }
 0x62f   :  { %2602 = vmatprep.mubr.bf16.mxu1 %v2487_v57  ;;  %2643 = vmatprep.mubr.bf16.mxu0 %v2487_v57  ;;  %v12422_v57 = vld [vmem:[#allocation95_spill] sm:$0xff] }
 0x630   :  { %2572 = vmatprep.subr.bf16.mxu1 %v12302_v31  ;;  %2613 = vmatprep.subr.bf16.mxu0 %v12303_v33 }
 0x632   :  { %2573 = vmatpush1.bf16.msra.mxu1 %v12304_v32  ;;  %2614 = vmatpush1.bf16.msra.mxu0 %v12305_v40 }
 0x633   :  { %2574 = vmatprep.subr.bf16.mxu1 %v12402_v37  ;;  %2615 = vmatprep.subr.bf16.mxu0 %v12403_v36 }
 0x636   :  { %2575 = vmatpush1.bf16.msra.mxu1 %v12404_v30  ;;  %2616 = vmatpush1.bf16.msra.mxu0 %v12405_v42 }
 0x637   :  { %2576 = vmatprep.subr.bf16.mxu1 %v12406_v0  ;;  %2617 = vmatprep.subr.bf16.mxu0 %v12407_v45 }
 0x63a   :  { %2577 = vmatpush1.bf16.msra.mxu1 %v12408_v22  ;;  %2618 = vmatpush1.bf16.msra.mxu0 %v12409_v44 }
 0x63b   :  { %2578 = vmatprep.subr.bf16.mxu1 %v12410_v51  ;;  %2619 = vmatprep.subr.bf16.mxu0 %v12411_v60 }
 0x63e   :  { %2579 = vmatpush1.bf16.msra.mxu1 %v12412_v55  ;;  %2620 = vmatpush1.bf16.msra.mxu0 %v12413_v47 }
 0x63f   :  { %2580 = vmatprep.subr.bf16.mxu1 %v12414_v8  ;;  %2621 = vmatprep.subr.bf16.mxu0 %v12415_v59  ;;  %v12425_v8 = vld [vmem:[#allocation98_spill] sm:$0xff]  ;;  %v12426_v59 = vld [vmem:[#allocation99_spill] sm:$0xff] }
 0x642   :  { %2581 = vmatpush1.bf16.msra.mxu1 %v12416_v13  ;;  %2622 = vmatpush1.bf16.msra.mxu0 %v12417_v52  ;;  %v12427_v13 = vld [vmem:[#allocation100_spill] sm:$0xff]  ;;  %v12428_v52 = vld [vmem:[#allocation101_spill] sm:$0xff] }
 0x643   :  { %2582 = vmatprep.subr.bf16.mxu1 %v12418_v24  ;;  %2623 = vmatprep.subr.bf16.mxu0 %v12419_v46  ;;  %v12429_v24 = vld [vmem:[#allocation102_spill] sm:$0xff]  ;;  %v12430_v46 = vld [vmem:[#allocation103_spill] sm:$0xff] }
 0x646   :  { %2583 = vmatpush1.bf16.msra.mxu1 %v12420_v58  ;;  %2624 = vmatpush1.bf16.msra.mxu0 %v12421_v3  ;;  %v12431_v58 = vld [vmem:[#allocation104_spill] sm:$0xff]  ;;  %v12432_v3 = vld [vmem:[#allocation105_spill] sm:$0xff] }
 0x647   :  { %2584 = vmatprep.subr.bf16.mxu1 %v12422_v57  ;;  %2625 = vmatprep.subr.bf16.mxu0 %v12423_v50  ;;  %v12433_v57 = vld [vmem:[#allocation106_spill] sm:$0xff]  ;;  %v12434_v50 = vld [vmem:[#allocation107_spill] sm:$0xff] }
 0x64a   :  { %2585 = vmatpush1.bf16.msra.mxu1 %v12424_v43  ;;  %2626 = vmatpush1.bf16.msra.mxu0 %v12425_v8  ;;  %v12435_v43 = vld [vmem:[#allocation108_spill] sm:$0xff]  ;;  %v12436_v8 = vld [vmem:[#allocation109_spill] sm:$0xff] }
 0x64b   :  { %2586 = vmatprep.subr.bf16.mxu1 %v12426_v59  ;;  %2627 = vmatprep.subr.bf16.mxu0 %v12427_v13  ;;  %v12437_v59 = vld [vmem:[#allocation110_spill] sm:$0xff] }
 0x64e   :  { %2587 = vmatpush1.bf16.msra.mxu1 %v12428_v52  ;;  %2628 = vmatpush1.bf16.msra.mxu0 %v12429_v24 }
 0x64f   :  { %2588 = vmatprep.subr.bf16.mxu1 %v12430_v46  ;;  %2629 = vmatprep.subr.bf16.mxu0 %v12431_v58 }
 0x652   :  { %2589 = vmatpush1.bf16.msra.mxu1 %v12432_v3  ;;  %2630 = vmatpush1.bf16.msra.mxu0 %v12433_v57 }
 0x653   :  { %2590 = vmatprep.subr.bf16.mxu1 %v12434_v50  ;;  %2631 = vmatprep.subr.bf16.mxu0 %v12435_v43 }
 0x656   :  { %2591 = vmatpush1.bf16.msra.mxu1 %v12436_v8  ;;  %2632 = vmatpush1.bf16.msra.mxu0 %v12437_v59 }
 0x657   :  { %2592 = vmatprep.subr.bf16.mxu1 %v12342_v9  ;;  %2633 = vmatprep.subr.bf16.mxu0 %v12343_v63 }
 0x65a   :  { %2593 = vmatpush1.bf16.msra.mxu1 %v12344_v16  ;;  %2634 = vmatpush1.bf16.msra.mxu0 %v12345_v61 }
 0x65b   :  { %2594 = vmatprep.subr.bf16.mxu1 %v12346_v5  ;;  %2635 = vmatprep.subr.bf16.mxu0 %v12347_v56 }
 0x65e   :  { %2595 = vmatpush1.bf16.msra.mxu1 %v12348_v39  ;;  %2636 = vmatpush1.bf16.msra.mxu0 %v12349_v6 }
 0x65f   :  { %2596 = vmatprep.subr.bf16.mxu1 %v12350_v14  ;;  %2637 = vmatprep.subr.bf16.mxu0 %v12351_v15 }
 0x662   :  { %2597 = vmatpush1.bf16.msra.mxu1 %v12352_v1  ;;  %2638 = vmatpush1.bf16.msra.mxu0 %v8647_v25 }
 0x663   :  { %2598 = vmatprep.subr.bf16.mxu1 %v8651_v21  ;;  %2639 = vmatprep.subr.bf16.mxu0 %v8653_v2 }
 0x666   :  { %2599 = vmatpush1.bf16.msra.mxu1 %v8669_v23  ;;  %2640 = vmatpush1.bf16.msra.mxu0 %v8671_v49 }
 0x667   :  { %2600 = vmatprep.subr.bf16.mxu1 %v8675_v54  ;;  %2641 = vmatprep.subr.bf16.mxu0 %v8677_v53  ;;  %v12498_v53 = vld [vmem:[#allocation136_spill] sm:$0xff]  ;;  %v12499_v54 = vld [vmem:[#allocation162_spill] sm:$0xff] }
 0x66a   :  { %2601 = vmatpush1.bf16.msra.mxu1 %v8681_v38  ;;  %2642 = vmatpush1.bf16.msra.mxu0 %v8683_v10  ;;  %v12440_v10 = vld [vmem:[#allocation14_spill] sm:$0xff] }
 0x66b   :  { %2710 = vmatprep.subr.bf16.mxu1 %v7897_v7  ;;  %2751 = vmatprep.subr.bf16.mxu0 %v7908_v12  ;;  %v12438_v7 = vld [vmem:[#allocation12_spill] sm:$0xff]  ;;  %v12439_v12 = vld [vmem:[#allocation13_spill] sm:$0xff] }
 0x66d   :  { %2603 = vmatmul.mubr.bf16.vlgmr.msra.gmra.mrb[64].mxu1 %v9048_v48  ;;  %2644 = vmatmul.mubr.bf16.vlgmr.msra.gmra.mrb[68].mxu0 %v9048_v48  ;;  %v12441_v48 = vld [vmem:[#allocation15_spill] sm:$0xff] }
 0x66e   :  { %2711 = vmatpush1.bf16.msra.mxu1 %v7929_v17  ;;  %2752 = vmatpush1.bf16.msra.mxu0 %v7931_v18  ;;  %v12442_v17 = vld [vmem:[#allocation16_spill] sm:$0xff]  ;;  %v12443_v18 = vld [vmem:[#allocation17_spill] sm:$0xff] }
 0x66f   :  { %2712 = vmatprep.subr.bf16.mxu1 %v7933_v19  ;;  %2753 = vmatprep.subr.bf16.mxu0 %v7935_v20  ;;  %v12444_v19 = vld [vmem:[#allocation18_spill] sm:$0xff]  ;;  %v12445_v20 = vld [vmem:[#allocation19_spill] sm:$0xff] }
 0x672   :  { %2713 = vmatpush1.bf16.msra.mxu1 %v7955_v27  ;;  %2754 = vmatpush1.bf16.msra.mxu0 %v7957_v28  ;;  %v12446_v27 = vld [vmem:[#allocation20_spill] sm:$0xff]  ;;  %v12447_v28 = vld [vmem:[#allocation21_spill] sm:$0xff] }
 0x673   :  { %2714 = vmatprep.subr.bf16.mxu1 %v7961_v29  ;;  %2755 = vmatprep.subr.bf16.mxu0 %v12438_v7  ;;  %v12448_v29 = vld [vmem:[#allocation22_spill] sm:$0xff]  ;;  %v12449_v7 = vld [vmem:[#allocation23_spill] sm:$0xff] }
 0x676   :  { %2715 = vmatpush1.bf16.msra.mxu1 %v12439_v12  ;;  %2756 = vmatpush1.bf16.msra.mxu0 %v12440_v10  ;;  %v12450_v12 = vld [vmem:[#allocation24_spill] sm:$0xff]  ;;  %v12451_v10 = vld [vmem:[#allocation25_spill] sm:$0xff] }
 0x677   :  { %2716 = vmatprep.subr.bf16.mxu1 %v12441_v48  ;;  %2757 = vmatprep.subr.bf16.mxu0 %v12442_v17  ;;  %v12452_v48 = vld [vmem:[#allocation26_spill] sm:$0xff]  ;;  %v12453_v17 = vld [vmem:[#allocation27_spill] sm:$0xff] }
 0x67a   :  { %2717 = vmatpush1.bf16.msra.mxu1 %v12443_v18  ;;  %2758 = vmatpush1.bf16.msra.mxu0 %v12444_v19  ;;  %v12454_v18 = vld [vmem:[#allocation28_spill] sm:$0xff]  ;;  %v12455_v19 = vld [vmem:[#allocation29_spill] sm:$0xff] }
 0x67b   :  { %2718 = vmatprep.subr.bf16.mxu1 %v12445_v20  ;;  %2759 = vmatprep.subr.bf16.mxu0 %v12446_v27  ;;  %v12456_v20 = vld [vmem:[#allocation30_spill] sm:$0xff]  ;;  %v12457_v27 = vld [vmem:[#allocation31_spill] sm:$0xff] }
 0x67e   :  { %2719 = vmatpush1.bf16.msra.mxu1 %v12447_v28  ;;  %2760 = vmatpush1.bf16.msra.mxu0 %v12448_v29  ;;  %v12458_v28 = vld [vmem:[#allocation32_spill] sm:$0xff]  ;;  %v12459_v29 = vld [vmem:[#allocation33_spill] sm:$0xff] }
 0x67f   :  { %2720 = vmatprep.subr.bf16.mxu1 %v12449_v7  ;;  %2761 = vmatprep.subr.bf16.mxu0 %v12450_v12  ;;  %v12460_v7 = vld [vmem:[#allocation34_spill] sm:$0xff]  ;;  %v12461_v12 = vld [vmem:[#allocation35_spill] sm:$0xff] }
 0x682   :  { %2721 = vmatpush1.bf16.msra.mxu1 %v12451_v10  ;;  %2762 = vmatpush1.bf16.msra.mxu0 %v12452_v48  ;;  %v12462_v10 = vld [vmem:[#allocation36_spill] sm:$0xff]  ;;  %v12463_v48 = vld [vmem:[#allocation37_spill] sm:$0xff] }
 0x683   :  { %2722 = vmatprep.subr.bf16.mxu1 %v12453_v17  ;;  %2763 = vmatprep.subr.bf16.mxu0 %v12454_v18  ;;  %v12464_v17 = vld [vmem:[#allocation38_spill] sm:$0xff]  ;;  %v12465_v18 = vld [vmem:[#allocation39_spill] sm:$0xff] }
 0x686   :  { %2723 = vmatpush1.bf16.msra.mxu1 %v12455_v19  ;;  %2764 = vmatpush1.bf16.msra.mxu0 %v12456_v20  ;;  %v12466_v19 = vld [vmem:[#allocation40_spill] sm:$0xff]  ;;  %v12467_v20 = vld [vmem:[#allocation41_spill] sm:$0xff] }
 0x687   :  { %2724 = vmatprep.subr.bf16.mxu1 %v12457_v27  ;;  %2765 = vmatprep.subr.bf16.mxu0 %v12458_v28  ;;  %v12468_v27 = vld [vmem:[#allocation42_spill] sm:$0xff]  ;;  %v12469_v28 = vld [vmem:[#allocation43_spill] sm:$0xff] }
 0x68a   :  { %2725 = vmatpush1.bf16.msra.mxu1 %v12459_v29  ;;  %2766 = vmatpush1.bf16.msra.mxu0 %v12460_v7  ;;  %v12470_v29 = vld [vmem:[#allocation44_spill] sm:$0xff]  ;;  %v12471_v7 = vld [vmem:[#allocation45_spill] sm:$0xff] }
 0x68b   :  { %2726 = vmatprep.subr.bf16.mxu1 %v12461_v12  ;;  %2767 = vmatprep.subr.bf16.mxu0 %v12462_v10  ;;  %v12472_v12 = vld [vmem:[#allocation46_spill] sm:$0xff]  ;;  %v12473_v10 = vld [vmem:[#allocation47_spill] sm:$0xff] }
 0x68e   :  { %2727 = vmatpush1.bf16.msra.mxu1 %v12463_v48  ;;  %2768 = vmatpush1.bf16.msra.mxu0 %v12464_v17  ;;  %v12474_v48 = vld [vmem:[#allocation48_spill] sm:$0xff]  ;;  %v12475_v17 = vld [vmem:[#allocation49_spill] sm:$0xff] }
 0x68f   :  { %2728 = vmatprep.subr.bf16.mxu1 %v12465_v18  ;;  %2769 = vmatprep.subr.bf16.mxu0 %v12466_v19  ;;  %v12476_v18 = vld [vmem:[#allocation50_spill] sm:$0xff]  ;;  %v12477_v19 = vld [vmem:[#allocation51_spill] sm:$0xff] }
 0x692   :  { %2729 = vmatpush1.bf16.msra.mxu1 %v12467_v20  ;;  %2770 = vmatpush1.bf16.msra.mxu0 %v12468_v27  ;;  %v12478_v20 = vld [vmem:[#allocation52_spill] sm:$0xff]  ;;  %v12479_v27 = vld [vmem:[#allocation53_spill] sm:$0xff] }
 0x693   :  { %2730 = vmatprep.subr.bf16.mxu1 %v12469_v28  ;;  %2771 = vmatprep.subr.bf16.mxu0 %v12470_v29  ;;  %v12480_v28 = vld [vmem:[#allocation54_spill] sm:$0xff]  ;;  %v12481_v29 = vld [vmem:[#allocation55_spill] sm:$0xff] }
 0x696   :  { %2731 = vmatpush1.bf16.msra.mxu1 %v12471_v7  ;;  %2772 = vmatpush1.bf16.msra.mxu0 %v12472_v12  ;;  %v12482_v7 = vld [vmem:[#allocation56_spill] sm:$0xff]  ;;  %v12483_v12 = vld [vmem:[#allocation57_spill] sm:$0xff] }
 0x697   :  { %2732 = vmatprep.subr.bf16.mxu1 %v12473_v10  ;;  %2773 = vmatprep.subr.bf16.mxu0 %v12474_v48  ;;  %v12484_v10 = vld [vmem:[#allocation58_spill] sm:$0xff]  ;;  %v12485_v48 = vld [vmem:[#allocation59_spill] sm:$0xff] }
 0x69a   :  { %2733 = vmatpush1.bf16.msra.mxu1 %v12475_v17  ;;  %2774 = vmatpush1.bf16.msra.mxu0 %v12476_v18  ;;  %v12486_v17 = vld [vmem:[#allocation60_spill] sm:$0xff]  ;;  %v12487_v18 = vld [vmem:[#allocation61_spill] sm:$0xff] }
 0x69b   :  { %2734 = vmatprep.subr.bf16.mxu1 %v12477_v19  ;;  %2775 = vmatprep.subr.bf16.mxu0 %v12478_v20  ;;  %v12488_v19 = vld [vmem:[#allocation62_spill] sm:$0xff]  ;;  %v12489_v20 = vld [vmem:[#allocation63_spill] sm:$0xff] }
 0x69e   :  { %2735 = vmatpush1.bf16.msra.mxu1 %v12479_v27  ;;  %2776 = vmatpush1.bf16.msra.mxu0 %v12480_v28  ;;  %v12490_v27 = vld [vmem:[#allocation64_spill] sm:$0xff]  ;;  %v12491_v28 = vld [vmem:[#allocation65_spill] sm:$0xff] }
 0x69f   :  { %2736 = vmatprep.subr.bf16.mxu1 %v12481_v29  ;;  %2777 = vmatprep.subr.bf16.mxu0 %v12482_v7  ;;  %v12492_v29 = vld [vmem:[#allocation66_spill] sm:$0xff]  ;;  %v12493_v7 = vld [vmem:[#allocation67_spill] sm:$0xff] }
 0x6a2   :  { %2737 = vmatpush1.bf16.msra.mxu1 %v12483_v12  ;;  %2778 = vmatpush1.bf16.msra.mxu0 %v12484_v10  ;;  %v12494_v12 = vld [vmem:[#allocation68_spill] sm:$0xff] }
 0x6a3   :  { %2738 = vmatprep.subr.bf16.mxu1 %v12485_v48  ;;  %2779 = vmatprep.subr.bf16.mxu0 %v12486_v17  ;;  %v12495_v10 = vld [vmem:[#allocation160_spill] sm:$0xff]  ;;  %v12496_v48 = vld [vmem:[#allocation135_spill] sm:$0xff]  ;;  %v12497_v17 = vld [vmem:[#allocation161_spill] sm:$0xff] }
 0x6a4   :  { %v1076_v38 = vadd.f32 %v12496_v48, %v12495_v10 }
 0x6a6   :  { %2739 = vmatpush1.bf16.msra.mxu1 %v12487_v18  ;;  %2780 = vmatpush1.bf16.msra.mxu0 %v12488_v19  ;;  %v1137_v18 = vadd.f32 %v12498_v53, %v12497_v17  ;;  %v12500_v19 = vld [vmem:[#allocation137_spill] sm:$0xff] }
 0x6a7   :  { %2740 = vmatprep.subr.bf16.mxu1 %v12489_v20  ;;  %2781 = vmatprep.subr.bf16.mxu0 %v12490_v27  ;;  %v1078_v49 = vadd.f32 %v12500_v19, %v12499_v54  ;;  %v12501_v20 = vld [vmem:[#allocation138_spill] sm:$0xff] }
 0x6a8   :  { %v1139_v27 = vadd.f32 %v12501_v20, %v8836_v34 }
 0x6aa   :  { %2741 = vmatpush1.bf16.msra.mxu1 %v12491_v28  ;;  %2782 = vmatpush1.bf16.msra.mxu0 %v12492_v29 }
 0x6ab   :  { %2792 = vmatprep.subr.bf16.mxu1 %v12493_v7  ;;  %2833 = vmatprep.subr.bf16.mxu0 %v12494_v12 }
 0x700   :  { %v2522_v23 = vpop.f32.mrb[60].mxu1  ;;  %v2563_v28 = vpop.f32.mrb[64].mxu0 }
 0x701   :  { %v2652_v2 = vadd.f32 %v2522_v23, %v1076_v38  ;;  %v2654_v29 = vadd.f32 %v2563_v28, %v1137_v18  ;;  %v2524_v21 = vpop.f32.mrb[61].mxu1  ;;  %v2565_v7 = vpop.f32.mrb[65].mxu0 }
 0x702   :  { %v2653_v25 = vadd.f32 %v2524_v21, %v1078_v49  ;;  %v2655_v12 = vadd.f32 %v2565_v7, %v1139_v27  ;;  %v2526_v1 = vpop.f32.mrb[62].mxu1  ;;  %v2567_v15 = vpop.f32.mrb[66].mxu0  ;;  %v12504_v49 = vld [vmem:[#allocation165_spill] sm:$0xff] }
 0x703   :  { %v6523_v48 = vmul.f32 -1.442695, %v2652_v2  ;;  %v2527_v10 = vpop.f32.mrb[63].mxu1  ;;  %v2568_v14 = vpop.f32.mrb[67].mxu0  ;;  %v12502_v2 = vld [vmem:[#allocation151_spill] sm:$0xff] }
 0x704   :  { %v6524_v53 = vmul.f32 -1.442695, %v2653_v25  ;;  %v1198_v10 = vadd.f32 %v12502_v2, %v8848_v11  ;;  %v12503_v25 = vld [vmem:[#allocation152_spill] sm:$0xff]  ;;  %v12505_v14 = vld [vmem:[#allocation153_spill] sm:$0xff] }
 0x705   :  { %7179 = vpow2.f32 %v6523_v48  ;;  %v1259_v23 = vadd.f32 %v12503_v25, %v8865_v41 }
 0x706   :  { %7181 = vpow2.f32 %v6524_v53 }
 0x707   :  { %7183 = vtanh.f32 %v2654_v29  ;;  %v1200_v29 = vadd.f32 %v12505_v14, %v12504_v49  ;;  %v6525_v14 = vmul.f32 -1.442695, %v2655_v12 }
 0x70f   :  { %v7180_v19 = vpop.eup %7179 }
 0x710   :  { %v7182_v54 = vpop.eup %7181  ;;  %v2663_v17 = vadd.f32 1.0, %v7180_v19 }
 0x711   :  { %v2669_v20 = vadd.f32 1.0, %v7182_v54  ;;  %v7184_v18 = vpop.eup %7183  ;;  %v12506_v54 = vld [vmem:[#allocation166_spill] sm:$0xff] }
 0x712   :  { %7185 = vrcp.f32 %v2663_v17  ;;  %v12507_v17 = vld [vmem:[#allocation154_spill] sm:$0xff] }
 0x713   :  { %7187 = vrcp.f32 %v2669_v20  ;;  %v1261_v15 = vadd.f32 %v12507_v17, %v12506_v54 }
 0x71c   :  { %v7186_v28 = vpop.eup %7185 }
 0x71d   :  { %v7188_v38 = vpop.eup %7187  ;;  %v2680_v21 = vmul.f32 %v7186_v28, %v7184_v18 }
 0x71e   :  { %v2679_v7 = vmul.f32 %v7188_v38, %v9025_v35 }
 0x720   :  { %v9191_v27 = vadd.f32 %v2680_v21, %v2679_v7 }
 0x740   :  { %v2604_v1 = vpop.f32.mrb[64].mxu1  ;;  %v2645_v48 = vpop.f32.mrb[68].mxu0 }
 0x741   :  { %v2656_v53 = vadd.f32 %v2604_v1, %v1198_v10  ;;  %v2658_v19 = vadd.f32 %v2645_v48, %v1259_v23  ;;  %v2606_v20 = vpop.f32.mrb[65].mxu1  ;;  %v2647_v35 = vpop.f32.mrb[69].mxu0 }
 0x742   :  { %v2657_v18 = vadd.f32 %v2606_v20, %v1200_v29  ;;  %v2659_v28 = vadd.f32 %v2647_v35, %v1261_v15  ;;  %v2608_v38 = vpop.f32.mrb[66].mxu1  ;;  %v2649_v21 = vpop.f32.mrb[70].mxu0 }
 0x743   :  { %v6526_v7 = vmul.f32 -1.442695, %v2656_v53  ;;  %v2609_v2 = vpop.f32.mrb[67].mxu1  ;;  %v2650_v11 = vpop.f32.mrb[71].mxu0  ;;  %v12510_v21 = vld [vmem:[#allocation87_spill] sm:$0xff] }
 0x744   :  { %v6527_v25 = vmul.f32 -1.442695, %v2657_v18  ;;  %v6528_v49 = vmul.f32 -1.442695, %v2659_v28  ;;  %v12512_v2 = vld [vmem:[#allocation89_spill] sm:$0xff] }
 0x745   :  { %7189 = vpow2.f32 %v6526_v7  ;;  %v12511_v7 = vld [vmem:[#allocation88_spill] sm:$0xff] }
 0x746   :  { %7191 = vpow2.f32 %v6527_v25  ;;  %v12513_v25 = vld [vmem:[#allocation90_spill] sm:$0xff] }
 0x747   :  { %7193 = vpow2.f32 %v6525_v14  ;;  %v12514_v14 = vld [vmem:[#allocation91_spill] sm:$0xff] }
 0x748   :  { %7195 = vpow2.f32 %v6528_v49 }
 0x749   :  { %7197 = vtanh.f32 %v2658_v19 }
 0x74f   :  { %v7190_v41 = vpop.eup %7189 }
 0x750   :  { %v7192_v17 = vpop.eup %7191  ;;  %v2687_v54 = vadd.f32 1.0, %v7190_v41 }
 0x751   :  { %v2693_v10 = vadd.f32 1.0, %v7192_v17  ;;  %v7194_v23 = vpop.eup %7193  ;;  %v12515_v17 = vld [vmem:[#allocation92_spill] sm:$0xff] }
 0x752   :  { %7199 = vrcp.f32 %v2687_v54  ;;  %v7196_v29 = vpop.eup %7195  ;;  %v2676_v48 = vadd.f32 1.0, %v7194_v23  ;;  %v12517_v23 = vld [vmem:[#allocation94_spill] sm:$0xff] }
 0x753   :  { %7201 = vrcp.f32 %v2693_v10  ;;  %v7198_v15 = vpop.eup %7197  ;;  %v2700_v20 = vadd.f32 1.0, %v7196_v29  ;;  %v12516_v10 = vld [vmem:[#allocation93_spill] sm:$0xff]  ;;  %v12518_v29 = vld [vmem:[#allocation95_spill] sm:$0xff] }
 0x754   :  { %7203 = vtanh.f32 %v9191_v27 }
 0x755   :  { %7205 = vrcp.f32 %v2676_v48  ;;  %v12521_v48 = vld [vmem:[#allocation98_spill] sm:$0xff] }
 0x756   :  { %7207 = vrcp.f32 %v2700_v20  ;;  %v12524_v20 = vld [vmem:[#allocation120_spill] sm:$0xff] }
 0x75c   :  { %v7200_v1 = vpop.eup %7199 }
 0x75d   :  { %v7202_v11 = vpop.eup %7201  ;;  %v2704_v53 = vmul.f32 %v7200_v1, %v7198_v15  ;;  %v12519_v15 = vld [vmem:[#allocation96_spill] sm:$0xff]  ;;  %v12520_v1 = vld [vmem:[#allocation97_spill] sm:$0xff] }
 0x75e   :  { %v2703_v12 = vmul.f32 %v7202_v11, %v9037_v62  ;;  %v7204_v41 = vpop.eup %7203  ;;  %v12522_v11 = vld [vmem:[#allocation99_spill] sm:$0xff] }
 0x75f   :  { %v7206_v49 = vpop.eup %7205 }
 0x760   :  { %v9203_v35 = vadd.f32 %v2704_v53, %v2703_v12  ;;  %v7208_v54 = vpop.eup %7207  ;;  %v9206_v18 = vmul.f32 %v7206_v49, %v7204_v41  ;;  %v12523_v53 = vld [vmem:[#allocation119_spill] sm:$0xff]  ;;  %v12525_v12 = vld [vmem:[#allocation121_spill] sm:$0xff]  ;;  %v12526_v41 = vld [vmem:[#allocation122_spill] sm:$0xff] }
 0x761   :  { %v12527_v49 = vld [vmem:[#allocation123_spill] sm:$0xff] }
 0x762   :  { %7209 = vtanh.f32 %v9203_v35  ;;  %12508 = vst [vmem:[#allocation71_spill] sm:$0xff] %v9206_v18  ;;  %v9214_v62 = vpack.c.bf16 %v9206_v18, %v9206_v18  ;;  %v12531_v18 = vld [vmem:[#allocation127_spill] sm:$0xff] }
 0x76c   :  { %v7210_v19 = vpop.eup %7209 }
 0x76d   :  { %v9208_v28 = vmul.f32 %v7210_v19, %v7208_v54  ;;  %v12528_v54 = vld [vmem:[#allocation124_spill] sm:$0xff]  ;;  %v12529_v19 = vld [vmem:[#allocation125_spill] sm:$0xff] }
 0x76f   :  { %12509 = vst [vmem:[#allocation72_spill] sm:$0xff] %v9208_v28  ;;  %v2709_v38 = vpack.c.bf16 %v9208_v28, %v9208_v28  ;;  %v12532_v28 = vld [vmem:[#allocation128_spill] sm:$0xff] }
 0x771   :  { %2742 = vmatprep.mubr.bf16.mxu1 %v2709_v38  ;;  %2783 = vmatprep.mubr.bf16.mxu0 %v2709_v38 }
 0x772   :  { %2743 = vmatmul.mubr.bf16.vlgmr.msra.gmra.mrb[68].mxu1 %v9214_v62  ;;  %2784 = vmatmul.mubr.bf16.vlgmr.msra.gmra.mrb[72].mxu0 %v9214_v62 }
 0x773   :  { %2793 = vmatpush1.bf16.msra.mxu1 %v12300_v4  ;;  %2834 = vmatpush1.bf16.msra.mxu0 %v12301_v26 }
 0x774   :  { %2824 = vmatprep.mubr.bf16.mxu1 %v2709_v38  ;;  %2865 = vmatprep.mubr.bf16.mxu0 %v2709_v38  ;;  %v12530_v38 = vld [vmem:[#allocation126_spill] sm:$0xff] }
 0x775   :  { %2794 = vmatprep.subr.bf16.mxu1 %v12302_v31  ;;  %2835 = vmatprep.subr.bf16.mxu0 %v12303_v33 }
 0x777   :  { %2795 = vmatpush1.bf16.msra.mxu1 %v12304_v32  ;;  %2836 = vmatpush1.bf16.msra.mxu0 %v12305_v40 }
 0x778   :  { %2796 = vmatprep.subr.bf16.mxu1 %v12402_v37  ;;  %2837 = vmatprep.subr.bf16.mxu0 %v12403_v36 }
 0x77b   :  { %2797 = vmatpush1.bf16.msra.mxu1 %v12404_v30  ;;  %2838 = vmatpush1.bf16.msra.mxu0 %v12405_v42 }
 0x77c   :  { %2798 = vmatprep.subr.bf16.mxu1 %v12406_v0  ;;  %2839 = vmatprep.subr.bf16.mxu0 %v12407_v45 }
 0x77f   :  { %2799 = vmatpush1.bf16.msra.mxu1 %v12408_v22  ;;  %2840 = vmatpush1.bf16.msra.mxu0 %v12409_v44 }
 0x780   :  { %2800 = vmatprep.subr.bf16.mxu1 %v12410_v51  ;;  %2841 = vmatprep.subr.bf16.mxu0 %v12411_v60 }
 0x783   :  { %2801 = vmatpush1.bf16.msra.mxu1 %v12412_v55  ;;  %2842 = vmatpush1.bf16.msra.mxu0 %v12413_v47 }
 0x784   :  { %2802 = vmatprep.subr.bf16.mxu1 %v12510_v21  ;;  %2843 = vmatprep.subr.bf16.mxu0 %v12511_v7 }
 0x787   :  { %2803 = vmatpush1.bf16.msra.mxu1 %v12512_v2  ;;  %2844 = vmatpush1.bf16.msra.mxu0 %v12513_v25 }
 0x788   :  { %2804 = vmatprep.subr.bf16.mxu1 %v12514_v14  ;;  %2845 = vmatprep.subr.bf16.mxu0 %v12515_v17 }
 0x78b   :  { %2805 = vmatpush1.bf16.msra.mxu1 %v12516_v10  ;;  %2846 = vmatpush1.bf16.msra.mxu0 %v12517_v23 }
 0x78c   :  { %2806 = vmatprep.subr.bf16.mxu1 %v12518_v29  ;;  %2847 = vmatprep.subr.bf16.mxu0 %v12519_v15 }
 0x78f   :  { %2807 = vmatpush1.bf16.msra.mxu1 %v12520_v1  ;;  %2848 = vmatpush1.bf16.msra.mxu0 %v12521_v48 }
 0x790   :  { %2808 = vmatprep.subr.bf16.mxu1 %v12522_v11  ;;  %2849 = vmatprep.subr.bf16.mxu0 %v12427_v13 }
 0x793   :  { %2809 = vmatpush1.bf16.msra.mxu1 %v12428_v52  ;;  %2850 = vmatpush1.bf16.msra.mxu0 %v12429_v24 }
 0x794   :  { %2810 = vmatprep.subr.bf16.mxu1 %v12430_v46  ;;  %2851 = vmatprep.subr.bf16.mxu0 %v12431_v58 }
 0x797   :  { %2811 = vmatpush1.bf16.msra.mxu1 %v12432_v3  ;;  %2852 = vmatpush1.bf16.msra.mxu0 %v12433_v57 }
 0x798   :  { %2812 = vmatprep.subr.bf16.mxu1 %v12434_v50  ;;  %2853 = vmatprep.subr.bf16.mxu0 %v12435_v43 }
 0x79b   :  { %2813 = vmatpush1.bf16.msra.mxu1 %v12436_v8  ;;  %2854 = vmatpush1.bf16.msra.mxu0 %v12437_v59 }
 0x79c   :  { %2814 = vmatprep.subr.bf16.mxu1 %v12342_v9  ;;  %2855 = vmatprep.subr.bf16.mxu0 %v12343_v63 }
 0x79f   :  { %2815 = vmatpush1.bf16.msra.mxu1 %v12344_v16  ;;  %2856 = vmatpush1.bf16.msra.mxu0 %v12345_v61 }
 0x7a0   :  { %2816 = vmatprep.subr.bf16.mxu1 %v12346_v5  ;;  %2857 = vmatprep.subr.bf16.mxu0 %v12347_v56  ;;  %v12605_v56 = vld [vmem:[#allocation162_spill] sm:$0xff] }
 0x7a3   :  { %2817 = vmatpush1.bf16.msra.mxu1 %v12348_v39  ;;  %2858 = vmatpush1.bf16.msra.mxu0 %v12349_v6  ;;  %v12533_v6 = vld [vmem:[#allocation129_spill] sm:$0xff]  ;;  %v12604_v39 = vld [vmem:[#allocation140_spill] sm:$0xff] }
 0x7a4   :  { %2818 = vmatprep.subr.bf16.mxu1 %v12523_v53  ;;  %2859 = vmatprep.subr.bf16.mxu0 %v12524_v20  ;;  %v12534_v53 = vld [vmem:[#allocation130_spill] sm:$0xff]  ;;  %v12535_v20 = vld [vmem:[#allocation3_spill] sm:$0xff] }
 0x7a7   :  { %2819 = vmatpush1.bf16.msra.mxu1 %v12525_v12  ;;  %2860 = vmatpush1.bf16.msra.mxu0 %v12526_v41  ;;  %v12536_v12 = vld [vmem:[#allocation4_spill] sm:$0xff] }
 0x7a8   :  { %2820 = vmatprep.subr.bf16.mxu1 %v12527_v49  ;;  %2861 = vmatprep.subr.bf16.mxu0 %v12528_v54  ;;  %v12537_v54 = vld [vmem:[#allocation5_spill] sm:$0xff]  ;;  %v12546_v49 = vld [vmem:[#allocation14_spill] sm:$0xff] }
 0x7ab   :  { %2821 = vmatpush1.bf16.msra.mxu1 %v12529_v19  ;;  %2862 = vmatpush1.bf16.msra.mxu0 %v12530_v38  ;;  %v12538_v19 = vld [vmem:[#allocation6_spill] sm:$0xff]  ;;  %v12539_v38 = vld [vmem:[#allocation7_spill] sm:$0xff] }
 0x7ac   :  { %2822 = vmatprep.subr.bf16.mxu1 %v12531_v18  ;;  %2863 = vmatprep.subr.bf16.mxu0 %v12532_v28  ;;  %v12540_v18 = vld [vmem:[#allocation8_spill] sm:$0xff]  ;;  %v12541_v28 = vld [vmem:[#allocation9_spill] sm:$0xff] }
 0x7af   :  { %2823 = vmatpush1.bf16.msra.mxu1 %v12533_v6  ;;  %2864 = vmatpush1.bf16.msra.mxu0 %v12534_v53  ;;  %v12542_v6 = vld [vmem:[#allocation10_spill] sm:$0xff]  ;;  %v12543_v53 = vld [vmem:[#allocation11_spill] sm:$0xff] }
 0x7b0   :  { %2932 = vmatprep.subr.bf16.mxu1 %v12535_v20  ;;  %2973 = vmatprep.subr.bf16.mxu0 %v12536_v12  ;;  %v12544_v20 = vld [vmem:[#allocation12_spill] sm:$0xff]  ;;  %v12545_v12 = vld [vmem:[#allocation13_spill] sm:$0xff] }
 0x7b2   :  { %2825 = vmatmul.mubr.bf16.vlgmr.msra.gmra.mrb[72].mxu1 %v9214_v62  ;;  %2866 = vmatmul.mubr.bf16.vlgmr.msra.gmra.mrb[76].mxu0 %v9214_v62  ;;  %v12547_v62 = vld [vmem:[#allocation15_spill] sm:$0xff] }
 0x7b3   :  { %2933 = vmatpush1.bf16.msra.mxu1 %v12537_v54  ;;  %2974 = vmatpush1.bf16.msra.mxu0 %v12538_v19  ;;  %v12548_v54 = vld [vmem:[#allocation16_spill] sm:$0xff]  ;;  %v12549_v19 = vld [vmem:[#allocation17_spill] sm:$0xff] }
 0x7b4   :  { %2934 = vmatprep.subr.bf16.mxu1 %v12539_v38  ;;  %2975 = vmatprep.subr.bf16.mxu0 %v12540_v18  ;;  %v12550_v38 = vld [vmem:[#allocation18_spill] sm:$0xff]  ;;  %v12551_v18 = vld [vmem:[#allocation19_spill] sm:$0xff] }
 0x7b7   :  { %2935 = vmatpush1.bf16.msra.mxu1 %v12541_v28  ;;  %2976 = vmatpush1.bf16.msra.mxu0 %v12542_v6  ;;  %v12552_v28 = vld [vmem:[#allocation20_spill] sm:$0xff]  ;;  %v12553_v6 = vld [vmem:[#allocation21_spill] sm:$0xff] }
 0x7b8   :  { %2936 = vmatprep.subr.bf16.mxu1 %v12543_v53  ;;  %2977 = vmatprep.subr.bf16.mxu0 %v12544_v20  ;;  %v12554_v53 = vld [vmem:[#allocation22_spill] sm:$0xff]  ;;  %v12555_v20 = vld [vmem:[#allocation23_spill] sm:$0xff] }
 0x7bb   :  { %2937 = vmatpush1.bf16.msra.mxu1 %v12545_v12  ;;  %2978 = vmatpush1.bf16.msra.mxu0 %v12546_v49  ;;  %v12556_v12 = vld [vmem:[#allocation24_spill] sm:$0xff]  ;;  %v12557_v49 = vld [vmem:[#allocation25_spill] sm:$0xff] }
 0x7bc   :  { %2938 = vmatprep.subr.bf16.mxu1 %v12547_v62  ;;  %2979 = vmatprep.subr.bf16.mxu0 %v12548_v54  ;;  %v12558_v62 = vld [vmem:[#allocation26_spill] sm:$0xff]  ;;  %v12559_v54 = vld [vmem:[#allocation27_spill] sm:$0xff] }
 0x7bf   :  { %2939 = vmatpush1.bf16.msra.mxu1 %v12549_v19  ;;  %2980 = vmatpush1.bf16.msra.mxu0 %v12550_v38  ;;  %v12560_v19 = vld [vmem:[#allocation28_spill] sm:$0xff]  ;;  %v12561_v38 = vld [vmem:[#allocation29_spill] sm:$0xff] }
 0x7c0   :  { %2940 = vmatprep.subr.bf16.mxu1 %v12551_v18  ;;  %2981 = vmatprep.subr.bf16.mxu0 %v12552_v28  ;;  %v12562_v18 = vld [vmem:[#allocation30_spill] sm:$0xff]  ;;  %v12563_v28 = vld [vmem:[#allocation31_spill] sm:$0xff] }
 0x7c3   :  { %2941 = vmatpush1.bf16.msra.mxu1 %v12553_v6  ;;  %2982 = vmatpush1.bf16.msra.mxu0 %v12554_v53  ;;  %v12564_v6 = vld [vmem:[#allocation32_spill] sm:$0xff]  ;;  %v12565_v53 = vld [vmem:[#allocation33_spill] sm:$0xff] }
 0x7c4   :  { %2942 = vmatprep.subr.bf16.mxu1 %v12555_v20  ;;  %2983 = vmatprep.subr.bf16.mxu0 %v12556_v12  ;;  %v12566_v20 = vld [vmem:[#allocation34_spill] sm:$0xff]  ;;  %v12567_v12 = vld [vmem:[#allocation35_spill] sm:$0xff] }
 0x7c7   :  { %2943 = vmatpush1.bf16.msra.mxu1 %v12557_v49  ;;  %2984 = vmatpush1.bf16.msra.mxu0 %v12558_v62  ;;  %v12568_v49 = vld [vmem:[#allocation36_spill] sm:$0xff]  ;;  %v12569_v62 = vld [vmem:[#allocation37_spill] sm:$0xff] }
 0x7c8   :  { %2944 = vmatprep.subr.bf16.mxu1 %v12559_v54  ;;  %2985 = vmatprep.subr.bf16.mxu0 %v12560_v19  ;;  %v12570_v54 = vld [vmem:[#allocation38_spill] sm:$0xff]  ;;  %v12571_v19 = vld [vmem:[#allocation39_spill] sm:$0xff] }
 0x7cb   :  { %2945 = vmatpush1.bf16.msra.mxu1 %v12561_v38  ;;  %2986 = vmatpush1.bf16.msra.mxu0 %v12562_v18  ;;  %v12572_v38 = vld [vmem:[#allocation40_spill] sm:$0xff]  ;;  %v12573_v18 = vld [vmem:[#allocation41_spill] sm:$0xff] }
 0x7cc   :  { %2946 = vmatprep.subr.bf16.mxu1 %v12563_v28  ;;  %2987 = vmatprep.subr.bf16.mxu0 %v12564_v6  ;;  %v12574_v28 = vld [vmem:[#allocation42_spill] sm:$0xff]  ;;  %v12575_v6 = vld [vmem:[#allocation43_spill] sm:$0xff] }
 0x7cf   :  { %2947 = vmatpush1.bf16.msra.mxu1 %v12565_v53  ;;  %2988 = vmatpush1.bf16.msra.mxu0 %v12566_v20  ;;  %v12576_v53 = vld [vmem:[#allocation44_spill] sm:$0xff]  ;;  %v12577_v20 = vld [vmem:[#allocation45_spill] sm:$0xff] }
 0x7d0   :  { %2948 = vmatprep.subr.bf16.mxu1 %v12567_v12  ;;  %2989 = vmatprep.subr.bf16.mxu0 %v12568_v49  ;;  %v12578_v12 = vld [vmem:[#allocation46_spill] sm:$0xff]  ;;  %v12579_v49 = vld [vmem:[#allocation47_spill] sm:$0xff] }
 0x7d3   :  { %2949 = vmatpush1.bf16.msra.mxu1 %v12569_v62  ;;  %2990 = vmatpush1.bf16.msra.mxu0 %v12570_v54  ;;  %v12580_v62 = vld [vmem:[#allocation48_spill] sm:$0xff]  ;;  %v12581_v54 = vld [vmem:[#allocation49_spill] sm:$0xff] }
 0x7d4   :  { %2950 = vmatprep.subr.bf16.mxu1 %v12571_v19  ;;  %2991 = vmatprep.subr.bf16.mxu0 %v12572_v38  ;;  %v12582_v19 = vld [vmem:[#allocation50_spill] sm:$0xff]  ;;  %v12583_v38 = vld [vmem:[#allocation51_spill] sm:$0xff] }
 0x7d7   :  { %2951 = vmatpush1.bf16.msra.mxu1 %v12573_v18  ;;  %2992 = vmatpush1.bf16.msra.mxu0 %v12574_v28  ;;  %v12584_v18 = vld [vmem:[#allocation52_spill] sm:$0xff]  ;;  %v12585_v28 = vld [vmem:[#allocation53_spill] sm:$0xff] }
 0x7d8   :  { %2952 = vmatprep.subr.bf16.mxu1 %v12575_v6  ;;  %2993 = vmatprep.subr.bf16.mxu0 %v12576_v53  ;;  %v12586_v6 = vld [vmem:[#allocation54_spill] sm:$0xff]  ;;  %v12587_v53 = vld [vmem:[#allocation55_spill] sm:$0xff] }
 0x7db   :  { %2953 = vmatpush1.bf16.msra.mxu1 %v12577_v20  ;;  %2994 = vmatpush1.bf16.msra.mxu0 %v12578_v12  ;;  %v12588_v20 = vld [vmem:[#allocation56_spill] sm:$0xff]  ;;  %v12589_v12 = vld [vmem:[#allocation57_spill] sm:$0xff] }
 0x7dc   :  { %2954 = vmatprep.subr.bf16.mxu1 %v12579_v49  ;;  %2995 = vmatprep.subr.bf16.mxu0 %v12580_v62  ;;  %v12590_v49 = vld [vmem:[#allocation58_spill] sm:$0xff]  ;;  %v12591_v62 = vld [vmem:[#allocation59_spill] sm:$0xff] }
 0x7df   :  { %2955 = vmatpush1.bf16.msra.mxu1 %v12581_v54  ;;  %2996 = vmatpush1.bf16.msra.mxu0 %v12582_v19  ;;  %v12592_v54 = vld [vmem:[#allocation60_spill] sm:$0xff]  ;;  %v12593_v19 = vld [vmem:[#allocation61_spill] sm:$0xff] }
 0x7e0   :  { %2956 = vmatprep.subr.bf16.mxu1 %v12583_v38  ;;  %2997 = vmatprep.subr.bf16.mxu0 %v12584_v18  ;;  %v12594_v38 = vld [vmem:[#allocation62_spill] sm:$0xff]  ;;  %v12595_v18 = vld [vmem:[#allocation63_spill] sm:$0xff] }
 0x7e3   :  { %2957 = vmatpush1.bf16.msra.mxu1 %v12585_v28  ;;  %2998 = vmatpush1.bf16.msra.mxu0 %v12586_v6  ;;  %v12596_v28 = vld [vmem:[#allocation64_spill] sm:$0xff]  ;;  %v12597_v6 = vld [vmem:[#allocation65_spill] sm:$0xff] }
 0x7e4   :  { %2958 = vmatprep.subr.bf16.mxu1 %v12587_v53  ;;  %2999 = vmatprep.subr.bf16.mxu0 %v12588_v20  ;;  %v12598_v53 = vld [vmem:[#allocation66_spill] sm:$0xff]  ;;  %v12599_v20 = vld [vmem:[#allocation67_spill] sm:$0xff] }
 0x7e7   :  { %2959 = vmatpush1.bf16.msra.mxu1 %v12589_v12  ;;  %3000 = vmatpush1.bf16.msra.mxu0 %v12590_v49  ;;  %v12600_v12 = vld [vmem:[#allocation68_spill] sm:$0xff] }
 0x7e8   :  { %2960 = vmatprep.subr.bf16.mxu1 %v12591_v62  ;;  %3001 = vmatprep.subr.bf16.mxu0 %v12592_v54  ;;  %v12601_v49 = vld [vmem:[#allocation160_spill] sm:$0xff]  ;;  %v12602_v62 = vld [vmem:[#allocation139_spill] sm:$0xff]  ;;  %v12603_v54 = vld [vmem:[#allocation161_spill] sm:$0xff] }
 0x7e9   :  { %v1080_v41 = vadd.f32 %v12602_v62, %v12601_v49 }
 0x7eb   :  { %2961 = vmatpush1.bf16.msra.mxu1 %v12593_v19  ;;  %3002 = vmatpush1.bf16.msra.mxu0 %v12594_v38  ;;  %v1141_v19 = vadd.f32 %v12604_v39, %v12603_v54  ;;  %v12606_v38 = vld [vmem:[#allocation141_spill] sm:$0xff] }
 0x7ec   :  { %2962 = vmatprep.subr.bf16.mxu1 %v12595_v18  ;;  %3003 = vmatprep.subr.bf16.mxu0 %v12596_v28  ;;  %v1082_v5 = vadd.f32 %v12606_v38, %v12605_v56  ;;  %v12607_v18 = vld [vmem:[#allocation142_spill] sm:$0xff] }
 0x7ed   :  { %v1143_v28 = vadd.f32 %v12607_v18, %v8836_v34 }
 0x7ef   :  { %2963 = vmatpush1.bf16.msra.mxu1 %v12597_v6  ;;  %3004 = vmatpush1.bf16.msra.mxu0 %v12598_v53 }
 0x7f0   :  { %3014 = vmatprep.subr.bf16.mxu1 %v12599_v20  ;;  %3055 = vmatprep.subr.bf16.mxu0 %v12600_v12 }
 0x845   :  { %v2744_v61 = vpop.f32.mrb[68].mxu1  ;;  %v2785_v6 = vpop.f32.mrb[72].mxu0 }
 0x846   :  { %v2874_v16 = vadd.f32 %v2744_v61, %v1080_v41  ;;  %v2876_v53 = vadd.f32 %v2785_v6, %v1141_v19  ;;  %v2746_v63 = vpop.f32.mrb[69].mxu1  ;;  %v2787_v20 = vpop.f32.mrb[73].mxu0  ;;  %v12612_v6 = vld [vmem:[#allocation165_spill] sm:$0xff] }
 0x847   :  { %v2875_v9 = vadd.f32 %v2746_v63, %v1082_v5  ;;  %v2877_v12 = vadd.f32 %v2787_v20, %v1143_v28  ;;  %v2748_v59 = vpop.f32.mrb[70].mxu1  ;;  %v2789_v8 = vpop.f32.mrb[74].mxu0  ;;  %v12613_v20 = vld [vmem:[#allocation149_spill] sm:$0xff] }
 0x848   :  { %v6529_v62 = vmul.f32 -1.442695, %v2874_v16  ;;  %v2749_v49 = vpop.f32.mrb[71].mxu1  ;;  %v2790_v43 = vpop.f32.mrb[75].mxu0  ;;  %v12608_v16 = vld [vmem:[#allocation164_spill] sm:$0xff]  ;;  %v12610_v59 = vld [vmem:[#allocation167_spill] sm:$0xff] }
 0x849   :  { %v6530_v39 = vmul.f32 -1.442695, %v2875_v9  ;;  %v12609_v43 = vld [vmem:[#allocation147_spill] sm:$0xff]  ;;  %v12611_v49 = vld [vmem:[#allocation148_spill] sm:$0xff] }
 0x84a   :  { %7211 = vpow2.f32 %v6529_v62  ;;  %v1192_v9 = vadd.f32 %v12609_v43, %v12608_v16  ;;  %v1253_v28 = vadd.f32 %v12611_v49, %v12610_v59 }
 0x84b   :  { %7213 = vpow2.f32 %v6530_v39 }
 0x84c   :  { %7215 = vtanh.f32 %v2876_v53  ;;  %v1194_v53 = vadd.f32 %v12613_v20, %v12612_v6  ;;  %v6531_v20 = vmul.f32 -1.442695, %v2877_v12 }
 0x854   :  { %v7212_v38 = vpop.eup %7211 }
 0x855   :  { %v7214_v54 = vpop.eup %7213  ;;  %v2885_v56 = vadd.f32 1.0, %v7212_v38 }
 0x856   :  { %v2891_v18 = vadd.f32 1.0, %v7214_v54  ;;  %v7216_v61 = vpop.eup %7215  ;;  %v12614_v54 = vld [vmem:[#allocation166_spill] sm:$0xff] }
 0x857   :  { %7217 = vrcp.f32 %v2885_v56  ;;  %v12615_v56 = vld [vmem:[#allocation150_spill] sm:$0xff] }
 0x858   :  { %7219 = vrcp.f32 %v2891_v18  ;;  %v1255_v62 = vadd.f32 %v12615_v56, %v12614_v54 }
 0x861   :  { %v7218_v41 = vpop.eup %7217 }
 0x862   :  { %v7220_v19 = vpop.eup %7219  ;;  %v2902_v5 = vmul.f32 %v7218_v41, %v7216_v61 }
 0x863   :  { %v2901_v63 = vmul.f32 %v7220_v19, %v9191_v27 }
 0x865   :  { %v9357_v8 = vadd.f32 %v2902_v5, %v2901_v63 }
 0x885   :  { %v2826_v39 = vpop.f32.mrb[72].mxu1  ;;  %v2867_v38 = vpop.f32.mrb[76].mxu0 }
 0x886   :  { %v2878_v18 = vadd.f32 %v2826_v39, %v1192_v9  ;;  %v2880_v61 = vadd.f32 %v2867_v38, %v1253_v28  ;;  %v2828_v41 = vpop.f32.mrb[73].mxu1  ;;  %v2869_v27 = vpop.f32.mrb[77].mxu0 }
 0x887   :  { %v2879_v19 = vadd.f32 %v2828_v41, %v1194_v53  ;;  %v2881_v5 = vadd.f32 %v2869_v27, %v1255_v62  ;;  %v2830_v63 = vpop.f32.mrb[74].mxu1  ;;  %v2871_v34 = vpop.f32.mrb[78].mxu0 }
 0x888   :  { %v6532_v43 = vmul.f32 -1.442695, %v2878_v18  ;;  %v2831_v16 = vpop.f32.mrb[75].mxu1  ;;  %v2872_v50 = vpop.f32.mrb[79].mxu0  ;;  %v3177_v63 = vld [vmem:[%s11528_s10 + $0xa0] sm:$0xff] }
 0x889   :  { %v6533_v49 = vmul.f32 -1.442695, %v2879_v19  ;;  %v6534_v6 = vmul.f32 -1.442695, %v2881_v5 }
 0x88a   :  { %7221 = vpow2.f32 %v6532_v43  ;;  %v3174_v43 = vld [vmem:[%s11528_s10 + $0x88] sm:$0xff] }
 0x88b   :  { %7223 = vpow2.f32 %v6533_v49  ;;  %v3178_v49 = vld [vmem:[%s11528_s10 + $0xa8] sm:$0xff] }
 0x88c   :  { %7225 = vpow2.f32 %v6531_v20 }
 0x88d   :  { %7227 = vpow2.f32 %v6534_v6 }
 0x88e   :  { %7229 = vtanh.f32 %v2880_v61 }
 0x894   :  { %v7222_v59 = vpop.eup %7221 }
 0x895   :  { %v7224_v56 = vpop.eup %7223  ;;  %v2909_v54 = vadd.f32 1.0, %v7222_v59 }
 0x896   :  { %v2915_v9 = vadd.f32 1.0, %v7224_v56  ;;  %v7226_v28 = vpop.eup %7225 }
 0x897   :  { %7231 = vrcp.f32 %v2909_v54  ;;  %v7228_v53 = vpop.eup %7227  ;;  %v2898_v16 = vadd.f32 1.0, %v7226_v28  ;;  %v6560_v28 = vcombine.high %v3174_v43, %v3178_v49 }
 0x898   :  { %7233 = vrcp.f32 %v2915_v9  ;;  %v7230_v34 = vpop.eup %7229  ;;  %v2922_v38 = vadd.f32 1.0, %v7228_v53  ;;  %v3181_v53 = vld [vmem:[%s11528_s10 + $0xc0] sm:$0xff] }
 0x899   :  { %7235 = vtanh.f32 %v9357_v8 }
 0x89a   :  { %7237 = vrcp.f32 %v2898_v16  ;;  %v3186_v16 = vld [vmem:[%s11528_s10 + $0xe8] sm:$0xff] }
 0x89b   :  { %7239 = vrcp.f32 %v2922_v38 }
 0x8a1   :  { %v7232_v62 = vpop.eup %7231 }
 0x8a2   :  { %v7234_v50 = vpop.eup %7233  ;;  %v2926_v39 = vmul.f32 %v7232_v62, %v7230_v34  ;;  %v3185_v34 = vld [vmem:[%s11528_s10 + $0xe0] sm:$0xff]  ;;  %v3182_v62 = vld [vmem:[%s11528_s10 + $0xc8] sm:$0xff] }
 0x8a3   :  { %v2925_v12 = vmul.f32 %v7234_v50, %v9203_v35  ;;  %v7236_v59 = vpop.eup %7235  ;;  %v6566_v38 = vcombine.high %v3181_v53, %v3185_v34 }
 0x8a4   :  { %v7238_v6 = vpop.eup %7237 }
 0x8a5   :  { %v9369_v18 = vadd.f32 %v2926_v39, %v2925_v12  ;;  %v7240_v54 = vpop.eup %7239  ;;  %v9372_v41 = vmul.f32 %v7238_v6, %v7236_v59  ;;  %v6559_v39 = vcombine.low %v3174_v43, %v3178_v49  ;;  %v6568_v12 = vcombine.high %v3182_v62, %v3186_v16  ;;  %v3234_v43 = vld [vmem:[%s11528_s10 + $0x268] sm:$0xff] }
 0x8a6   :  { %v6565_v59 = vcombine.low %v3181_v53, %v3185_v34  ;;  %v6567_v6 = vcombine.low %v3182_v62, %v3186_v16  ;;  %v3238_v53 = vld [vmem:[%s11528_s10 + $0x288] sm:$0xff] }
 0x8a7   :  { %7241 = vtanh.f32 %v9369_v18  ;;  %v9380_v35 = vpack.c.bf16 %v9372_v41, %v9372_v41  ;;  %v3242_v62 = vld [vmem:[%s11528_s10 + $0x2a8] sm:$0xff] }
 0x8b1   :  { %v7242_v61 = vpop.eup %7241 }
 0x8b2   :  { %v9374_v27 = vmul.f32 %v7242_v61, %v7240_v54  ;;  %v3189_v54 = vld [vmem:[%s11528_s10 + $0x100] sm:$0xff] }
 0x8b3   :  { %v3193_v61 = vld [vmem:[%s11528_s10 + $0x120] sm:$0xff] }
 0x8b4   :  { %v2931_v19 = vpack.c.bf16 %v9374_v27, %v9374_v27 }
 0x8b6   :  { %2964 = vmatprep.mubr.bf16.mxu1 %v2931_v19  ;;  %3005 = vmatprep.mubr.bf16.mxu0 %v2931_v19 }
 0x8b7   :  { %2965 = vmatmul.mubr.bf16.vlgmr.msra.gmra.mrb[32].mxu1 %v9380_v35  ;;  %3006 = vmatmul.mubr.bf16.vlgmr.msra.gmra.mrb[36].mxu0 %v9380_v35 }
 0x8b8   :  { %3015 = vmatpush1.bf16.msra.mxu1 %v12300_v4  ;;  %3056 = vmatpush1.bf16.msra.mxu0 %v12301_v26  ;;  %v12616_v4 = vld [vmem:[#allocation107_spill] sm:$0xff]  ;;  %v12617_v26 = vld [vmem:[#allocation108_spill] sm:$0xff] }
 0x8b9   :  { %3046 = vmatprep.mubr.bf16.mxu1 %v2931_v19  ;;  %3087 = vmatprep.mubr.bf16.mxu0 %v2931_v19  ;;  %v3190_v19 = vld [vmem:[%s11528_s10 + $0x108] sm:$0xff] }
 0x8ba   :  { %3016 = vmatprep.subr.bf16.mxu1 %v12302_v31  ;;  %3057 = vmatprep.subr.bf16.mxu0 %v12303_v33  ;;  %v12618_v31 = vld [vmem:[#allocation109_spill] sm:$0xff]  ;;  %v12619_v33 = vld [vmem:[#allocation110_spill] sm:$0xff] }
 0x8bc   :  { %3017 = vmatpush1.bf16.msra.mxu1 %v12304_v32  ;;  %3058 = vmatpush1.bf16.msra.mxu0 %v12305_v40  ;;  %v12620_v32 = vld [vmem:[#allocation111_spill] sm:$0xff]  ;;  %v12621_v40 = vld [vmem:[#allocation112_spill] sm:$0xff] }
 0x8bd   :  { %3018 = vmatprep.subr.bf16.mxu1 %v12402_v37  ;;  %3059 = vmatprep.subr.bf16.mxu0 %v12403_v36  ;;  %v12622_v37 = vld [vmem:[#allocation113_spill] sm:$0xff]  ;;  %v12623_v36 = vld [vmem:[#allocation114_spill] sm:$0xff] }
 0x8c0   :  { %3019 = vmatpush1.bf16.msra.mxu1 %v12404_v30  ;;  %3060 = vmatpush1.bf16.msra.mxu0 %v12405_v42  ;;  %v12624_v30 = vld [vmem:[#allocation115_spill] sm:$0xff]  ;;  %v12625_v42 = vld [vmem:[#allocation116_spill] sm:$0xff] }
 0x8c1   :  { %3020 = vmatprep.subr.bf16.mxu1 %v12406_v0  ;;  %3061 = vmatprep.subr.bf16.mxu0 %v12407_v45  ;;  %v12626_v0 = vld [vmem:[#allocation117_spill] sm:$0xff]  ;;  %v12627_v45 = vld [vmem:[#allocation118_spill] sm:$0xff] }
 0x8c4   :  { %3021 = vmatpush1.bf16.msra.mxu1 %v12408_v22  ;;  %3062 = vmatpush1.bf16.msra.mxu0 %v12409_v44  ;;  %v12628_v22 = vld [vmem:[#allocation119_spill] sm:$0xff]  ;;  %v12629_v44 = vld [vmem:[#allocation120_spill] sm:$0xff] }
 0x8c5   :  { %3022 = vmatprep.subr.bf16.mxu1 %v12410_v51  ;;  %3063 = vmatprep.subr.bf16.mxu0 %v12411_v60  ;;  %v12630_v51 = vld [vmem:[#allocation121_spill] sm:$0xff]  ;;  %v12631_v60 = vld [vmem:[#allocation122_spill] sm:$0xff] }
 0x8c8   :  { %3023 = vmatpush1.bf16.msra.mxu1 %v12412_v55  ;;  %3064 = vmatpush1.bf16.msra.mxu0 %v12413_v47  ;;  %v12632_v55 = vld [vmem:[#allocation123_spill] sm:$0xff]  ;;  %v12633_v47 = vld [vmem:[#allocation124_spill] sm:$0xff] }
 0x8c9   :  { %3024 = vmatprep.subr.bf16.mxu1 %v12510_v21  ;;  %3065 = vmatprep.subr.bf16.mxu0 %v12511_v7  ;;  %v3161_v21 = vld [vmem:[%s11528_s10 + $0x20] sm:$0xff]  ;;  %v3158_v7 = vld [vmem:[%s11528_s10 + $0x8] sm:$0xff] }
 0x8cc   :  { %3025 = vmatpush1.bf16.msra.mxu1 %v12512_v2  ;;  %3066 = vmatpush1.bf16.msra.mxu0 %v12513_v25 }
 0x8cd   :  { %3026 = vmatprep.subr.bf16.mxu1 %v12514_v14  ;;  %3067 = vmatprep.subr.bf16.mxu0 %v12515_v17  ;;  %v3162_v14 = vld [vmem:[%s11528_s10 + $0x28] sm:$0xff]  ;;  %v3165_v17 = vld [vmem:[%s11528_s10 + $0x40] sm:$0xff] }
 0x8d0   :  { %3027 = vmatpush1.bf16.msra.mxu1 %v12516_v10  ;;  %3068 = vmatpush1.bf16.msra.mxu0 %v12517_v23  ;;  %v3169_v10 = vld [vmem:[%s11528_s10 + $0x60] sm:$0xff]  ;;  %v6543_v23 = vcombine.low %v3158_v7, %v3162_v14 }
 0x8d1   :  { %3028 = vmatprep.subr.bf16.mxu1 %v12518_v29  ;;  %3069 = vmatprep.subr.bf16.mxu0 %v12519_v15  ;;  %v6544_v29 = vcombine.high %v3158_v7, %v3162_v14  ;;  %v6550_v15 = vcombine.high %v3165_v17, %v3169_v10  ;;  %v6549_v20 = vcombine.low %v3165_v17, %v3169_v10  ;;  %v3225_v14 = vld [vmem:[%s11528_s10 + $0x220] sm:$0xff]  ;;  %v3222_v17 = vld [vmem:[%s11528_s10 + $0x208] sm:$0xff] }
 0x8d4   :  { %3029 = vmatpush1.bf16.msra.mxu1 %v12520_v1  ;;  %3070 = vmatpush1.bf16.msra.mxu0 %v12521_v48  ;;  %v3166_v1 = vld [vmem:[%s11528_s10 + $0x48] sm:$0xff] }
 0x8d5   :  { %3030 = vmatprep.subr.bf16.mxu1 %v12522_v11  ;;  %3071 = vmatprep.subr.bf16.mxu0 %v12427_v13  ;;  %v12634_v13 = vld [vmem:[#allocation125_spill] sm:$0xff]  ;;  %v3170_v48 = vld [vmem:[%s11528_s10 + $0x68] sm:$0xff]  ;;  %v3173_v11 = vld [vmem:[%s11528_s10 + $0x80] sm:$0xff] }
 0x8d6   :  { %v6552_v5 = vcombine.high %v3166_v1, %v3170_v48  ;;  %v6551_v56 = vcombine.low %v3166_v1, %v3170_v48  ;;  %v6558_v9 = vcombine.high %v3173_v11, %v3177_v63  ;;  %v6557_v50 = vcombine.low %v3173_v11, %v3177_v63  ;;  %v3229_v48 = vld [vmem:[%s11528_s10 + $0x240] sm:$0xff] }
 0x8d7   :  { %v3233_v11 = vld [vmem:[%s11528_s10 + $0x260] sm:$0xff] }
 0x8d8   :  { %3031 = vmatpush1.bf16.msra.mxu1 %v12428_v52  ;;  %3072 = vmatpush1.bf16.msra.mxu0 %v12429_v24  ;;  %v12635_v52 = vld [vmem:[#allocation126_spill] sm:$0xff]  ;;  %v12636_v24 = vld [vmem:[#allocation127_spill] sm:$0xff]  ;;  %v6614_v63 = vcombine.high %v3229_v48, %v3233_v11  ;;  %v6613_v49 = vcombine.low %v3229_v48, %v3233_v11 }
 0x8d9   :  { %3032 = vmatprep.subr.bf16.mxu1 %v12430_v46  ;;  %3073 = vmatprep.subr.bf16.mxu0 %v12431_v58  ;;  %v12637_v46 = vld [vmem:[#allocation128_spill] sm:$0xff]  ;;  %v12638_v58 = vld [vmem:[#allocation129_spill] sm:$0xff]  ;;  %v9660_v48 = vld [vmem:[%s11528_s10 + $0x38] sm:$0xff] }
 0x8dc   :  { %3033 = vmatpush1.bf16.msra.mxu1 %v12432_v3  ;;  %3074 = vmatpush1.bf16.msra.mxu0 %v12433_v57  ;;  %v12639_v3 = vld [vmem:[#allocation130_spill] sm:$0xff]  ;;  %v3157_v57 = vld [vmem:[%s11528_s10] sm:$0xff] }
 0x8dd   :  { %3034 = vmatprep.subr.bf16.mxu1 %v12616_v4  ;;  %3075 = vmatprep.subr.bf16.mxu0 %v12617_v26  ;;  %v6541_v2 = vcombine.low %v3157_v57, %v3161_v21  ;;  %v6542_v25 = vcombine.high %v3157_v57, %v3161_v21  ;;  %v3194_v4 = vld [vmem:[%s11528_s10 + $0x128] sm:$0xff]  ;;  %v6573_v26 = vcombine.low %v3189_v54, %v3193_v61 }
 0x8de   :  { %v3218_v57 = vld [vmem:[%s11528_s10 + $0x1e8] sm:$0xff] }
 0x8e0   :  { %3035 = vmatpush1.bf16.msra.mxu1 %v12618_v31  ;;  %3076 = vmatpush1.bf16.msra.mxu0 %v12619_v33  ;;  %v6575_v31 = vcombine.low %v3190_v19, %v3194_v4  ;;  %v6576_v33 = vcombine.high %v3190_v19, %v3194_v4  ;;  %v3253_v4 = vld [vmem:[%s11528_s10 + $0x300] sm:$0xff] }
 0x8e1   :  { %3036 = vmatprep.subr.bf16.mxu1 %v12620_v32  ;;  %3077 = vmatprep.subr.bf16.mxu0 %v12621_v40  ;;  %v3197_v32 = vld [vmem:[%s11528_s10 + $0x140] sm:$0xff] }
 0x8e2   :  { %v3201_v40 = vld [vmem:[%s11528_s10 + $0x160] sm:$0xff] }
 0x8e4   :  { %3037 = vmatpush1.bf16.msra.mxu1 %v12622_v37  ;;  %3078 = vmatpush1.bf16.msra.mxu0 %v12623_v36  ;;  %v3198_v37 = vld [vmem:[%s11528_s10 + $0x148] sm:$0xff]  ;;  %v6582_v36 = vcombine.high %v3197_v32, %v3201_v40 }
 0x8e5   :  { %3038 = vmatprep.subr.bf16.mxu1 %v12624_v30  ;;  %3079 = vmatprep.subr.bf16.mxu0 %v12625_v42  ;;  %v3202_v30 = vld [vmem:[%s11528_s10 + $0x168] sm:$0xff]  ;;  %v6581_v42 = vcombine.low %v3197_v32, %v3201_v40 }
 0x8e6   :  { %v3258_v32 = vld [vmem:[%s11528_s10 + $0x328] sm:$0xff] }
 0x8e8   :  { %3039 = vmatpush1.bf16.msra.mxu1 %v12626_v0  ;;  %3080 = vmatpush1.bf16.msra.mxu0 %v12627_v45  ;;  %v6583_v0 = vcombine.low %v3198_v37, %v3202_v30  ;;  %v6584_v45 = vcombine.high %v3198_v37, %v3202_v30  ;;  %v3261_v30 = vld [vmem:[%s11528_s10 + $0x340] sm:$0xff] }
 0x8e9   :  { %3040 = vmatprep.subr.bf16.mxu1 %v12628_v22  ;;  %3081 = vmatprep.subr.bf16.mxu0 %v12629_v44  ;;  %v3205_v22 = vld [vmem:[%s11528_s10 + $0x180] sm:$0xff] }
 0x8ea   :  { %v3209_v44 = vld [vmem:[%s11528_s10 + $0x1a0] sm:$0xff] }
 0x8ec   :  { %3041 = vmatpush1.bf16.msra.mxu1 %v12630_v51  ;;  %3082 = vmatpush1.bf16.msra.mxu0 %v12631_v60  ;;  %v3206_v51 = vld [vmem:[%s11528_s10 + $0x188] sm:$0xff]  ;;  %v6590_v60 = vcombine.high %v3205_v22, %v3209_v44 }
 0x8ed   :  { %3042 = vmatprep.subr.bf16.mxu1 %v12632_v55  ;;  %3083 = vmatprep.subr.bf16.mxu0 %v12633_v47  ;;  %v3210_v55 = vld [vmem:[%s11528_s10 + $0x1a8] sm:$0xff]  ;;  %v6589_v47 = vcombine.low %v3205_v22, %v3209_v44 }
 0x8ee   :  { %v3266_v44 = vld [vmem:[%s11528_s10 + $0x368] sm:$0xff] }
 0x8f0   :  { %3043 = vmatpush1.bf16.msra.mxu1 %v12634_v13  ;;  %3084 = vmatpush1.bf16.msra.mxu0 %v12635_v52  ;;  %v6591_v13 = vcombine.low %v3206_v51, %v3210_v55  ;;  %v6592_v52 = vcombine.high %v3206_v51, %v3210_v55  ;;  %v3269_v51 = vld [vmem:[%s11528_s10 + $0x380] sm:$0xff] }
 0x8f1   :  { %3044 = vmatprep.subr.bf16.mxu1 %v12636_v24  ;;  %3085 = vmatprep.subr.bf16.mxu0 %v12637_v46  ;;  %v3213_v24 = vld [vmem:[%s11528_s10 + $0x1c0] sm:$0xff] }
 0x8f2   :  { %v3217_v46 = vld [vmem:[%s11528_s10 + $0x1e0] sm:$0xff] }
 0x8f3   :  { %v6597_v21 = vcombine.low %v3213_v24, %v3217_v46 }
 0x8f4   :  { %3045 = vmatpush1.bf16.msra.mxu1 %v12638_v58  ;;  %3086 = vmatpush1.bf16.msra.mxu0 %v12639_v3  ;;  %v3214_v58 = vld [vmem:[%s11528_s10 + $0x1c8] sm:$0xff]  ;;  %v6598_v3 = vcombine.high %v3213_v24, %v3217_v46 }
 0x8f5   :  { %3967 = vmatprep.subr.bf16.mxu1 %v6542_v25  ;;  %4028 = vmatprep.subr.bf16.mxu0 %v6544_v29  ;;  %v6599_v7 = vcombine.low %v3214_v58, %v3218_v57  ;;  %v3221_v25 = vld [vmem:[%s11528_s10 + $0x200] sm:$0xff]  ;;  %v3274_v24 = vld [vmem:[%s11528_s10 + $0x3a8] sm:$0xff] }
 0x8f6   :  { %v6606_v10 = vcombine.high %v3221_v25, %v3225_v14  ;;  %v6605_v29 = vcombine.low %v3221_v25, %v3225_v14 }
 0x8f7   :  { %3047 = vmatmul.mubr.bf16.vlgmr.msra.gmra.mrb[76].mxu1 %v9380_v35  ;;  %3088 = vmatmul.mubr.bf16.vlgmr.msra.gmra.mrb[80].mxu0 %v9380_v35  ;;  %v6574_v35 = vcombine.high %v3189_v54, %v3193_v61  ;;  %v3250_v54 = vld [vmem:[%s11528_s10 + $0x2e8] sm:$0xff] }
 0x8f8   :  { %3968 = vmatpush1.bf16.msra.mxu1 %v6541_v2  ;;  %4029 = vmatpush1.bf16.msra.mxu0 %v6543_v23  ;;  %v6600_v2 = vcombine.high %v3214_v58, %v3218_v57  ;;  %v3226_v23 = vld [vmem:[%s11528_s10 + $0x228] sm:$0xff]  ;;  %v3277_v58 = vld [vmem:[%s11528_s10 + $0x3c0] sm:$0xff] }
 0x8f9   :  { %3969 = vmatprep.subr.bf16.mxu1 %v6550_v15  ;;  %4030 = vmatprep.subr.bf16.mxu0 %v6552_v5  ;;  %v6607_v15 = vcombine.low %v3222_v17, %v3226_v23  ;;  %v6608_v1 = vcombine.high %v3222_v17, %v3226_v23  ;;  %v3230_v5 = vld [vmem:[%s11528_s10 + $0x248] sm:$0xff]  ;;  %v9643_v23 = vld [vmem:[%s11528_s10 + $0x10] sm:$0xff] }
 0x8fa   :  { %v3278_v57 = vld [vmem:[%s11528_s10 + $0x3c8] sm:$0xff] }
 0x8fc   :  { %3970 = vmatpush1.bf16.msra.mxu1 %v6549_v20  ;;  %4031 = vmatpush1.bf16.msra.mxu0 %v6551_v56  ;;  %v6615_v20 = vcombine.low %v3230_v5, %v3234_v43  ;;  %v6616_v56 = vcombine.high %v3230_v5, %v3234_v43 }
 0x8fd   :  { %3971 = vmatprep.subr.bf16.mxu1 %v6558_v9  ;;  %4032 = vmatprep.subr.bf16.mxu0 %v6560_v28  ;;  %v3237_v9 = vld [vmem:[%s11528_s10 + $0x280] sm:$0xff] }
 0x8fe   :  { %v3241_v28 = vld [vmem:[%s11528_s10 + $0x2a0] sm:$0xff] }
 0x8ff   :  { %v6622_v34 = vcombine.high %v3237_v9, %v3241_v28  ;;  %v6621_v16 = vcombine.low %v3237_v9, %v3241_v28 }
 0x900   :  { %3972 = vmatpush1.bf16.msra.mxu1 %v6557_v50  ;;  %4033 = vmatpush1.bf16.msra.mxu0 %v6559_v39  ;;  %v6623_v50 = vcombine.low %v3238_v53, %v3242_v62  ;;  %v6624_v39 = vcombine.high %v3238_v53, %v3242_v62  ;;  %v12641_v53 = vld [vmem:[#allocation162_spill] sm:$0xff] }
 0x901   :  { %3973 = vmatprep.subr.bf16.mxu1 %v6566_v38  ;;  %4034 = vmatprep.subr.bf16.mxu0 %v6568_v12  ;;  %v3245_v38 = vld [vmem:[%s11528_s10 + $0x2c0] sm:$0xff] }
 0x902   :  { %v3249_v12 = vld [vmem:[%s11528_s10 + $0x2e0] sm:$0xff] }
 0x903   :  { %v6629_v61 = vcombine.low %v3245_v38, %v3249_v12 }
 0x904   :  { %3974 = vmatpush1.bf16.msra.mxu1 %v6565_v59  ;;  %4035 = vmatpush1.bf16.msra.mxu0 %v6567_v6  ;;  %v3246_v59 = vld [vmem:[%s11528_s10 + $0x2c8] sm:$0xff]  ;;  %v6630_v6 = vcombine.high %v3245_v38, %v3249_v12 }
 0x905   :  { %3975 = vmatprep.subr.bf16.mxu1 %v6574_v35  ;;  %4036 = vmatprep.subr.bf16.mxu0 %v6576_v33  ;;  %v6631_v19 = vcombine.low %v3246_v59, %v3250_v54  ;;  %v6632_v35 = vcombine.high %v3246_v59, %v3250_v54  ;;  %v12642_v59 = vld [vmem:[#allocation163_spill] sm:$0xff] }
 0x908   :  { %3976 = vmatpush1.bf16.msra.mxu1 %v6573_v26  ;;  %4037 = vmatpush1.bf16.msra.mxu0 %v6575_v31  ;;  %v3257_v26 = vld [vmem:[%s11528_s10 + $0x320] sm:$0xff]  ;;  %v3254_v31 = vld [vmem:[%s11528_s10 + $0x308] sm:$0xff] }
 0x909   :  { %3977 = vmatprep.subr.bf16.mxu1 %v6582_v36  ;;  %4038 = vmatprep.subr.bf16.mxu0 %v6584_v45  ;;  %v6638_v33 = vcombine.high %v3253_v4, %v3257_v26  ;;  %v6637_v40 = vcombine.low %v3253_v4, %v3257_v26  ;;  %v6639_v37 = vcombine.low %v3254_v31, %v3258_v32 }
 0x90a   :  { %v6640_v36 = vcombine.high %v3254_v31, %v3258_v32 }
 0x90c   :  { %3978 = vmatpush1.bf16.msra.mxu1 %v6581_v42  ;;  %4039 = vmatpush1.bf16.msra.mxu0 %v6583_v0  ;;  %v3265_v42 = vld [vmem:[%s11528_s10 + $0x360] sm:$0xff]  ;;  %v3262_v0 = vld [vmem:[%s11528_s10 + $0x348] sm:$0xff] }
 0x90d   :  { %3979 = vmatprep.subr.bf16.mxu1 %v6590_v60  ;;  %4040 = vmatprep.subr.bf16.mxu0 %v6592_v52  ;;  %v6645_v45 = vcombine.low %v3261_v30, %v3265_v42  ;;  %v6646_v22 = vcombine.high %v3261_v30, %v3265_v42  ;;  %v3273_v60 = vld [vmem:[%s11528_s10 + $0x3a0] sm:$0xff]  ;;  %v6647_v55 = vcombine.low %v3262_v0, %v3266_v44  ;;  %v3270_v52 = vld [vmem:[%s11528_s10 + $0x388] sm:$0xff] }
 0x90e   :  { %v6656_v46 = vcombine.high %v3270_v52, %v3274_v24 }
 0x910   :  { %3980 = vmatpush1.bf16.msra.mxu1 %v6589_v47  ;;  %4041 = vmatpush1.bf16.msra.mxu0 %v6591_v13  ;;  %v6648_v47 = vcombine.high %v3262_v0, %v3266_v44  ;;  %v6654_v13 = vcombine.high %v3269_v51, %v3273_v60 }
 0x911   :  { %3981 = vmatprep.subr.bf16.mxu1 %v6598_v3  ;;  %4042 = vmatprep.subr.bf16.mxu0 %v6600_v2  ;;  %v3281_v3 = vld [vmem:[%s11528_s10 + $0x3e0] sm:$0xff]  ;;  %v6655_v2 = vcombine.low %v3270_v52, %v3274_v24  ;;  %v12648_v24 = vld [vmem:[#allocation165_spill] sm:$0xff] }
 0x912   :  { %v6662_v25 = vcombine.high %v3277_v58, %v3281_v3  ;;  %v6661_v17 = vcombine.low %v3277_v58, %v3281_v3  ;;  %v12650_v3 = vld [vmem:[#allocation166_spill] sm:$0xff] }
 0x914   :  { %3982 = vmatpush1.bf16.msra.mxu1 %v6597_v21  ;;  %4043 = vmatpush1.bf16.msra.mxu0 %v6599_v7  ;;  %v3282_v21 = vld [vmem:[%s11528_s10 + $0x3e8] sm:$0xff]  ;;  %v6653_v7 = vcombine.low %v3269_v51, %v3273_v60  ;;  %v12645_v60 = vld [vmem:[#allocation143_spill] sm:$0xff] }
 0x915   :  { %3983 = vmatprep.subr.bf16.mxu1 %v6606_v10  ;;  %4044 = vmatprep.subr.bf16.mxu0 %v6608_v1  ;;  %v6664_v14 = vcombine.high %v3278_v57, %v3282_v21  ;;  %v6663_v10 = vcombine.low %v3278_v57, %v3282_v21  ;;  %v12644_v51 = vld [vmem:[#allocation164_spill] sm:$0xff]  ;;  %v12651_v57 = vld [vmem:[#allocation146_spill] sm:$0xff] }
 0x916   :  { %v1251_v21 = vadd.f32 %v12651_v57, %v12650_v3  ;;  %v3191_v3 = vld [vmem:[%s11528_s10 + $0x110] sm:$0xff] }
 0x918   :  { %3984 = vmatpush1.bf16.msra.mxu1 %v6605_v29  ;;  %4045 = vmatpush1.bf16.msra.mxu0 %v6607_v15  ;;  %v9648_v29 = vld [vmem:[%s11528_s10 + $0x30] sm:$0xff]  ;;  %v9653_v15 = vld [vmem:[%s11528_s10 + $0x18] sm:$0xff] }
 0x919   :  { %3985 = vmatprep.subr.bf16.mxu1 %v6614_v63  ;;  %4046 = vmatprep.subr.bf16.mxu0 %v6616_v56  ;;  %v6546_v1 = vcombine.high %v9643_v23, %v9648_v29  ;;  %v6545_v11 = vcombine.low %v9643_v23, %v9648_v29  ;;  %v6547_v5 = vcombine.low %v9653_v15, %v9660_v48  ;;  %v3187_v23 = vld [vmem:[%s11528_s10 + $0xf0] sm:$0xff]  ;;  %v3184_v29 = vld [vmem:[%s11528_s10 + $0xd8] sm:$0xff] }
 0x91a   :  { %v6548_v63 = vcombine.high %v9653_v15, %v9660_v48  ;;  %v3188_v15 = vld [vmem:[%s11528_s10 + $0xf8] sm:$0xff] }
 0x91c   :  { %3986 = vmatpush1.bf16.msra.mxu1 %v6613_v49  ;;  %4047 = vmatpush1.bf16.msra.mxu0 %v6615_v20  ;;  %v12640_v20 = vld [vmem:[#allocation160_spill] sm:$0xff] }
 0x91d   :  { %3987 = vmatprep.subr.bf16.mxu1 %v6622_v34  ;;  %4048 = vmatprep.subr.bf16.mxu0 %v6624_v39 }
 0x920   :  { %3988 = vmatpush1.bf16.msra.mxu1 %v6621_v16  ;;  %4049 = vmatpush1.bf16.msra.mxu0 %v6623_v50 }
 0x921   :  { %3989 = vmatprep.subr.bf16.mxu1 %v6630_v6  ;;  %4050 = vmatprep.subr.bf16.mxu0 %v6632_v35 }
 0x924   :  { %3990 = vmatpush1.bf16.msra.mxu1 %v6629_v61  ;;  %4051 = vmatpush1.bf16.msra.mxu0 %v6631_v19  ;;  %v12643_v61 = vld [vmem:[#allocation161_spill] sm:$0xff] }
 0x925   :  { %3991 = vmatprep.subr.bf16.mxu1 %v6638_v33  ;;  %4052 = vmatprep.subr.bf16.mxu0 %v6640_v36 }
 0x928   :  { %3992 = vmatpush1.bf16.msra.mxu1 %v6637_v40  ;;  %4053 = vmatpush1.bf16.msra.mxu0 %v6639_v37 }
 0x929   :  { %3993 = vmatprep.subr.bf16.mxu1 %v6646_v22  ;;  %4054 = vmatprep.subr.bf16.mxu0 %v6648_v47  ;;  %v12646_v47 = vld [vmem:[#allocation167_spill] sm:$0xff] }
 0x92c   :  { %3994 = vmatpush1.bf16.msra.mxu1 %v6645_v45  ;;  %4055 = vmatpush1.bf16.msra.mxu0 %v6647_v55  ;;  %v1188_v55 = vadd.f32 %v12645_v60, %v12644_v51  ;;  %v12654_v51 = vld [vmem:[#allocation72_spill] sm:$0xff]  ;;  %v12655_v60 = vld [vmem:[#allocation70_spill] sm:$0xff] }
 0x92d   :  { %3995 = vmatprep.subr.bf16.mxu1 %v6654_v13  ;;  %4056 = vmatprep.subr.bf16.mxu0 %v6656_v46  ;;  %v12647_v13 = vld [vmem:[#allocation144_spill] sm:$0xff]  ;;  %v12649_v46 = vld [vmem:[#allocation145_spill] sm:$0xff] }
 0x92e   :  { %v1249_v52 = vadd.f32 %v12647_v13, %v12646_v47  ;;  %v1190_v58 = vadd.f32 %v12649_v46, %v12648_v24  ;;  %v3183_v46 = vld [vmem:[%s11528_s10 + $0xd0] sm:$0xff] }
 0x92f   :  { %v6570_v57 = vcombine.high %v3183_v46, %v3187_v23 }
 0x930   :  { %3996 = vmatpush1.bf16.msra.mxu1 %v6653_v7  ;;  %4057 = vmatpush1.bf16.msra.mxu0 %v6655_v2 }
 0x931   :  { %3997 = vmatprep.subr.bf16.mxu1 %v6662_v25  ;;  %4058 = vmatprep.subr.bf16.mxu0 %v6664_v14 }
 0x934   :  { %3998 = vmatpush1.bf16.msra.mxu1 %v6661_v17  ;;  %4059 = vmatpush1.bf16.msra.mxu0 %v6663_v10 }
 0x935   :  { %4089 = vmatprep.subr.bf16.mxu1 %v6546_v1  ;;  %4150 = vmatprep.subr.bf16.mxu0 %v6548_v63 }
 0x98a   :  { %v2966_v43 = vpop.f32.mrb[32].mxu1  ;;  %v3007_v49 = vpop.f32.mrb[36].mxu0 }
 0x98b   :  { %v6972_v56 = vadd.f32 %v2966_v43, %v12640_v20  ;;  %v2968_v9 = vpop.f32.mrb[33].mxu1  ;;  %v3009_v28 = vpop.f32.mrb[37].mxu0  ;;  %v6974_v19 = vadd.f32 %v3007_v49, %v12643_v61 }
 0x98c   :  { %v6973_v34 = vadd.f32 %v2968_v9, %v12641_v53  ;;  %v2970_v62 = vpop.f32.mrb[34].mxu1  ;;  %v3011_v16 = vpop.f32.mrb[38].mxu0  ;;  %v6975_v6 = vadd.f32 %v3009_v28, %v12642_v59 }
 0x98d   :  { %v6535_v50 = vmul.f32 -1.442695, %v6972_v56  ;;  %v2971_v39 = vpop.f32.mrb[35].mxu1  ;;  %v3012_v38 = vpop.f32.mrb[39].mxu0 }
 0x98e   :  { %v6536_v12 = vmul.f32 -1.442695, %v6973_v34  ;;  %v6537_v54 = vmul.f32 -1.442695, %v6975_v6 }
 0x98f   :  { %7243 = vpow2.f32 %v6535_v50 }
 0x990   :  { %7245 = vpow2.f32 %v6536_v12 }
 0x991   :  { %7247 = vpow2.f32 %v6537_v54 }
 0x992   :  { %7249 = vtanh.f32 %v6974_v19 }
 0x999   :  { %v7244_v35 = vpop.eup %7243 }
 0x99a   :  { %v7246_v4 = vpop.eup %7245  ;;  %v3107_v26 = vadd.f32 1.0, %v7244_v35 }
 0x99b   :  { %v3113_v31 = vadd.f32 1.0, %v7246_v4  ;;  %v7248_v33 = vpop.eup %7247 }
 0x99c   :  { %7251 = vrcp.f32 %v3107_v26  ;;  %v7250_v32 = vpop.eup %7249  ;;  %v3120_v30 = vadd.f32 1.0, %v7248_v33  ;;  %v3167_v26 = vld [vmem:[%s11528_s10 + $0x50] sm:$0xff]  ;;  %v3168_v33 = vld [vmem:[%s11528_s10 + $0x58] sm:$0xff] }
 0x99d   :  { %7253 = vrcp.f32 %v3113_v31  ;;  %v3171_v31 = vld [vmem:[%s11528_s10 + $0x70] sm:$0xff] }
 0x99e   :  { %7255 = vrcp.f32 %v3120_v30  ;;  %v3175_v30 = vld [vmem:[%s11528_s10 + $0x90] sm:$0xff]  ;;  %v6553_v47 = vcombine.low %v3167_v26, %v3171_v31 }
 0x9a6   :  { %v7252_v40 = vpop.eup %7251 }
 0x9a7   :  { %v7254_v37 = vpop.eup %7253  ;;  %v3124_v36 = vmul.f32 %v7252_v40, %v7250_v32  ;;  %v12652_v40 = vld [vmem:[#allocation168_spill] sm:$0xff] }
 0x9a8   :  { %v3123_v42 = vmul.f32 %v7254_v37, %v9357_v8  ;;  %v7256_v45 = vpop.eup %7255  ;;  %v12653_v37 = vld [vmem:[#allocation69_spill] sm:$0xff] }
 0x9aa   :  { %v3125_v0 = vadd.f32 %v3124_v36, %v3123_v42  ;;  %v9701_v36 = vpack.c.bf16 %v12653_v37, %v12652_v40  ;;  %v6554_v42 = vcombine.high %v3167_v26, %v3171_v31  ;;  %v3223_v31 = vld [vmem:[%s11528_s10 + $0x210] sm:$0xff] }
 0x9ac   :  { %7257 = vtanh.f32 %v3125_v0 }
 0x9b6   :  { %v7258_v22 = vpop.eup %7257 }
 0x9b7   :  { %v9673_v44 = vmul.f32 %v7258_v22, %v7256_v45  ;;  %v3179_v45 = vld [vmem:[%s11528_s10 + $0xb0] sm:$0xff]  ;;  %v3180_v22 = vld [vmem:[%s11528_s10 + $0xb8] sm:$0xff] }
 0x9b8   :  { %v6561_v48 = vcombine.low %v3175_v30, %v3179_v45 }
 0x9ca   :  { %v3048_v8 = vpop.f32.mrb[76].mxu1  ;;  %v3089_v7 = vpop.f32.mrb[80].mxu0 }
 0x9cb   :  { %v3100_v2 = vadd.f32 %v3048_v8, %v1188_v55  ;;  %v3102_v25 = vadd.f32 %v3089_v7, %v1249_v52  ;;  %v3050_v14 = vpop.f32.mrb[77].mxu1  ;;  %v3091_v17 = vpop.f32.mrb[81].mxu0  ;;  %v9721_v55 = vpack.c.bf16 %v12655_v60, %v12654_v51  ;;  %v6562_v52 = vcombine.high %v3175_v30, %v3179_v45  ;;  %v3195_v8 = vld [vmem:[%s11528_s10 + $0x130] sm:$0xff]  ;;  %v3192_v7 = vld [vmem:[%s11528_s10 + $0x118] sm:$0xff] }
 0x9cc   :  { %v3101_v10 = vadd.f32 %v3050_v14, %v1190_v58  ;;  %v3103_v1 = vadd.f32 %v3091_v17, %v1251_v21  ;;  %v3052_v63 = vpop.f32.mrb[78].mxu1  ;;  %v3093_v43 = vpop.f32.mrb[82].mxu0  ;;  %v6572_v21 = vcombine.high %v3184_v29, %v3188_v15  ;;  %v12657_v14 = vld [vmem:[#allocation169_spill] sm:$0xff]  ;;  %v6578_v17 = vcombine.high %v3191_v3, %v3195_v8 }
 0x9cd   :  { %v6538_v49 = vmul.f32 -1.442695, %v3100_v2  ;;  %v3053_v20 = vpop.f32.mrb[79].mxu1  ;;  %v3094_v56 = vpop.f32.mrb[83].mxu0  ;;  %v3196_v2 = vld [vmem:[%s11528_s10 + $0x138] sm:$0xff]  ;;  %v3203_v63 = vld [vmem:[%s11528_s10 + $0x170] sm:$0xff] }
 0x9ce   :  { %v6539_v9 = vmul.f32 -1.442695, %v3101_v10  ;;  %v6540_v28 = vmul.f32 -1.442695, %v3103_v1  ;;  %v6580_v10 = vcombine.high %v3192_v7, %v3196_v2  ;;  %v3199_v1 = vld [vmem:[%s11528_s10 + $0x150] sm:$0xff]  ;;  %v3200_v43 = vld [vmem:[%s11528_s10 + $0x158] sm:$0xff]  ;;  %v6577_v20 = vcombine.low %v3191_v3, %v3195_v8 }
 0x9cf   :  { %7259 = vpow2.f32 %v6538_v49  ;;  %v3204_v49 = vld [vmem:[%s11528_s10 + $0x178] sm:$0xff]  ;;  %v6579_v56 = vcombine.low %v3192_v7, %v3196_v2  ;;  %v3235_v45 = vld [vmem:[%s11528_s10 + $0x270] sm:$0xff] }
 0x9d0   :  { %7261 = vpow2.f32 %v6539_v9  ;;  %v9777_v9 = vpack.c.bf16 %v9673_v44, %v9673_v44  ;;  %v6585_v44 = vcombine.low %v3199_v1, %v3203_v63  ;;  %v3251_v3 = vld [vmem:[%s11528_s10 + $0x2f0] sm:$0xff] }
 0x9d1   :  { %7263 = vpow2.f32 %v6540_v28  ;;  %v3207_v28 = vld [vmem:[%s11528_s10 + $0x190] sm:$0xff] }
 0x9d2   :  { %7265 = vtanh.f32 %v3102_v25  ;;  %v6571_v25 = vcombine.low %v3184_v29, %v3188_v15 }
 0x9d9   :  { %v7260_v53 = vpop.eup %7259 }
 0x9da   :  { %v7262_v34 = vpop.eup %7261  ;;  %v3131_v62 = vadd.f32 1.0, %v7260_v53  ;;  %v6586_v53 = vcombine.high %v3199_v1, %v3203_v63  ;;  %v3260_v1 = vld [vmem:[%s11528_s10 + $0x338] sm:$0xff] }
 0x9db   :  { %v3137_v16 = vadd.f32 1.0, %v7262_v34  ;;  %v7264_v50 = vpop.eup %7263  ;;  %v6588_v34 = vcombine.high %v3200_v43, %v3204_v49 }
 0x9dc   :  { %7267 = vrcp.f32 %v3131_v62  ;;  %v7266_v39 = vpop.eup %7265  ;;  %v3144_v6 = vadd.f32 1.0, %v7264_v50  ;;  %v3211_v62 = vld [vmem:[%s11528_s10 + $0x1b0] sm:$0xff]  ;;  %v3212_v50 = vld [vmem:[%s11528_s10 + $0x1b8] sm:$0xff] }
 0x9dd   :  { %7269 = vrcp.f32 %v3137_v16  ;;  %v3208_v16 = vld [vmem:[%s11528_s10 + $0x198] sm:$0xff] }
 0x9de   :  { %7271 = vrcp.f32 %v3144_v6  ;;  %v3219_v6 = vld [vmem:[%s11528_s10 + $0x1f0] sm:$0xff] }
 0x9e6   :  { %v7268_v38 = vpop.eup %7267 }
 0x9e7   :  { %v7270_v12 = vpop.eup %7269  ;;  %v3148_v59 = vmul.f32 %v7268_v38, %v7266_v39  ;;  %v6587_v39 = vcombine.low %v3200_v43, %v3204_v49  ;;  %v6594_v38 = vcombine.high %v3207_v28, %v3211_v62 }
 0x9e8   :  { %v3147_v54 = vmul.f32 %v7270_v12, %v9369_v18  ;;  %v7272_v19 = vpop.eup %7271  ;;  %v3172_v18 = vld [vmem:[%s11528_s10 + $0x78] sm:$0xff]  ;;  %v6596_v12 = vcombine.high %v3208_v16, %v3212_v50 }
 0x9e9   :  { %v6556_v0 = vcombine.high %v3168_v33, %v3172_v18  ;;  %v6555_v13 = vcombine.low %v3168_v33, %v3172_v18  ;;  %v3227_v33 = vld [vmem:[%s11528_s10 + $0x230] sm:$0xff]  ;;  %v3224_v18 = vld [vmem:[%s11528_s10 + $0x218] sm:$0xff] }
 0x9ea   :  { %v3149_v61 = vadd.f32 %v3148_v59, %v3147_v54  ;;  %v3215_v59 = vld [vmem:[%s11528_s10 + $0x1d0] sm:$0xff]  ;;  %v3216_v54 = vld [vmem:[%s11528_s10 + $0x1d8] sm:$0xff]  ;;  %v6610_v30 = vcombine.high %v3223_v31, %v3227_v33  ;;  %v6609_v51 = vcombine.low %v3223_v31, %v3227_v33 }
 0x9eb   :  { %v6601_v40 = vcombine.low %v3215_v59, %v3219_v6  ;;  %v3284_v31 = vld [vmem:[%s11528_s10 + $0x3f8] sm:$0xff] }
 0x9ec   :  { %7273 = vtanh.f32 %v3149_v61  ;;  %v3220_v61 = vld [vmem:[%s11528_s10 + $0x1f8] sm:$0xff] }
 0x9ed   :  { %v6604_v26 = vcombine.high %v3216_v54, %v3220_v61  ;;  %v6603_v37 = vcombine.low %v3216_v54, %v3220_v61 }
 0x9f6   :  { %v7274_v35 = vpop.eup %7273 }
 0x9f7   :  { %v3151_v4 = vmul.f32 %v7274_v35, %v7272_v19  ;;  %v6593_v19 = vcombine.low %v3207_v28, %v3211_v62  ;;  %v6595_v35 = vcombine.low %v3208_v16, %v3212_v50  ;;  %v3267_v28 = vld [vmem:[%s11528_s10 + $0x370] sm:$0xff] }
 0x9f9   :  { %v9697_v32 = vpack.c.bf16 %v9374_v27, %v3151_v4  ;;  %v3176_v27 = vld [vmem:[%s11528_s10 + $0x98] sm:$0xff]  ;;  %v6602_v4 = vcombine.high %v3215_v59, %v3219_v6 }
 0x9fa   :  { %v6564_v24 = vcombine.high %v3176_v27, %v3180_v22  ;;  %v3276_v59 = vld [vmem:[%s11528_s10 + $0x3b8] sm:$0xff] }
 0x9fb   :  { %3999 = vmatprep.mubr.bf16.mxu1 %v9697_v32  ;;  %4060 = vmatprep.mubr.bf16.mxu0 %v9697_v32 }
 0x9fc   :  { %4000 = vmatmul.mubr.bf16.vlgmr.msra.gmra.mrb[80].mxu1 %v9701_v36  ;;  %4061 = vmatmul.mubr.bf16.vlgmr.msra.gmra.mrb[84].mxu0 %v9701_v36 }
 0x9fd   :  { %4090 = vmatpush1.bf16.msra.mxu1 %v6545_v11  ;;  %4151 = vmatpush1.bf16.msra.mxu0 %v6547_v5  ;;  %v6563_v11 = vcombine.low %v3176_v27, %v3180_v22  ;;  %v12656_v5 = vld [vmem:[#allocation71_spill] sm:$0xff]  ;;  %v3232_v27 = vld [vmem:[%s11528_s10 + $0x258] sm:$0xff] }
 0x9fe   :  { %4009 = vmatprep.mubr.bf16.mxu1 %v9721_v55  ;;  %4070 = vmatprep.mubr.bf16.mxu0 %v9721_v55  ;;  %v9745_v58 = vpack.c.bf16 %v9372_v41, %v12656_v5  ;;  %v6569_v41 = vcombine.low %v3183_v46, %v3187_v23  ;;  %v3236_v22 = vld [vmem:[%s11528_s10 + $0x278] sm:$0xff]  ;;  %v3247_v5 = vld [vmem:[%s11528_s10 + $0x2d0] sm:$0xff] }
 0x9ff   :  { %4091 = vmatprep.subr.bf16.mxu1 %v6554_v42  ;;  %4152 = vmatprep.subr.bf16.mxu0 %v6556_v0  ;;  %v3231_v0 = vld [vmem:[%s11528_s10 + $0x250] sm:$0xff]  ;;  %v3240_v46 = vld [vmem:[%s11528_s10 + $0x298] sm:$0xff]  ;;  %v6619_v15 = vcombine.low %v3232_v27, %v3236_v22  ;;  %v6634_v2 = vcombine.high %v3247_v5, %v3251_v3  ;;  %v6633_v63 = vcombine.low %v3247_v5, %v3251_v3  ;;  %v4232_v5 = vld [vmem:[%s11529_s11 + $0xa8] sm:$0xff] }
 0xa00   :  { %v3244_v23 = vld [vmem:[%s11528_s10 + $0x2b8] sm:$0xff]  ;;  %v6617_v29 = vcombine.low %v3231_v0, %v3235_v45 }
 0xa01   :  { %4092 = vmatpush1.bf16.msra.mxu1 %v6553_v47  ;;  %4153 = vmatpush1.bf16.msra.mxu0 %v6555_v13  ;;  %v6618_v47 = vcombine.high %v3231_v0, %v3235_v45  ;;  %v6620_v13 = vcombine.high %v3232_v27, %v3236_v22  ;;  %v6627_v7 = vcombine.low %v3240_v46, %v3244_v23  ;;  %v4216_v0 = vld [vmem:[%s11529_s11 + $0x28] sm:$0xff] }
 0xa02   :  { %4093 = vmatprep.subr.bf16.mxu1 %v6562_v52  ;;  %4154 = vmatprep.subr.bf16.mxu0 %v6564_v24  ;;  %v3239_v52 = vld [vmem:[%s11528_s10 + $0x290] sm:$0xff] }
 0xa03   :  { %v3243_v24 = vld [vmem:[%s11528_s10 + $0x2b0] sm:$0xff] }
 0xa04   :  { %4010 = vmatmul.mubr.bf16.gmra.mrb[84].mxu1 %v9745_v58  ;;  %4071 = vmatmul.mubr.bf16.gmra.mrb[88].mxu0 %v9745_v58  ;;  %v6625_v8 = vcombine.low %v3239_v52, %v3243_v24 }
 0xa05   :  { %4094 = vmatpush1.bf16.msra.mxu1 %v6561_v48  ;;  %4155 = vmatpush1.bf16.msra.mxu0 %v6563_v11  ;;  %v6626_v48 = vcombine.high %v3239_v52, %v3243_v24  ;;  %v6628_v11 = vcombine.high %v3240_v46, %v3244_v23  ;;  %v4224_v52 = vld [vmem:[%s11529_s11 + $0x68] sm:$0xff] }
 0xa06   :  { %4019 = vmatprep.mubr.bf16.mxu1 %v12657_v14  ;;  %4080 = vmatprep.mubr.bf16.mxu0 %v12657_v14 }
 0xa07   :  { %4095 = vmatprep.subr.bf16.mxu1 %v6570_v57  ;;  %4156 = vmatprep.subr.bf16.mxu0 %v6572_v21  ;;  %v3248_v57 = vld [vmem:[%s11528_s10 + $0x2d8] sm:$0xff] }
 0xa08   :  { %v3252_v21 = vld [vmem:[%s11528_s10 + $0x2f8] sm:$0xff] }
 0xa09   :  { %4096 = vmatpush1.bf16.msra.mxu1 %v6569_v41  ;;  %4157 = vmatpush1.bf16.msra.mxu0 %v6571_v25  ;;  %v6636_v41 = vcombine.high %v3248_v57, %v3252_v21  ;;  %v3255_v25 = vld [vmem:[%s11528_s10 + $0x310] sm:$0xff]  ;;  %v6635_v43 = vcombine.low %v3248_v57, %v3252_v21 }
 0xa0a   :  { %4097 = vmatprep.subr.bf16.mxu1 %v6578_v17  ;;  %4158 = vmatprep.subr.bf16.mxu0 %v6580_v10  ;;  %v3259_v17 = vld [vmem:[%s11528_s10 + $0x330] sm:$0xff]  ;;  %v3256_v10 = vld [vmem:[%s11528_s10 + $0x318] sm:$0xff] }
 0xa0b   :  { %v6642_v49 = vcombine.high %v3255_v25, %v3259_v17  ;;  %v6641_v62 = vcombine.low %v3255_v25, %v3259_v17  ;;  %v6643_v16 = vcombine.low %v3256_v10, %v3260_v1 }
 0xa0c   :  { %4020 = vmatmul.mubr.bf16.gmra.mrb[88].mxu1 %v9777_v9  ;;  %4081 = vmatmul.mubr.bf16.gmra.mrb[92].mxu0 %v9777_v9 }
 0xa0d   :  { %4098 = vmatpush1.bf16.msra.mxu1 %v6577_v20  ;;  %4159 = vmatpush1.bf16.msra.mxu0 %v6579_v56  ;;  %v6644_v20 = vcombine.high %v3256_v10, %v3260_v1  ;;  %v3263_v56 = vld [vmem:[%s11528_s10 + $0x350] sm:$0xff]  ;;  %v4243_v1 = vld [vmem:[%s11529_s11 + $0x100] sm:$0xff] }
 0xa0e   :  { %4121 = vmatprep.mubr.bf16.mxu1 %v9697_v32  ;;  %4182 = vmatprep.mubr.bf16.mxu0 %v9697_v32  ;;  %v3228_v32 = vld [vmem:[%s11528_s10 + $0x238] sm:$0xff]  ;;  %v6650_v50 = vcombine.high %v3263_v56, %v3267_v28  ;;  %v6649_v6 = vcombine.low %v3263_v56, %v3267_v28 }
 0xa0f   :  { %4099 = vmatprep.subr.bf16.mxu1 %v6586_v53  ;;  %4160 = vmatprep.subr.bf16.mxu0 %v6588_v34  ;;  %v6612_v42 = vcombine.high %v3224_v18, %v3228_v32  ;;  %v6611_v60 = vcombine.low %v3224_v18, %v3228_v32  ;;  %v3264_v53 = vld [vmem:[%s11528_s10 + $0x358] sm:$0xff] }
 0xa10   :  { %v3268_v34 = vld [vmem:[%s11528_s10 + $0x378] sm:$0xff] }
 0xa11   :  { %4100 = vmatpush1.bf16.msra.mxu1 %v6585_v44  ;;  %4161 = vmatpush1.bf16.msra.mxu0 %v6587_v39  ;;  %v6652_v44 = vcombine.high %v3264_v53, %v3268_v34  ;;  %v3271_v39 = vld [vmem:[%s11528_s10 + $0x390] sm:$0xff]  ;;  %v6651_v54 = vcombine.low %v3264_v53, %v3268_v34  ;;  %v4255_v53 = vld [vmem:[%s11529_s11 + $0x160] sm:$0xff]  ;;  %v4252_v34 = vld [vmem:[%s11529_s11 + $0x148] sm:$0xff] }
 0xa12   :  { %4101 = vmatprep.subr.bf16.mxu1 %v6594_v38  ;;  %4162 = vmatprep.subr.bf16.mxu0 %v6596_v12  ;;  %v3275_v38 = vld [vmem:[%s11528_s10 + $0x3b0] sm:$0xff]  ;;  %v3272_v12 = vld [vmem:[%s11528_s10 + $0x398] sm:$0xff] }
 0xa13   :  { %v6658_v61 = vcombine.high %v3271_v39, %v3275_v38  ;;  %v6657_v33 = vcombine.low %v3271_v39, %v3275_v38  ;;  %v6659_v18 = vcombine.low %v3272_v12, %v3276_v59  ;;  %v4259_v38 = vld [vmem:[%s11529_s11 + $0x180] sm:$0xff] }
 0xa15   :  { %4102 = vmatpush1.bf16.msra.mxu1 %v6593_v19  ;;  %4163 = vmatpush1.bf16.msra.mxu0 %v6595_v35  ;;  %v6660_v19 = vcombine.high %v3272_v12, %v3276_v59  ;;  %v3279_v35 = vld [vmem:[%s11528_s10 + $0x3d0] sm:$0xff]  ;;  %v4263_v12 = vld [vmem:[%s11529_s11 + $0x1a0] sm:$0xff]  ;;  %v4260_v59 = vld [vmem:[%s11529_s11 + $0x188] sm:$0xff] }
 0xa16   :  { %4103 = vmatprep.subr.bf16.mxu1 %v6602_v4  ;;  %4164 = vmatprep.subr.bf16.mxu0 %v6604_v26  ;;  %v3283_v4 = vld [vmem:[%s11528_s10 + $0x3f0] sm:$0xff]  ;;  %v3280_v26 = vld [vmem:[%s11528_s10 + $0x3d8] sm:$0xff] }
 0xa17   :  { %v6666_v32 = vcombine.high %v3279_v35, %v3283_v4  ;;  %v6665_v45 = vcombine.low %v3279_v35, %v3283_v4  ;;  %v6667_v27 = vcombine.low %v3280_v26, %v3284_v31  ;;  %v4267_v4 = vld [vmem:[%s11529_s11 + $0x1c0] sm:$0xff] }
 0xa19   :  { %4104 = vmatpush1.bf16.msra.mxu1 %v6601_v40  ;;  %4165 = vmatpush1.bf16.msra.mxu0 %v6603_v37  ;;  %v6668_v40 = vcombine.high %v3280_v26, %v3284_v31  ;;  %v4211_v37 = vld [vmem:[%s11529_s11] sm:$0xff]  ;;  %v4268_v31 = vld [vmem:[%s11529_s11 + $0x1c8] sm:$0xff] }
 0xa1a   :  { %4105 = vmatprep.subr.bf16.mxu1 %v6610_v30  ;;  %4166 = vmatprep.subr.bf16.mxu0 %v6612_v42  ;;  %v4215_v30 = vld [vmem:[%s11529_s11 + $0x20] sm:$0xff]  ;;  %v4212_v42 = vld [vmem:[%s11529_s11 + $0x8] sm:$0xff] }
 0xa1b   :  { %v9915_v22 = vcombine.high %v4211_v37, %v4215_v30  ;;  %v9933_v24 = vcombine.low %v4211_v37, %v4215_v30  ;;  %v9935_v46 = vcombine.low %v4212_v42, %v4216_v0  ;;  %v4271_v26 = vld [vmem:[%s11529_s11 + $0x1e0] sm:$0xff] }
 0xa1c   :  { %v4275_v30 = vld [vmem:[%s11529_s11 + $0x200] sm:$0xff] }
 0xa1d   :  { %4106 = vmatpush1.bf16.msra.mxu1 %v6609_v51  ;;  %4167 = vmatpush1.bf16.msra.mxu0 %v6611_v60  ;;  %12658 = vst [vmem:[#allocation73_spill] sm:$0xff] %v9915_v22  ;;  %v9917_v51 = vcombine.high %v4212_v42, %v4216_v0  ;;  %v4219_v60 = vld [vmem:[%s11529_s11 + $0x40] sm:$0xff]  ;;  %12660 = vst [vmem:[#allocation131_spill] sm:$0xff] %v9933_v24  ;;  %v4276_v0 = vld [vmem:[%s11529_s11 + $0x208] sm:$0xff] }
 0xa1e   :  { %4107 = vmatprep.subr.bf16.mxu1 %v6618_v47  ;;  %4168 = vmatprep.subr.bf16.mxu0 %v6620_v13  ;;  %v4223_v47 = vld [vmem:[%s11529_s11 + $0x60] sm:$0xff]  ;;  %v4220_v13 = vld [vmem:[%s11529_s11 + $0x48] sm:$0xff]  ;;  %12661 = vst [vmem:[#allocation132_spill] sm:$0xff] %v9935_v46 }
 0xa1f   :  { %12659 = vst [vmem:[#allocation74_spill] sm:$0xff] %v9917_v51  ;;  %v9937_v23 = vcombine.high %v4219_v60, %v4223_v47  ;;  %v9961_v3 = vcombine.low %v4220_v13, %v4224_v52  ;;  %v4279_v42 = vld [vmem:[%s11529_s11 + $0x220] sm:$0xff] }
 0xa21   :  { %4108 = vmatpush1.bf16.msra.mxu1 %v6617_v29  ;;  %4169 = vmatpush1.bf16.msra.mxu0 %v6619_v15  ;;  %12662 = vst [vmem:[#allocation133_spill] sm:$0xff] %v9937_v23  ;;  %v9939_v29 = vcombine.high %v4220_v13, %v4224_v52  ;;  %v4227_v15 = vld [vmem:[%s11529_s11 + $0x80] sm:$0xff]  ;;  %12665 = vst [vmem:[#allocation156_spill] sm:$0xff] %v9961_v3 }
 0xa22   :  { %4109 = vmatprep.subr.bf16.mxu1 %v6626_v48  ;;  %4170 = vmatprep.subr.bf16.mxu0 %v6628_v11  ;;  %v4231_v48 = vld [vmem:[%s11529_s11 + $0xa0] sm:$0xff]  ;;  %v4228_v11 = vld [vmem:[%s11529_s11 + $0x88] sm:$0xff] }
 0xa23   :  { %12663 = vst [vmem:[#allocation134_spill] sm:$0xff] %v9939_v29  ;;  %v9965_v57 = vcombine.high %v4227_v15, %v4231_v48  ;;  %v9967_v21 = vcombine.high %v4228_v11, %v4232_v5  ;;  %v9985_v25 = vcombine.low %v4228_v11, %v4232_v5  ;;  %v4283_v52 = vld [vmem:[%s11529_s11 + $0x240] sm:$0xff]  ;;  %v4288_v11 = vld [vmem:[%s11529_s11 + $0x268] sm:$0xff]  ;;  %v10135_v5 = vcombine.low %v4275_v30, %v4279_v42 }
 0xa25   :  { %4110 = vmatpush1.bf16.msra.mxu1 %v6625_v8  ;;  %4171 = vmatpush1.bf16.msra.mxu0 %v6627_v7  ;;  %12666 = vst [vmem:[#allocation157_spill] sm:$0xff] %v9965_v57  ;;  %12667 = vst [vmem:[#allocation158_spill] sm:$0xff] %v9967_v21  ;;  %v4239_v8 = vld [vmem:[%s11529_s11 + $0xe0] sm:$0xff]  ;;  %v4236_v7 = vld [vmem:[%s11529_s11 + $0xc8] sm:$0xff] }
 0xa26   :  { %4111 = vmatprep.subr.bf16.mxu1 %v6634_v2  ;;  %4172 = vmatprep.subr.bf16.mxu0 %v6636_v41  ;;  %v4240_v2 = vld [vmem:[%s11529_s11 + $0xe8] sm:$0xff]  ;;  %v9983_v41 = vcombine.low %v4227_v15, %v4231_v48  ;;  %12669 = vst [vmem:[#allocation76_spill] sm:$0xff] %v9985_v25  ;;  %v4287_v15 = vld [vmem:[%s11529_s11 + $0x260] sm:$0xff]  ;;  %12693 = vst [vmem:[#allocation152_spill] sm:$0xff] %v10135_v5 }
 0xa27   :  { %v9991_v10 = vcombine.high %v4236_v7, %v4240_v2  ;;  %v4284_v48 = vld [vmem:[%s11529_s11 + $0x248] sm:$0xff] }
 0xa28   :  { %12668 = vst [vmem:[#allocation75_spill] sm:$0xff] %v9983_v41 }
 0xa29   :  { %4112 = vmatpush1.bf16.msra.mxu1 %v6633_v63  ;;  %4173 = vmatpush1.bf16.msra.mxu0 %v6635_v43  ;;  %12671 = vst [vmem:[#allocation78_spill] sm:$0xff] %v9991_v10  ;;  %v4247_v63 = vld [vmem:[%s11529_s11 + $0x120] sm:$0xff]  ;;  %v4244_v43 = vld [vmem:[%s11529_s11 + $0x108] sm:$0xff] }
 0xa2a   :  { %4113 = vmatprep.subr.bf16.mxu1 %v6642_v49  ;;  %4174 = vmatprep.subr.bf16.mxu0 %v6644_v20  ;;  %v4248_v49 = vld [vmem:[%s11529_s11 + $0x128] sm:$0xff]  ;;  %v10013_v20 = vcombine.low %v4236_v7, %v4240_v2  ;;  %v10017_v56 = vcombine.high %v4243_v1, %v4247_v63  ;;  %v10143_v7 = vcombine.high %v4284_v48, %v4288_v11  ;;  %v4291_v2 = vld [vmem:[%s11529_s11 + $0x280] sm:$0xff] }
 0xa2b   :  { %v10019_v28 = vcombine.high %v4244_v43, %v4248_v49 }
 0xa2c   :  { %12673 = vst [vmem:[#allocation80_spill] sm:$0xff] %v10013_v20  ;;  %12674 = vst [vmem:[#allocation81_spill] sm:$0xff] %v10017_v56 }
 0xa2d   :  { %4114 = vmatpush1.bf16.msra.mxu1 %v6641_v62  ;;  %4175 = vmatpush1.bf16.msra.mxu0 %v6643_v16  ;;  %12675 = vst [vmem:[#allocation82_spill] sm:$0xff] %v10019_v28  ;;  %v4256_v62 = vld [vmem:[%s11529_s11 + $0x168] sm:$0xff]  ;;  %v10035_v16 = vcombine.low %v4243_v1, %v4247_v63  ;;  %12696 = vst [vmem:[#allocation87_spill] sm:$0xff] %v10143_v7  ;;  %v4295_v1 = vld [vmem:[%s11529_s11 + $0x2a0] sm:$0xff] }
 0xa2e   :  { %4115 = vmatprep.subr.bf16.mxu1 %v6650_v50  ;;  %4176 = vmatprep.subr.bf16.mxu0 %v6652_v44  ;;  %v10037_v50 = vcombine.low %v4244_v43, %v4248_v49  ;;  %v10043_v39 = vcombine.high %v4252_v34, %v4256_v62  ;;  %v4292_v63 = vld [vmem:[%s11529_s11 + $0x288] sm:$0xff]  ;;  %v10159_v49 = vcombine.low %v4283_v52, %v4287_v15 }
 0xa2f   :  { %12676 = vst [vmem:[#allocation83_spill] sm:$0xff] %v10035_v16  ;;  %v4296_v43 = vld [vmem:[%s11529_s11 + $0x2a8] sm:$0xff] }
 0xa30   :  { %12677 = vst [vmem:[#allocation84_spill] sm:$0xff] %v10037_v50  ;;  %12679 = vst [vmem:[#allocation86_spill] sm:$0xff] %v10043_v39 }
 0xa31   :  { %4116 = vmatpush1.bf16.msra.mxu1 %v6649_v6  ;;  %4177 = vmatpush1.bf16.msra.mxu0 %v6651_v54  ;;  %v4264_v6 = vld [vmem:[%s11529_s11 + $0x1a8] sm:$0xff]  ;;  %v12680_v54 = vmov 0.0|0.0   ;;  %12697 = vst [vmem:[#allocation88_spill] sm:$0xff] %v10159_v49 }
 0xa32   :  { %4117 = vmatprep.subr.bf16.mxu1 %v6658_v61  ;;  %4178 = vmatprep.subr.bf16.mxu0 %v6660_v19  ;;  %v10065_v61 = vcombine.low %v4252_v34, %v4256_v62  ;;  %v10069_v19 = vcombine.high %v4259_v38, %v4263_v12  ;;  %v10071_v35 = vcombine.high %v4260_v59, %v4264_v6  ;;  %v4299_v62 = vld [vmem:[%s11529_s11 + $0x2c0] sm:$0xff] }
 0xa33   :  { %v10167_v34 = vcombine.high %v4292_v63, %v4296_v43 }
 0xa34   :  { %12682 = vst [vmem:[#allocation101_spill] sm:$0xff] %v10065_v61  ;;  %12683 = vst [vmem:[#allocation102_spill] sm:$0xff] %v10069_v19 }
 0xa35   :  { %4118 = vmatpush1.bf16.msra.mxu1 %v6657_v33  ;;  %4179 = vmatpush1.bf16.msra.mxu0 %v6659_v18  ;;  %12684 = vst [vmem:[#allocation103_spill] sm:$0xff] %v10071_v35  ;;  %v4272_v33 = vld [vmem:[%s11529_s11 + $0x1e8] sm:$0xff]  ;;  %v10087_v18 = vcombine.low %v4259_v38, %v4263_v12  ;;  %12700 = vst [vmem:[#allocation91_spill] sm:$0xff] %v10167_v34  ;;  %v4303_v38 = vld [vmem:[%s11529_s11 + $0x2e0] sm:$0xff] }
 0xa36   :  { %4119 = vmatprep.subr.bf16.mxu1 %v6666_v32  ;;  %4180 = vmatprep.subr.bf16.mxu0 %v6668_v40  ;;  %v10089_v32 = vcombine.low %v4260_v59, %v4264_v6  ;;  %v10093_v40 = vcombine.high %v4267_v4, %v4271_v26  ;;  %v10095_v37 = vcombine.high %v4268_v31, %v4272_v33  ;;  %v4300_v12 = vld [vmem:[%s11529_s11 + $0x2c8] sm:$0xff] }
 0xa37   :  { %12685 = vst [vmem:[#allocation104_spill] sm:$0xff] %v10087_v18  ;;  %v4304_v59 = vld [vmem:[%s11529_s11 + $0x2e8] sm:$0xff]  ;;  %v10183_v6 = vcombine.low %v4291_v2, %v4295_v1 }
 0xa38   :  { %12686 = vst [vmem:[#allocation105_spill] sm:$0xff] %v10089_v32  ;;  %12687 = vst [vmem:[#allocation106_spill] sm:$0xff] %v10093_v40 }
 0xa39   :  { %4120 = vmatpush1.bf16.msra.mxu1 %v6665_v45  ;;  %4181 = vmatpush1.bf16.msra.mxu0 %v6667_v27  ;;  %12688 = vst [vmem:[#allocation135_spill] sm:$0xff] %v10095_v37  ;;  %v4280_v45 = vld [vmem:[%s11529_s11 + $0x228] sm:$0xff]  ;;  %v10111_v27 = vcombine.low %v4267_v4, %v4271_v26  ;;  %12701 = vst [vmem:[#allocation92_spill] sm:$0xff] %v10183_v6  ;;  %v10185_v4 = vcombine.low %v4292_v63, %v4296_v43 }
 0xa3a   :  { %4979 = vmatprep.subr.bf16.mxu1 %v9915_v22  ;;  %5020 = vmatprep.subr.bf16.mxu0 %v9917_v51  ;;  %v10119_v13 = vcombine.high %v4276_v0, %v4280_v45  ;;  %v10189_v26 = vcombine.high %v4299_v62, %v4303_v38  ;;  %v4320_v63 = vld [vmem:[%s11529_s11 + $0x368] sm:$0xff] }
 0xa3b   :  { %12689 = vst [vmem:[#allocation136_spill] sm:$0xff] %v10111_v27  ;;  %12702 = vst [vmem:[#allocation93_spill] sm:$0xff] %v10185_v4 }
 0xa3c   :  { %4122 = vmatmul.mubr.bf16.vlgmr.msra.gmra.mrb[92].mxu1 %v9701_v36  ;;  %4183 = vmatmul.mubr.bf16.vlgmr.msra.gmra.mrb[96].mxu0 %v9701_v36  ;;  %v9959_v36 = vcombine.low %v4219_v60, %v4223_v47  ;;  %v10113_v60 = vcombine.low %v4268_v31, %v4272_v33  ;;  %v10117_v47 = vcombine.high %v4275_v30, %v4279_v42  ;;  %v4307_v33 = vld [vmem:[%s11529_s11 + $0x300] sm:$0xff]  ;;  %v4308_v42 = vld [vmem:[%s11529_s11 + $0x308] sm:$0xff] }
 0xa3d   :  { %4131 = vmatprep.mubr.bf16.mxu1 %v9721_v55  ;;  %4192 = vmatprep.mubr.bf16.mxu0 %v9721_v55  ;;  %v4235_v55 = vld [vmem:[%s11529_s11 + $0xc0] sm:$0xff]  ;;  %12692 = vst [vmem:[#allocation151_spill] sm:$0xff] %v10119_v13  ;;  %12703 = vst [vmem:[#allocation94_spill] sm:$0xff] %v10189_v26  ;;  %v10191_v31 = vcombine.high %v4300_v12, %v4304_v59 }
 0xa3e   :  { %4980 = vmatpush1.bf16.msra.mxu1 %v9933_v24  ;;  %5021 = vmatpush1.bf16.msra.mxu0 %v9935_v46  ;;  %12664 = vst [vmem:[#allocation155_spill] sm:$0xff] %v9959_v36  ;;  %v9989_v17 = vcombine.high %v4235_v55, %v4239_v8  ;;  %12690 = vst [vmem:[#allocation137_spill] sm:$0xff] %v10113_v60  ;;  %v4311_v30 = vld [vmem:[%s11529_s11 + $0x320] sm:$0xff] }
 0xa3f   :  { %4981 = vmatprep.subr.bf16.mxu1 %v9937_v23  ;;  %5022 = vmatprep.subr.bf16.mxu0 %v9939_v29  ;;  %12691 = vst [vmem:[#allocation138_spill] sm:$0xff] %v10117_v47  ;;  %12704 = vst [vmem:[#allocation95_spill] sm:$0xff] %v10191_v31  ;;  %v10231_v43 = vcombine.low %v4307_v33, %v4311_v30 }
 0xa40   :  { %12670 = vst [vmem:[#allocation77_spill] sm:$0xff] %v9989_v17 }
 0xa41   :  { %12709 = vst [vmem:[#allocation3_spill] sm:$0xff] %v10231_v43 }
 0xa42   :  { %4982 = vmatpush1.bf16.msra.mxu1 %v9959_v36  ;;  %5023 = vmatpush1.bf16.msra.mxu0 %v9961_v3 }
 0xa43   :  { %4983 = vmatprep.subr.bf16.mxu1 %v9965_v57  ;;  %5024 = vmatprep.subr.bf16.mxu0 %v9967_v21 }
 0xa44   :  { %4132 = vmatmul.mubr.bf16.gmra.mrb[96].mxu1 %v9745_v58  ;;  %4193 = vmatmul.mubr.bf16.gmra.mrb[100].mxu0 %v9745_v58  ;;  %v10011_v58 = vcombine.low %v4235_v55, %v4239_v8  ;;  %v10137_v55 = vcombine.low %v4276_v0, %v4280_v45  ;;  %v10141_v8 = vcombine.high %v4283_v52, %v4287_v15  ;;  %v4312_v0 = vld [vmem:[%s11529_s11 + $0x328] sm:$0xff] }
 0xa45   :  { %4141 = vmatprep.mubr.bf16.mxu1 %v12657_v14  ;;  %4202 = vmatprep.mubr.bf16.mxu0 %v12657_v14  ;;  %v4251_v14 = vld [vmem:[%s11529_s11 + $0x140] sm:$0xff]  ;;  %v10207_v45 = vcombine.low %v4299_v62, %v4303_v38  ;;  %v10209_v52 = vcombine.low %v4300_v12, %v4304_v59  ;;  %v10213_v15 = vcombine.high %v4307_v33, %v4311_v30  ;;  %v4324_v33 = vld [vmem:[%s11529_s11 + $0x388] sm:$0xff] }
 0xa46   :  { %4984 = vmatpush1.bf16.msra.mxu1 %v9983_v41  ;;  %5025 = vmatpush1.bf16.msra.mxu0 %v9985_v25  ;;  %12672 = vst [vmem:[#allocation79_spill] sm:$0xff] %v10011_v58  ;;  %v10041_v44 = vcombine.high %v4251_v14, %v4255_v53  ;;  %12694 = vst [vmem:[#allocation153_spill] sm:$0xff] %v10137_v55  ;;  %v10233_v62 = vcombine.low %v4308_v42, %v4312_v0  ;;  %v4323_v59 = vld [vmem:[%s11529_s11 + $0x380] sm:$0xff]  ;;  %v4328_v30 = vld [vmem:[%s11529_s11 + $0x3a8] sm:$0xff] }
 0xa47   :  { %4985 = vmatprep.subr.bf16.mxu1 %v9989_v17  ;;  %5026 = vmatprep.subr.bf16.mxu0 %v9991_v10  ;;  %12695 = vst [vmem:[#allocation154_spill] sm:$0xff] %v10141_v8  ;;  %12705 = vst [vmem:[#allocation96_spill] sm:$0xff] %v10207_v45 }
 0xa48   :  { %12678 = vst [vmem:[#allocation85_spill] sm:$0xff] %v10041_v44  ;;  %12706 = vst [vmem:[#allocation97_spill] sm:$0xff] %v10209_v52 }
 0xa49   :  { %12707 = vst [vmem:[#allocation98_spill] sm:$0xff] %v10213_v15  ;;  %12710 = vst [vmem:[#allocation4_spill] sm:$0xff] %v10233_v62 }
 0xa4a   :  { %4986 = vmatpush1.bf16.msra.mxu1 %v10011_v58  ;;  %5027 = vmatpush1.bf16.msra.mxu0 %v10013_v20 }
 0xa4b   :  { %4987 = vmatprep.subr.bf16.mxu1 %v10017_v56  ;;  %5028 = vmatprep.subr.bf16.mxu0 %v10019_v28 }
 0xa4c   :  { %4142 = vmatmul.mubr.bf16.gmra.mrb[100].mxu1 %v9777_v9  ;;  %4203 = vmatmul.mubr.bf16.gmra.mrb[104].mxu0 %v9777_v9  ;;  %v10063_v9 = vcombine.low %v4251_v14, %v4255_v53  ;;  %v10161_v14 = vcombine.low %v4284_v48, %v4288_v11  ;;  %v10165_v53 = vcombine.high %v4291_v2, %v4295_v1  ;;  %v4315_v11 = vld [vmem:[%s11529_s11 + $0x340] sm:$0xff]  ;;  %v4316_v1 = vld [vmem:[%s11529_s11 + $0x348] sm:$0xff] }
 0xa4d   :  { %5011 = vmatprep.mubr.bf16.mxu1 %v12680_v54  ;;  %5052 = vmatprep.mubr.bf16.mxu0 %v12680_v54  ;;  %v10215_v48 = vcombine.high %v4308_v42, %v4312_v0  ;;  %v4319_v2 = vld [vmem:[%s11529_s11 + $0x360] sm:$0xff]  ;;  %v10239_v12 = vcombine.high %v4316_v1, %v4320_v63  ;;  %v10257_v0 = vcombine.low %v4316_v1, %v4320_v63 }
 0xa4e   :  { %4988 = vmatpush1.bf16.msra.mxu1 %v10035_v16  ;;  %5029 = vmatpush1.bf16.msra.mxu0 %v10037_v50  ;;  %12681 = vst [vmem:[#allocation100_spill] sm:$0xff] %v10063_v9  ;;  %12698 = vst [vmem:[#allocation89_spill] sm:$0xff] %v10161_v14  ;;  %v10237_v38 = vcombine.high %v4315_v11, %v4319_v2  ;;  %v10255_v42 = vcombine.low %v4315_v11, %v4319_v2  ;;  %v4332_v11 = vld [vmem:[%s11529_s11 + $0x3c8] sm:$0xff] }
 0xa4f   :  { %4989 = vmatprep.subr.bf16.mxu1 %v10041_v44  ;;  %5030 = vmatprep.subr.bf16.mxu0 %v10043_v39  ;;  %12699 = vst [vmem:[#allocation90_spill] sm:$0xff] %v10165_v53  ;;  %12708 = vst [vmem:[#allocation99_spill] sm:$0xff] %v10215_v48  ;;  %v4336_v2 = vld [vmem:[%s11529_s11 + $0x3e8] sm:$0xff]  ;;  %v10281_v63 = vcombine.low %v4324_v33, %v4328_v30 }
 0xa50   :  { %12711 = vst [vmem:[#allocation5_spill] sm:$0xff] %v10237_v38  ;;  %12712 = vst [vmem:[#allocation6_spill] sm:$0xff] %v10239_v12 }
 0xa51   :  { %12713 = vst [vmem:[#allocation7_spill] sm:$0xff] %v10255_v42  ;;  %12714 = vst [vmem:[#allocation8_spill] sm:$0xff] %v10257_v0 }
 0xa52   :  { %4990 = vmatpush1.bf16.msra.mxu1 %v10063_v9  ;;  %5031 = vmatpush1.bf16.msra.mxu0 %v10065_v61  ;;  %12718 = vst [vmem:[#allocation12_spill] sm:$0xff] %v10281_v63 }
 0xa53   :  { %4991 = vmatprep.subr.bf16.mxu1 %v10069_v19  ;;  %5032 = vmatprep.subr.bf16.mxu0 %v10071_v35 }
 0xa56   :  { %4992 = vmatpush1.bf16.msra.mxu1 %v10087_v18  ;;  %5033 = vmatpush1.bf16.msra.mxu0 %v10089_v32 }
 0xa57   :  { %4993 = vmatprep.subr.bf16.mxu1 %v10093_v40  ;;  %5034 = vmatprep.subr.bf16.mxu0 %v10095_v37 }
 0xa5a   :  { %4994 = vmatpush1.bf16.msra.mxu1 %v10111_v27  ;;  %5035 = vmatpush1.bf16.msra.mxu0 %v10113_v60 }
 0xa5b   :  { %4995 = vmatprep.subr.bf16.mxu1 %v10117_v47  ;;  %5036 = vmatprep.subr.bf16.mxu0 %v10119_v13 }
 0xa5e   :  { %4996 = vmatpush1.bf16.msra.mxu1 %v10135_v5  ;;  %5037 = vmatpush1.bf16.msra.mxu0 %v10137_v55 }
 0xa5f   :  { %4997 = vmatprep.subr.bf16.mxu1 %v10141_v8  ;;  %5038 = vmatprep.subr.bf16.mxu0 %v10143_v7 }
 0xa62   :  { %4998 = vmatpush1.bf16.msra.mxu1 %v10159_v49  ;;  %5039 = vmatpush1.bf16.msra.mxu0 %v10161_v14 }
 0xa63   :  { %4999 = vmatprep.subr.bf16.mxu1 %v10165_v53  ;;  %5040 = vmatprep.subr.bf16.mxu0 %v10167_v34 }
 0xa66   :  { %5000 = vmatpush1.bf16.msra.mxu1 %v10183_v6  ;;  %5041 = vmatpush1.bf16.msra.mxu0 %v10185_v4 }
 0xa67   :  { %5001 = vmatprep.subr.bf16.mxu1 %v10189_v26  ;;  %5042 = vmatprep.subr.bf16.mxu0 %v10191_v31 }
 0xa6a   :  { %5002 = vmatpush1.bf16.msra.mxu1 %v10207_v45  ;;  %5043 = vmatpush1.bf16.msra.mxu0 %v10209_v52  ;;  %v4327_v52 = vld [vmem:[%s11529_s11 + $0x3a0] sm:$0xff] }
 0xa6b   :  { %5003 = vmatprep.subr.bf16.mxu1 %v10213_v15  ;;  %5044 = vmatprep.subr.bf16.mxu0 %v10215_v48  ;;  %v10261_v48 = vcombine.high %v4323_v59, %v4327_v52  ;;  %v10263_v15 = vcombine.high %v4324_v33, %v4328_v30  ;;  %v4331_v45 = vld [vmem:[%s11529_s11 + $0x3c0] sm:$0xff]  ;;  %v10279_v1 = vcombine.low %v4323_v59, %v4327_v52  ;;  %v4214_v52 = vld [vmem:[%s11529_s11 + $0x18] sm:$0xff] }
 0xa6c   :  { %v4218_v59 = vld [vmem:[%s11529_s11 + $0x38] sm:$0xff]  ;;  %v10305_v30 = vcombine.low %v4332_v11, %v4336_v2 }
 0xa6d   :  { %12715 = vst [vmem:[#allocation9_spill] sm:$0xff] %v10261_v48  ;;  %12716 = vst [vmem:[#allocation10_spill] sm:$0xff] %v10263_v15 }
 0xa6e   :  { %5004 = vmatpush1.bf16.msra.mxu1 %v10231_v43  ;;  %5045 = vmatpush1.bf16.msra.mxu0 %v10233_v62  ;;  %v4335_v62 = vld [vmem:[%s11529_s11 + $0x3e0] sm:$0xff]  ;;  %12717 = vst [vmem:[#allocation11_spill] sm:$0xff] %v10279_v1  ;;  %v4213_v43 = vld [vmem:[%s11529_s11 + $0x10] sm:$0xff]  ;;  %12722 = vst [vmem:[#allocation16_spill] sm:$0xff] %v10305_v30 }
 0xa6f   :  { %5005 = vmatprep.subr.bf16.mxu1 %v10237_v38  ;;  %5046 = vmatprep.subr.bf16.mxu0 %v10239_v12  ;;  %v10285_v12 = vcombine.high %v4331_v45, %v4335_v62  ;;  %v10287_v38 = vcombine.high %v4332_v11, %v4336_v2  ;;  %v10303_v33 = vcombine.low %v4331_v45, %v4335_v62  ;;  %v4222_v45 = vld [vmem:[%s11529_s11 + $0x58] sm:$0xff] }
 0xa70   :  { %v4226_v62 = vld [vmem:[%s11529_s11 + $0x78] sm:$0xff]  ;;  %v10329_v2 = vcombine.low %v4214_v52, %v4218_v59 }
 0xa71   :  { %12719 = vst [vmem:[#allocation13_spill] sm:$0xff] %v10285_v12  ;;  %12720 = vst [vmem:[#allocation14_spill] sm:$0xff] %v10287_v38 }
 0xa72   :  { %5006 = vmatpush1.bf16.msra.mxu1 %v10255_v42  ;;  %5047 = vmatpush1.bf16.msra.mxu0 %v10257_v0  ;;  %v4217_v0 = vld [vmem:[%s11529_s11 + $0x30] sm:$0xff]  ;;  %12721 = vst [vmem:[#allocation15_spill] sm:$0xff] %v10303_v33  ;;  %12726 = vst [vmem:[#allocation20_spill] sm:$0xff] %v10329_v2 }
 0xa73   :  { %5007 = vmatprep.subr.bf16.mxu1 %v10261_v48  ;;  %5048 = vmatprep.subr.bf16.mxu0 %v10263_v15  ;;  %v10309_v15 = vcombine.high %v4213_v43, %v4217_v0  ;;  %v10311_v48 = vcombine.high %v4214_v52, %v4218_v59  ;;  %v4221_v42 = vld [vmem:[%s11529_s11 + $0x50] sm:$0xff]  ;;  %v10327_v11 = vcombine.low %v4213_v43, %v4217_v0  ;;  %v4230_v43 = vld [vmem:[%s11529_s11 + $0x98] sm:$0xff] }
 0xa74   :  { %v4234_v0 = vld [vmem:[%s11529_s11 + $0xb8] sm:$0xff]  ;;  %v10355_v59 = vcombine.low %v4222_v45, %v4226_v62 }
 0xa75   :  { %12723 = vst [vmem:[#allocation17_spill] sm:$0xff] %v10309_v15  ;;  %12724 = vst [vmem:[#allocation18_spill] sm:$0xff] %v10311_v48 }
 0xa76   :  { %5008 = vmatpush1.bf16.msra.mxu1 %v10279_v1  ;;  %5049 = vmatpush1.bf16.msra.mxu0 %v10281_v63  ;;  %v4225_v63 = vld [vmem:[%s11529_s11 + $0x70] sm:$0xff]  ;;  %12725 = vst [vmem:[#allocation19_spill] sm:$0xff] %v10327_v11  ;;  %12730 = vst [vmem:[#allocation24_spill] sm:$0xff] %v10355_v59 }
 0xa77   :  { %5009 = vmatprep.subr.bf16.mxu1 %v10285_v12  ;;  %5050 = vmatprep.subr.bf16.mxu0 %v10287_v38  ;;  %v10333_v38 = vcombine.high %v4221_v42, %v4225_v63  ;;  %v10335_v12 = vcombine.high %v4222_v45, %v4226_v62  ;;  %v4229_v1 = vld [vmem:[%s11529_s11 + $0x90] sm:$0xff]  ;;  %v10353_v52 = vcombine.low %v4221_v42, %v4225_v63  ;;  %v4238_v42 = vld [vmem:[%s11529_s11 + $0xd8] sm:$0xff] }
 0xa78   :  { %v4242_v63 = vld [vmem:[%s11529_s11 + $0xf8] sm:$0xff]  ;;  %v10381_v62 = vcombine.low %v4230_v43, %v4234_v0 }
 0xa79   :  { %12727 = vst [vmem:[#allocation21_spill] sm:$0xff] %v10333_v38  ;;  %12728 = vst [vmem:[#allocation22_spill] sm:$0xff] %v10335_v12 }
 0xa7a   :  { %5010 = vmatpush1.bf16.msra.mxu1 %v10303_v33  ;;  %5051 = vmatpush1.bf16.msra.mxu0 %v10305_v30  ;;  %v4233_v30 = vld [vmem:[%s11529_s11 + $0xb0] sm:$0xff]  ;;  %12729 = vst [vmem:[#allocation23_spill] sm:$0xff] %v10353_v52  ;;  %12734 = vst [vmem:[#allocation28_spill] sm:$0xff] %v10381_v62 }
 0xa7b   :  { %5061 = vmatprep.subr.bf16.mxu1 %v10309_v15  ;;  %5102 = vmatprep.subr.bf16.mxu0 %v10311_v48  ;;  %v10359_v48 = vcombine.high %v4229_v1, %v4233_v30  ;;  %v10361_v15 = vcombine.high %v4230_v43, %v4234_v0  ;;  %v4237_v33 = vld [vmem:[%s11529_s11 + $0xd0] sm:$0xff]  ;;  %v10379_v45 = vcombine.low %v4229_v1, %v4233_v30  ;;  %v4246_v1 = vld [vmem:[%s11529_s11 + $0x118] sm:$0xff] }
 0xa7c   :  { %v4250_v30 = vld [vmem:[%s11529_s11 + $0x138] sm:$0xff]  ;;  %v10405_v0 = vcombine.low %v4238_v42, %v4242_v63 }
 0xa7d   :  { %5012 = vmatmul.mubr.bf16.vlgmr.msra.gmra.mrb[104].mxu1 %v12680_v54  ;;  %5053 = vmatmul.mubr.bf16.vlgmr.msra.gmra.mrb[108].mxu0 %v12680_v54  ;;  %12731 = vst [vmem:[#allocation25_spill] sm:$0xff] %v10359_v48  ;;  %12732 = vst [vmem:[#allocation26_spill] sm:$0xff] %v10361_v15 }
 0xa7e   :  { %5062 = vmatpush1.bf16.msra.mxu1 %v10327_v11  ;;  %5103 = vmatpush1.bf16.msra.mxu0 %v10329_v2  ;;  %v4241_v2 = vld [vmem:[%s11529_s11 + $0xf0] sm:$0xff]  ;;  %12733 = vst [vmem:[#allocation27_spill] sm:$0xff] %v10379_v45  ;;  %12738 = vst [vmem:[#allocation32_spill] sm:$0xff] %v10405_v0 }
 0xa7f   :  { %5063 = vmatprep.subr.bf16.mxu1 %v10333_v38  ;;  %5104 = vmatprep.subr.bf16.mxu0 %v10335_v12  ;;  %v10385_v12 = vcombine.high %v4237_v33, %v4241_v2  ;;  %v10387_v38 = vcombine.high %v4238_v42, %v4242_v63  ;;  %v4245_v11 = vld [vmem:[%s11529_s11 + $0x110] sm:$0xff]  ;;  %v10403_v43 = vcombine.low %v4237_v33, %v4241_v2  ;;  %v4254_v33 = vld [vmem:[%s11529_s11 + $0x158] sm:$0xff] }
 0xa80   :  { %5093 = vmatprep.mubr.bf16.mxu1 %v12680_v54  ;;  %5134 = vmatprep.mubr.bf16.mxu0 %v12680_v54  ;;  %v4258_v2 = vld [vmem:[%s11529_s11 + $0x178] sm:$0xff]  ;;  %v10429_v63 = vcombine.low %v4246_v1, %v4250_v30 }
 0xa81   :  { %12735 = vst [vmem:[#allocation29_spill] sm:$0xff] %v10385_v12  ;;  %12736 = vst [vmem:[#allocation30_spill] sm:$0xff] %v10387_v38 }
 0xa82   :  { %5064 = vmatpush1.bf16.msra.mxu1 %v10353_v52  ;;  %5105 = vmatpush1.bf16.msra.mxu0 %v10355_v59  ;;  %v4249_v59 = vld [vmem:[%s11529_s11 + $0x130] sm:$0xff]  ;;  %12737 = vst [vmem:[#allocation31_spill] sm:$0xff] %v10403_v43  ;;  %12742 = vst [vmem:[#allocation36_spill] sm:$0xff] %v10429_v63 }
 0xa83   :  { %5065 = vmatprep.subr.bf16.mxu1 %v10359_v48  ;;  %5106 = vmatprep.subr.bf16.mxu0 %v10361_v15  ;;  %v10409_v15 = vcombine.high %v4245_v11, %v4249_v59  ;;  %v10411_v48 = vcombine.high %v4246_v1, %v4250_v30  ;;  %v4253_v52 = vld [vmem:[%s11529_s11 + $0x150] sm:$0xff]  ;;  %v10427_v42 = vcombine.low %v4245_v11, %v4249_v59  ;;  %v4262_v11 = vld [vmem:[%s11529_s11 + $0x198] sm:$0xff] }
 0xa84   :  { %v4266_v59 = vld [vmem:[%s11529_s11 + $0x1b8] sm:$0xff]  ;;  %v10453_v30 = vcombine.low %v4254_v33, %v4258_v2 }
 0xa85   :  { %12739 = vst [vmem:[#allocation33_spill] sm:$0xff] %v10409_v15  ;;  %12740 = vst [vmem:[#allocation34_spill] sm:$0xff] %v10411_v48 }
 0xa86   :  { %5066 = vmatpush1.bf16.msra.mxu1 %v10379_v45  ;;  %5107 = vmatpush1.bf16.msra.mxu0 %v10381_v62  ;;  %v4257_v62 = vld [vmem:[%s11529_s11 + $0x170] sm:$0xff]  ;;  %12741 = vst [vmem:[#allocation35_spill] sm:$0xff] %v10427_v42  ;;  %12746 = vst [vmem:[#allocation40_spill] sm:$0xff] %v10453_v30 }
 0xa87   :  { %5067 = vmatprep.subr.bf16.mxu1 %v10385_v12  ;;  %5108 = vmatprep.subr.bf16.mxu0 %v10387_v38  ;;  %v10433_v38 = vcombine.high %v4253_v52, %v4257_v62  ;;  %v10435_v12 = vcombine.high %v4254_v33, %v4258_v2  ;;  %v4261_v45 = vld [vmem:[%s11529_s11 + $0x190] sm:$0xff]  ;;  %v10451_v1 = vcombine.low %v4253_v52, %v4257_v62  ;;  %v4270_v52 = vld [vmem:[%s11529_s11 + $0x1d8] sm:$0xff] }
 0xa88   :  { %v4274_v62 = vld [vmem:[%s11529_s11 + $0x1f8] sm:$0xff]  ;;  %v10477_v2 = vcombine.low %v4262_v11, %v4266_v59 }
 0xa89   :  { %12743 = vst [vmem:[#allocation37_spill] sm:$0xff] %v10433_v38  ;;  %12744 = vst [vmem:[#allocation38_spill] sm:$0xff] %v10435_v12 }
 0xa8a   :  { %5068 = vmatpush1.bf16.msra.mxu1 %v10403_v43  ;;  %5109 = vmatpush1.bf16.msra.mxu0 %v10405_v0  ;;  %v4265_v0 = vld [vmem:[%s11529_s11 + $0x1b0] sm:$0xff]  ;;  %12745 = vst [vmem:[#allocation39_spill] sm:$0xff] %v10451_v1  ;;  %12750 = vst [vmem:[#allocation44_spill] sm:$0xff] %v10477_v2 }
 0xa8b   :  { %5069 = vmatprep.subr.bf16.mxu1 %v10409_v15  ;;  %5110 = vmatprep.subr.bf16.mxu0 %v10411_v48  ;;  %v10457_v48 = vcombine.high %v4261_v45, %v4265_v0  ;;  %v10459_v15 = vcombine.high %v4262_v11, %v4266_v59  ;;  %v4269_v43 = vld [vmem:[%s11529_s11 + $0x1d0] sm:$0xff]  ;;  %v10475_v33 = vcombine.low %v4261_v45, %v4265_v0  ;;  %v4278_v45 = vld [vmem:[%s11529_s11 + $0x218] sm:$0xff] }
 0xa8c   :  { %v4282_v0 = vld [vmem:[%s11529_s11 + $0x238] sm:$0xff]  ;;  %v10501_v59 = vcombine.low %v4270_v52, %v4274_v62 }
 0xa8d   :  { %12747 = vst [vmem:[#allocation41_spill] sm:$0xff] %v10457_v48  ;;  %12748 = vst [vmem:[#allocation42_spill] sm:$0xff] %v10459_v15 }
 0xa8e   :  { %5070 = vmatpush1.bf16.msra.mxu1 %v10427_v42  ;;  %5111 = vmatpush1.bf16.msra.mxu0 %v10429_v63  ;;  %v4273_v63 = vld [vmem:[%s11529_s11 + $0x1f0] sm:$0xff]  ;;  %12749 = vst [vmem:[#allocation43_spill] sm:$0xff] %v10475_v33  ;;  %12754 = vst [vmem:[#allocation48_spill] sm:$0xff] %v10501_v59 }
 0xa8f   :  { %5071 = vmatprep.subr.bf16.mxu1 %v10433_v38  ;;  %5112 = vmatprep.subr.bf16.mxu0 %v10435_v12  ;;  %v10481_v12 = vcombine.high %v4269_v43, %v4273_v63  ;;  %v10483_v38 = vcombine.high %v4270_v52, %v4274_v62  ;;  %v4277_v42 = vld [vmem:[%s11529_s11 + $0x210] sm:$0xff]  ;;  %v10499_v11 = vcombine.low %v4269_v43, %v4273_v63  ;;  %v4286_v43 = vld [vmem:[%s11529_s11 + $0x258] sm:$0xff] }
 0xa90   :  { %v4290_v63 = vld [vmem:[%s11529_s11 + $0x278] sm:$0xff]  ;;  %v10525_v62 = vcombine.low %v4278_v45, %v4282_v0 }
 0xa91   :  { %12751 = vst [vmem:[#allocation45_spill] sm:$0xff] %v10481_v12  ;;  %12752 = vst [vmem:[#allocation46_spill] sm:$0xff] %v10483_v38 }
 0xa92   :  { %5072 = vmatpush1.bf16.msra.mxu1 %v10451_v1  ;;  %5113 = vmatpush1.bf16.msra.mxu0 %v10453_v30  ;;  %v4281_v30 = vld [vmem:[%s11529_s11 + $0x230] sm:$0xff]  ;;  %12753 = vst [vmem:[#allocation47_spill] sm:$0xff] %v10499_v11  ;;  %12758 = vst [vmem:[#allocation52_spill] sm:$0xff] %v10525_v62 }
 0xa93   :  { %5073 = vmatprep.subr.bf16.mxu1 %v10457_v48  ;;  %5114 = vmatprep.subr.bf16.mxu0 %v10459_v15  ;;  %v10505_v15 = vcombine.high %v4277_v42, %v4281_v30  ;;  %v10507_v48 = vcombine.high %v4278_v45, %v4282_v0  ;;  %v4285_v1 = vld [vmem:[%s11529_s11 + $0x250] sm:$0xff]  ;;  %v10523_v52 = vcombine.low %v4277_v42, %v4281_v30  ;;  %v4294_v42 = vld [vmem:[%s11529_s11 + $0x298] sm:$0xff] }
 0xa94   :  { %v4298_v30 = vld [vmem:[%s11529_s11 + $0x2b8] sm:$0xff]  ;;  %v10549_v0 = vcombine.low %v4286_v43, %v4290_v63 }
 0xa95   :  { %12755 = vst [vmem:[#allocation49_spill] sm:$0xff] %v10505_v15  ;;  %12756 = vst [vmem:[#allocation50_spill] sm:$0xff] %v10507_v48 }
 0xa96   :  { %5074 = vmatpush1.bf16.msra.mxu1 %v10475_v33  ;;  %5115 = vmatpush1.bf16.msra.mxu0 %v10477_v2  ;;  %v4289_v2 = vld [vmem:[%s11529_s11 + $0x270] sm:$0xff]  ;;  %12757 = vst [vmem:[#allocation51_spill] sm:$0xff] %v10523_v52  ;;  %12762 = vst [vmem:[#allocation56_spill] sm:$0xff] %v10549_v0 }
 0xa97   :  { %5075 = vmatprep.subr.bf16.mxu1 %v10481_v12  ;;  %5116 = vmatprep.subr.bf16.mxu0 %v10483_v38  ;;  %v10529_v38 = vcombine.high %v4285_v1, %v4289_v2  ;;  %v10531_v12 = vcombine.high %v4286_v43, %v4290_v63  ;;  %v4293_v33 = vld [vmem:[%s11529_s11 + $0x290] sm:$0xff]  ;;  %v10547_v45 = vcombine.low %v4285_v1, %v4289_v2  ;;  %v4302_v1 = vld [vmem:[%s11529_s11 + $0x2d8] sm:$0xff] }
 0xa98   :  { %v4306_v2 = vld [vmem:[%s11529_s11 + $0x2f8] sm:$0xff]  ;;  %v10573_v63 = vcombine.low %v4294_v42, %v4298_v30 }
 0xa99   :  { %12759 = vst [vmem:[#allocation53_spill] sm:$0xff] %v10529_v38  ;;  %12760 = vst [vmem:[#allocation54_spill] sm:$0xff] %v10531_v12 }
 0xa9a   :  { %5076 = vmatpush1.bf16.msra.mxu1 %v10499_v11  ;;  %5117 = vmatpush1.bf16.msra.mxu0 %v10501_v59  ;;  %v4297_v59 = vld [vmem:[%s11529_s11 + $0x2b0] sm:$0xff]  ;;  %12761 = vst [vmem:[#allocation55_spill] sm:$0xff] %v10547_v45  ;;  %12766 = vst [vmem:[#allocation60_spill] sm:$0xff] %v10573_v63 }
 0xa9b   :  { %5077 = vmatprep.subr.bf16.mxu1 %v10505_v15  ;;  %5118 = vmatprep.subr.bf16.mxu0 %v10507_v48  ;;  %v10553_v48 = vcombine.high %v4293_v33, %v4297_v59  ;;  %v10555_v15 = vcombine.high %v4294_v42, %v4298_v30  ;;  %v4301_v11 = vld [vmem:[%s11529_s11 + $0x2d0] sm:$0xff]  ;;  %v10571_v43 = vcombine.low %v4293_v33, %v4297_v59  ;;  %v4310_v33 = vld [vmem:[%s11529_s11 + $0x318] sm:$0xff] }
 0xa9c   :  { %v4314_v59 = vld [vmem:[%s11529_s11 + $0x338] sm:$0xff]  ;;  %v10597_v30 = vcombine.low %v4302_v1, %v4306_v2 }
 0xa9d   :  { %12763 = vst [vmem:[#allocation57_spill] sm:$0xff] %v10553_v48  ;;  %12764 = vst [vmem:[#allocation58_spill] sm:$0xff] %v10555_v15 }
 0xa9e   :  { %5078 = vmatpush1.bf16.msra.mxu1 %v10523_v52  ;;  %5119 = vmatpush1.bf16.msra.mxu0 %v10525_v62  ;;  %v4305_v62 = vld [vmem:[%s11529_s11 + $0x2f0] sm:$0xff]  ;;  %12765 = vst [vmem:[#allocation59_spill] sm:$0xff] %v10571_v43  ;;  %12770 = vst [vmem:[#allocation64_spill] sm:$0xff] %v10597_v30 }
 0xa9f   :  { %5079 = vmatprep.subr.bf16.mxu1 %v10529_v38  ;;  %5120 = vmatprep.subr.bf16.mxu0 %v10531_v12  ;;  %v10577_v12 = vcombine.high %v4301_v11, %v4305_v62  ;;  %v10579_v38 = vcombine.high %v4302_v1, %v4306_v2  ;;  %v4309_v52 = vld [vmem:[%s11529_s11 + $0x310] sm:$0xff]  ;;  %v10595_v42 = vcombine.low %v4301_v11, %v4305_v62  ;;  %v4318_v11 = vld [vmem:[%s11529_s11 + $0x358] sm:$0xff] }
 0xaa0   :  { %v4322_v62 = vld [vmem:[%s11529_s11 + $0x378] sm:$0xff]  ;;  %v10621_v2 = vcombine.low %v4310_v33, %v4314_v59 }
 0xaa1   :  { %12767 = vst [vmem:[#allocation61_spill] sm:$0xff] %v10577_v12  ;;  %12768 = vst [vmem:[#allocation62_spill] sm:$0xff] %v10579_v38 }
 0xaa2   :  { %5080 = vmatpush1.bf16.msra.mxu1 %v10547_v45  ;;  %5121 = vmatpush1.bf16.msra.mxu0 %v10549_v0  ;;  %v4313_v0 = vld [vmem:[%s11529_s11 + $0x330] sm:$0xff]  ;;  %12769 = vst [vmem:[#allocation63_spill] sm:$0xff] %v10595_v42  ;;  %12774 = vst [vmem:[#allocation68_spill] sm:$0xff] %v10621_v2 }
 0xaa3   :  { %5081 = vmatprep.subr.bf16.mxu1 %v10553_v48  ;;  %5122 = vmatprep.subr.bf16.mxu0 %v10555_v15  ;;  %v10601_v15 = vcombine.high %v4309_v52, %v4313_v0  ;;  %v10603_v48 = vcombine.high %v4310_v33, %v4314_v59  ;;  %v4317_v45 = vld [vmem:[%s11529_s11 + $0x350] sm:$0xff]  ;;  %v10619_v1 = vcombine.low %v4309_v52, %v4313_v0  ;;  %v4326_v52 = vld [vmem:[%s11529_s11 + $0x398] sm:$0xff] }
 0xaa4   :  { %v4330_v0 = vld [vmem:[%s11529_s11 + $0x3b8] sm:$0xff]  ;;  %v10645_v59 = vcombine.low %v4318_v11, %v4322_v62 }
 0xaa5   :  { %12771 = vst [vmem:[#allocation65_spill] sm:$0xff] %v10601_v15  ;;  %12772 = vst [vmem:[#allocation66_spill] sm:$0xff] %v10603_v48 }
 0xaa6   :  { %5082 = vmatpush1.bf16.msra.mxu1 %v10571_v43  ;;  %5123 = vmatpush1.bf16.msra.mxu0 %v10573_v63  ;;  %v4321_v63 = vld [vmem:[%s11529_s11 + $0x370] sm:$0xff]  ;;  %12773 = vst [vmem:[#allocation67_spill] sm:$0xff] %v10619_v1  ;;  %12778 = vst [vmem:[#allocation142_spill] sm:$0xff] %v10645_v59 }
 0xaa7   :  { %5083 = vmatprep.subr.bf16.mxu1 %v10577_v12  ;;  %5124 = vmatprep.subr.bf16.mxu0 %v10579_v38  ;;  %v10625_v38 = vcombine.high %v4317_v45, %v4321_v63  ;;  %v10627_v12 = vcombine.high %v4318_v11, %v4322_v62  ;;  %v4325_v43 = vld [vmem:[%s11529_s11 + $0x390] sm:$0xff]  ;;  %v10643_v33 = vcombine.low %v4317_v45, %v4321_v63  ;;  %v4334_v45 = vld [vmem:[%s11529_s11 + $0x3d8] sm:$0xff] }
 0xaa8   :  { %v4338_v63 = vld [vmem:[%s11529_s11 + $0x3f8] sm:$0xff]  ;;  %v10669_v62 = vcombine.low %v4326_v52, %v4330_v0 }
 0xaa9   :  { %12775 = vst [vmem:[#allocation139_spill] sm:$0xff] %v10625_v38  ;;  %12776 = vst [vmem:[#allocation140_spill] sm:$0xff] %v10627_v12 }
 0xaaa   :  { %5084 = vmatpush1.bf16.msra.mxu1 %v10595_v42  ;;  %5125 = vmatpush1.bf16.msra.mxu0 %v10597_v30  ;;  %v4329_v30 = vld [vmem:[%s11529_s11 + $0x3b0] sm:$0xff]  ;;  %12777 = vst [vmem:[#allocation141_spill] sm:$0xff] %v10643_v33  ;;  %12782 = vst [vmem:[#allocation150_spill] sm:$0xff] %v10669_v62 }
 0xaab   :  { %5085 = vmatprep.subr.bf16.mxu1 %v10601_v15  ;;  %5126 = vmatprep.subr.bf16.mxu0 %v10603_v48  ;;  %v10649_v48 = vcombine.high %v4325_v43, %v4329_v30  ;;  %v10651_v15 = vcombine.high %v4326_v52, %v4330_v0  ;;  %v4333_v42 = vld [vmem:[%s11529_s11 + $0x3d0] sm:$0xff]  ;;  %v10667_v11 = vcombine.low %v4325_v43, %v4329_v30 }
 0xaad   :  { %12779 = vst [vmem:[#allocation147_spill] sm:$0xff] %v10649_v48  ;;  %12780 = vst [vmem:[#allocation148_spill] sm:$0xff] %v10651_v15 }
 0xaae   :  { %5086 = vmatpush1.bf16.msra.mxu1 %v10619_v1  ;;  %5127 = vmatpush1.bf16.msra.mxu0 %v10621_v2  ;;  %v4337_v2 = vld [vmem:[%s11529_s11 + $0x3f0] sm:$0xff]  ;;  %12781 = vst [vmem:[#allocation149_spill] sm:$0xff] %v10667_v11 }
 0xaaf   :  { %5087 = vmatprep.subr.bf16.mxu1 %v10625_v38  ;;  %5128 = vmatprep.subr.bf16.mxu0 %v10627_v12  ;;  %v10673_v12 = vcombine.high %v4333_v42, %v4337_v2  ;;  %v10675_v38 = vcombine.high %v4334_v45, %v4338_v63  ;;  %v10679_v1 = vcombine.low %v4333_v42, %v4337_v2 }
 0xab1   :  { %12783 = vst [vmem:[#allocation107_spill] sm:$0xff] %v10673_v12  ;;  %12784 = vst [vmem:[#allocation108_spill] sm:$0xff] %v10675_v38 }
 0xab2   :  { %5088 = vmatpush1.bf16.msra.mxu1 %v10643_v33  ;;  %5129 = vmatpush1.bf16.msra.mxu0 %v10645_v59  ;;  %12785 = vst [vmem:[#allocation109_spill] sm:$0xff] %v10679_v1  ;;  %v10681_v33 = vcombine.low %v4334_v45, %v4338_v63 }
 0xab3   :  { %5089 = vmatprep.subr.bf16.mxu1 %v10649_v48  ;;  %5130 = vmatprep.subr.bf16.mxu0 %v10651_v15 }
 0xab4   :  { %12786 = vst [vmem:[#allocation110_spill] sm:$0xff] %v10681_v33 }
 0xab6   :  { %5090 = vmatpush1.bf16.msra.mxu1 %v10667_v11  ;;  %5131 = vmatpush1.bf16.msra.mxu0 %v10669_v62 }
 0xab7   :  { %5091 = vmatprep.subr.bf16.mxu1 %v10673_v12  ;;  %5132 = vmatprep.subr.bf16.mxu0 %v10675_v38 }
 0xaba   :  { %5092 = vmatpush1.bf16.msra.mxu1 %v10679_v1  ;;  %5133 = vmatpush1.bf16.msra.mxu0 %v10681_v33 }
 0xabb   :  { %5201 = vmatprep.subr.bf16.mxu1 %v9915_v22  ;;  %5242 = vmatprep.subr.bf16.mxu0 %v9917_v51 }
 0xabd   :  { %5094 = vmatmul.mubr.bf16.vlgmr.msra.gmra.mrb[100].mxu1 %v12680_v54  ;;  %5135 = vmatmul.mubr.bf16.vlgmr.msra.gmra.mrb[104].mxu0 %v12680_v54 }
 0xabe   :  { %5202 = vmatpush1.bf16.msra.mxu1 %v9933_v24  ;;  %5243 = vmatpush1.bf16.msra.mxu0 %v9935_v46 }
 0xabf   :  { %5203 = vmatprep.subr.bf16.mxu1 %v9937_v23  ;;  %5244 = vmatprep.subr.bf16.mxu0 %v9939_v29 }
 0xac2   :  { %5204 = vmatpush1.bf16.msra.mxu1 %v9959_v36  ;;  %5245 = vmatpush1.bf16.msra.mxu0 %v9961_v3 }
 0xac3   :  { %5205 = vmatprep.subr.bf16.mxu1 %v9965_v57  ;;  %5246 = vmatprep.subr.bf16.mxu0 %v9967_v21 }
 0xac6   :  { %5206 = vmatpush1.bf16.msra.mxu1 %v9983_v41  ;;  %5247 = vmatpush1.bf16.msra.mxu0 %v9985_v25 }
 0xac7   :  { %5207 = vmatprep.subr.bf16.mxu1 %v9989_v17  ;;  %5248 = vmatprep.subr.bf16.mxu0 %v9991_v10 }
 0xaca   :  { %5208 = vmatpush1.bf16.msra.mxu1 %v10011_v58  ;;  %5249 = vmatpush1.bf16.msra.mxu0 %v10013_v20 }
 0xacb   :  { %5209 = vmatprep.subr.bf16.mxu1 %v10017_v56  ;;  %5250 = vmatprep.subr.bf16.mxu0 %v10019_v28 }
 0xace   :  { %5210 = vmatpush1.bf16.msra.mxu1 %v10035_v16  ;;  %5251 = vmatpush1.bf16.msra.mxu0 %v10037_v50 }
 0xacf   :  { %v10709_v54 = vpop.f32.mrb[80].mxu1  ;;  %v10711_v43 = vpop.f32.mrb[84].mxu0  ;;  %5211 = vmatprep.subr.bf16.mxu1 %v10041_v44  ;;  %5252 = vmatprep.subr.bf16.mxu0 %v10043_v39 }
 0xad0   :  { %v10715_v42 = vpop.f32.mrb[81].mxu1  ;;  %v10717_v30 = vpop.f32.mrb[85].mxu0 }
 0xad1   :  { %v10719_v2 = vpop.f32.mrb[82].mxu1  ;;  %v10721_v52 = vpop.f32.mrb[86].mxu0 }
 0xad2   :  { %12787 = vst [vmem:[#allocation111_spill] sm:$0xff] %v10719_v2  ;;  %12788 = vst [vmem:[#allocation112_spill] sm:$0xff] %v10721_v52  ;;  %v10723_v0 = vpop.f32.mrb[83].mxu1  ;;  %v10725_v45 = vpop.f32.mrb[87].mxu0  ;;  %5212 = vmatpush1.bf16.msra.mxu1 %v10063_v9  ;;  %5253 = vmatpush1.bf16.msra.mxu0 %v10065_v61 }
 0xad3   :  { %12789 = vst [vmem:[#allocation113_spill] sm:$0xff] %v10723_v0  ;;  %12790 = vst [vmem:[#allocation114_spill] sm:$0xff] %v10725_v45  ;;  %5213 = vmatprep.subr.bf16.mxu1 %v10069_v19  ;;  %5254 = vmatprep.subr.bf16.mxu0 %v10071_v35 }
 0xad6   :  { %5214 = vmatpush1.bf16.msra.mxu1 %v10087_v18  ;;  %5255 = vmatpush1.bf16.msra.mxu0 %v10089_v32 }
 0xad7   :  { %v10733_v63 = vpop.f32.mrb[84].mxu1  ;;  %v10735_v2 = vpop.f32.mrb[88].mxu0  ;;  %5215 = vmatprep.subr.bf16.mxu1 %v10093_v40  ;;  %5256 = vmatprep.subr.bf16.mxu0 %v10095_v37 }
 0xad8   :  { %12791 = vst [vmem:[#allocation115_spill] sm:$0xff] %v10733_v63  ;;  %12792 = vst [vmem:[#allocation116_spill] sm:$0xff] %v10735_v2  ;;  %v10739_v45 = vpop.f32.mrb[85].mxu1  ;;  %v10741_v0 = vpop.f32.mrb[89].mxu0  ;;  %v12805_v2 = vld [vmem:[#allocation5_spill] sm:$0xff]  ;;  %v12806_v63 = vld [vmem:[#allocation6_spill] sm:$0xff] }
 0xad9   :  { %12793 = vst [vmem:[#allocation117_spill] sm:$0xff] %v10739_v45  ;;  %12794 = vst [vmem:[#allocation118_spill] sm:$0xff] %v10741_v0  ;;  %v10743_v52 = vpop.f32.mrb[86].mxu1  ;;  %v10745_v19 = vpop.f32.mrb[90].mxu0  ;;  %v12803_v0 = vld [vmem:[#allocation3_spill] sm:$0xff]  ;;  %v12804_v45 = vld [vmem:[#allocation4_spill] sm:$0xff] }
 0xada   :  { %12795 = vst [vmem:[#allocation119_spill] sm:$0xff] %v10743_v52  ;;  %12796 = vst [vmem:[#allocation120_spill] sm:$0xff] %v10745_v19  ;;  %v10747_v35 = vpop.f32.mrb[87].mxu1  ;;  %v10749_v18 = vpop.f32.mrb[91].mxu0  ;;  %5216 = vmatpush1.bf16.msra.mxu1 %v10111_v27  ;;  %5257 = vmatpush1.bf16.msra.mxu0 %v10113_v60  ;;  %v12801_v19 = vld [vmem:[#allocation98_spill] sm:$0xff]  ;;  %v12802_v52 = vld [vmem:[#allocation99_spill] sm:$0xff] }
 0xadb   :  { %12797 = vst [vmem:[#allocation121_spill] sm:$0xff] %v10747_v35  ;;  %12798 = vst [vmem:[#allocation122_spill] sm:$0xff] %v10749_v18  ;;  %5217 = vmatprep.subr.bf16.mxu1 %v10117_v47  ;;  %5258 = vmatprep.subr.bf16.mxu0 %v10119_v13  ;;  %v12799_v18 = vld [vmem:[#allocation96_spill] sm:$0xff]  ;;  %v12800_v35 = vld [vmem:[#allocation97_spill] sm:$0xff] }
 0xade   :  { %5218 = vmatpush1.bf16.msra.mxu1 %v10135_v5  ;;  %5259 = vmatpush1.bf16.msra.mxu0 %v10137_v55 }
 0xadf   :  { %5219 = vmatprep.subr.bf16.mxu1 %v10141_v8  ;;  %5260 = vmatprep.subr.bf16.mxu0 %v10143_v7 }
 0xae2   :  { %5220 = vmatpush1.bf16.msra.mxu1 %v10159_v49  ;;  %5261 = vmatpush1.bf16.msra.mxu0 %v10161_v14 }
 0xae3   :  { %5221 = vmatprep.subr.bf16.mxu1 %v10165_v53  ;;  %5262 = vmatprep.subr.bf16.mxu0 %v10167_v34 }
 0xae6   :  { %5222 = vmatpush1.bf16.msra.mxu1 %v10183_v6  ;;  %5263 = vmatpush1.bf16.msra.mxu0 %v10185_v4  ;;  %v12807_v4 = vld [vmem:[#allocation7_spill] sm:$0xff] }
 0xae7   :  { %5223 = vmatprep.subr.bf16.mxu1 %v10189_v26  ;;  %5264 = vmatprep.subr.bf16.mxu0 %v10191_v31  ;;  %v12808_v26 = vld [vmem:[#allocation8_spill] sm:$0xff]  ;;  %v12809_v31 = vld [vmem:[#allocation9_spill] sm:$0xff] }
 0xaea   :  { %5224 = vmatpush1.bf16.msra.mxu1 %v12799_v18  ;;  %5265 = vmatpush1.bf16.msra.mxu0 %v12800_v35  ;;  %v12810_v18 = vld [vmem:[#allocation10_spill] sm:$0xff]  ;;  %v12811_v35 = vld [vmem:[#allocation11_spill] sm:$0xff] }
 0xaeb   :  { %5225 = vmatprep.subr.bf16.mxu1 %v12801_v19  ;;  %5266 = vmatprep.subr.bf16.mxu0 %v12802_v52  ;;  %v12812_v19 = vld [vmem:[#allocation12_spill] sm:$0xff]  ;;  %v12813_v52 = vld [vmem:[#allocation13_spill] sm:$0xff] }
 0xaee   :  { %5226 = vmatpush1.bf16.msra.mxu1 %v12803_v0  ;;  %5267 = vmatpush1.bf16.msra.mxu0 %v12804_v45  ;;  %v12814_v0 = vld [vmem:[#allocation14_spill] sm:$0xff]  ;;  %v12815_v45 = vld [vmem:[#allocation15_spill] sm:$0xff] }
 0xaef   :  { %5227 = vmatprep.subr.bf16.mxu1 %v12805_v2  ;;  %5268 = vmatprep.subr.bf16.mxu0 %v12806_v63  ;;  %v12816_v2 = vld [vmem:[#allocation16_spill] sm:$0xff]  ;;  %v12817_v63 = vld [vmem:[#allocation17_spill] sm:$0xff] }
 0xaf2   :  { %5228 = vmatpush1.bf16.msra.mxu1 %v12807_v4  ;;  %5269 = vmatpush1.bf16.msra.mxu0 %v12808_v26  ;;  %v12818_v4 = vld [vmem:[#allocation18_spill] sm:$0xff] }
 0xaf3   :  { %5229 = vmatprep.subr.bf16.mxu1 %v12809_v31  ;;  %5270 = vmatprep.subr.bf16.mxu0 %v12810_v18 }
 0xaf6   :  { %5230 = vmatpush1.bf16.msra.mxu1 %v12811_v35  ;;  %5271 = vmatpush1.bf16.msra.mxu0 %v12812_v19 }
 0xaf7   :  { %5231 = vmatprep.subr.bf16.mxu1 %v12813_v52  ;;  %5272 = vmatprep.subr.bf16.mxu0 %v12814_v0 }
 0xafa   :  { %5232 = vmatpush1.bf16.msra.mxu1 %v12815_v45  ;;  %5273 = vmatpush1.bf16.msra.mxu0 %v12816_v2 }
 0xafb   :  { %5283 = vmatprep.subr.bf16.mxu1 %v12817_v63  ;;  %5324 = vmatprep.subr.bf16.mxu0 %v12818_v4 }
 0xb0f   :  { %v10787_v26 = vpop.f32.mrb[92].mxu1  ;;  %v10789_v31 = vpop.f32.mrb[96].mxu0 }
 0xb10   :  { %12819 = vst [vmem:[#allocation123_spill] sm:$0xff] %v10787_v26  ;;  %12820 = vst [vmem:[#allocation124_spill] sm:$0xff] %v10789_v31  ;;  %v10791_v18 = vpop.f32.mrb[93].mxu1  ;;  %v10793_v35 = vpop.f32.mrb[97].mxu0 }
 0xb11   :  { %12821 = vst [vmem:[#allocation125_spill] sm:$0xff] %v10791_v18  ;;  %12822 = vst [vmem:[#allocation126_spill] sm:$0xff] %v10793_v35  ;;  %v10795_v19 = vpop.f32.mrb[94].mxu1  ;;  %v10797_v52 = vpop.f32.mrb[98].mxu0 }
 0xb12   :  { %12823 = vst [vmem:[#allocation127_spill] sm:$0xff] %v10795_v19  ;;  %12824 = vst [vmem:[#allocation128_spill] sm:$0xff] %v10797_v52  ;;  %v10799_v0 = vpop.f32.mrb[95].mxu1  ;;  %v10801_v45 = vpop.f32.mrb[99].mxu0 }
 0xb13   :  { %12825 = vst [vmem:[#allocation129_spill] sm:$0xff] %v10799_v0  ;;  %12826 = vst [vmem:[#allocation130_spill] sm:$0xff] %v10801_v45  ;;  %v3285_v45 = vld [vmem:[%s11530_s12] sm:$0xff] }
 0xb14   :  { %v12835_v0 = vld [vmem:[#allocation159_spill] sm:$0xff] }
 0xb15   :  { %v12836_v52 = vsub.s32 0, %v12835_v0 }
 0xb17   :  { %v10803_v2 = vpop.f32.mrb[96].mxu1  ;;  %v10805_v63 = vpop.f32.mrb[100].mxu0 }
 0xb18   :  { %12827 = vst [vmem:[#allocation160_spill] sm:$0xff] %v10803_v2  ;;  %12828 = vst [vmem:[#allocation162_spill] sm:$0xff] %v10805_v63  ;;  %v10807_v4 = vpop.f32.mrb[97].mxu1  ;;  %v10809_v26 = vpop.f32.mrb[101].mxu0  ;;  %v10824_v2 = vrot.slane %v3285_v45, %v12836_v52 }
 0xb19   :  { %12829 = vst [vmem:[#allocation163_spill] sm:$0xff] %v10807_v4  ;;  %12830 = vst [vmem:[#allocation161_spill] sm:$0xff] %v10809_v26  ;;  %v10811_v31 = vpop.f32.mrb[98].mxu1  ;;  %v10813_v18 = vpop.f32.mrb[102].mxu0  ;;  %v12838_v4 = vsub.s32 2, %v12835_v0  ;;  %v12840_v26 = vsub.s32 1, %v12835_v0 }
 0xb1a   :  { %12831 = vst [vmem:[#allocation164_spill] sm:$0xff] %v10811_v31  ;;  %12832 = vst [vmem:[#allocation143_spill] sm:$0xff] %v10813_v18  ;;  %v10815_v35 = vpop.f32.mrb[99].mxu1  ;;  %v10817_v19 = vpop.f32.mrb[103].mxu0 }
 0xb1b   :  { %12833 = vst [vmem:[#allocation167_spill] sm:$0xff] %v10815_v35  ;;  %12834 = vst [vmem:[#allocation144_spill] sm:$0xff] %v10817_v19  ;;  %v10828_v63 = vrot.slane %v3285_v45, %v12838_v4  ;;  %v10832_v31 = vrot.slane %v3285_v45, %v12840_v26  ;;  %v12842_v35 = vsub.s32 3, %v12835_v0  ;;  %v4002_v19 = vadd.f32 %v10709_v54, %v10824_v2 }
 0xb1c   :  { %12837 = vst [vmem:[#allocation165_spill] sm:$0xff] %v10824_v2 }
 0xb1d   :  { %12839 = vst [vmem:[#allocation145_spill] sm:$0xff] %v10828_v63  ;;  %12841 = vst [vmem:[#allocation166_spill] sm:$0xff] %v10832_v31  ;;  %v10836_v18 = vrot.slane %v3285_v45, %v12842_v35  ;;  %v4063_v6 = vadd.f32 %v10711_v43, %v10828_v63  ;;  %v4004_v52 = vadd.f32 %v10715_v42, %v10832_v31 }
 0xb1f   :  { %v4065_v4 = vadd.f32 %v10717_v30, %v10836_v18 }
 0xb50   :  { %v5013_v34 = vpop.f32.mrb[104].mxu1  ;;  %v5054_v53 = vpop.f32.mrb[108].mxu0 }
 0xb51   :  { %v5143_v26 = vadd.f32 %v5013_v34, %v4002_v19  ;;  %v5145_v14 = vadd.f32 %v5054_v53, %v4063_v6  ;;  %v5015_v49 = vpop.f32.mrb[105].mxu1  ;;  %v5056_v7 = vpop.f32.mrb[109].mxu0  ;;  %v12845_v6 = vsub.s32 5, %v12835_v0 }
 0xb52   :  { %v5144_v35 = vadd.f32 %v5015_v49, %v4004_v52  ;;  %v5146_v8 = vadd.f32 %v5056_v7, %v4065_v4  ;;  %v5017_v55 = vpop.f32.mrb[106].mxu1  ;;  %v5058_v5 = vpop.f32.mrb[110].mxu0 }
 0xb53   :  { %v6797_v54 = vmul.f32 -1.442695, %v5143_v26  ;;  %v5018_v2 = vpop.f32.mrb[107].mxu1  ;;  %v5059_v13 = vpop.f32.mrb[111].mxu0  ;;  %v12843_v5 = vsub.s32 4, %v12835_v0 }
 0xb54   :  { %v6798_v43 = vmul.f32 -1.442695, %v5144_v35  ;;  %v10854_v2 = vrot.slane %v3285_v45, %v12845_v6  ;;  %v6799_v6 = vmul.f32 -1.442695, %v5146_v8 }
 0xb55   :  { %7275 = vpow2.f32 %v6797_v54  ;;  %v10850_v13 = vrot.slane %v3285_v45, %v12843_v5 }
 0xb56   :  { %7277 = vpow2.f32 %v6798_v43  ;;  %12846 = vst [vmem:[#allocation168_spill] sm:$0xff] %v10854_v2 }
 0xb57   :  { %7279 = vtanh.f32 %v5145_v14  ;;  %12844 = vst [vmem:[#allocation146_spill] sm:$0xff] %v10850_v13 }
 0xb5f   :  { %v7276_v42 = vpop.eup %7275 }
 0xb60   :  { %v7278_v31 = vpop.eup %7277  ;;  %v5154_v63 = vadd.f32 1.0, %v7276_v42 }
 0xb61   :  { %v5160_v30 = vadd.f32 1.0, %v7278_v31  ;;  %v7280_v19 = vpop.eup %7279 }
 0xb62   :  { %7281 = vrcp.f32 %v5154_v63 }
 0xb63   :  { %7283 = vrcp.f32 %v5160_v30 }
 0xb6c   :  { %v7282_v53 = vpop.eup %7281 }
 0xb6d   :  { %v7284_v34 = vpop.eup %7283  ;;  %v5171_v49 = vmul.f32 %v7282_v53, %v7280_v19  ;;  %v12847_v53 = vsub.s32 7, %v12835_v0 }
 0xb6e   :  { %v5170_v7 = vmul.f32 0.0, %v7284_v34 }
 0xb6f   :  { %v10860_v34 = vrot.slane %v3285_v45, %v12847_v53 }
 0xb70   :  { %v10846_v55 = vadd.f32 %v5171_v49, %v5170_v7  ;;  %v12849_v7 = vsub.s32 6, %v12835_v0 }
 0xb71   :  { %12848 = vst [vmem:[#allocation69_spill] sm:$0xff] %v10860_v34 }
 0xb72   :  { %v10865_v5 = vrot.slane %v3285_v45, %v12849_v7 }
 0xb74   :  { %12850 = vst [vmem:[#allocation72_spill] sm:$0xff] %v10865_v5 }
 0xb90   :  { %v5095_v52 = vpop.f32.mrb[100].mxu1  ;;  %v5136_v14 = vpop.f32.mrb[104].mxu0 }
 0xb91   :  { %v6984_v31 = vadd.f32 %v5095_v52, %v10850_v13  ;;  %v5097_v63 = vpop.f32.mrb[101].mxu1  ;;  %v5138_v4 = vpop.f32.mrb[105].mxu0 }
 0xb92   :  { %v6985_v26 = vadd.f32 %v5097_v63, %v10854_v2  ;;  %v5099_v35 = vpop.f32.mrb[102].mxu1  ;;  %v5140_v54 = vpop.f32.mrb[106].mxu0  ;;  %v6987_v49 = vadd.f32 %v5138_v4, %v10860_v34  ;;  %v6986_v63 = vadd.f32 %v5136_v14, %v10865_v5 }
 0xb93   :  { %v6800_v43 = vmul.f32 -1.442695, %v6984_v31  ;;  %v5100_v42 = vpop.f32.mrb[103].mxu1  ;;  %v5141_v30 = vpop.f32.mrb[107].mxu0 }
 0xb94   :  { %v6801_v19 = vmul.f32 -1.442695, %v6985_v26  ;;  %v6802_v52 = vmul.f32 -1.442695, %v6987_v49 }
 0xb95   :  { %7285 = vpow2.f32 %v6800_v43 }
 0xb96   :  { %7287 = vpow2.f32 %v6801_v19 }
 0xb97   :  { %7289 = vpow2.f32 %v6799_v6 }
 0xb98   :  { %7291 = vpow2.f32 %v6802_v52 }
 0xb99   :  { %7293 = vtanh.f32 %v6986_v63 }
 0xb9f   :  { %v7286_v31 = vpop.eup %7285 }
 0xba0   :  { %v7288_v35 = vpop.eup %7287  ;;  %v5178_v26 = vadd.f32 1.0, %v7286_v31 }
 0xba1   :  { %v5184_v54 = vadd.f32 1.0, %v7288_v35  ;;  %v7290_v43 = vpop.eup %7289 }
 0xba2   :  { %7295 = vrcp.f32 %v5178_v26  ;;  %v7292_v42 = vpop.eup %7291  ;;  %v5167_v0 = vadd.f32 1.0, %v7290_v43  ;;  %v12854_v43 = vld [vmem:[#allocation20_spill] sm:$0xff] }
 0xba3   :  { %7297 = vrcp.f32 %v5184_v54  ;;  %v7294_v4 = vpop.eup %7293  ;;  %v5191_v8 = vadd.f32 1.0, %v7292_v42  ;;  %v12853_v54 = vld [vmem:[#allocation19_spill] sm:$0xff]  ;;  %v12855_v42 = vld [vmem:[#allocation21_spill] sm:$0xff] }
 0xba4   :  { %7299 = vtanh.f32 %v10846_v55 }
 0xba5   :  { %7301 = vrcp.f32 %v5167_v0  ;;  %v12858_v0 = vld [vmem:[#allocation24_spill] sm:$0xff] }
 0xba6   :  { %7303 = vrcp.f32 %v5191_v8  ;;  %v12861_v8 = vld [vmem:[#allocation27_spill] sm:$0xff] }
 0xbac   :  { %v7296_v30 = vpop.eup %7295 }
 0xbad   :  { %v7298_v45 = vpop.eup %7297  ;;  %v5195_v19 = vmul.f32 %v7296_v30, %v7294_v4  ;;  %v12856_v4 = vld [vmem:[#allocation22_spill] sm:$0xff]  ;;  %v12857_v30 = vld [vmem:[#allocation23_spill] sm:$0xff] }
 0xbae   :  { %v5194_v53 = vmul.f32 0.0, %v7298_v45  ;;  %v7300_v49 = vpop.eup %7299  ;;  %v12859_v45 = vld [vmem:[#allocation25_spill] sm:$0xff] }
 0xbaf   :  { %v7302_v7 = vpop.eup %7301 }
 0xbb0   :  { %v10869_v14 = vadd.f32 %v5195_v19, %v5194_v53  ;;  %v7304_v6 = vpop.eup %7303  ;;  %v10872_v63 = vmul.f32 %v7302_v7, %v7300_v49  ;;  %v12860_v19 = vld [vmem:[#allocation26_spill] sm:$0xff]  ;;  %v12862_v53 = vld [vmem:[#allocation28_spill] sm:$0xff]  ;;  %v12863_v49 = vld [vmem:[#allocation29_spill] sm:$0xff] }
 0xbb1   :  { %v12864_v7 = vld [vmem:[#allocation30_spill] sm:$0xff] }
 0xbb2   :  { %7305 = vtanh.f32 %v10869_v14  ;;  %12851 = vst [vmem:[#allocation70_spill] sm:$0xff] %v10872_v63  ;;  %v10880_v26 = vpack.c.bf16 %v10872_v63, %v10872_v63  ;;  %v12869_v63 = vld [vmem:[#allocation35_spill] sm:$0xff] }
 0xbbc   :  { %v7306_v52 = vpop.eup %7305 }
 0xbbd   :  { %v10874_v31 = vmul.f32 %v7306_v52, %v7304_v6  ;;  %v12865_v6 = vld [vmem:[#allocation31_spill] sm:$0xff]  ;;  %v12866_v52 = vld [vmem:[#allocation32_spill] sm:$0xff] }
 0xbbf   :  { %12852 = vst [vmem:[#allocation71_spill] sm:$0xff] %v10874_v31  ;;  %v5200_v35 = vpack.c.bf16 %v10874_v31, %v10874_v31  ;;  %v12868_v31 = vld [vmem:[#allocation34_spill] sm:$0xff] }
 0xbc1   :  { %5233 = vmatprep.mubr.bf16.mxu1 %v5200_v35  ;;  %5274 = vmatprep.mubr.bf16.mxu0 %v5200_v35 }
 0xbc2   :  { %5234 = vmatmul.mubr.bf16.vlgmr.msra.gmra.mrb[108].mxu1 %v10880_v26  ;;  %5275 = vmatmul.mubr.bf16.vlgmr.msra.gmra.mrb[112].mxu0 %v10880_v26 }
 0xbc3   :  { %5284 = vmatpush1.bf16.msra.mxu1 %v12853_v54  ;;  %5325 = vmatpush1.bf16.msra.mxu0 %v12854_v43 }
 0xbc4   :  { %5315 = vmatprep.mubr.bf16.mxu1 %v5200_v35  ;;  %5356 = vmatprep.mubr.bf16.mxu0 %v5200_v35  ;;  %v12867_v35 = vld [vmem:[#allocation33_spill] sm:$0xff] }
 0xbc5   :  { %5285 = vmatprep.subr.bf16.mxu1 %v12855_v42  ;;  %5326 = vmatprep.subr.bf16.mxu0 %v12856_v4 }
 0xbc7   :  { %5286 = vmatpush1.bf16.msra.mxu1 %v12857_v30  ;;  %5327 = vmatpush1.bf16.msra.mxu0 %v12858_v0 }
 0xbc8   :  { %5287 = vmatprep.subr.bf16.mxu1 %v12859_v45  ;;  %5328 = vmatprep.subr.bf16.mxu0 %v12860_v19  ;;  %v12870_v45 = vld [vmem:[#allocation36_spill] sm:$0xff]  ;;  %v12871_v19 = vld [vmem:[#allocation37_spill] sm:$0xff] }
 0xbcb   :  { %5288 = vmatpush1.bf16.msra.mxu1 %v12861_v8  ;;  %5329 = vmatpush1.bf16.msra.mxu0 %v12862_v53  ;;  %v12872_v8 = vld [vmem:[#allocation38_spill] sm:$0xff]  ;;  %v12873_v53 = vld [vmem:[#allocation39_spill] sm:$0xff] }
 0xbcc   :  { %5289 = vmatprep.subr.bf16.mxu1 %v12863_v49  ;;  %5330 = vmatprep.subr.bf16.mxu0 %v12864_v7  ;;  %v12874_v49 = vld [vmem:[#allocation40_spill] sm:$0xff]  ;;  %v12875_v7 = vld [vmem:[#allocation41_spill] sm:$0xff] }
 0xbcf   :  { %5290 = vmatpush1.bf16.msra.mxu1 %v12865_v6  ;;  %5331 = vmatpush1.bf16.msra.mxu0 %v12866_v52  ;;  %v12876_v6 = vld [vmem:[#allocation42_spill] sm:$0xff]  ;;  %v12877_v52 = vld [vmem:[#allocation43_spill] sm:$0xff] }
 0xbd0   :  { %5291 = vmatprep.subr.bf16.mxu1 %v12867_v35  ;;  %5332 = vmatprep.subr.bf16.mxu0 %v12868_v31  ;;  %v12878_v35 = vld [vmem:[#allocation44_spill] sm:$0xff]  ;;  %v12879_v31 = vld [vmem:[#allocation45_spill] sm:$0xff] }
 0xbd3   :  { %5292 = vmatpush1.bf16.msra.mxu1 %v12869_v63  ;;  %5333 = vmatpush1.bf16.msra.mxu0 %v12870_v45  ;;  %v12880_v63 = vld [vmem:[#allocation46_spill] sm:$0xff]  ;;  %v12881_v45 = vld [vmem:[#allocation47_spill] sm:$0xff] }
 0xbd4   :  { %5293 = vmatprep.subr.bf16.mxu1 %v12871_v19  ;;  %5334 = vmatprep.subr.bf16.mxu0 %v12872_v8  ;;  %v12882_v19 = vld [vmem:[#allocation48_spill] sm:$0xff]  ;;  %v12883_v8 = vld [vmem:[#allocation49_spill] sm:$0xff] }
 0xbd7   :  { %5294 = vmatpush1.bf16.msra.mxu1 %v12873_v53  ;;  %5335 = vmatpush1.bf16.msra.mxu0 %v12874_v49  ;;  %v12884_v53 = vld [vmem:[#allocation50_spill] sm:$0xff]  ;;  %v12885_v49 = vld [vmem:[#allocation51_spill] sm:$0xff] }
 0xbd8   :  { %5295 = vmatprep.subr.bf16.mxu1 %v12875_v7  ;;  %5336 = vmatprep.subr.bf16.mxu0 %v12876_v6  ;;  %v12886_v7 = vld [vmem:[#allocation52_spill] sm:$0xff]  ;;  %v12887_v6 = vld [vmem:[#allocation53_spill] sm:$0xff] }
 0xbdb   :  { %5296 = vmatpush1.bf16.msra.mxu1 %v12877_v52  ;;  %5337 = vmatpush1.bf16.msra.mxu0 %v12878_v35  ;;  %v12888_v52 = vld [vmem:[#allocation54_spill] sm:$0xff]  ;;  %v12889_v35 = vld [vmem:[#allocation55_spill] sm:$0xff] }
 0xbdc   :  { %5297 = vmatprep.subr.bf16.mxu1 %v12879_v31  ;;  %5338 = vmatprep.subr.bf16.mxu0 %v12880_v63  ;;  %v12890_v31 = vld [vmem:[#allocation56_spill] sm:$0xff]  ;;  %v12891_v63 = vld [vmem:[#allocation57_spill] sm:$0xff] }
 0xbdf   :  { %5298 = vmatpush1.bf16.msra.mxu1 %v12881_v45  ;;  %5339 = vmatpush1.bf16.msra.mxu0 %v12882_v19  ;;  %v12892_v45 = vld [vmem:[#allocation58_spill] sm:$0xff]  ;;  %v12893_v19 = vld [vmem:[#allocation59_spill] sm:$0xff] }
 0xbe0   :  { %5299 = vmatprep.subr.bf16.mxu1 %v12883_v8  ;;  %5340 = vmatprep.subr.bf16.mxu0 %v12884_v53  ;;  %v12894_v8 = vld [vmem:[#allocation60_spill] sm:$0xff]  ;;  %v12895_v53 = vld [vmem:[#allocation61_spill] sm:$0xff] }
 0xbe3   :  { %5300 = vmatpush1.bf16.msra.mxu1 %v12885_v49  ;;  %5341 = vmatpush1.bf16.msra.mxu0 %v12886_v7  ;;  %v12896_v49 = vld [vmem:[#allocation62_spill] sm:$0xff]  ;;  %v12897_v7 = vld [vmem:[#allocation63_spill] sm:$0xff] }
 0xbe4   :  { %5301 = vmatprep.subr.bf16.mxu1 %v12887_v6  ;;  %5342 = vmatprep.subr.bf16.mxu0 %v12888_v52  ;;  %v12898_v6 = vld [vmem:[#allocation64_spill] sm:$0xff]  ;;  %v12899_v52 = vld [vmem:[#allocation65_spill] sm:$0xff] }
 0xbe7   :  { %5302 = vmatpush1.bf16.msra.mxu1 %v12889_v35  ;;  %5343 = vmatpush1.bf16.msra.mxu0 %v12890_v31  ;;  %v12900_v35 = vld [vmem:[#allocation66_spill] sm:$0xff]  ;;  %v12901_v31 = vld [vmem:[#allocation67_spill] sm:$0xff] }
 0xbe8   :  { %5303 = vmatprep.subr.bf16.mxu1 %v12891_v63  ;;  %5344 = vmatprep.subr.bf16.mxu0 %v12892_v45  ;;  %v12902_v63 = vld [vmem:[#allocation68_spill] sm:$0xff]  ;;  %v12903_v45 = vld [vmem:[#allocation139_spill] sm:$0xff] }
 0xbeb   :  { %5304 = vmatpush1.bf16.msra.mxu1 %v12893_v19  ;;  %5345 = vmatpush1.bf16.msra.mxu0 %v12894_v8  ;;  %v12904_v19 = vld [vmem:[#allocation140_spill] sm:$0xff]  ;;  %v12905_v8 = vld [vmem:[#allocation141_spill] sm:$0xff] }
 0xbec   :  { %5305 = vmatprep.subr.bf16.mxu1 %v12895_v53  ;;  %5346 = vmatprep.subr.bf16.mxu0 %v12896_v49 }
 0xbef   :  { %5306 = vmatpush1.bf16.msra.mxu1 %v12897_v7  ;;  %5347 = vmatpush1.bf16.msra.mxu0 %v12898_v6 }
 0xbf0   :  { %5307 = vmatprep.subr.bf16.mxu1 %v12899_v52  ;;  %5348 = vmatprep.subr.bf16.mxu0 %v12900_v35 }
 0xbf3   :  { %5308 = vmatpush1.bf16.msra.mxu1 %v12901_v31  ;;  %5349 = vmatpush1.bf16.msra.mxu0 %v12902_v63 }
 0xbf4   :  { %5309 = vmatprep.subr.bf16.mxu1 %v12903_v45  ;;  %5350 = vmatprep.subr.bf16.mxu0 %v12904_v19 }
 0xbf7   :  { %5310 = vmatpush1.bf16.msra.mxu1 %v12905_v8  ;;  %5351 = vmatpush1.bf16.msra.mxu0 %v10645_v59 }
 0xbf8   :  { %5311 = vmatprep.subr.bf16.mxu1 %v10649_v48  ;;  %5352 = vmatprep.subr.bf16.mxu0 %v10651_v15 }
 0xbfb   :  { %5312 = vmatpush1.bf16.msra.mxu1 %v10667_v11  ;;  %5353 = vmatpush1.bf16.msra.mxu0 %v10669_v62 }
 0xbfc   :  { %5313 = vmatprep.subr.bf16.mxu1 %v10673_v12  ;;  %5354 = vmatprep.subr.bf16.mxu0 %v10675_v38 }
 0xbff   :  { %5314 = vmatpush1.bf16.msra.mxu1 %v10679_v1  ;;  %5355 = vmatpush1.bf16.msra.mxu0 %v10681_v33 }
 0xc00   :  { %5423 = vmatprep.subr.bf16.mxu1 %v9915_v22  ;;  %5464 = vmatprep.subr.bf16.mxu0 %v9917_v51 }
 0xc02   :  { %5316 = vmatmul.mubr.bf16.vlgmr.msra.gmra.mrb[112].mxu1 %v10880_v26  ;;  %5357 = vmatmul.mubr.bf16.vlgmr.msra.gmra.mrb[116].mxu0 %v10880_v26  ;;  %v12906_v26 = vld [vmem:[#allocation102_spill] sm:$0xff] }
 0xc03   :  { %5424 = vmatpush1.bf16.msra.mxu1 %v9933_v24  ;;  %5465 = vmatpush1.bf16.msra.mxu0 %v9935_v46 }
 0xc04   :  { %5425 = vmatprep.subr.bf16.mxu1 %v9937_v23  ;;  %5466 = vmatprep.subr.bf16.mxu0 %v9939_v29 }
 0xc07   :  { %5426 = vmatpush1.bf16.msra.mxu1 %v9959_v36  ;;  %5467 = vmatpush1.bf16.msra.mxu0 %v9961_v3 }
 0xc08   :  { %5427 = vmatprep.subr.bf16.mxu1 %v9965_v57  ;;  %5468 = vmatprep.subr.bf16.mxu0 %v9967_v21 }
 0xc0b   :  { %5428 = vmatpush1.bf16.msra.mxu1 %v9983_v41  ;;  %5469 = vmatpush1.bf16.msra.mxu0 %v9985_v25 }
 0xc0c   :  { %5429 = vmatprep.subr.bf16.mxu1 %v9989_v17  ;;  %5470 = vmatprep.subr.bf16.mxu0 %v9991_v10 }
 0xc0f   :  { %5430 = vmatpush1.bf16.msra.mxu1 %v10011_v58  ;;  %5471 = vmatpush1.bf16.msra.mxu0 %v10013_v20  ;;  %v12907_v58 = vld [vmem:[#allocation103_spill] sm:$0xff]  ;;  %v12908_v20 = vld [vmem:[#allocation104_spill] sm:$0xff] }
 0xc10   :  { %5431 = vmatprep.subr.bf16.mxu1 %v10017_v56  ;;  %5472 = vmatprep.subr.bf16.mxu0 %v10019_v28 }
 0xc13   :  { %5432 = vmatpush1.bf16.msra.mxu1 %v10035_v16  ;;  %5473 = vmatpush1.bf16.msra.mxu0 %v10037_v50  ;;  %v12946_v50 = vld [vmem:[#allocation166_spill] sm:$0xff] }
 0xc14   :  { %5433 = vmatprep.subr.bf16.mxu1 %v10041_v44  ;;  %5474 = vmatprep.subr.bf16.mxu0 %v10043_v39  ;;  %v12945_v44 = vld [vmem:[#allocation112_spill] sm:$0xff] }
 0xc17   :  { %5434 = vmatpush1.bf16.msra.mxu1 %v10063_v9  ;;  %5475 = vmatpush1.bf16.msra.mxu0 %v10065_v61  ;;  %v12909_v9 = vld [vmem:[#allocation151_spill] sm:$0xff]  ;;  %v12910_v61 = vld [vmem:[#allocation152_spill] sm:$0xff] }
 0xc18   :  { %5435 = vmatprep.subr.bf16.mxu1 %v12906_v26  ;;  %5476 = vmatprep.subr.bf16.mxu0 %v12907_v58  ;;  %v12911_v26 = vld [vmem:[#allocation153_spill] sm:$0xff]  ;;  %v12912_v58 = vld [vmem:[#allocation154_spill] sm:$0xff] }
 0xc1b   :  { %5436 = vmatpush1.bf16.msra.mxu1 %v12908_v20  ;;  %5477 = vmatpush1.bf16.msra.mxu0 %v10089_v32  ;;  %v12913_v20 = vld [vmem:[#allocation87_spill] sm:$0xff]  ;;  %v12914_v32 = vld [vmem:[#allocation88_spill] sm:$0xff] }
 0xc1c   :  { %5437 = vmatprep.subr.bf16.mxu1 %v10093_v40  ;;  %5478 = vmatprep.subr.bf16.mxu0 %v10095_v37  ;;  %v12915_v40 = vld [vmem:[#allocation89_spill] sm:$0xff]  ;;  %v12916_v37 = vld [vmem:[#allocation90_spill] sm:$0xff] }
 0xc1f   :  { %5438 = vmatpush1.bf16.msra.mxu1 %v10111_v27  ;;  %5479 = vmatpush1.bf16.msra.mxu0 %v10113_v60  ;;  %v12917_v27 = vld [vmem:[#allocation91_spill] sm:$0xff]  ;;  %v12918_v60 = vld [vmem:[#allocation92_spill] sm:$0xff] }
 0xc20   :  { %5439 = vmatprep.subr.bf16.mxu1 %v10117_v47  ;;  %5480 = vmatprep.subr.bf16.mxu0 %v12909_v9  ;;  %v12919_v47 = vld [vmem:[#allocation93_spill] sm:$0xff]  ;;  %v12920_v9 = vld [vmem:[#allocation94_spill] sm:$0xff] }
 0xc23   :  { %5440 = vmatpush1.bf16.msra.mxu1 %v12910_v61  ;;  %5481 = vmatpush1.bf16.msra.mxu0 %v12911_v26  ;;  %v12921_v61 = vld [vmem:[#allocation95_spill] sm:$0xff]  ;;  %v12922_v26 = vld [vmem:[#allocation96_spill] sm:$0xff] }
 0xc24   :  { %5441 = vmatprep.subr.bf16.mxu1 %v12912_v58  ;;  %5482 = vmatprep.subr.bf16.mxu0 %v12913_v20  ;;  %v12923_v58 = vld [vmem:[#allocation97_spill] sm:$0xff]  ;;  %v12924_v20 = vld [vmem:[#allocation98_spill] sm:$0xff] }
 0xc27   :  { %5442 = vmatpush1.bf16.msra.mxu1 %v12914_v32  ;;  %5483 = vmatpush1.bf16.msra.mxu0 %v12915_v40  ;;  %v12925_v32 = vld [vmem:[#allocation99_spill] sm:$0xff] }
 0xc28   :  { %5443 = vmatprep.subr.bf16.mxu1 %v12916_v37  ;;  %5484 = vmatprep.subr.bf16.mxu0 %v12917_v27  ;;  %v12926_v40 = vld [vmem:[#allocation3_spill] sm:$0xff]  ;;  %v12927_v37 = vld [vmem:[#allocation4_spill] sm:$0xff]  ;;  %v12928_v27 = vld [vmem:[#allocation5_spill] sm:$0xff] }
 0xc2b   :  { %5444 = vmatpush1.bf16.msra.mxu1 %v12918_v60  ;;  %5485 = vmatpush1.bf16.msra.mxu0 %v12919_v47  ;;  %v12929_v60 = vld [vmem:[#allocation6_spill] sm:$0xff]  ;;  %v12930_v47 = vld [vmem:[#allocation7_spill] sm:$0xff] }
 0xc2c   :  { %5445 = vmatprep.subr.bf16.mxu1 %v12920_v9  ;;  %5486 = vmatprep.subr.bf16.mxu0 %v12921_v61  ;;  %v12931_v9 = vld [vmem:[#allocation8_spill] sm:$0xff]  ;;  %v12932_v61 = vld [vmem:[#allocation9_spill] sm:$0xff] }
 0xc2f   :  { %5446 = vmatpush1.bf16.msra.mxu1 %v12922_v26  ;;  %5487 = vmatpush1.bf16.msra.mxu0 %v12923_v58  ;;  %v12933_v26 = vld [vmem:[#allocation10_spill] sm:$0xff]  ;;  %v12934_v58 = vld [vmem:[#allocation11_spill] sm:$0xff] }
 0xc30   :  { %5447 = vmatprep.subr.bf16.mxu1 %v12924_v20  ;;  %5488 = vmatprep.subr.bf16.mxu0 %v12925_v32  ;;  %v12935_v20 = vld [vmem:[#allocation12_spill] sm:$0xff]  ;;  %v12936_v32 = vld [vmem:[#allocation13_spill] sm:$0xff] }
 0xc33   :  { %5448 = vmatpush1.bf16.msra.mxu1 %v12926_v40  ;;  %5489 = vmatpush1.bf16.msra.mxu0 %v12927_v37  ;;  %v12937_v40 = vld [vmem:[#allocation14_spill] sm:$0xff]  ;;  %v12938_v37 = vld [vmem:[#allocation15_spill] sm:$0xff] }
 0xc34   :  { %5449 = vmatprep.subr.bf16.mxu1 %v12928_v27  ;;  %5490 = vmatprep.subr.bf16.mxu0 %v12929_v60  ;;  %v12939_v27 = vld [vmem:[#allocation16_spill] sm:$0xff]  ;;  %v12940_v60 = vld [vmem:[#allocation17_spill] sm:$0xff] }
 0xc37   :  { %5450 = vmatpush1.bf16.msra.mxu1 %v12930_v47  ;;  %5491 = vmatpush1.bf16.msra.mxu0 %v12931_v9  ;;  %v12941_v47 = vld [vmem:[#allocation18_spill] sm:$0xff]  ;;  %v12942_v9 = vld [vmem:[#allocation165_spill] sm:$0xff] }
 0xc38   :  { %5451 = vmatprep.subr.bf16.mxu1 %v12932_v61  ;;  %5492 = vmatprep.subr.bf16.mxu0 %v12933_v26  ;;  %v12943_v61 = vld [vmem:[#allocation111_spill] sm:$0xff]  ;;  %v12944_v26 = vld [vmem:[#allocation145_spill] sm:$0xff] }
 0xc39   :  { %v4006_v39 = vadd.f32 %v12943_v61, %v12942_v9 }
 0xc3b   :  { %5452 = vmatpush1.bf16.msra.mxu1 %v12934_v58  ;;  %5493 = vmatpush1.bf16.msra.mxu0 %v12935_v20  ;;  %v4067_v58 = vadd.f32 %v12945_v44, %v12944_v26  ;;  %v12947_v20 = vld [vmem:[#allocation113_spill] sm:$0xff] }
 0xc3c   :  { %5453 = vmatprep.subr.bf16.mxu1 %v12936_v32  ;;  %5494 = vmatprep.subr.bf16.mxu0 %v12937_v40  ;;  %v4008_v16 = vadd.f32 %v12947_v20, %v12946_v50  ;;  %v12948_v32 = vld [vmem:[#allocation114_spill] sm:$0xff] }
 0xc3d   :  { %v4069_v40 = vadd.f32 %v12948_v32, %v10836_v18 }
 0xc3f   :  { %5454 = vmatpush1.bf16.msra.mxu1 %v12938_v37  ;;  %5495 = vmatpush1.bf16.msra.mxu0 %v12939_v27 }
 0xc40   :  { %5505 = vmatprep.subr.bf16.mxu1 %v12940_v60  ;;  %5546 = vmatprep.subr.bf16.mxu0 %v12941_v47 }
 0xc95   :  { %v5235_v28 = vpop.f32.mrb[108].mxu1  ;;  %v5276_v37 = vpop.f32.mrb[112].mxu0 }
 0xc96   :  { %v5365_v56 = vadd.f32 %v5235_v28, %v4006_v39  ;;  %v5367_v27 = vadd.f32 %v5276_v37, %v4067_v58  ;;  %v5237_v10 = vpop.f32.mrb[109].mxu1  ;;  %v5278_v60 = vpop.f32.mrb[113].mxu0 }
 0xc97   :  { %v5366_v17 = vadd.f32 %v5237_v10, %v4008_v16  ;;  %v5368_v47 = vadd.f32 %v5278_v60, %v4069_v40  ;;  %v5239_v25 = vpop.f32.mrb[110].mxu1  ;;  %v5280_v41 = vpop.f32.mrb[114].mxu0 }
 0xc98   :  { %v6803_v61 = vmul.f32 -1.442695, %v5365_v56  ;;  %v5240_v9 = vpop.f32.mrb[111].mxu1  ;;  %v5281_v21 = vpop.f32.mrb[115].mxu0  ;;  %v12950_v56 = vld [vmem:[#allocation143_spill] sm:$0xff] }
 0xc99   :  { %v6804_v44 = vmul.f32 -1.442695, %v5366_v17  ;;  %v12949_v21 = vld [vmem:[#allocation164_spill] sm:$0xff]  ;;  %v4199_v16 = vadd.f32 %v12950_v56, %v10865_v5  ;;  %v12951_v9 = vld [vmem:[#allocation167_spill] sm:$0xff]  ;;  %v6805_v56 = vmul.f32 -1.442695, %v5368_v47 }
 0xc9a   :  { %7307 = vpow2.f32 %v6803_v61  ;;  %v4138_v17 = vadd.f32 %v12949_v21, %v10850_v13  ;;  %v4140_v40 = vadd.f32 %v12951_v9, %v10854_v2 }
 0xc9b   :  { %7309 = vpow2.f32 %v6804_v44 }
 0xc9c   :  { %7311 = vtanh.f32 %v5367_v27 }
 0xca4   :  { %v7308_v20 = vpop.eup %7307 }
 0xca5   :  { %v7310_v50 = vpop.eup %7309  ;;  %v5376_v26 = vadd.f32 1.0, %v7308_v20 }
 0xca6   :  { %v5382_v32 = vadd.f32 1.0, %v7310_v50  ;;  %v7312_v58 = vpop.eup %7311  ;;  %v12952_v50 = vld [vmem:[#allocation144_spill] sm:$0xff] }
 0xca7   :  { %7313 = vrcp.f32 %v5376_v26  ;;  %v4201_v37 = vadd.f32 %v12952_v50, %v10860_v34 }
 0xca8   :  { %7315 = vrcp.f32 %v5382_v32 }
 0xcb1   :  { %v7314_v28 = vpop.eup %7313 }
 0xcb2   :  { %v7316_v39 = vpop.eup %7315  ;;  %v5393_v10 = vmul.f32 %v7314_v28, %v7312_v58 }
 0xcb3   :  { %v5392_v25 = vmul.f32 %v7316_v39, %v10846_v55 }
 0xcb5   :  { %v11023_v41 = vadd.f32 %v5393_v10, %v5392_v25 }
 0xcd5   :  { %v5317_v27 = vpop.f32.mrb[112].mxu1  ;;  %v5358_v60 = vpop.f32.mrb[116].mxu0 }
 0xcd6   :  { %v5369_v26 = vadd.f32 %v5317_v27, %v4138_v17  ;;  %v5371_v61 = vadd.f32 %v5358_v60, %v4199_v16  ;;  %v5319_v44 = vpop.f32.mrb[113].mxu1  ;;  %v5360_v55 = vpop.f32.mrb[117].mxu0 }
 0xcd7   :  { %v5370_v20 = vadd.f32 %v5319_v44, %v4140_v40  ;;  %v5372_v32 = vadd.f32 %v5360_v55, %v4201_v37  ;;  %v5321_v58 = vpop.f32.mrb[114].mxu1  ;;  %v5362_v28 = vpop.f32.mrb[118].mxu0 }
 0xcd8   :  { %v6806_v39 = vmul.f32 -1.442695, %v5369_v26  ;;  %v5322_v10 = vpop.f32.mrb[115].mxu1  ;;  %v5363_v25 = vpop.f32.mrb[119].mxu0 }
 0xcd9   :  { %v6807_v21 = vmul.f32 -1.442695, %v5370_v20  ;;  %v6808_v9 = vmul.f32 -1.442695, %v5372_v32  ;;  %v12954_v10 = vld [vmem:[#allocation25_spill] sm:$0xff]  ;;  %v12955_v25 = vld [vmem:[#allocation26_spill] sm:$0xff] }
 0xcda   :  { %7317 = vpow2.f32 %v6806_v39 }
 0xcdb   :  { %7319 = vpow2.f32 %v6807_v21  ;;  %v12956_v21 = vld [vmem:[#allocation27_spill] sm:$0xff] }
 0xcdc   :  { %7321 = vpow2.f32 %v6805_v56  ;;  %v12957_v56 = vld [vmem:[#allocation28_spill] sm:$0xff] }
 0xcdd   :  { %7323 = vpow2.f32 %v6808_v9  ;;  %v12958_v9 = vld [vmem:[#allocation29_spill] sm:$0xff] }
 0xcde   :  { %7325 = vtanh.f32 %v5371_v61 }
 0xce4   :  { %v7318_v2 = vpop.eup %7317 }
 0xce5   :  { %v7320_v50 = vpop.eup %7319  ;;  %v5400_v34 = vadd.f32 1.0, %v7318_v2 }
 0xce6   :  { %v5406_v17 = vadd.f32 1.0, %v7320_v50  ;;  %v7322_v16 = vpop.eup %7321  ;;  %v12959_v50 = vld [vmem:[#allocation30_spill] sm:$0xff] }
 0xce7   :  { %7327 = vrcp.f32 %v5400_v34  ;;  %v7324_v40 = vpop.eup %7323  ;;  %v5389_v60 = vadd.f32 1.0, %v7322_v16  ;;  %v12961_v16 = vld [vmem:[#allocation32_spill] sm:$0xff] }
 0xce8   :  { %7329 = vrcp.f32 %v5406_v17  ;;  %v7326_v37 = vpop.eup %7325  ;;  %v5413_v55 = vadd.f32 1.0, %v7324_v40  ;;  %v12960_v17 = vld [vmem:[#allocation31_spill] sm:$0xff]  ;;  %v12962_v40 = vld [vmem:[#allocation33_spill] sm:$0xff] }
 0xce9   :  { %7331 = vtanh.f32 %v11023_v41 }
 0xcea   :  { %7333 = vrcp.f32 %v5389_v60  ;;  %v12965_v60 = vld [vmem:[#allocation36_spill] sm:$0xff] }
 0xceb   :  { %7335 = vrcp.f32 %v5413_v55  ;;  %v12968_v55 = vld [vmem:[#allocation39_spill] sm:$0xff] }
 0xcf1   :  { %v7328_v27 = vpop.eup %7327 }
 0xcf2   :  { %v7330_v26 = vpop.eup %7329  ;;  %v5417_v44 = vmul.f32 %v7328_v27, %v7326_v37  ;;  %v12963_v37 = vld [vmem:[#allocation34_spill] sm:$0xff]  ;;  %v12964_v27 = vld [vmem:[#allocation35_spill] sm:$0xff] }
 0xcf3   :  { %v5416_v47 = vmul.f32 %v7330_v26, %v10869_v14  ;;  %v7332_v2 = vpop.eup %7331  ;;  %v12966_v26 = vld [vmem:[#allocation37_spill] sm:$0xff] }
 0xcf4   :  { %v7334_v34 = vpop.eup %7333 }
 0xcf5   :  { %v11035_v20 = vadd.f32 %v5417_v44, %v5416_v47  ;;  %v7336_v61 = vpop.eup %7335  ;;  %v11038_v58 = vmul.f32 %v7334_v34, %v7332_v2  ;;  %v12967_v44 = vld [vmem:[#allocation38_spill] sm:$0xff]  ;;  %v12969_v47 = vld [vmem:[#allocation40_spill] sm:$0xff]  ;;  %v12970_v2 = vld [vmem:[#allocation41_spill] sm:$0xff] }
 0xcf6   :  { %v12971_v34 = vld [vmem:[#allocation42_spill] sm:$0xff] }
 0xcf7   :  { %7337 = vtanh.f32 %v11035_v20  ;;  %v11046_v14 = vpack.c.bf16 %v11038_v58, %v11038_v58 }
 0xd01   :  { %v7338_v32 = vpop.eup %7337 }
 0xd02   :  { %v11040_v28 = vmul.f32 %v7338_v32, %v7336_v61  ;;  %v12972_v61 = vld [vmem:[#allocation43_spill] sm:$0xff]  ;;  %v12973_v32 = vld [vmem:[#allocation44_spill] sm:$0xff] }
 0xd04   :  { %12953 = vst [vmem:[#allocation169_spill] sm:$0xff] %v11040_v28  ;;  %v5422_v39 = vpack.c.bf16 %v11040_v28, %v11040_v28  ;;  %v12975_v28 = vld [vmem:[#allocation46_spill] sm:$0xff] }
 0xd06   :  { %5455 = vmatprep.mubr.bf16.mxu1 %v5422_v39  ;;  %5496 = vmatprep.mubr.bf16.mxu0 %v5422_v39 }
 0xd07   :  { %5456 = vmatmul.mubr.bf16.vlgmr.msra.gmra.mrb[116].mxu1 %v11046_v14  ;;  %5497 = vmatmul.mubr.bf16.vlgmr.msra.gmra.mrb[120].mxu0 %v11046_v14 }
 0xd08   :  { %5506 = vmatpush1.bf16.msra.mxu1 %v12853_v54  ;;  %5547 = vmatpush1.bf16.msra.mxu0 %v12854_v43 }
 0xd09   :  { %5537 = vmatprep.mubr.bf16.mxu1 %v5422_v39  ;;  %5578 = vmatprep.mubr.bf16.mxu0 %v5422_v39  ;;  %v12974_v39 = vld [vmem:[#allocation45_spill] sm:$0xff] }
 0xd0a   :  { %5507 = vmatprep.subr.bf16.mxu1 %v12855_v42  ;;  %5548 = vmatprep.subr.bf16.mxu0 %v12856_v4 }
 0xd0c   :  { %5508 = vmatpush1.bf16.msra.mxu1 %v12857_v30  ;;  %5549 = vmatpush1.bf16.msra.mxu0 %v12858_v0 }
 0xd0d   :  { %5509 = vmatprep.subr.bf16.mxu1 %v12954_v10  ;;  %5550 = vmatprep.subr.bf16.mxu0 %v12955_v25 }
 0xd10   :  { %5510 = vmatpush1.bf16.msra.mxu1 %v12956_v21  ;;  %5551 = vmatpush1.bf16.msra.mxu0 %v12957_v56 }
 0xd11   :  { %5511 = vmatprep.subr.bf16.mxu1 %v12958_v9  ;;  %5552 = vmatprep.subr.bf16.mxu0 %v12959_v50 }
 0xd14   :  { %5512 = vmatpush1.bf16.msra.mxu1 %v12960_v17  ;;  %5553 = vmatpush1.bf16.msra.mxu0 %v12961_v16 }
 0xd15   :  { %5513 = vmatprep.subr.bf16.mxu1 %v12962_v40  ;;  %5554 = vmatprep.subr.bf16.mxu0 %v12963_v37 }
 0xd18   :  { %5514 = vmatpush1.bf16.msra.mxu1 %v12964_v27  ;;  %5555 = vmatpush1.bf16.msra.mxu0 %v12965_v60  ;;  %v12976_v60 = vld [vmem:[#allocation47_spill] sm:$0xff] }
 0xd19   :  { %5515 = vmatprep.subr.bf16.mxu1 %v12966_v26  ;;  %5556 = vmatprep.subr.bf16.mxu0 %v12967_v44  ;;  %v12977_v26 = vld [vmem:[#allocation48_spill] sm:$0xff]  ;;  %v12978_v44 = vld [vmem:[#allocation49_spill] sm:$0xff] }
 0xd1c   :  { %5516 = vmatpush1.bf16.msra.mxu1 %v12968_v55  ;;  %5557 = vmatpush1.bf16.msra.mxu0 %v12969_v47  ;;  %v12979_v55 = vld [vmem:[#allocation50_spill] sm:$0xff]  ;;  %v12980_v47 = vld [vmem:[#allocation51_spill] sm:$0xff] }
 0xd1d   :  { %5517 = vmatprep.subr.bf16.mxu1 %v12970_v2  ;;  %5558 = vmatprep.subr.bf16.mxu0 %v12971_v34  ;;  %v12981_v2 = vld [vmem:[#allocation52_spill] sm:$0xff]  ;;  %v12982_v34 = vld [vmem:[#allocation53_spill] sm:$0xff] }
 0xd20   :  { %5518 = vmatpush1.bf16.msra.mxu1 %v12972_v61  ;;  %5559 = vmatpush1.bf16.msra.mxu0 %v12973_v32  ;;  %v12983_v61 = vld [vmem:[#allocation54_spill] sm:$0xff]  ;;  %v12984_v32 = vld [vmem:[#allocation55_spill] sm:$0xff] }
 0xd21   :  { %5519 = vmatprep.subr.bf16.mxu1 %v12974_v39  ;;  %5560 = vmatprep.subr.bf16.mxu0 %v12975_v28  ;;  %v12985_v39 = vld [vmem:[#allocation56_spill] sm:$0xff]  ;;  %v12986_v28 = vld [vmem:[#allocation57_spill] sm:$0xff] }
 0xd24   :  { %5520 = vmatpush1.bf16.msra.mxu1 %v12976_v60  ;;  %5561 = vmatpush1.bf16.msra.mxu0 %v12977_v26  ;;  %v12987_v60 = vld [vmem:[#allocation58_spill] sm:$0xff]  ;;  %v12988_v26 = vld [vmem:[#allocation59_spill] sm:$0xff] }
 0xd25   :  { %5521 = vmatprep.subr.bf16.mxu1 %v12978_v44  ;;  %5562 = vmatprep.subr.bf16.mxu0 %v12979_v55  ;;  %v12989_v44 = vld [vmem:[#allocation60_spill] sm:$0xff] }
 0xd28   :  { %5522 = vmatpush1.bf16.msra.mxu1 %v12980_v47  ;;  %5563 = vmatpush1.bf16.msra.mxu0 %v12981_v2 }
 0xd29   :  { %5523 = vmatprep.subr.bf16.mxu1 %v12982_v34  ;;  %5564 = vmatprep.subr.bf16.mxu0 %v12983_v61 }
 0xd2c   :  { %5524 = vmatpush1.bf16.msra.mxu1 %v12984_v32  ;;  %5565 = vmatpush1.bf16.msra.mxu0 %v12985_v39 }
 0xd2d   :  { %5525 = vmatprep.subr.bf16.mxu1 %v12986_v28  ;;  %5566 = vmatprep.subr.bf16.mxu0 %v12987_v60 }
 0xd30   :  { %5526 = vmatpush1.bf16.msra.mxu1 %v12988_v26  ;;  %5567 = vmatpush1.bf16.msra.mxu0 %v12989_v44 }
 0xd31   :  { %5527 = vmatprep.subr.bf16.mxu1 %v12895_v53  ;;  %5568 = vmatprep.subr.bf16.mxu0 %v12896_v49 }
 0xd34   :  { %5528 = vmatpush1.bf16.msra.mxu1 %v12897_v7  ;;  %5569 = vmatpush1.bf16.msra.mxu0 %v12898_v6 }
 0xd35   :  { %5529 = vmatprep.subr.bf16.mxu1 %v12899_v52  ;;  %5570 = vmatprep.subr.bf16.mxu0 %v12900_v35 }
 0xd38   :  { %5530 = vmatpush1.bf16.msra.mxu1 %v12901_v31  ;;  %5571 = vmatpush1.bf16.msra.mxu0 %v12902_v63 }
 0xd39   :  { %5531 = vmatprep.subr.bf16.mxu1 %v12903_v45  ;;  %5572 = vmatprep.subr.bf16.mxu0 %v12904_v19 }
 0xd3c   :  { %5532 = vmatpush1.bf16.msra.mxu1 %v12905_v8  ;;  %5573 = vmatpush1.bf16.msra.mxu0 %v10645_v59 }
 0xd3d   :  { %5533 = vmatprep.subr.bf16.mxu1 %v10649_v48  ;;  %5574 = vmatprep.subr.bf16.mxu0 %v10651_v15 }
 0xd40   :  { %5534 = vmatpush1.bf16.msra.mxu1 %v10667_v11  ;;  %5575 = vmatpush1.bf16.msra.mxu0 %v10669_v62 }
 0xd41   :  { %5535 = vmatprep.subr.bf16.mxu1 %v10673_v12  ;;  %5576 = vmatprep.subr.bf16.mxu0 %v10675_v38  ;;  %v13050_v38 = vld [vmem:[#allocation116_spill] sm:$0xff]  ;;  %v13051_v12 = vld [vmem:[#allocation166_spill] sm:$0xff] }
 0xd44   :  { %5536 = vmatpush1.bf16.msra.mxu1 %v10679_v1  ;;  %5577 = vmatpush1.bf16.msra.mxu0 %v10681_v33  ;;  %v12992_v33 = vld [vmem:[#allocation76_spill] sm:$0xff] }
 0xd45   :  { %5645 = vmatprep.subr.bf16.mxu1 %v9915_v22  ;;  %5686 = vmatprep.subr.bf16.mxu0 %v9917_v51  ;;  %v12990_v22 = vld [vmem:[#allocation158_spill] sm:$0xff]  ;;  %v12991_v51 = vld [vmem:[#allocation75_spill] sm:$0xff] }
 0xd47   :  { %5538 = vmatmul.mubr.bf16.vlgmr.msra.gmra.mrb[120].mxu1 %v11046_v14  ;;  %5579 = vmatmul.mubr.bf16.vlgmr.msra.gmra.mrb[124].mxu0 %v11046_v14  ;;  %v12993_v14 = vld [vmem:[#allocation77_spill] sm:$0xff] }
 0xd48   :  { %5646 = vmatpush1.bf16.msra.mxu1 %v9933_v24  ;;  %5687 = vmatpush1.bf16.msra.mxu0 %v9935_v46  ;;  %v12994_v24 = vld [vmem:[#allocation78_spill] sm:$0xff]  ;;  %v12995_v46 = vld [vmem:[#allocation79_spill] sm:$0xff] }
 0xd49   :  { %5647 = vmatprep.subr.bf16.mxu1 %v9937_v23  ;;  %5688 = vmatprep.subr.bf16.mxu0 %v9939_v29  ;;  %v12996_v23 = vld [vmem:[#allocation80_spill] sm:$0xff]  ;;  %v12997_v29 = vld [vmem:[#allocation81_spill] sm:$0xff] }
 0xd4c   :  { %5648 = vmatpush1.bf16.msra.mxu1 %v9959_v36  ;;  %5689 = vmatpush1.bf16.msra.mxu0 %v9961_v3  ;;  %v12998_v36 = vld [vmem:[#allocation82_spill] sm:$0xff]  ;;  %v12999_v3 = vld [vmem:[#allocation83_spill] sm:$0xff] }
 0xd4d   :  { %5649 = vmatprep.subr.bf16.mxu1 %v9965_v57  ;;  %5690 = vmatprep.subr.bf16.mxu0 %v12990_v22  ;;  %v13000_v57 = vld [vmem:[#allocation84_spill] sm:$0xff]  ;;  %v13001_v22 = vld [vmem:[#allocation85_spill] sm:$0xff] }
 0xd50   :  { %5650 = vmatpush1.bf16.msra.mxu1 %v12991_v51  ;;  %5691 = vmatpush1.bf16.msra.mxu0 %v12992_v33  ;;  %v13002_v51 = vld [vmem:[#allocation86_spill] sm:$0xff]  ;;  %v13003_v33 = vld [vmem:[#allocation100_spill] sm:$0xff] }
 0xd51   :  { %5651 = vmatprep.subr.bf16.mxu1 %v12993_v14  ;;  %5692 = vmatprep.subr.bf16.mxu0 %v12994_v24  ;;  %v13004_v14 = vld [vmem:[#allocation101_spill] sm:$0xff]  ;;  %v13005_v24 = vld [vmem:[#allocation102_spill] sm:$0xff] }
 0xd54   :  { %5652 = vmatpush1.bf16.msra.mxu1 %v12995_v46  ;;  %5693 = vmatpush1.bf16.msra.mxu0 %v12996_v23  ;;  %v13006_v46 = vld [vmem:[#allocation103_spill] sm:$0xff]  ;;  %v13007_v23 = vld [vmem:[#allocation104_spill] sm:$0xff] }
 0xd55   :  { %5653 = vmatprep.subr.bf16.mxu1 %v12997_v29  ;;  %5694 = vmatprep.subr.bf16.mxu0 %v12998_v36  ;;  %v13008_v29 = vld [vmem:[#allocation105_spill] sm:$0xff]  ;;  %v13009_v36 = vld [vmem:[#allocation106_spill] sm:$0xff] }
 0xd58   :  { %5654 = vmatpush1.bf16.msra.mxu1 %v12999_v3  ;;  %5695 = vmatpush1.bf16.msra.mxu0 %v13000_v57  ;;  %v13010_v3 = vld [vmem:[#allocation135_spill] sm:$0xff]  ;;  %v13011_v57 = vld [vmem:[#allocation136_spill] sm:$0xff] }
 0xd59   :  { %5655 = vmatprep.subr.bf16.mxu1 %v13001_v22  ;;  %5696 = vmatprep.subr.bf16.mxu0 %v13002_v51  ;;  %v13012_v22 = vld [vmem:[#allocation137_spill] sm:$0xff]  ;;  %v13013_v51 = vld [vmem:[#allocation138_spill] sm:$0xff] }
 0xd5c   :  { %5656 = vmatpush1.bf16.msra.mxu1 %v13003_v33  ;;  %5697 = vmatpush1.bf16.msra.mxu0 %v13004_v14  ;;  %v13014_v33 = vld [vmem:[#allocation151_spill] sm:$0xff]  ;;  %v13015_v14 = vld [vmem:[#allocation152_spill] sm:$0xff] }
 0xd5d   :  { %5657 = vmatprep.subr.bf16.mxu1 %v13005_v24  ;;  %5698 = vmatprep.subr.bf16.mxu0 %v13006_v46  ;;  %v13016_v24 = vld [vmem:[#allocation153_spill] sm:$0xff]  ;;  %v13017_v46 = vld [vmem:[#allocation154_spill] sm:$0xff] }
 0xd60   :  { %5658 = vmatpush1.bf16.msra.mxu1 %v13007_v23  ;;  %5699 = vmatpush1.bf16.msra.mxu0 %v13008_v29  ;;  %v13018_v23 = vld [vmem:[#allocation87_spill] sm:$0xff]  ;;  %v13019_v29 = vld [vmem:[#allocation88_spill] sm:$0xff] }
 0xd61   :  { %5659 = vmatprep.subr.bf16.mxu1 %v13009_v36  ;;  %5700 = vmatprep.subr.bf16.mxu0 %v13010_v3  ;;  %v13020_v36 = vld [vmem:[#allocation89_spill] sm:$0xff]  ;;  %v13021_v3 = vld [vmem:[#allocation90_spill] sm:$0xff] }
 0xd64   :  { %5660 = vmatpush1.bf16.msra.mxu1 %v13011_v57  ;;  %5701 = vmatpush1.bf16.msra.mxu0 %v13012_v22  ;;  %v13022_v57 = vld [vmem:[#allocation91_spill] sm:$0xff]  ;;  %v13023_v22 = vld [vmem:[#allocation92_spill] sm:$0xff] }
 0xd65   :  { %5661 = vmatprep.subr.bf16.mxu1 %v13013_v51  ;;  %5702 = vmatprep.subr.bf16.mxu0 %v13014_v33  ;;  %v13024_v51 = vld [vmem:[#allocation93_spill] sm:$0xff]  ;;  %v13025_v33 = vld [vmem:[#allocation94_spill] sm:$0xff] }
 0xd68   :  { %5662 = vmatpush1.bf16.msra.mxu1 %v13015_v14  ;;  %5703 = vmatpush1.bf16.msra.mxu0 %v13016_v24  ;;  %v13026_v14 = vld [vmem:[#allocation95_spill] sm:$0xff]  ;;  %v13027_v24 = vld [vmem:[#allocation96_spill] sm:$0xff] }
 0xd69   :  { %5663 = vmatprep.subr.bf16.mxu1 %v13017_v46  ;;  %5704 = vmatprep.subr.bf16.mxu0 %v13018_v23  ;;  %v13028_v46 = vld [vmem:[#allocation97_spill] sm:$0xff]  ;;  %v13029_v23 = vld [vmem:[#allocation98_spill] sm:$0xff] }
 0xd6c   :  { %5664 = vmatpush1.bf16.msra.mxu1 %v13019_v29  ;;  %5705 = vmatpush1.bf16.msra.mxu0 %v13020_v36  ;;  %v13030_v29 = vld [vmem:[#allocation99_spill] sm:$0xff] }
 0xd6d   :  { %5665 = vmatprep.subr.bf16.mxu1 %v13021_v3  ;;  %5706 = vmatprep.subr.bf16.mxu0 %v13022_v57  ;;  %v13031_v36 = vld [vmem:[#allocation3_spill] sm:$0xff]  ;;  %v13032_v3 = vld [vmem:[#allocation4_spill] sm:$0xff]  ;;  %v13033_v57 = vld [vmem:[#allocation5_spill] sm:$0xff] }
 0xd70   :  { %5666 = vmatpush1.bf16.msra.mxu1 %v13023_v22  ;;  %5707 = vmatpush1.bf16.msra.mxu0 %v13024_v51  ;;  %v13034_v22 = vld [vmem:[#allocation6_spill] sm:$0xff]  ;;  %v13035_v51 = vld [vmem:[#allocation7_spill] sm:$0xff] }
 0xd71   :  { %5667 = vmatprep.subr.bf16.mxu1 %v13025_v33  ;;  %5708 = vmatprep.subr.bf16.mxu0 %v13026_v14  ;;  %v13036_v33 = vld [vmem:[#allocation8_spill] sm:$0xff]  ;;  %v13037_v14 = vld [vmem:[#allocation9_spill] sm:$0xff] }
 0xd74   :  { %5668 = vmatpush1.bf16.msra.mxu1 %v13027_v24  ;;  %5709 = vmatpush1.bf16.msra.mxu0 %v13028_v46  ;;  %v13038_v24 = vld [vmem:[#allocation10_spill] sm:$0xff]  ;;  %v13039_v46 = vld [vmem:[#allocation11_spill] sm:$0xff] }
 0xd75   :  { %5669 = vmatprep.subr.bf16.mxu1 %v13029_v23  ;;  %5710 = vmatprep.subr.bf16.mxu0 %v13030_v29  ;;  %v13040_v23 = vld [vmem:[#allocation12_spill] sm:$0xff]  ;;  %v13041_v29 = vld [vmem:[#allocation13_spill] sm:$0xff] }
 0xd78   :  { %5670 = vmatpush1.bf16.msra.mxu1 %v13031_v36  ;;  %5711 = vmatpush1.bf16.msra.mxu0 %v13032_v3  ;;  %v13042_v36 = vld [vmem:[#allocation14_spill] sm:$0xff]  ;;  %v13043_v3 = vld [vmem:[#allocation15_spill] sm:$0xff] }
 0xd79   :  { %5671 = vmatprep.subr.bf16.mxu1 %v13033_v57  ;;  %5712 = vmatprep.subr.bf16.mxu0 %v13034_v22  ;;  %v13044_v57 = vld [vmem:[#allocation16_spill] sm:$0xff]  ;;  %v13045_v22 = vld [vmem:[#allocation17_spill] sm:$0xff] }
 0xd7c   :  { %5672 = vmatpush1.bf16.msra.mxu1 %v13035_v51  ;;  %5713 = vmatpush1.bf16.msra.mxu0 %v13036_v33  ;;  %v13046_v51 = vld [vmem:[#allocation18_spill] sm:$0xff]  ;;  %v13047_v33 = vld [vmem:[#allocation165_spill] sm:$0xff] }
 0xd7d   :  { %5673 = vmatprep.subr.bf16.mxu1 %v13037_v14  ;;  %5714 = vmatprep.subr.bf16.mxu0 %v13038_v24  ;;  %v13048_v14 = vld [vmem:[#allocation115_spill] sm:$0xff]  ;;  %v13049_v24 = vld [vmem:[#allocation145_spill] sm:$0xff] }
 0xd7e   :  { %v4012_v1 = vadd.f32 %v13048_v14, %v13047_v33 }
 0xd80   :  { %5674 = vmatpush1.bf16.msra.mxu1 %v13039_v46  ;;  %5715 = vmatpush1.bf16.msra.mxu0 %v13040_v23  ;;  %v4073_v46 = vadd.f32 %v13050_v38, %v13049_v24  ;;  %v13052_v23 = vld [vmem:[#allocation117_spill] sm:$0xff] }
 0xd81   :  { %5675 = vmatprep.subr.bf16.mxu1 %v13041_v29  ;;  %5716 = vmatprep.subr.bf16.mxu0 %v13042_v36  ;;  %v4014_v62 = vadd.f32 %v13052_v23, %v13051_v12  ;;  %v13053_v29 = vld [vmem:[#allocation118_spill] sm:$0xff] }
 0xd82   :  { %v4075_v36 = vadd.f32 %v13053_v29, %v10836_v18 }
 0xd84   :  { %5676 = vmatpush1.bf16.msra.mxu1 %v13043_v3  ;;  %5717 = vmatpush1.bf16.msra.mxu0 %v13044_v57 }
 0xd85   :  { %5727 = vmatprep.subr.bf16.mxu1 %v13045_v22  ;;  %5768 = vmatprep.subr.bf16.mxu0 %v13046_v51 }
 0xdda   :  { %v5457_v11 = vpop.f32.mrb[116].mxu1  ;;  %v5498_v3 = vpop.f32.mrb[120].mxu0 }
 0xddb   :  { %v5587_v15 = vadd.f32 %v5457_v11, %v4012_v1  ;;  %v5589_v57 = vadd.f32 %v5498_v3, %v4073_v46  ;;  %v5459_v48 = vpop.f32.mrb[117].mxu1  ;;  %v5500_v22 = vpop.f32.mrb[121].mxu0  ;;  %v13054_v11 = vld [vmem:[#allocation70_spill] sm:$0xff] }
 0xddc   :  { %v5588_v59 = vadd.f32 %v5459_v48, %v4014_v62  ;;  %v5590_v51 = vadd.f32 %v5500_v22, %v4075_v36  ;;  %v5461_v8 = vpop.f32.mrb[118].mxu1  ;;  %v5502_v19 = vpop.f32.mrb[122].mxu0 }
 0xddd   :  { %v6809_v14 = vmul.f32 -1.442695, %v5587_v15  ;;  %v5462_v33 = vpop.f32.mrb[119].mxu1  ;;  %v5503_v45 = vpop.f32.mrb[123].mxu0  ;;  %v13056_v8 = vld [vmem:[#allocation162_spill] sm:$0xff] }
 0xdde   :  { %v6810_v38 = vmul.f32 -1.442695, %v5588_v59  ;;  %v6811_v23 = vmul.f32 -1.442695, %v5590_v51  ;;  %v13055_v45 = vld [vmem:[#allocation160_spill] sm:$0xff] }
 0xddf   :  { %7339 = vpow2.f32 %v6809_v14  ;;  %v4134_v19 = vadd.f32 %v13055_v45, %v10850_v13  ;;  %v4195_v14 = vadd.f32 %v13056_v8, %v10865_v5 }
 0xde0   :  { %7341 = vpow2.f32 %v6810_v38  ;;  %v13058_v38 = vld [vmem:[#allocation163_spill] sm:$0xff] }
 0xde1   :  { %7343 = vpow2.f32 %v6811_v23 }
 0xde2   :  { %7345 = vtanh.f32 %v5589_v57 }
 0xde9   :  { %v7340_v12 = vpop.eup %7339 }
 0xdea   :  { %v7342_v24 = vpop.eup %7341  ;;  %v5598_v29 = vadd.f32 1.0, %v7340_v12 }
 0xdeb   :  { %v5604_v1 = vadd.f32 1.0, %v7342_v24  ;;  %v7344_v46 = vpop.eup %7343  ;;  %v6087_v24 = vadd.f32 %v11038_v58, %v13054_v11 }
 0xdec   :  { %7347 = vrcp.f32 %v5598_v29  ;;  %v7346_v3 = vpop.eup %7345  ;;  %v5611_v15 = vadd.f32 1.0, %v7344_v46  ;;  %v13059_v29 = vld [vmem:[#allocation69_spill] sm:$0xff] }
 0xded   :  { %7349 = vrcp.f32 %v5604_v1  ;;  %v13060_v1 = vld [vmem:[#allocation161_spill] sm:$0xff] }
 0xdee   :  { %7351 = vrcp.f32 %v5611_v15  ;;  %v4197_v46 = vadd.f32 %v13060_v1, %v13059_v29 }
 0xdf6   :  { %v7348_v22 = vpop.eup %7347 }
 0xdf7   :  { %v7350_v36 = vpop.eup %7349  ;;  %v5615_v48 = vmul.f32 %v7348_v22, %v7346_v3 }
 0xdf8   :  { %v5614_v33 = vmul.f32 %v7350_v36, %v11023_v41  ;;  %v7352_v51 = vpop.eup %7351  ;;  %v13057_v41 = vld [vmem:[#allocation168_spill] sm:$0xff] }
 0xdf9   :  { %v4136_v23 = vadd.f32 %v13058_v38, %v13057_v41 }
 0xdfa   :  { %v11189_v59 = vadd.f32 %v5615_v48, %v5614_v33 }
 0xdfc   :  { %7353 = vtanh.f32 %v11189_v59 }
 0xe06   :  { %v7354_v12 = vpop.eup %7353 }
 0xe07   :  { %v5618_v57 = vmul.f32 %v7354_v12, %v7352_v51 }
 0xe09   :  { %v11194_v62 = vadd.f32 %v6087_v24, %v5618_v57 }
 0xe1a   :  { %v5539_v3 = vpop.f32.mrb[120].mxu1  ;;  %v5580_v22 = vpop.f32.mrb[124].mxu0 }
 0xe1b   :  { %v5591_v36 = vadd.f32 %v5539_v3, %v4134_v19  ;;  %v5593_v48 = vadd.f32 %v5580_v22, %v4195_v14  ;;  %v5541_v58 = vpop.f32.mrb[121].mxu1  ;;  %v5582_v15 = vpop.f32.mrb[125].mxu0 }
 0xe1c   :  { %v5592_v33 = vadd.f32 %v5541_v58, %v4136_v23  ;;  %v5594_v51 = vadd.f32 %v5582_v15, %v4197_v46  ;;  %v5543_v12 = vpop.f32.mrb[122].mxu1  ;;  %v5584_v11 = vpop.f32.mrb[126].mxu0 }
 0xe1d   :  { %v6812_v24 = vmul.f32 -1.442695, %v5591_v36  ;;  %v5544_v45 = vpop.f32.mrb[123].mxu1  ;;  %v5585_v13 = vpop.f32.mrb[127].mxu0  ;;  %v13065_v12 = vld [vmem:[#allocation39_spill] sm:$0xff]  ;;  %v13066_v11 = vld [vmem:[#allocation40_spill] sm:$0xff] }
 0xe1e   :  { %v6813_v8 = vmul.f32 -1.442695, %v5592_v33  ;;  %v6814_v38 = vmul.f32 -1.442695, %v5594_v51  ;;  %v13064_v51 = vld [vmem:[#allocation38_spill] sm:$0xff] }
 0xe1f   :  { %7355 = vpow2.f32 %v6812_v24  ;;  %v13067_v24 = vld [vmem:[#allocation41_spill] sm:$0xff]  ;;  %v13068_v45 = vld [vmem:[#allocation42_spill] sm:$0xff] }
 0xe20   :  { %7357 = vpow2.f32 %v6813_v8  ;;  %v13069_v8 = vld [vmem:[#allocation43_spill] sm:$0xff] }
 0xe21   :  { %7359 = vpow2.f32 %v6814_v38  ;;  %v13070_v38 = vld [vmem:[#allocation44_spill] sm:$0xff] }
 0xe22   :  { %7361 = vtanh.f32 %v5593_v48  ;;  %v11212_v48 = vpack.c.bf16 %v5618_v57, %v5618_v57  ;;  %v13063_v57 = vld [vmem:[#allocation37_spill] sm:$0xff] }
 0xe29   :  { %v7356_v41 = vpop.eup %7355 }
 0xe2a   :  { %v7358_v5 = vpop.eup %7357  ;;  %v5622_v1 = vadd.f32 1.0, %v7356_v41 }
 0xe2b   :  { %v5628_v19 = vadd.f32 1.0, %v7358_v5  ;;  %v7360_v14 = vpop.eup %7359 }
 0xe2c   :  { %7363 = vrcp.f32 %v5622_v1  ;;  %v7362_v23 = vpop.eup %7361  ;;  %v5635_v36 = vadd.f32 1.0, %v7360_v14  ;;  %v13071_v1 = vld [vmem:[#allocation45_spill] sm:$0xff]  ;;  %v13073_v14 = vld [vmem:[#allocation47_spill] sm:$0xff] }
 0xe2d   :  { %7365 = vrcp.f32 %v5628_v19  ;;  %v13072_v19 = vld [vmem:[#allocation46_spill] sm:$0xff] }
 0xe2e   :  { %7367 = vrcp.f32 %v5635_v36  ;;  %v13078_v36 = vld [vmem:[#allocation141_spill] sm:$0xff] }
 0xe36   :  { %v7364_v46 = vpop.eup %7363 }
 0xe37   :  { %v7366_v3 = vpop.eup %7365  ;;  %v5639_v22 = vmul.f32 %v7364_v46, %v7362_v23  ;;  %v13074_v23 = vld [vmem:[#allocation48_spill] sm:$0xff]  ;;  %v13075_v46 = vld [vmem:[#allocation49_spill] sm:$0xff] }
 0xe38   :  { %v5638_v13 = vmul.f32 %v7366_v3, %v11035_v20  ;;  %v7368_v15 = vpop.eup %7367  ;;  %v13062_v20 = vld [vmem:[#allocation36_spill] sm:$0xff]  ;;  %v13076_v3 = vld [vmem:[#allocation139_spill] sm:$0xff] }
 0xe3a   :  { %v11205_v58 = vadd.f32 %v5639_v22, %v5638_v13  ;;  %v13077_v22 = vld [vmem:[#allocation140_spill] sm:$0xff]  ;;  %v13079_v13 = vld [vmem:[#allocation142_spill] sm:$0xff] }
 0xe3c   :  { %7369 = vtanh.f32 %v11205_v58 }
 0xe46   :  { %v7370_v41 = vpop.eup %7369 }
 0xe47   :  { %v11208_v33 = vmul.f32 %v7370_v41, %v7368_v15  ;;  %v13080_v15 = vld [vmem:[#allocation147_spill] sm:$0xff]  ;;  %v13081_v41 = vld [vmem:[#allocation148_spill] sm:$0xff] }
 0xe49   :  { %13061 = vst [vmem:[#allocation159_spill] sm:$0xff] %v11208_v33  ;;  %v5644_v5 = vpack.c.bf16 %v11208_v33, %v11208_v33  ;;  %v13083_v33 = vld [vmem:[#allocation150_spill] sm:$0xff] }
 0xe4b   :  { %5677 = vmatprep.mubr.bf16.mxu1 %v5644_v5  ;;  %5718 = vmatprep.mubr.bf16.mxu0 %v5644_v5 }
 0xe4c   :  { %5678 = vmatmul.mubr.bf16.vlgmr.msra.gmra.mrb[124].mxu1 %v11212_v48  ;;  %5719 = vmatmul.mubr.bf16.vlgmr.msra.gmra.mrb[128].mxu0 %v11212_v48 }
 0xe4d   :  { %5728 = vmatpush1.bf16.msra.mxu1 %v12853_v54  ;;  %5769 = vmatpush1.bf16.msra.mxu0 %v12854_v43 }
 0xe4e   :  { %5759 = vmatprep.mubr.bf16.mxu1 %v5644_v5  ;;  %5800 = vmatprep.mubr.bf16.mxu0 %v5644_v5  ;;  %v13082_v5 = vld [vmem:[#allocation149_spill] sm:$0xff] }
 0xe4f   :  { %5729 = vmatprep.subr.bf16.mxu1 %v12855_v42  ;;  %5770 = vmatprep.subr.bf16.mxu0 %v12856_v4 }
 0xe51   :  { %5730 = vmatpush1.bf16.msra.mxu1 %v12857_v30  ;;  %5771 = vmatpush1.bf16.msra.mxu0 %v12858_v0 }
 0xe52   :  { %5731 = vmatprep.subr.bf16.mxu1 %v12954_v10  ;;  %5772 = vmatprep.subr.bf16.mxu0 %v12955_v25 }
 0xe55   :  { %5732 = vmatpush1.bf16.msra.mxu1 %v12956_v21  ;;  %5773 = vmatpush1.bf16.msra.mxu0 %v12957_v56 }
 0xe56   :  { %5733 = vmatprep.subr.bf16.mxu1 %v12958_v9  ;;  %5774 = vmatprep.subr.bf16.mxu0 %v12959_v50 }
 0xe59   :  { %5734 = vmatpush1.bf16.msra.mxu1 %v12960_v17  ;;  %5775 = vmatpush1.bf16.msra.mxu0 %v12961_v16 }
 0xe5a   :  { %5735 = vmatprep.subr.bf16.mxu1 %v12962_v40  ;;  %5776 = vmatprep.subr.bf16.mxu0 %v12963_v37 }
 0xe5d   :  { %5736 = vmatpush1.bf16.msra.mxu1 %v12964_v27  ;;  %5777 = vmatpush1.bf16.msra.mxu0 %v13062_v20 }
 0xe5e   :  { %5737 = vmatprep.subr.bf16.mxu1 %v13063_v57  ;;  %5778 = vmatprep.subr.bf16.mxu0 %v13064_v51 }
 0xe61   :  { %5738 = vmatpush1.bf16.msra.mxu1 %v13065_v12  ;;  %5779 = vmatpush1.bf16.msra.mxu0 %v13066_v11 }
 0xe62   :  { %5739 = vmatprep.subr.bf16.mxu1 %v13067_v24  ;;  %5780 = vmatprep.subr.bf16.mxu0 %v13068_v45 }
 0xe65   :  { %5740 = vmatpush1.bf16.msra.mxu1 %v13069_v8  ;;  %5781 = vmatpush1.bf16.msra.mxu0 %v13070_v38 }
 0xe66   :  { %5741 = vmatprep.subr.bf16.mxu1 %v13071_v1  ;;  %5782 = vmatprep.subr.bf16.mxu0 %v13072_v19 }
 0xe69   :  { %5742 = vmatpush1.bf16.msra.mxu1 %v13073_v14  ;;  %5783 = vmatpush1.bf16.msra.mxu0 %v13074_v23 }
 0xe6a   :  { %5743 = vmatprep.subr.bf16.mxu1 %v13075_v46  ;;  %5784 = vmatprep.subr.bf16.mxu0 %v12979_v55 }
 0xe6d   :  { %5744 = vmatpush1.bf16.msra.mxu1 %v12980_v47  ;;  %5785 = vmatpush1.bf16.msra.mxu0 %v12981_v2 }
 0xe6e   :  { %5745 = vmatprep.subr.bf16.mxu1 %v12982_v34  ;;  %5786 = vmatprep.subr.bf16.mxu0 %v12983_v61 }
 0xe71   :  { %5746 = vmatpush1.bf16.msra.mxu1 %v12984_v32  ;;  %5787 = vmatpush1.bf16.msra.mxu0 %v12985_v39 }
 0xe72   :  { %5747 = vmatprep.subr.bf16.mxu1 %v12986_v28  ;;  %5788 = vmatprep.subr.bf16.mxu0 %v12987_v60 }
 0xe75   :  { %5748 = vmatpush1.bf16.msra.mxu1 %v12988_v26  ;;  %5789 = vmatpush1.bf16.msra.mxu0 %v12989_v44 }
 0xe76   :  { %5749 = vmatprep.subr.bf16.mxu1 %v12895_v53  ;;  %5790 = vmatprep.subr.bf16.mxu0 %v12896_v49 }
 0xe79   :  { %5750 = vmatpush1.bf16.msra.mxu1 %v12897_v7  ;;  %5791 = vmatpush1.bf16.msra.mxu0 %v12898_v6  ;;  %v13158_v6 = vld [vmem:[#allocation166_spill] sm:$0xff] }
 0xe7a   :  { %5751 = vmatprep.subr.bf16.mxu1 %v12899_v52  ;;  %5792 = vmatprep.subr.bf16.mxu0 %v12900_v35  ;;  %v13084_v35 = vld [vmem:[#allocation107_spill] sm:$0xff]  ;;  %v13157_v52 = vld [vmem:[#allocation120_spill] sm:$0xff] }
 0xe7d   :  { %5752 = vmatpush1.bf16.msra.mxu1 %v12901_v31  ;;  %5793 = vmatpush1.bf16.msra.mxu0 %v12902_v63  ;;  %v13085_v31 = vld [vmem:[#allocation108_spill] sm:$0xff]  ;;  %v13086_v63 = vld [vmem:[#allocation109_spill] sm:$0xff] }
 0xe7e   :  { %5753 = vmatprep.subr.bf16.mxu1 %v13076_v3  ;;  %5794 = vmatprep.subr.bf16.mxu0 %v13077_v22  ;;  %v13087_v3 = vld [vmem:[#allocation110_spill] sm:$0xff]  ;;  %v13088_v22 = vld [vmem:[#allocation73_spill] sm:$0xff] }
 0xe81   :  { %5754 = vmatpush1.bf16.msra.mxu1 %v13078_v36  ;;  %5795 = vmatpush1.bf16.msra.mxu0 %v13079_v13  ;;  %v13089_v36 = vld [vmem:[#allocation74_spill] sm:$0xff] }
 0xe82   :  { %5755 = vmatprep.subr.bf16.mxu1 %v13080_v15  ;;  %5796 = vmatprep.subr.bf16.mxu0 %v13081_v41  ;;  %v13090_v41 = vld [vmem:[#allocation131_spill] sm:$0xff]  ;;  %v13099_v15 = vld [vmem:[#allocation76_spill] sm:$0xff] }
 0xe85   :  { %5756 = vmatpush1.bf16.msra.mxu1 %v13082_v5  ;;  %5797 = vmatpush1.bf16.msra.mxu0 %v13083_v33  ;;  %v13091_v5 = vld [vmem:[#allocation132_spill] sm:$0xff]  ;;  %v13092_v33 = vld [vmem:[#allocation133_spill] sm:$0xff] }
 0xe86   :  { %5757 = vmatprep.subr.bf16.mxu1 %v13084_v35  ;;  %5798 = vmatprep.subr.bf16.mxu0 %v13085_v31  ;;  %v13093_v35 = vld [vmem:[#allocation134_spill] sm:$0xff]  ;;  %v13094_v31 = vld [vmem:[#allocation155_spill] sm:$0xff] }
 0xe89   :  { %5758 = vmatpush1.bf16.msra.mxu1 %v13086_v63  ;;  %5799 = vmatpush1.bf16.msra.mxu0 %v13087_v3  ;;  %v13095_v63 = vld [vmem:[#allocation156_spill] sm:$0xff]  ;;  %v13096_v3 = vld [vmem:[#allocation157_spill] sm:$0xff] }
 0xe8a   :  { %5867 = vmatprep.subr.bf16.mxu1 %v13088_v22  ;;  %5908 = vmatprep.subr.bf16.mxu0 %v13089_v36  ;;  %v13097_v22 = vld [vmem:[#allocation158_spill] sm:$0xff]  ;;  %v13098_v36 = vld [vmem:[#allocation75_spill] sm:$0xff] }
 0xe8c   :  { %5760 = vmatmul.mubr.bf16.vlgmr.msra.gmra.mrb[128].mxu1 %v11212_v48  ;;  %5801 = vmatmul.mubr.bf16.vlgmr.msra.gmra.mrb[132].mxu0 %v11212_v48  ;;  %v13100_v48 = vld [vmem:[#allocation77_spill] sm:$0xff] }
 0xe8d   :  { %5868 = vmatpush1.bf16.msra.mxu1 %v13090_v41  ;;  %5909 = vmatpush1.bf16.msra.mxu0 %v13091_v5  ;;  %v13101_v41 = vld [vmem:[#allocation78_spill] sm:$0xff]  ;;  %v13102_v5 = vld [vmem:[#allocation79_spill] sm:$0xff] }
 0xe8e   :  { %5869 = vmatprep.subr.bf16.mxu1 %v13092_v33  ;;  %5910 = vmatprep.subr.bf16.mxu0 %v13093_v35  ;;  %v13103_v33 = vld [vmem:[#allocation80_spill] sm:$0xff]  ;;  %v13104_v35 = vld [vmem:[#allocation81_spill] sm:$0xff] }
 0xe91   :  { %5870 = vmatpush1.bf16.msra.mxu1 %v13094_v31  ;;  %5911 = vmatpush1.bf16.msra.mxu0 %v13095_v63  ;;  %v13105_v31 = vld [vmem:[#allocation82_spill] sm:$0xff]  ;;  %v13106_v63 = vld [vmem:[#allocation83_spill] sm:$0xff] }
 0xe92   :  { %5871 = vmatprep.subr.bf16.mxu1 %v13096_v3  ;;  %5912 = vmatprep.subr.bf16.mxu0 %v13097_v22  ;;  %v13107_v3 = vld [vmem:[#allocation84_spill] sm:$0xff]  ;;  %v13108_v22 = vld [vmem:[#allocation85_spill] sm:$0xff] }
 0xe95   :  { %5872 = vmatpush1.bf16.msra.mxu1 %v13098_v36  ;;  %5913 = vmatpush1.bf16.msra.mxu0 %v13099_v15  ;;  %v13109_v36 = vld [vmem:[#allocation86_spill] sm:$0xff]  ;;  %v13110_v15 = vld [vmem:[#allocation100_spill] sm:$0xff] }
 0xe96   :  { %5873 = vmatprep.subr.bf16.mxu1 %v13100_v48  ;;  %5914 = vmatprep.subr.bf16.mxu0 %v13101_v41  ;;  %v13111_v48 = vld [vmem:[#allocation101_spill] sm:$0xff]  ;;  %v13112_v41 = vld [vmem:[#allocation102_spill] sm:$0xff] }
 0xe99   :  { %5874 = vmatpush1.bf16.msra.mxu1 %v13102_v5  ;;  %5915 = vmatpush1.bf16.msra.mxu0 %v13103_v33  ;;  %v13113_v5 = vld [vmem:[#allocation103_spill] sm:$0xff]  ;;  %v13114_v33 = vld [vmem:[#allocation104_spill] sm:$0xff] }
 0xe9a   :  { %5875 = vmatprep.subr.bf16.mxu1 %v13104_v35  ;;  %5916 = vmatprep.subr.bf16.mxu0 %v13105_v31  ;;  %v13115_v35 = vld [vmem:[#allocation105_spill] sm:$0xff]  ;;  %v13116_v31 = vld [vmem:[#allocation106_spill] sm:$0xff] }
 0xe9d   :  { %5876 = vmatpush1.bf16.msra.mxu1 %v13106_v63  ;;  %5917 = vmatpush1.bf16.msra.mxu0 %v13107_v3  ;;  %v13117_v63 = vld [vmem:[#allocation135_spill] sm:$0xff]  ;;  %v13118_v3 = vld [vmem:[#allocation136_spill] sm:$0xff] }
 0xe9e   :  { %5877 = vmatprep.subr.bf16.mxu1 %v13108_v22  ;;  %5918 = vmatprep.subr.bf16.mxu0 %v13109_v36  ;;  %v13119_v22 = vld [vmem:[#allocation137_spill] sm:$0xff]  ;;  %v13120_v36 = vld [vmem:[#allocation138_spill] sm:$0xff] }
 0xea1   :  { %5878 = vmatpush1.bf16.msra.mxu1 %v13110_v15  ;;  %5919 = vmatpush1.bf16.msra.mxu0 %v13111_v48  ;;  %v13121_v15 = vld [vmem:[#allocation151_spill] sm:$0xff]  ;;  %v13122_v48 = vld [vmem:[#allocation152_spill] sm:$0xff] }
 0xea2   :  { %5879 = vmatprep.subr.bf16.mxu1 %v13112_v41  ;;  %5920 = vmatprep.subr.bf16.mxu0 %v13113_v5  ;;  %v13123_v41 = vld [vmem:[#allocation153_spill] sm:$0xff]  ;;  %v13124_v5 = vld [vmem:[#allocation154_spill] sm:$0xff] }
 0xea5   :  { %5880 = vmatpush1.bf16.msra.mxu1 %v13114_v33  ;;  %5921 = vmatpush1.bf16.msra.mxu0 %v13115_v35  ;;  %v13125_v33 = vld [vmem:[#allocation87_spill] sm:$0xff]  ;;  %v13126_v35 = vld [vmem:[#allocation88_spill] sm:$0xff] }
 0xea6   :  { %5881 = vmatprep.subr.bf16.mxu1 %v13116_v31  ;;  %5922 = vmatprep.subr.bf16.mxu0 %v13117_v63  ;;  %v13127_v31 = vld [vmem:[#allocation89_spill] sm:$0xff]  ;;  %v13128_v63 = vld [vmem:[#allocation90_spill] sm:$0xff] }
 0xea9   :  { %5882 = vmatpush1.bf16.msra.mxu1 %v13118_v3  ;;  %5923 = vmatpush1.bf16.msra.mxu0 %v13119_v22  ;;  %v13129_v3 = vld [vmem:[#allocation91_spill] sm:$0xff]  ;;  %v13130_v22 = vld [vmem:[#allocation92_spill] sm:$0xff] }
 0xeaa   :  { %5883 = vmatprep.subr.bf16.mxu1 %v13120_v36  ;;  %5924 = vmatprep.subr.bf16.mxu0 %v13121_v15  ;;  %v13131_v36 = vld [vmem:[#allocation93_spill] sm:$0xff]  ;;  %v13132_v15 = vld [vmem:[#allocation94_spill] sm:$0xff] }
 0xead   :  { %5884 = vmatpush1.bf16.msra.mxu1 %v13122_v48  ;;  %5925 = vmatpush1.bf16.msra.mxu0 %v13123_v41  ;;  %v13133_v48 = vld [vmem:[#allocation95_spill] sm:$0xff]  ;;  %v13134_v41 = vld [vmem:[#allocation96_spill] sm:$0xff] }
 0xeae   :  { %5885 = vmatprep.subr.bf16.mxu1 %v13124_v5  ;;  %5926 = vmatprep.subr.bf16.mxu0 %v13125_v33  ;;  %v13135_v5 = vld [vmem:[#allocation97_spill] sm:$0xff]  ;;  %v13136_v33 = vld [vmem:[#allocation98_spill] sm:$0xff] }
 0xeb1   :  { %5886 = vmatpush1.bf16.msra.mxu1 %v13126_v35  ;;  %5927 = vmatpush1.bf16.msra.mxu0 %v13127_v31  ;;  %v13137_v35 = vld [vmem:[#allocation99_spill] sm:$0xff] }
 0xeb2   :  { %5887 = vmatprep.subr.bf16.mxu1 %v13128_v63  ;;  %5928 = vmatprep.subr.bf16.mxu0 %v13129_v3  ;;  %v13138_v31 = vld [vmem:[#allocation3_spill] sm:$0xff]  ;;  %v13139_v63 = vld [vmem:[#allocation4_spill] sm:$0xff]  ;;  %v13140_v3 = vld [vmem:[#allocation5_spill] sm:$0xff] }
 0xeb5   :  { %5888 = vmatpush1.bf16.msra.mxu1 %v13130_v22  ;;  %5929 = vmatpush1.bf16.msra.mxu0 %v13131_v36  ;;  %v13141_v22 = vld [vmem:[#allocation6_spill] sm:$0xff]  ;;  %v13142_v36 = vld [vmem:[#allocation7_spill] sm:$0xff] }
 0xeb6   :  { %5889 = vmatprep.subr.bf16.mxu1 %v13132_v15  ;;  %5930 = vmatprep.subr.bf16.mxu0 %v13133_v48  ;;  %v13143_v15 = vld [vmem:[#allocation8_spill] sm:$0xff]  ;;  %v13144_v48 = vld [vmem:[#allocation9_spill] sm:$0xff] }
 0xeb9   :  { %5890 = vmatpush1.bf16.msra.mxu1 %v13134_v41  ;;  %5931 = vmatpush1.bf16.msra.mxu0 %v13135_v5  ;;  %v13145_v41 = vld [vmem:[#allocation10_spill] sm:$0xff]  ;;  %v13146_v5 = vld [vmem:[#allocation11_spill] sm:$0xff] }
 0xeba   :  { %5891 = vmatprep.subr.bf16.mxu1 %v13136_v33  ;;  %5932 = vmatprep.subr.bf16.mxu0 %v13137_v35  ;;  %v13147_v33 = vld [vmem:[#allocation12_spill] sm:$0xff]  ;;  %v13148_v35 = vld [vmem:[#allocation13_spill] sm:$0xff] }
 0xebd   :  { %5892 = vmatpush1.bf16.msra.mxu1 %v13138_v31  ;;  %5933 = vmatpush1.bf16.msra.mxu0 %v13139_v63  ;;  %v13149_v31 = vld [vmem:[#allocation14_spill] sm:$0xff]  ;;  %v13150_v63 = vld [vmem:[#allocation15_spill] sm:$0xff] }
 0xebe   :  { %5893 = vmatprep.subr.bf16.mxu1 %v13140_v3  ;;  %5934 = vmatprep.subr.bf16.mxu0 %v13141_v22  ;;  %v13151_v3 = vld [vmem:[#allocation16_spill] sm:$0xff]  ;;  %v13152_v22 = vld [vmem:[#allocation17_spill] sm:$0xff] }
 0xec1   :  { %5894 = vmatpush1.bf16.msra.mxu1 %v13142_v36  ;;  %5935 = vmatpush1.bf16.msra.mxu0 %v13143_v15  ;;  %v13153_v36 = vld [vmem:[#allocation18_spill] sm:$0xff]  ;;  %v13154_v15 = vld [vmem:[#allocation165_spill] sm:$0xff] }
 0xec2   :  { %5895 = vmatprep.subr.bf16.mxu1 %v13144_v48  ;;  %5936 = vmatprep.subr.bf16.mxu0 %v13145_v41  ;;  %v13155_v48 = vld [vmem:[#allocation119_spill] sm:$0xff]  ;;  %v13156_v41 = vld [vmem:[#allocation145_spill] sm:$0xff] }
 0xec3   :  { %v4016_v13 = vadd.f32 %v13155_v48, %v13154_v15 }
 0xec5   :  { %5896 = vmatpush1.bf16.msra.mxu1 %v13146_v5  ;;  %5937 = vmatpush1.bf16.msra.mxu0 %v13147_v33  ;;  %v4077_v5 = vadd.f32 %v13157_v52, %v13156_v41  ;;  %v13159_v33 = vld [vmem:[#allocation121_spill] sm:$0xff] }
 0xec6   :  { %5897 = vmatprep.subr.bf16.mxu1 %v13148_v35  ;;  %5938 = vmatprep.subr.bf16.mxu0 %v13149_v31  ;;  %v4018_v7 = vadd.f32 %v13159_v33, %v13158_v6  ;;  %v13160_v35 = vld [vmem:[#allocation122_spill] sm:$0xff] }
 0xec7   :  { %v4079_v31 = vadd.f32 %v13160_v35, %v10836_v18 }
 0xec9   :  { %5898 = vmatpush1.bf16.msra.mxu1 %v13150_v63  ;;  %5939 = vmatpush1.bf16.msra.mxu0 %v13151_v3 }
 0xeca   :  { %5949 = vmatprep.subr.bf16.mxu1 %v13152_v22  ;;  %5990 = vmatprep.subr.bf16.mxu0 %v13153_v36 }
 0xf1f   :  { %v5679_v49 = vpop.f32.mrb[124].mxu1  ;;  %v5720_v63 = vpop.f32.mrb[128].mxu0 }
 0xf20   :  { %v5809_v53 = vadd.f32 %v5679_v49, %v4016_v13  ;;  %v5811_v3 = vadd.f32 %v5720_v63, %v4077_v5  ;;  %v5681_v44 = vpop.f32.mrb[125].mxu1  ;;  %v5722_v22 = vpop.f32.mrb[129].mxu0  ;;  %v13163_v63 = vld [vmem:[#allocation127_spill] sm:$0xff] }
 0xf21   :  { %v5810_v26 = vadd.f32 %v5681_v44, %v4018_v7  ;;  %v5812_v36 = vadd.f32 %v5722_v22, %v4079_v31  ;;  %v5683_v60 = vpop.f32.mrb[126].mxu1  ;;  %v5724_v28 = vpop.f32.mrb[130].mxu0  ;;  %v13162_v31 = vld [vmem:[#allocation146_spill] sm:$0xff]  ;;  %v13164_v22 = vld [vmem:[#allocation72_spill] sm:$0xff] }
 0xf22   :  { %v6815_v48 = vmul.f32 -1.442695, %v5809_v53  ;;  %v5684_v15 = vpop.f32.mrb[127].mxu1  ;;  %v5725_v39 = vpop.f32.mrb[131].mxu0 }
 0xf23   :  { %v6816_v52 = vmul.f32 -1.442695, %v5810_v26  ;;  %v6817_v33 = vmul.f32 -1.442695, %v5812_v36  ;;  %v13165_v36 = vld [vmem:[#allocation128_spill] sm:$0xff] }
 0xf24   :  { %7371 = vpow2.f32 %v6815_v48  ;;  %v4189_v48 = vadd.f32 %v13165_v36, %v13164_v22 }
 0xf25   :  { %7373 = vpow2.f32 %v6816_v52  ;;  %v13166_v52 = vld [vmem:[#allocation168_spill] sm:$0xff] }
 0xf26   :  { %7375 = vpow2.f32 %v6817_v33  ;;  %v13167_v33 = vld [vmem:[#allocation129_spill] sm:$0xff] }
 0xf27   :  { %7377 = vtanh.f32 %v5811_v3  ;;  %v4128_v3 = vadd.f32 %v13163_v63, %v13162_v31 }
 0xf2e   :  { %v7372_v41 = vpop.eup %7371 }
 0xf2f   :  { %v7374_v6 = vpop.eup %7373  ;;  %v5820_v35 = vadd.f32 1.0, %v7372_v41 }
 0xf30   :  { %v5826_v49 = vadd.f32 1.0, %v7374_v6  ;;  %v7376_v13 = vpop.eup %7375 }
 0xf31   :  { %7379 = vrcp.f32 %v5820_v35  ;;  %v7378_v7 = vpop.eup %7377  ;;  %v5833_v53 = vadd.f32 1.0, %v7376_v13  ;;  %v13168_v35 = vld [vmem:[#allocation130_spill] sm:$0xff] }
 0xf32   :  { %7381 = vrcp.f32 %v5826_v49  ;;  %v4191_v49 = vadd.f32 %v13168_v35, %v13059_v29 }
 0xf33   :  { %7383 = vrcp.f32 %v5833_v53 }
 0xf3b   :  { %v7380_v44 = vpop.eup %7379 }
 0xf3c   :  { %v7382_v60 = vpop.eup %7381  ;;  %v5837_v28 = vmul.f32 %v7380_v44, %v7378_v7 }
 0xf3d   :  { %v5836_v39 = vmul.f32 %v7382_v60, %v11189_v59  ;;  %v7384_v15 = vpop.eup %7383  ;;  %v4130_v59 = vadd.f32 %v13167_v33, %v13166_v52 }
 0xf3f   :  { %v11355_v26 = vadd.f32 %v5837_v28, %v5836_v39 }
 0xf41   :  { %7385 = vtanh.f32 %v11355_v26 }
 0xf4b   :  { %v7386_v41 = vpop.eup %7385 }
 0xf4c   :  { %v5840_v5 = vmul.f32 %v7386_v41, %v7384_v15 }
 0xf4e   :  { %v11359_v6 = vadd.f32 %v11194_v62, %v5840_v5 }
 0xf50   :  { %13161 = vst [vmem:[#allocation19_spill] sm:$0xff] %v11359_v6 }
 0xf5f   :  { %v5761_v13 = vpop.f32.mrb[128].mxu1  ;;  %v5802_v7 = vpop.f32.mrb[132].mxu0 }
 0xf60   :  { %v5813_v44 = vadd.f32 %v5761_v13, %v4128_v3  ;;  %v5815_v60 = vadd.f32 %v5802_v7, %v4189_v48  ;;  %v5763_v28 = vpop.f32.mrb[129].mxu1  ;;  %v5804_v53 = vpop.f32.mrb[133].mxu0 }
 0xf61   :  { %v5814_v62 = vadd.f32 %v5763_v28, %v4130_v59  ;;  %v5816_v39 = vadd.f32 %v5804_v53, %v4191_v49  ;;  %v5765_v15 = vpop.f32.mrb[130].mxu1  ;;  %v5806_v41 = vpop.f32.mrb[134].mxu0 }
 0xf62   :  { %v6818_v63 = vmul.f32 -1.442695, %v5813_v44  ;;  %v5766_v31 = vpop.f32.mrb[131].mxu1  ;;  %v5807_v6 = vpop.f32.mrb[135].mxu0 }
 0xf63   :  { %v6819_v36 = vmul.f32 -1.442695, %v5814_v62  ;;  %v6820_v33 = vmul.f32 -1.442695, %v5816_v39  ;;  %v7113_v62 = vld [vmem:[%s11531_s13 + $0x78] sm:$0xff]  }
 0xf64   :  { %7387 = vpow2.f32 %v6818_v63  ;;  %v7114_v39 = vld [vmem:[%s11531_s13 + $0x38] sm:$0xff]   ;;  %v13194_v63 = vld [vmem:[#allocation165_spill] sm:$0xff] }
 0xf65   :  { %7389 = vpow2.f32 %v6819_v36 }
 0xf66   :  { %7391 = vpow2.f32 %v6820_v33 }
 0xf67   :  { %7393 = vtanh.f32 %v5815_v60  ;;  %v11377_v60 = vpack.c.bf16 %v5840_v5, %v5840_v5  ;;  %v7112_v5 = vld [vmem:[%s11531_s13 + $0x30] sm:$0xff]  }
 0xf6e   :  { %v7388_v52 = vpop.eup %7387 }
 0xf6f   :  { %v7390_v22 = vpop.eup %7389  ;;  %v5844_v35 = vadd.f32 1.0, %v7388_v52 }
 0xf70   :  { %v5850_v3 = vadd.f32 1.0, %v7390_v22  ;;  %v7392_v48 = vpop.eup %7391 }
 0xf71   :  { %7395 = vrcp.f32 %v5844_v35  ;;  %v7394_v59 = vpop.eup %7393  ;;  %v5857_v44 = vadd.f32 1.0, %v7392_v48 }
 0xf72   :  { %7397 = vrcp.f32 %v5850_v3  ;;  %v13195_v3 = vld [vmem:[#allocation166_spill] sm:$0xff] }
 0xf73   :  { %7399 = vrcp.f32 %v5857_v44 }
 0xf7b   :  { %v7396_v49 = vpop.eup %7395 }
 0xf7c   :  { %v7398_v13 = vpop.eup %7397  ;;  %v5861_v7 = vmul.f32 %v7396_v49, %v7394_v59 }
 0xf7d   :  { %v5860_v6 = vmul.f32 %v7398_v13, %v11205_v58  ;;  %v7400_v28 = vpop.eup %7399  ;;  %v13192_v58 = vld [vmem:[#allocation109_spill] sm:$0xff] }
 0xf7f   :  { %v11370_v31 = vadd.f32 %v5861_v7, %v5860_v6 }
 0xf81   :  { %7401 = vtanh.f32 %v11370_v31 }
 0xf8b   :  { %v7402_v52 = vpop.eup %7401 }
 0xf8c   :  { %v11373_v53 = vmul.f32 %v7402_v52, %v7400_v28 }
 0xf8e   :  { %v5866_v22 = vpack.c.bf16 %v11373_v53, %v11373_v53 }
 0xf90   :  { %5899 = vmatprep.mubr.bf16.mxu1 %v5866_v22  ;;  %5940 = vmatprep.mubr.bf16.mxu0 %v5866_v22 }
 0xf91   :  { %5900 = vmatmul.mubr.bf16.vlgmr.msra.gmra.mrb[88].mxu1 %v11377_v60  ;;  %5941 = vmatmul.mubr.bf16.vlgmr.msra.gmra.mrb[92].mxu0 %v11377_v60 }
 0xf92   :  { %5950 = vmatpush1.bf16.msra.mxu1 %v12853_v54  ;;  %5991 = vmatpush1.bf16.msra.mxu0 %v12854_v43  ;;  %v13169_v54 = vld [vmem:[#allocation56_spill] sm:$0xff]  ;;  %v13170_v43 = vld [vmem:[#allocation57_spill] sm:$0xff] }
 0xf93   :  { %5981 = vmatprep.mubr.bf16.mxu1 %v5866_v22  ;;  %6022 = vmatprep.mubr.bf16.mxu0 %v5866_v22  ;;  %v13196_v22 = vld [vmem:[#allocation145_spill] sm:$0xff] }
 0xf94   :  { %5951 = vmatprep.subr.bf16.mxu1 %v12855_v42  ;;  %5992 = vmatprep.subr.bf16.mxu0 %v12856_v4  ;;  %v13171_v42 = vld [vmem:[#allocation58_spill] sm:$0xff]  ;;  %v13172_v4 = vld [vmem:[#allocation59_spill] sm:$0xff] }
 0xf96   :  { %5952 = vmatpush1.bf16.msra.mxu1 %v12857_v30  ;;  %5993 = vmatpush1.bf16.msra.mxu0 %v12858_v0  ;;  %v13173_v30 = vld [vmem:[#allocation60_spill] sm:$0xff]  ;;  %v13174_v0 = vld [vmem:[#allocation61_spill] sm:$0xff] }
 0xf97   :  { %5953 = vmatprep.subr.bf16.mxu1 %v12954_v10  ;;  %5994 = vmatprep.subr.bf16.mxu0 %v12955_v25  ;;  %v13175_v10 = vld [vmem:[#allocation62_spill] sm:$0xff]  ;;  %v13176_v25 = vld [vmem:[#allocation63_spill] sm:$0xff] }
 0xf9a   :  { %5954 = vmatpush1.bf16.msra.mxu1 %v12956_v21  ;;  %5995 = vmatpush1.bf16.msra.mxu0 %v12957_v56  ;;  %v13177_v21 = vld [vmem:[#allocation64_spill] sm:$0xff]  ;;  %v13178_v56 = vld [vmem:[#allocation65_spill] sm:$0xff] }
 0xf9b   :  { %5955 = vmatprep.subr.bf16.mxu1 %v12958_v9  ;;  %5996 = vmatprep.subr.bf16.mxu0 %v12959_v50  ;;  %v13179_v9 = vld [vmem:[#allocation66_spill] sm:$0xff]  ;;  %v13180_v50 = vld [vmem:[#allocation67_spill] sm:$0xff] }
 0xf9e   :  { %5956 = vmatpush1.bf16.msra.mxu1 %v12960_v17  ;;  %5997 = vmatpush1.bf16.msra.mxu0 %v12961_v16  ;;  %v13181_v17 = vld [vmem:[#allocation68_spill] sm:$0xff]  ;;  %v13182_v16 = vld [vmem:[#allocation139_spill] sm:$0xff] }
 0xf9f   :  { %5957 = vmatprep.subr.bf16.mxu1 %v12962_v40  ;;  %5998 = vmatprep.subr.bf16.mxu0 %v12963_v37  ;;  %v13183_v40 = vld [vmem:[#allocation140_spill] sm:$0xff]  ;;  %v13184_v37 = vld [vmem:[#allocation141_spill] sm:$0xff] }
 0xfa2   :  { %5958 = vmatpush1.bf16.msra.mxu1 %v12964_v27  ;;  %5999 = vmatpush1.bf16.msra.mxu0 %v13062_v20  ;;  %v13185_v27 = vld [vmem:[#allocation142_spill] sm:$0xff] }
 0xfa3   :  { %5959 = vmatprep.subr.bf16.mxu1 %v13063_v57  ;;  %6000 = vmatprep.subr.bf16.mxu0 %v13064_v51  ;;  %v13193_v20 = vld [vmem:[#allocation110_spill] sm:$0xff]  ;;  %v7099_v57 = vld [vmem:[%s11531_s13 + $0x40] sm:$0xff]  }
 0xfa4   :  { %v7100_v51 = vld [vmem:[%s11531_s13] sm:$0xff]  }
 0xfa6   :  { %5960 = vmatpush1.bf16.msra.mxu1 %v13065_v12  ;;  %6001 = vmatpush1.bf16.msra.mxu0 %v13066_v11  ;;  %v7101_v12 = vld [vmem:[%s11531_s13 + $0x48] sm:$0xff]  }
 0xfa7   :  { %5961 = vmatprep.subr.bf16.mxu1 %v13067_v24  ;;  %6002 = vmatprep.subr.bf16.mxu0 %v13068_v45  ;;  %v7102_v11 = vld [vmem:[%s11531_s13 + $0x8] sm:$0xff]   ;;  %v7103_v24 = vld [vmem:[%s11531_s13 + $0x50] sm:$0xff]  }
 0xfa8   :  { %v7104_v45 = vld [vmem:[%s11531_s13 + $0x10] sm:$0xff]  }
 0xfaa   :  { %5962 = vmatpush1.bf16.msra.mxu1 %v13069_v8  ;;  %6003 = vmatpush1.bf16.msra.mxu0 %v13070_v38  ;;  %v7105_v8 = vld [vmem:[%s11531_s13 + $0x58] sm:$0xff]  }
 0xfab   :  { %5963 = vmatprep.subr.bf16.mxu1 %v13071_v1  ;;  %6004 = vmatprep.subr.bf16.mxu0 %v13072_v19  ;;  %v7106_v38 = vld [vmem:[%s11531_s13 + $0x18] sm:$0xff]   ;;  %v7107_v1 = vld [vmem:[%s11531_s13 + $0x60] sm:$0xff]  }
 0xfac   :  { %v7108_v19 = vld [vmem:[%s11531_s13 + $0x20] sm:$0xff]  }
 0xfae   :  { %5964 = vmatpush1.bf16.msra.mxu1 %v13073_v14  ;;  %6005 = vmatpush1.bf16.msra.mxu0 %v13074_v23  ;;  %v7109_v14 = vld [vmem:[%s11531_s13 + $0x68] sm:$0xff]  }
 0xfaf   :  { %5965 = vmatprep.subr.bf16.mxu1 %v13075_v46  ;;  %6006 = vmatprep.subr.bf16.mxu0 %v12979_v55  ;;  %v13186_v55 = vld [vmem:[#allocation147_spill] sm:$0xff]  ;;  %v7110_v23 = vld [vmem:[%s11531_s13 + $0x28] sm:$0xff]   ;;  %v7111_v46 = vld [vmem:[%s11531_s13 + $0x70] sm:$0xff]  }
 0xfb2   :  { %5966 = vmatpush1.bf16.msra.mxu1 %v12980_v47  ;;  %6007 = vmatpush1.bf16.msra.mxu0 %v12981_v2  ;;  %v13187_v47 = vld [vmem:[#allocation148_spill] sm:$0xff]  ;;  %v13188_v2 = vld [vmem:[#allocation149_spill] sm:$0xff] }
 0xfb3   :  { %5967 = vmatprep.subr.bf16.mxu1 %v12982_v34  ;;  %6008 = vmatprep.subr.bf16.mxu0 %v12983_v61  ;;  %v13189_v34 = vld [vmem:[#allocation150_spill] sm:$0xff]  ;;  %v13190_v61 = vld [vmem:[#allocation107_spill] sm:$0xff] }
 0xfb6   :  { %5968 = vmatpush1.bf16.msra.mxu1 %v12984_v32  ;;  %6009 = vmatpush1.bf16.msra.mxu0 %v13169_v54  ;;  %v13191_v32 = vld [vmem:[#allocation108_spill] sm:$0xff] }
 0xfb7   :  { %5969 = vmatprep.subr.bf16.mxu1 %v13170_v43  ;;  %6010 = vmatprep.subr.bf16.mxu0 %v13171_v42 }
 0xfba   :  { %5970 = vmatpush1.bf16.msra.mxu1 %v13172_v4  ;;  %6011 = vmatpush1.bf16.msra.mxu0 %v13173_v30 }
 0xfbb   :  { %5971 = vmatprep.subr.bf16.mxu1 %v13174_v0  ;;  %6012 = vmatprep.subr.bf16.mxu0 %v13175_v10 }
 0xfbe   :  { %5972 = vmatpush1.bf16.msra.mxu1 %v13176_v25  ;;  %6013 = vmatpush1.bf16.msra.mxu0 %v13177_v21 }
 0xfbf   :  { %5973 = vmatprep.subr.bf16.mxu1 %v13178_v56  ;;  %6014 = vmatprep.subr.bf16.mxu0 %v13179_v9 }
 0xfc2   :  { %5974 = vmatpush1.bf16.msra.mxu1 %v13180_v50  ;;  %6015 = vmatpush1.bf16.msra.mxu0 %v13181_v17 }
 0xfc3   :  { %5975 = vmatprep.subr.bf16.mxu1 %v13182_v16  ;;  %6016 = vmatprep.subr.bf16.mxu0 %v13183_v40  ;;  %v13197_v40 = vld [vmem:[#allocation19_spill] sm:$0xff] }
 0xfc6   :  { %5976 = vmatpush1.bf16.msra.mxu1 %v13184_v37  ;;  %6017 = vmatpush1.bf16.msra.mxu0 %v13185_v27  ;;  %v13198_v27 = vld [vmem:[#allocation146_spill] sm:$0xff] }
 0xfc7   :  { %5977 = vmatprep.subr.bf16.mxu1 %v13186_v55  ;;  %6018 = vmatprep.subr.bf16.mxu0 %v13187_v47  ;;  %v13199_v55 = vld [vmem:[#allocation123_spill] sm:$0xff] }
 0xfc8   :  { %v4124_v47 = vadd.f32 %v13199_v55, %v13198_v27 }
 0xfca   :  { %5978 = vmatpush1.bf16.msra.mxu1 %v13188_v2  ;;  %6019 = vmatpush1.bf16.msra.mxu0 %v13189_v34  ;;  %v13200_v2 = vld [vmem:[#allocation72_spill] sm:$0xff] }
 0xfcb   :  { %5979 = vmatprep.subr.bf16.mxu1 %v13190_v61  ;;  %6020 = vmatprep.subr.bf16.mxu0 %v13191_v32  ;;  %v13201_v34 = vld [vmem:[#allocation124_spill] sm:$0xff] }
 0xfcc   :  { %v4185_v61 = vadd.f32 %v13201_v34, %v13200_v2  ;;  %v13202_v32 = vld [vmem:[#allocation168_spill] sm:$0xff] }
 0xfce   :  { %5980 = vmatpush1.bf16.msra.mxu1 %v13192_v58  ;;  %6021 = vmatpush1.bf16.msra.mxu0 %v13193_v20  ;;  %v13203_v58 = vld [vmem:[#allocation125_spill] sm:$0xff] }
 0xfcf   :  { %6898 = vmatprep.subr.bf16.mxu1 %v7099_v57  ;;  %v4126_v20 = vadd.f32 %v13203_v58, %v13202_v32  ;;  %v13204_v57 = vld [vmem:[#allocation126_spill] sm:$0xff] }
 0xfd1   :  { %5982 = vmatmul.mubr.bf16.vlgmr.msra.gmra.mrb[132].mxu1 %v11377_v60  ;;  %6023 = vmatmul.mubr.bf16.vlgmr.msra.gmra.mrb[136].mxu0 %v11377_v60 }
 0xfd2   :  { %6899 = vmatpush3.bf16.msra.mxu1 %v7100_v51 }
 0xfd3   :  { %6900 = vmatprep.subr.bf16.mxu1 %v7101_v12 }
 0xfd6   :  { %6901 = vmatpush3.bf16.msra.mxu1 %v7102_v11 }
 0xfd7   :  { %6902 = vmatprep.subr.bf16.mxu1 %v7103_v24 }
 0xfda   :  { %6903 = vmatpush3.bf16.msra.mxu1 %v7104_v45 }
 0xfdb   :  { %6904 = vmatprep.subr.bf16.mxu1 %v7105_v8 }
 0xfde   :  { %6905 = vmatpush3.bf16.msra.mxu1 %v7106_v38 }
 0xfdf   :  { %6906 = vmatprep.subr.bf16.mxu1 %v7107_v1 }
 0xfe2   :  { %6907 = vmatpush3.bf16.msra.mxu1 %v7108_v19 }
 0xfe3   :  { %6908 = vmatprep.subr.bf16.mxu1 %v7109_v14 }
 0xfe6   :  { %6909 = vmatpush3.bf16.msra.mxu1 %v7110_v23 }
 0xfe7   :  { %6910 = vmatprep.subr.bf16.mxu1 %v7111_v46 }
 0xfea   :  { %6911 = vmatpush3.bf16.msra.mxu1 %v7112_v5 }
 0xfeb   :  { %6912 = vmatprep.subr.bf16.mxu1 %v7113_v62 }
 0xfee   :  { %6913 = vmatpush3.bf16.msra.mxu1 %v7114_v39 }
0x1064   :  { %v5901_v15 = vpop.f32.mrb[88].mxu1  ;;  %v5942_v41 = vpop.f32.mrb[92].mxu0 }
0x1065   :  { %v6980_v36 = vadd.f32 %v5901_v15, %v13194_v63  ;;  %v5903_v33 = vpop.f32.mrb[89].mxu1  ;;  %v5944_v35 = vpop.f32.mrb[93].mxu0  ;;  %v6982_v60 = vadd.f32 %v5942_v41, %v13196_v22 }
0x1066   :  { %v6981_v48 = vadd.f32 %v5903_v33, %v13195_v3  ;;  %v5905_v59 = vpop.f32.mrb[90].mxu1  ;;  %v5946_v49 = vpop.f32.mrb[94].mxu0  ;;  %v6983_v28 = vadd.f32 %v5944_v35, %v10836_v18 }
0x1067   :  { %v6821_v13 = vmul.f32 -1.442695, %v6980_v36  ;;  %v5906_v7 = vpop.f32.mrb[91].mxu1  ;;  %v5947_v44 = vpop.f32.mrb[95].mxu0 }
0x1068   :  { %v6822_v6 = vmul.f32 -1.442695, %v6981_v48  ;;  %v6823_v52 = vmul.f32 -1.442695, %v6983_v28 }
0x1069   :  { %7403 = vpow2.f32 %v6821_v13 }
0x106a   :  { %7405 = vpow2.f32 %v6822_v6 }
0x106b   :  { %7407 = vpow2.f32 %v6823_v52  ;;  %v13205_v52 = vld [vmem:[#allocation159_spill] sm:$0xff] }
0x106c   :  { %7409 = vtanh.f32 %v6982_v60  ;;  %v13206_v60 = vld [vmem:[#allocation169_spill] sm:$0xff] }
0x1073   :  { %v7404_v54 = vpop.eup %7403 }
0x1074   :  { %v7406_v43 = vpop.eup %7405  ;;  %v6042_v42 = vadd.f32 1.0, %v7404_v54 }
0x1075   :  { %v6048_v4 = vadd.f32 1.0, %v7406_v43  ;;  %v7408_v30 = vpop.eup %7407  ;;  %v13207_v43 = vld [vmem:[#allocation71_spill] sm:$0xff] }
0x1076   :  { %7411 = vrcp.f32 %v6042_v42  ;;  %v7410_v0 = vpop.eup %7409  ;;  %v6055_v56 = vadd.f32 1.0, %v7408_v30 }
0x1077   :  { %7413 = vrcp.f32 %v6048_v4 }
0x1078   :  { %7415 = vrcp.f32 %v6055_v56 }
0x1080   :  { %v7412_v10 = vpop.eup %7411 }
0x1081   :  { %v7414_v25 = vpop.eup %7413  ;;  %v6059_v21 = vmul.f32 %v7412_v10, %v7410_v0 }
0x1082   :  { %v6058_v9 = vmul.f32 %v7414_v25, %v11355_v26  ;;  %v7416_v50 = vpop.eup %7415  ;;  %v4187_v26 = vadd.f32 %v13204_v57, %v13059_v29  ;;  %v6827_v25 = vld [vmem:[%s11532_s14] ss:$0 sm:$0xff] }
0x1084   :  { %v6060_v18 = vadd.f32 %v6059_v21, %v6058_v9 }
0x1086   :  { %7417 = vtanh.f32 %v6060_v18 }
0x1090   :  { %v7418_v17 = vpop.eup %7417 }
0x1091   :  { %v6062_v16 = vmul.f32 %v7418_v17, %v7416_v50 }
0x1093   :  { %v6093_v37 = vadd.f32 %v13197_v40, %v6062_v16 }
0x1095   :  { %v6095_v4 = vmul.f32 0.2, %v6093_v37 }
0x1097   :  { %v6097_v10 = vpack.c.bf16 %v6095_v4, %v6095_v4 }
0x10a4   :  { %v5983_v51 = vpop.f32.mrb[132].mxu1  ;;  %v6024_v12 = vpop.f32.mrb[136].mxu0 }
0x10a5   :  { %v6035_v11 = vadd.f32 %v5983_v51, %v4124_v47  ;;  %v6037_v24 = vadd.f32 %v6024_v12, %v4185_v61  ;;  %v5985_v45 = vpop.f32.mrb[133].mxu1  ;;  %v6026_v8 = vpop.f32.mrb[137].mxu0 }
0x10a6   :  { %v6036_v38 = vadd.f32 %v5985_v45, %v4126_v20  ;;  %v6038_v1 = vadd.f32 %v6026_v8, %v4187_v26  ;;  %v5987_v19 = vpop.f32.mrb[134].mxu1  ;;  %v6028_v14 = vpop.f32.mrb[138].mxu0 }
0x10a7   :  { %v6824_v23 = vmul.f32 -1.442695, %v6035_v11  ;;  %v5988_v46 = vpop.f32.mrb[135].mxu1  ;;  %v6029_v5 = vpop.f32.mrb[139].mxu0 }
0x10a8   :  { %v6825_v62 = vmul.f32 -1.442695, %v6036_v38  ;;  %v6826_v39 = vmul.f32 -1.442695, %v6038_v1 }
0x10a9   :  { %7419 = vpow2.f32 %v6824_v23 }
0x10aa   :  { %7421 = vpow2.f32 %v6825_v62 }
0x10ab   :  { %7423 = vpow2.f32 %v6826_v39 }
0x10ac   :  { %7425 = vtanh.f32 %v6037_v24 }
0x10b3   :  { %v7420_v15 = vpop.eup %7419 }
0x10b4   :  { %v7422_v41 = vpop.eup %7421  ;;  %v6066_v29 = vadd.f32 1.0, %v7420_v15 }
0x10b5   :  { %v6072_v63 = vadd.f32 1.0, %v7422_v41  ;;  %v7424_v36 = vpop.eup %7423 }
0x10b6   :  { %7427 = vrcp.f32 %v6066_v29  ;;  %v7426_v33 = vpop.eup %7425  ;;  %v6079_v59 = vadd.f32 1.0, %v7424_v36 }
0x10b7   :  { %7429 = vrcp.f32 %v6072_v63 }
0x10b8   :  { %7431 = vrcp.f32 %v6079_v59 }
0x10c0   :  { %v7428_v35 = vpop.eup %7427 }
0x10c1   :  { %v7430_v3 = vpop.eup %7429  ;;  %v6083_v48 = vmul.f32 %v7428_v35, %v7426_v33 }
0x10c2   :  { %v6082_v49 = vmul.f32 %v7430_v3, %v11370_v31  ;;  %v7432_v7 = vpop.eup %7431 }
0x10c4   :  { %v6084_v13 = vadd.f32 %v6083_v48, %v6082_v49 }
0x10c6   :  { %7433 = vtanh.f32 %v6084_v13 }
0x10d0   :  { %v7434_v44 = vpop.eup %7433 }
0x10d1   :  { %v6086_v6 = vmul.f32 %v7434_v44, %v7432_v7 }
0x10d3   :  { %v6088_v28 = vadd.f32 %v6086_v6, %v11373_v53 }
0x10d5   :  { %v6090_v22 = vadd.f32 %v6088_v28, %v13205_v52 }
0x10d7   :  { %v6092_v54 = vadd.f32 %v6090_v22, %v13206_v60 }
0x10d9   :  { %v6094_v42 = vadd.f32 %v6092_v54, %v13207_v43 }
0x10db   :  { %v6096_v30 = vmul.f32 0.2, %v6094_v42 }
0x10dd   :  { %v6098_v0 = vpack.c.bf16 %v6096_v30, %v6096_v30 }
0x10df   :  { %6266 = vmatprep.mubr.bf16.mxu1 %v6098_v0 }
0x10e0   :  { %6267 = vmatmul.mubr.bf16.vlgmr.msra.gmra.mrb[136].mxu1 %v6097_v10 }
0x11b3   :  { %v6914_v31 = vpop.f32.mrb[136].mxu1 }
0x11b4   :  { %v6915_v21 = vpop.f32.mrb[137].mxu1 }
0x11b5   :  { %v6916_v56 = vadd.f32 %v6915_v21, %v6914_v31  ;;  %v6917_v53 = vpop.f32.mrb[138].mxu1 }
0x11b6   :  { %v6918_v9 = vpop.f32.mrb[139].mxu1 }
0x11b7   :  { %v6269_v18 = vadd.f32 %v6916_v56, %v6827_v25 }
0x11b9   :  { %6275 = vst.msk [vmem:[%s11533_s15] sm:$0xff] %vm6274_vm4, %v6269_v18 }

</bundles_post_ra>
